<compile_context>
chip_gen: v7x
topology: tpu7x:2x2x1
jax: 0.10.0
libtpu: 0.0.40
codegen_flags: <defaults>
</compile_context>

<pallas_src>
import numpy as np

import jax
import jax.numpy as jnp
from jax import lax
from jax.experimental import pallas as pl
from jax.experimental.pallas import tpu as pltpu


# ----------------------------- Pallas kernels -----------------------------

def _embed_kernel(x_ref, w_ref, b_ref, o_ref):
    # patch_embed: (N, P) @ (P, E) + b   (tiny -> keep full f32 precision so the
    # residual path matches the f32 reference closely).
    o_ref[...] = (jnp.dot(x_ref[...], w_ref[...],
                          precision=lax.Precision.HIGHEST,
                          preferred_element_type=jnp.float32) + b_ref[...])


def _mase_head_kernel(x_ref, w_ref, bb_ref, wrr_ref, br_ref, emb_ref,
                      g_ref, bt_ref, wc_ref, bc_ref, logits_ref, alpha_ref):
    """Fused MASE (as one large-K bf16 matmul) + LayerNorm + classifier +
    attention pooling.  All elementwise math stays in f32 (v5e-friendly)."""
    N, E = emb_ref.shape
    CE = w_ref.shape[1]                       # 32 * E

    xb = x_ref[...]                           # (N, Kp) bf16

    # --- MASE conv branches: bf16 matmul in 128-lane output chunks ---------
    # Each chunk holds 128/E output channels; bias + ReLU + wr-weighting are
    # fused per chunk so only a (N, 128) f32 accumulator stays live.
    p = jnp.zeros((N, 128), jnp.float32)
    for j in range(CE // 128):
        lo = 128 * j
        acc = jnp.dot(xb, w_ref[:, lo:lo + 128],
                      preferred_element_type=jnp.float32)       # (N, 128) f32
        h = jnp.maximum(acc + bb_ref[:, lo:lo + 128], 0.0)      # per-branch bias+ReLU
        p = p + h * wrr_ref[:, lo:lo + 128]                     # wr-weighted channels

    # sum the channel groups packed along lanes: 128 -> 64 -> ... -> E lanes
    width = 128
    while width > E:
        half = width // 2
        p = p[:, :half] + p[:, half:width]
        width = half
    red = p                                                     # (N, E)

    # conv_reduce bias, ReLU, residual add with the embedded cube
    m = jnp.maximum(red + br_ref[...], 0.0) + emb_ref[...]      # (N, E)

    # --- LayerNorm ----------------------------------------------------------
    mu = jnp.mean(m, axis=-1, keepdims=True)
    var = jnp.mean((m - mu) ** 2, axis=-1, keepdims=True)
    xln = (m - mu) * lax.rsqrt(var + 1e-6) * g_ref[...] + bt_ref[...]

    # --- classifier (lane-padded to 128 cols; pad bias = -1e30 => exp -> 0) --
    out_c = (jnp.dot(xln, wc_ref[...], precision=lax.Precision.HIGHEST,
                     preferred_element_type=jnp.float32) + bc_ref[...])   # (N, 128)

    mx = jnp.max(out_c, keepdims=True)                          # global max (1, 1)
    srow = jnp.sum(jnp.exp(out_c - mx), axis=1, keepdims=True)  # (N, 1)
    alpha = srow / jnp.sum(srow, keepdims=True)                 # (N, 1)

    # v = alpha.T @ xln   (broadcast multiply + sublane reduce)
    v = jnp.sum(alpha * xln, axis=0, keepdims=True)             # (1, E)
    logits_ref[...] = (jnp.dot(v, wc_ref[...], precision=lax.Precision.HIGHEST,
                               preferred_element_type=jnp.float32) + bc_ref[...])
    alpha_ref[...] = alpha


# ----------------------------- wrappers -----------------------------

def patch_embed_pallas(x_flat, wp, bp):
    N, P = x_flat.shape
    E = wp.shape[1]
    return pl.pallas_call(
        _embed_kernel,
        out_shape=jax.ShapeDtypeStruct((N, E), jnp.float32),
        grid=(1,),
        in_specs=[pl.BlockSpec((N, P), lambda i: (0, 0)),
                  pl.BlockSpec((P, E), lambda i: (0, 0)),
                  pl.BlockSpec((1, E), lambda i: (0, 0))],
        out_specs=pl.BlockSpec((N, E), lambda i: (0, 0)),
        compiler_params=pltpu.CompilerParams(dimension_semantics=("arbitrary",)),
    )(x_flat, wp, bp)


def mase_head_pallas(x_cat, w_flat, b_big, wr_rep, br, emb,
                     gamma, beta, wc_pad, bc_pad):
    N, Kp = x_cat.shape
    CE = w_flat.shape[1]
    E = emb.shape[1]
    CP = wc_pad.shape[1]
    assert CE % 128 == 0 and 128 % E == 0
    return pl.pallas_call(
        _mase_head_kernel,
        out_shape=(jax.ShapeDtypeStruct((1, CP), jnp.float32),
                   jax.ShapeDtypeStruct((N, 1), jnp.float32)),
        grid=(1,),
        in_specs=[pl.BlockSpec((N, Kp), lambda i: (0, 0)),
                  pl.BlockSpec((Kp, CE), lambda i: (0, 0)),
                  pl.BlockSpec((1, CE), lambda i: (0, 0)),
                  pl.BlockSpec((1, CE), lambda i: (0, 0)),
                  pl.BlockSpec((1, 1), lambda i: (0, 0)),
                  pl.BlockSpec((N, E), lambda i: (0, 0)),
                  pl.BlockSpec((1, E), lambda i: (0, 0)),
                  pl.BlockSpec((1, E), lambda i: (0, 0)),
                  pl.BlockSpec((E, CP), lambda i: (0, 0)),
                  pl.BlockSpec((1, CP), lambda i: (0, 0))],
        out_specs=(pl.BlockSpec((1, CP), lambda i: (0, 0)),
                   pl.BlockSpec((N, 1), lambda i: (0, 0))),
        compiler_params=pltpu.CompilerParams(dimension_semantics=("arbitrary",)),
    )(x_cat, w_flat, b_big, wr_rep, br, emb, gamma, beta, wc_pad, bc_pad)


# ------------------------ host-side weight repacking (one time) -------------

def prepare_params(wp, bp, conv_ws, conv_bs, wr, br, gamma, beta, wc, bc):
    """Fold the four Conv3d branches into one banded (Kp, 32E) weight matrix
    (rows = spatial-tap * E + embed-tap, cols = channel * E + embed-out), plus
    per-lane conv biases and replicated conv_reduce weights.  Runs once on the
    host; the jitted forward only touches device arrays."""
    wp = np.asarray(wp); bp = np.asarray(bp)
    wr = np.asarray(wr); br = np.asarray(br)
    gamma = np.asarray(gamma); beta = np.asarray(beta)
    wc = np.asarray(wc); bc = np.asarray(bc)

    P, E = wp.shape
    C = wc.shape[1]
    assert E % 4 == 0 and 128 % E == 0, "lane-fold channel reduce assumes E | 128"
    S = 49
    K = S * E
    Kp = ((K + 127) // 128) * 128            # pad contraction dim to lane tiles
    CE = 32 * E
    CP = 128                                 # classifier padded to one lane tile

    w_flat = np.zeros((Kp, CE), np.float32)
    b_big = np.zeros((CE,), np.float32)
    wr_rep = np.zeros((CE,), np.float32)
    for ci, w in enumerate(conv_ws):                         # branches k = 1,3,5,7
        w = np.asarray(w)
        b = np.asarray(conv_bs[ci])
        k = w.shape[2]
        pk = k // 2
        for ocl in range(8):
            oc = ci * 8 + ocl                                # torch.cat channel order
            b_big[oc * E:(oc + 1) * E] = b[ocl]
            wr_rep[oc * E:(oc + 1) * E] = wr[oc]
            for di in range(-pk, pk + 1):
                for dj in range(-pk, pk + 1):
                    s = (di + 3) * 7 + (dj + 3)
                    for kw in range(k):
                        dw = kw - pk                          # e_in = e_out + dw
                        w_flat[s * E:(s + 1) * E, oc * E:(oc + 1) * E] += (
                            float(w[ocl, 0, di + pk, dj + pk, kw])
                            * np.eye(E, k=-dw, dtype=np.float32))

    wc_pad = np.zeros((E, CP), np.float32)
    wc_pad[:, :C] = wc
    bc_pad = np.full((1, CP), -1e30, np.float32)             # padded cols: exp -> 0
    bc_pad[0, :C] = bc

    return {
        "wp": jnp.asarray(wp, jnp.float32),
        "bp": jnp.asarray(bp.reshape(1, E), jnp.float32),
        "w_flat": jnp.asarray(w_flat).astype(jnp.bfloat16),  # bf16 MXU operand
        "b_big": jnp.asarray(b_big.reshape(1, CE), jnp.float32),
        "wr_rep": jnp.asarray(wr_rep.reshape(1, CE), jnp.float32),
        "br": jnp.asarray(br.reshape(1, 1), jnp.float32),
        "gamma": jnp.asarray(gamma.reshape(1, E), jnp.float32),
        "beta": jnp.asarray(beta.reshape(1, E), jnp.float32),
        "wc_pad": jnp.asarray(wc_pad, jnp.float32),
        "bc_pad": jnp.asarray(bc_pad, jnp.float32),
    }


# ------------------------ jittable forward ------------------------

def build_shift_cat(emb, Hg, Wg, k_pad):
    """Zero-padded 7x7 spatial shifts of the embedded volume, concatenated
    along lanes -> (N, k_pad) bf16.  Pure layout plumbing (no FLOPs)."""
    N, E = emb.shape
    xg = emb.reshape(Hg, Wg, E)
    xp = jnp.pad(xg, ((3, 3), (3, 3), (0, 0)))
    slabs = []
    for di in range(-3, 4):
        for dj in range(-3, 4):
            slabs.append(xp[3 + di:3 + di + Hg, 3 + dj:3 + dj + Wg, :]
                         .reshape(N, E))
    x_cat = jnp.concatenate(slabs, axis=1)                   # (N, 49*E)
    x_cat = jnp.pad(x_cat, ((0, 0), (0, k_pad - 49 * E)))
    return x_cat.astype(jnp.bfloat16)


def eaglenet_forward(params, cube, *, n_classes):
    _, Hg, Wg, P = cube.shape
    N = Hg * Wg
    Kp = params["w_flat"].shape[0]

    emb = patch_embed_pallas(cube.reshape(N, P), params["wp"], params["bp"])  # (N, E)
    x_cat = build_shift_cat(emb, Hg, Wg, Kp)                                  # (N, Kp) bf16
    logits_pad, alpha = mase_head_pallas(
        x_cat, params["w_flat"], params["b_big"], params["wr_rep"],
        params["br"], emb, params["gamma"], params["beta"],
        params["wc_pad"], params["bc_pad"])
    return logits_pad[:, :n_classes], alpha                                   # (1, C), (N, 1)


# ------------------------ pure-JAX f32 reference ------------------------

def reference_forward(cube, wp, bp, conv_ws, conv_bs, wr, br, gamma, beta, wc, bc):
    PH = lax.Precision.HIGHEST
    _, Hg, Wg, P = cube.shape
    N = Hg * Wg
    E = wp.shape[1]
    emb = jnp.dot(cube.reshape(N, P), wp, precision=PH) + bp
    x5 = emb.reshape(1, 1, Hg, Wg, E)                        # NCDHW
    dn = ('NCDHW', 'OIDHW', 'NCDHW')
    feats = []
    for w, b in zip(conv_ws, conv_bs):
        k = w.shape[2]
        p = k // 2
        y = lax.conv_general_dilated(x5, w, (1, 1, 1), [(p, p)] * 3,
                                     dimension_numbers=dn, precision=PH)
        feats.append(jnp.maximum(y + b.reshape(1, 8, 1, 1, 1), 0.0))
    cat = jnp.concatenate(feats, axis=1)
    red = lax.conv_general_dilated(cat, wr.reshape(1, 32, 1, 1, 1), (1, 1, 1),
                                   [(0, 0)] * 3, dimension_numbers=dn,
                                   precision=PH) + br
    m = (jnp.maximum(red, 0.0) + x5).reshape(N, E)
    mu = m.mean(-1, keepdims=True)
    var = ((m - mu) ** 2).mean(-1, keepdims=True)
    xln = (m - mu) / jnp.sqrt(var + 1e-6) * gamma + beta
    out_c = jnp.dot(xln, wc, precision=PH) + bc
    out = jnp.exp(out_c - out_c.max())
    srow = out.sum(1, keepdims=True)
    alpha = srow / srow.sum()
    v = jnp.dot(alpha.T, xln, precision=PH)
    logits = jnp.dot(v, wc, precision=PH) + bc
    return logits, alpha


# ----------------------------- main -----------------------------

if __name__ == "__main__":
    Hg, Wg = 8, 8      # patch grid
    P = 64             # patch_size
    E = 32             # embed_dim
    C = 4              # n_classes
    N = Hg * Wg

    key = jax.random.PRNGKey(0)
    ks = jax.random.split(key, 16)

    cube = jax.random.normal(ks[0], (1, Hg, Wg, P), dtype=jnp.float32)

    # patch_embed Linear(P, E): weight stored transposed (P, E)
    wp = 0.1 * jax.random.normal(ks[1], (P, E), dtype=jnp.float32)
    bp = 0.1 * jax.random.normal(ks[2], (E,), dtype=jnp.float32)

    # MASE conv branches (8 out channels each, single in channel)
    conv_ws, conv_bs = [], []
    for i, k in enumerate([1, 3, 5, 7]):
        conv_ws.append(0.05 * jax.random.normal(ks[3 + i], (8, 1, k, k, k),
                                                dtype=jnp.float32))
        conv_bs.append(0.05 * jax.random.normal(ks[7 + i], (8,), dtype=jnp.float32))
    wr = 0.1 * jax.random.normal(ks[11], (32,), dtype=jnp.float32)   # conv_reduce
    br = 0.1 * jax.random.normal(ks[12], (), dtype=jnp.float32)

    # LayerNorm + classifier_att Linear(E, C) (weight stored transposed)
    gamma = 1.0 + 0.1 * jax.random.normal(ks[13], (E,), dtype=jnp.float32)
    beta = 0.1 * jax.random.normal(ks[14], (E,), dtype=jnp.float32)
    wc = 0.1 * jax.random.normal(ks[15], (E, C), dtype=jnp.float32)
    bc = 0.1 * jax.random.normal(jax.random.PRNGKey(42), (C,), dtype=jnp.float32)

    # one-time host repacking (hoisted out of the forward so it jits cleanly)
    params = prepare_params(wp, bp, conv_ws, conv_bs, wr, br, gamma, beta, wc, bc)

    forward = jax.jit(eaglenet_forward, static_argnames=("n_classes",))
    logits, alpha = forward(params, cube, n_classes=C)
    logits = jax.block_until_ready(logits)
    alpha = jax.block_until_ready(alpha)

    ref_logits, ref_alpha = reference_forward(cube, wp, bp, conv_ws, conv_bs,
                                              wr, br, gamma, beta, wc, bc)
    # bf16 MXU operands with f32 accumulation vs. the full-f32 reference.
    np.testing.assert_allclose(np.asarray(logits), np.asarray(ref_logits),
                               rtol=1e-2, atol=5e-4)
    np.testing.assert_allclose(np.asarray(alpha), np.asarray(ref_alpha),
                               rtol=1e-2, atol=2e-5)
    print("KERNEL_OK")
</pallas_src>

<mosaic_0001>
module attributes {stable_mosaic.version = 11 : i64} {
  func.func @_embed_kernel(%arg0: i32, %arg1: memref<64x64xf32, #tpu.memory_space<vmem>>, %arg2: memref<64x32xf32, #tpu.memory_space<vmem>>, %arg3: memref<1x32xf32, #tpu.memory_space<vmem>>, %arg4: memref<64x32xf32, #tpu.memory_space<vmem>>) attributes {dimension_semantics = [#tpu.dimension_semantics<arbitrary>], iteration_bounds = array<i64: 1>, scalar_prefetch = 0 : i64, scratch_operands = 0 : i64, tpu.core_type = #tpu.core_type<tc>, window_params = [{pipeline_mode = #tpu.pipeline_mode<synchronous>, transform_indices = @transform_0, window_bounds = array<i64: 64, 64>}, {pipeline_mode = #tpu.pipeline_mode<synchronous>, transform_indices = @transform_1, window_bounds = array<i64: 64, 32>}, {pipeline_mode = #tpu.pipeline_mode<synchronous>, transform_indices = @transform_2, window_bounds = array<i64: 1, 32>}, {pipeline_mode = #tpu.pipeline_mode<synchronous>, transform_indices = @transform_3, window_bounds = array<i64: 64, 32>}]} {
    %c0 = arith.constant 0 : index
    %c0_0 = arith.constant 0 : index
    %0 = vector.load %arg1[%c0, %c0_0] : memref<64x64xf32, #tpu.memory_space<vmem>>, vector<64x64xf32>
    %c0_1 = arith.constant 0 : index
    %c0_2 = arith.constant 0 : index
    %1 = vector.load %arg2[%c0_1, %c0_2] : memref<64x32xf32, #tpu.memory_space<vmem>>, vector<64x32xf32>
    %cst = arith.constant dense<0.000000e+00> : vector<64x32xf32>
    %2 = tpu.matmul %0, %1, %cst {dimension_numbers = #tpu.dot_dimension_numbers<[1], [0], [0], [1], [0, 0, 1, 1], [], []>, precision = #tpu.contract_precision<fp32>} : vector<64x64xf32>, vector<64x32xf32>, vector<64x32xf32> -> vector<64x32xf32>
    %c0_3 = arith.constant 0 : index
    %c0_4 = arith.constant 0 : index
    %3 = vector.load %arg3[%c0_3, %c0_4] : memref<1x32xf32, #tpu.memory_space<vmem>>, vector<1x32xf32>
    %4 = vector.broadcast %3 : vector<1x32xf32> to vector<64x32xf32>
    %5 = arith.addf %2, %4 : vector<64x32xf32>
    %c0_5 = arith.constant 0 : index
    %c0_6 = arith.constant 0 : index
    %6 = vector.load %arg4[%c0_5, %c0_6] : memref<64x32xf32, #tpu.memory_space<vmem>>, vector<64x32xf32>
    tpu.vector_store %arg4[%c0_5, %c0_6], %5 {strides = array<i32>} : memref<64x32xf32, #tpu.memory_space<vmem>>, vector<64x32xf32>,
    return
  }
  func.func @transform_0(%arg0: i32) -> (i32, i32) {
    %c0_i32 = arith.constant 0 : i32
    %c0_i32_0 = arith.constant 0 : i32
    %c0_i32_1 = arith.constant 0 : i32
    return %c0_i32, %c0_i32_0 : i32, i32
  }
  func.func @transform_1(%arg0: i32) -> (i32, i32) {
    %c0_i32 = arith.constant 0 : i32
    %c0_i32_0 = arith.constant 0 : i32
    %c0_i32_1 = arith.constant 0 : i32
    return %c0_i32, %c0_i32_0 : i32, i32
  }
  func.func @transform_2(%arg0: i32) -> (i32, i32) {
    %c0_i32 = arith.constant 0 : i32
    %c0_i32_0 = arith.constant 0 : i32
    %c0_i32_1 = arith.constant 0 : i32
    return %c0_i32, %c0_i32_0 : i32, i32
  }
  func.func @transform_3(%arg0: i32) -> (i32, i32) {
    %c0_i32 = arith.constant 0 : i32
    %c0_i32_0 = arith.constant 0 : i32
    %c0_i32_1 = arith.constant 0 : i32
    return %c0_i32, %c0_i32_0 : i32, i32
  }
}

module attributes {stable_mosaic.version = 11 : i64} {
  func.func @_mase_head_kernel(%arg0: i32, %arg1: memref<64x1664xbf16, #tpu.memory_space<vmem>>, %arg2: memref<1664x1024xbf16, #tpu.memory_space<vmem>>, %arg3: memref<1x1024xf32, #tpu.memory_space<vmem>>, %arg4: memref<1x1024xf32, #tpu.memory_space<vmem>>, %arg5: memref<1x1xf32, #tpu.memory_space<vmem>>, %arg6: memref<64x32xf32, #tpu.memory_space<vmem>>, %arg7: memref<1x32xf32, #tpu.memory_space<vmem>>, %arg8: memref<1x32xf32, #tpu.memory_space<vmem>>, %arg9: memref<32x128xf32, #tpu.memory_space<vmem>>, %arg10: memref<1x128xf32, #tpu.memory_space<vmem>>, %arg11: memref<1x128xf32, #tpu.memory_space<vmem>>, %arg12: memref<64x1xf32, #tpu.memory_space<vmem>>) attributes {dimension_semantics = [#tpu.dimension_semantics<arbitrary>], iteration_bounds = array<i64: 1>, scalar_prefetch = 0 : i64, scratch_operands = 0 : i64, tpu.core_type = #tpu.core_type<tc>, window_params = [{pipeline_mode = #tpu.pipeline_mode<synchronous>, transform_indices = @transform_0, window_bounds = array<i64: 64, 1664>}, {pipeline_mode = #tpu.pipeline_mode<synchronous>, transform_indices = @transform_1, window_bounds = array<i64: 1664, 1024>}, {pipeline_mode = #tpu.pipeline_mode<synchronous>, transform_indices = @transform_2, window_bounds = array<i64: 1, 1024>}, {pipeline_mode = #tpu.pipeline_mode<synchronous>, transform_indices = @transform_3, window_bounds = array<i64: 1, 1024>}, {pipeline_mode = #tpu.pipeline_mode<synchronous>, transform_indices = @transform_4, window_bounds = array<i64: 1, 1>}, {pipeline_mode = #tpu.pipeline_mode<synchronous>, transform_indices = @transform_5, window_bounds = array<i64: 64, 32>}, {pipeline_mode = #tpu.pipeline_mode<synchronous>, transform_indices = @transform_6, window_bounds = array<i64: 1, 32>}, {pipeline_mode = #tpu.pipeline_mode<synchronous>, transform_indices = @transform_7, window_bounds = array<i64: 1, 32>}, {pipeline_mode = #tpu.pipeline_mode<synchronous>, transform_indices = @transform_8, window_bounds = array<i64: 32, 128>}, {pipeline_mode = #tpu.pipeline_mode<synchronous>, transform_indices = @transform_9, window_bounds = array<i64: 1, 128>}, {pipeline_mode = #tpu.pipeline_mode<synchronous>, transform_indices = @transform_10, window_bounds = array<i64: 1, 128>}, {pipeline_mode = #tpu.pipeline_mode<synchronous>, transform_indices = @transform_11, window_bounds = array<i64: 64, 1>}]} {
    %c0 = arith.constant 0 : index
    %c0_0 = arith.constant 0 : index
    %0 = vector.load %arg1[%c0, %c0_0] : memref<64x1664xbf16, #tpu.memory_space<vmem>>, vector<64x1664xbf16>
    %cst = arith.constant 0.000000e+00 : f32
    %1 = vector.broadcast %cst : f32 to vector<64x128xf32>
    %c0_1 = arith.constant 0 : index
    %c0_2 = arith.constant 0 : index
    %2 = vector.load %arg2[%c0_1, %c0_2] : memref<1664x1024xbf16, #tpu.memory_space<vmem>>, vector<1664x128xbf16>
    %cst_3 = arith.constant dense<0.000000e+00> : vector<64x128xf32>
    %3 = tpu.matmul %0, %2, %cst_3 {dimension_numbers = #tpu.dot_dimension_numbers<[1], [0], [0], [1], [0, 0, 1, 1], [], []>} : vector<64x1664xbf16>, vector<1664x128xbf16>, vector<64x128xf32> -> vector<64x128xf32>
    %c0_4 = arith.constant 0 : index
    %c0_5 = arith.constant 0 : index
    %4 = vector.load %arg3[%c0_4, %c0_5] : memref<1x1024xf32, #tpu.memory_space<vmem>>, vector<1x128xf32>
    %5 = vector.broadcast %4 : vector<1x128xf32> to vector<64x128xf32>
    %6 = arith.addf %3, %5 : vector<64x128xf32>
    %cst_6 = arith.constant 0.000000e+00 : f32
    %7 = vector.broadcast %cst_6 : f32 to vector<64x128xf32>
    %8 = arith.maximumf %6, %7 : vector<64x128xf32>
    %c0_7 = arith.constant 0 : index
    %c0_8 = arith.constant 0 : index
    %9 = vector.load %arg4[%c0_7, %c0_8] : memref<1x1024xf32, #tpu.memory_space<vmem>>, vector<1x128xf32>
    %10 = vector.broadcast %9 : vector<1x128xf32> to vector<64x128xf32>
    %11 = arith.mulf %8, %10 : vector<64x128xf32>
    %12 = arith.addf %1, %11 : vector<64x128xf32>
    %c0_9 = arith.constant 0 : index
    %c128 = arith.constant 128 : index
    %13 = vector.load %arg2[%c0_9, %c128] : memref<1664x1024xbf16, #tpu.memory_space<vmem>>, vector<1664x128xbf16>
    %cst_10 = arith.constant dense<0.000000e+00> : vector<64x128xf32>
    %14 = tpu.matmul %0, %13, %cst_10 {dimension_numbers = #tpu.dot_dimension_numbers<[1], [0], [0], [1], [0, 0, 1, 1], [], []>} : vector<64x1664xbf16>, vector<1664x128xbf16>, vector<64x128xf32> -> vector<64x128xf32>
    %c0_11 = arith.constant 0 : index
    %c128_12 = arith.constant 128 : index
    %15 = vector.load %arg3[%c0_11, %c128_12] : memref<1x1024xf32, #tpu.memory_space<vmem>>, vector<1x128xf32>
    %16 = vector.broadcast %15 : vector<1x128xf32> to vector<64x128xf32>
    %17 = arith.addf %14, %16 : vector<64x128xf32>
    %cst_13 = arith.constant 0.000000e+00 : f32
    %18 = vector.broadcast %cst_13 : f32 to vector<64x128xf32>
    %19 = arith.maximumf %17, %18 : vector<64x128xf32>
    %c0_14 = arith.constant 0 : index
    %c128_15 = arith.constant 128 : index
    %20 = vector.load %arg4[%c0_14, %c128_15] : memref<1x1024xf32, #tpu.memory_space<vmem>>, vector<1x128xf32>
    %21 = vector.broadcast %20 : vector<1x128xf32> to vector<64x128xf32>
    %22 = arith.mulf %19, %21 : vector<64x128xf32>
    %23 = arith.addf %12, %22 : vector<64x128xf32>
    %c0_16 = arith.constant 0 : index
    %c256 = arith.constant 256 : index
    %24 = vector.load %arg2[%c0_16, %c256] : memref<1664x1024xbf16, #tpu.memory_space<vmem>>, vector<1664x128xbf16>
    %cst_17 = arith.constant dense<0.000000e+00> : vector<64x128xf32>
    %25 = tpu.matmul %0, %24, %cst_17 {dimension_numbers = #tpu.dot_dimension_numbers<[1], [0], [0], [1], [0, 0, 1, 1], [], []>} : vector<64x1664xbf16>, vector<1664x128xbf16>, vector<64x128xf32> -> vector<64x128xf32>
    %c0_18 = arith.constant 0 : index
    %c256_19 = arith.constant 256 : index
    %26 = vector.load %arg3[%c0_18, %c256_19] : memref<1x1024xf32, #tpu.memory_space<vmem>>, vector<1x128xf32>
    %27 = vector.broadcast %26 : vector<1x128xf32> to vector<64x128xf32>
    %28 = arith.addf %25, %27 : vector<64x128xf32>
    %cst_20 = arith.constant 0.000000e+00 : f32
    %29 = vector.broadcast %cst_20 : f32 to vector<64x128xf32>
    %30 = arith.maximumf %28, %29 : vector<64x128xf32>
    %c0_21 = arith.constant 0 : index
    %c256_22 = arith.constant 256 : index
    %31 = vector.load %arg4[%c0_21, %c256_22] : memref<1x1024xf32, #tpu.memory_space<vmem>>, vector<1x128xf32>
    %32 = vector.broadcast %31 : vector<1x128xf32> to vector<64x128xf32>
    %33 = arith.mulf %30, %32 : vector<64x128xf32>
    %34 = arith.addf %23, %33 : vector<64x128xf32>
    %c0_23 = arith.constant 0 : index
    %c384 = arith.constant 384 : index
    %35 = vector.load %arg2[%c0_23, %c384] : memref<1664x1024xbf16, #tpu.memory_space<vmem>>, vector<1664x128xbf16>
    %cst_24 = arith.constant dense<0.000000e+00> : vector<64x128xf32>
    %36 = tpu.matmul %0, %35, %cst_24 {dimension_numbers = #tpu.dot_dimension_numbers<[1], [0], [0], [1], [0, 0, 1, 1], [], []>} : vector<64x1664xbf16>, vector<1664x128xbf16>, vector<64x128xf32> -> vector<64x128xf32>
    %c0_25 = arith.constant 0 : index
    %c384_26 = arith.constant 384 : index
    %37 = vector.load %arg3[%c0_25, %c384_26] : memref<1x1024xf32, #tpu.memory_space<vmem>>, vector<1x128xf32>
    %38 = vector.broadcast %37 : vector<1x128xf32> to vector<64x128xf32>
    %39 = arith.addf %36, %38 : vector<64x128xf32>
    %cst_27 = arith.constant 0.000000e+00 : f32
    %40 = vector.broadcast %cst_27 : f32 to vector<64x128xf32>
    %41 = arith.maximumf %39, %40 : vector<64x128xf32>
    %c0_28 = arith.constant 0 : index
    %c384_29 = arith.constant 384 : index
    %42 = vector.load %arg4[%c0_28, %c384_29] : memref<1x1024xf32, #tpu.memory_space<vmem>>, vector<1x128xf32>
    %43 = vector.broadcast %42 : vector<1x128xf32> to vector<64x128xf32>
    %44 = arith.mulf %41, %43 : vector<64x128xf32>
    %45 = arith.addf %34, %44 : vector<64x128xf32>
    %c0_30 = arith.constant 0 : index
    %c512 = arith.constant 512 : index
    %46 = vector.load %arg2[%c0_30, %c512] : memref<1664x1024xbf16, #tpu.memory_space<vmem>>, vector<1664x128xbf16>
    %cst_31 = arith.constant dense<0.000000e+00> : vector<64x128xf32>
    %47 = tpu.matmul %0, %46, %cst_31 {dimension_numbers = #tpu.dot_dimension_numbers<[1], [0], [0], [1], [0, 0, 1, 1], [], []>} : vector<64x1664xbf16>, vector<1664x128xbf16>, vector<64x128xf32> -> vector<64x128xf32>
    %c0_32 = arith.constant 0 : index
    %c512_33 = arith.constant 512 : index
    %48 = vector.load %arg3[%c0_32, %c512_33] : memref<1x1024xf32, #tpu.memory_space<vmem>>, vector<1x128xf32>
    %49 = vector.broadcast %48 : vector<1x128xf32> to vector<64x128xf32>
    %50 = arith.addf %47, %49 : vector<64x128xf32>
    %cst_34 = arith.constant 0.000000e+00 : f32
    %51 = vector.broadcast %cst_34 : f32 to vector<64x128xf32>
    %52 = arith.maximumf %50, %51 : vector<64x128xf32>
    %c0_35 = arith.constant 0 : index
    %c512_36 = arith.constant 512 : index
    %53 = vector.load %arg4[%c0_35, %c512_36] : memref<1x1024xf32, #tpu.memory_space<vmem>>, vector<1x128xf32>
    %54 = vector.broadcast %53 : vector<1x128xf32> to vector<64x128xf32>
    %55 = arith.mulf %52, %54 : vector<64x128xf32>
    %56 = arith.addf %45, %55 : vector<64x128xf32>
    %c0_37 = arith.constant 0 : index
    %c640 = arith.constant 640 : index
    %57 = vector.load %arg2[%c0_37, %c640] : memref<1664x1024xbf16, #tpu.memory_space<vmem>>, vector<1664x128xbf16>
    %cst_38 = arith.constant dense<0.000000e+00> : vector<64x128xf32>
    %58 = tpu.matmul %0, %57, %cst_38 {dimension_numbers = #tpu.dot_dimension_numbers<[1], [0], [0], [1], [0, 0, 1, 1], [], []>} : vector<64x1664xbf16>, vector<1664x128xbf16>, vector<64x128xf32> -> vector<64x128xf32>
    %c0_39 = arith.constant 0 : index
    %c640_40 = arith.constant 640 : index
    %59 = vector.load %arg3[%c0_39, %c640_40] : memref<1x1024xf32, #tpu.memory_space<vmem>>, vector<1x128xf32>
    %60 = vector.broadcast %59 : vector<1x128xf32> to vector<64x128xf32>
    %61 = arith.addf %58, %60 : vector<64x128xf32>
    %cst_41 = arith.constant 0.000000e+00 : f32
    %62 = vector.broadcast %cst_41 : f32 to vector<64x128xf32>
    %63 = arith.maximumf %61, %62 : vector<64x128xf32>
    %c0_42 = arith.constant 0 : index
    %c640_43 = arith.constant 640 : index
    %64 = vector.load %arg4[%c0_42, %c640_43] : memref<1x1024xf32, #tpu.memory_space<vmem>>, vector<1x128xf32>
    %65 = vector.broadcast %64 : vector<1x128xf32> to vector<64x128xf32>
    %66 = arith.mulf %63, %65 : vector<64x128xf32>
    %67 = arith.addf %56, %66 : vector<64x128xf32>
    %c0_44 = arith.constant 0 : index
    %c768 = arith.constant 768 : index
    %68 = vector.load %arg2[%c0_44, %c768] : memref<1664x1024xbf16, #tpu.memory_space<vmem>>, vector<1664x128xbf16>
    %cst_45 = arith.constant dense<0.000000e+00> : vector<64x128xf32>
    %69 = tpu.matmul %0, %68, %cst_45 {dimension_numbers = #tpu.dot_dimension_numbers<[1], [0], [0], [1], [0, 0, 1, 1], [], []>} : vector<64x1664xbf16>, vector<1664x128xbf16>, vector<64x128xf32> -> vector<64x128xf32>
    %c0_46 = arith.constant 0 : index
    %c768_47 = arith.constant 768 : index
    %70 = vector.load %arg3[%c0_46, %c768_47] : memref<1x1024xf32, #tpu.memory_space<vmem>>, vector<1x128xf32>
    %71 = vector.broadcast %70 : vector<1x128xf32> to vector<64x128xf32>
    %72 = arith.addf %69, %71 : vector<64x128xf32>
    %cst_48 = arith.constant 0.000000e+00 : f32
    %73 = vector.broadcast %cst_48 : f32 to vector<64x128xf32>
    %74 = arith.maximumf %72, %73 : vector<64x128xf32>
    %c0_49 = arith.constant 0 : index
    %c768_50 = arith.constant 768 : index
    %75 = vector.load %arg4[%c0_49, %c768_50] : memref<1x1024xf32, #tpu.memory_space<vmem>>, vector<1x128xf32>
    %76 = vector.broadcast %75 : vector<1x128xf32> to vector<64x128xf32>
    %77 = arith.mulf %74, %76 : vector<64x128xf32>
    %78 = arith.addf %67, %77 : vector<64x128xf32>
    %c0_51 = arith.constant 0 : index
    %c896 = arith.constant 896 : index
    %79 = vector.load %arg2[%c0_51, %c896] : memref<1664x1024xbf16, #tpu.memory_space<vmem>>, vector<1664x128xbf16>
    %cst_52 = arith.constant dense<0.000000e+00> : vector<64x128xf32>
    %80 = tpu.matmul %0, %79, %cst_52 {dimension_numbers = #tpu.dot_dimension_numbers<[1], [0], [0], [1], [0, 0, 1, 1], [], []>} : vector<64x1664xbf16>, vector<1664x128xbf16>, vector<64x128xf32> -> vector<64x128xf32>
    %c0_53 = arith.constant 0 : index
    %c896_54 = arith.constant 896 : index
    %81 = vector.load %arg3[%c0_53, %c896_54] : memref<1x1024xf32, #tpu.memory_space<vmem>>, vector<1x128xf32>
    %82 = vector.broadcast %81 : vector<1x128xf32> to vector<64x128xf32>
    %83 = arith.addf %80, %82 : vector<64x128xf32>
    %cst_55 = arith.constant 0.000000e+00 : f32
    %84 = vector.broadcast %cst_55 : f32 to vector<64x128xf32>
    %85 = arith.maximumf %83, %84 : vector<64x128xf32>
    %c0_56 = arith.constant 0 : index
    %c896_57 = arith.constant 896 : index
    %86 = vector.load %arg4[%c0_56, %c896_57] : memref<1x1024xf32, #tpu.memory_space<vmem>>, vector<1x128xf32>
    %87 = vector.broadcast %86 : vector<1x128xf32> to vector<64x128xf32>
    %88 = arith.mulf %85, %87 : vector<64x128xf32>
    %89 = arith.addf %78, %88 : vector<64x128xf32>
    %90 = vector.extract_strided_slice %89 {offsets = [0, 0], sizes = [64, 64], strides = [1, 1]} : vector<64x128xf32> to vector<64x64xf32>
    %91 = vector.extract_strided_slice %89 {offsets = [0, 64], sizes = [64, 64], strides = [1, 1]} : vector<64x128xf32> to vector<64x64xf32>
    %92 = arith.addf %90, %91 : vector<64x64xf32>
    %93 = vector.extract_strided_slice %92 {offsets = [0, 0], sizes = [64, 32], strides = [1, 1]} : vector<64x64xf32> to vector<64x32xf32>
    %94 = vector.extract_strided_slice %92 {offsets = [0, 32], sizes = [64, 32], strides = [1, 1]} : vector<64x64xf32> to vector<64x32xf32>
    %95 = arith.addf %93, %94 : vector<64x32xf32>
    %c0_58 = arith.constant 0 : index
    %c0_59 = arith.constant 0 : index
    %96 = vector.load %arg5[%c0_58, %c0_59] : memref<1x1xf32, #tpu.memory_space<vmem>>, vector<1x1xf32>
    %97 = vector.broadcast %96 : vector<1x1xf32> to vector<64x32xf32>
    %98 = arith.addf %95, %97 : vector<64x32xf32>
    %cst_60 = arith.constant 0.000000e+00 : f32
    %99 = vector.broadcast %cst_60 : f32 to vector<64x32xf32>
    %100 = arith.maximumf %98, %99 : vector<64x32xf32>
    %c0_61 = arith.constant 0 : index
    %c0_62 = arith.constant 0 : index
    %101 = vector.load %arg6[%c0_61, %c0_62] : memref<64x32xf32, #tpu.memory_space<vmem>>, vector<64x32xf32>
    %102 = arith.addf %100, %101 : vector<64x32xf32>
    %cst_63 = arith.constant dense<0.000000e+00> : vector<64xf32>
    %103 = vector.multi_reduction <add>, %102, %cst_63 [1] : vector<64x32xf32> to vector<64xf32>
    %104 = vector.shape_cast %103 : vector<64xf32> to vector<64x1xf32>
    %cst_64 = arith.constant 3.200000e+01 : f32
    %105 = vector.broadcast %cst_64 : f32 to vector<64x1xf32>
    %106 = arith.divf %104, %105 : vector<64x1xf32>
    %107 = vector.broadcast %106 : vector<64x1xf32> to vector<64x32xf32>
    %108 = arith.subf %102, %107 : vector<64x32xf32>
    %109 = arith.mulf %108, %108 : vector<64x32xf32>
    %cst_65 = arith.constant dense<0.000000e+00> : vector<64xf32>
    %110 = vector.multi_reduction <add>, %109, %cst_65 [1] : vector<64x32xf32> to vector<64xf32>
    %111 = vector.shape_cast %110 : vector<64xf32> to vector<64x1xf32>
    %cst_66 = arith.constant 3.200000e+01 : f32
    %112 = vector.broadcast %cst_66 : f32 to vector<64x1xf32>
    %113 = arith.divf %111, %112 : vector<64x1xf32>
    %114 = vector.broadcast %106 : vector<64x1xf32> to vector<64x32xf32>
    %115 = arith.subf %102, %114 : vector<64x32xf32>
    %cst_67 = arith.constant 9.99999997E-7 : f32
    %116 = vector.broadcast %cst_67 : f32 to vector<64x1xf32>
    %117 = arith.addf %113, %116 : vector<64x1xf32>
    %118 = math.rsqrt %117 : vector<64x1xf32>
    %119 = vector.broadcast %118 : vector<64x1xf32> to vector<64x32xf32>
    %120 = arith.mulf %115, %119 : vector<64x32xf32>
    %c0_68 = arith.constant 0 : index
    %c0_69 = arith.constant 0 : index
    %121 = vector.load %arg7[%c0_68, %c0_69] : memref<1x32xf32, #tpu.memory_space<vmem>>, vector<1x32xf32>
    %122 = vector.broadcast %121 : vector<1x32xf32> to vector<64x32xf32>
    %123 = arith.mulf %120, %122 : vector<64x32xf32>
    %c0_70 = arith.constant 0 : index
    %c0_71 = arith.constant 0 : index
    %124 = vector.load %arg8[%c0_70, %c0_71] : memref<1x32xf32, #tpu.memory_space<vmem>>, vector<1x32xf32>
    %125 = vector.broadcast %124 : vector<1x32xf32> to vector<64x32xf32>
    %126 = arith.addf %123, %125 : vector<64x32xf32>
    %c0_72 = arith.constant 0 : index
    %c0_73 = arith.constant 0 : index
    %127 = vector.load %arg9[%c0_72, %c0_73] : memref<32x128xf32, #tpu.memory_space<vmem>>, vector<32x128xf32>
    %cst_74 = arith.constant dense<0.000000e+00> : vector<64x128xf32>
    %128 = tpu.matmul %126, %127, %cst_74 {dimension_numbers = #tpu.dot_dimension_numbers<[1], [0], [0], [1], [0, 0, 1, 1], [], []>, precision = #tpu.contract_precision<fp32>} : vector<64x32xf32>, vector<32x128xf32>, vector<64x128xf32> -> vector<64x128xf32>
    %c0_75 = arith.constant 0 : index
    %c0_76 = arith.constant 0 : index
    %129 = vector.load %arg10[%c0_75, %c0_76] : memref<1x128xf32, #tpu.memory_space<vmem>>, vector<1x128xf32>
    %130 = vector.broadcast %129 : vector<1x128xf32> to vector<64x128xf32>
    %131 = arith.addf %128, %130 : vector<64x128xf32>
    %132 = vector.shape_cast %131 : vector<64x128xf32> to vector<1x64x128xf32>
    %cst_77 = arith.constant dense<0xFF800000> : vector<1xf32>
    %133 = vector.multi_reduction <maximumf>, %132, %cst_77 [1, 2] : vector<1x64x128xf32> to vector<1xf32>
    %134 = vector.shape_cast %133 : vector<1xf32> to vector<1x1x1xf32>
    %135 = vector.extract %134[0, 0, 0] : f32 from vector<1x1x1xf32>
    %136 = vector.broadcast %135 : f32 to vector<1x1xf32>
    %137 = vector.broadcast %136 : vector<1x1xf32> to vector<64x128xf32>
    %138 = arith.subf %131, %137 : vector<64x128xf32>
    %139 = math.exp %138 : vector<64x128xf32>
    %cst_78 = arith.constant dense<0.000000e+00> : vector<64xf32>
    %140 = vector.multi_reduction <add>, %139, %cst_78 [1] : vector<64x128xf32> to vector<64xf32>
    %141 = vector.shape_cast %140 : vector<64xf32> to vector<64x1xf32>
    %142 = vector.shape_cast %141 : vector<64x1xf32> to vector<1x64x1xf32>
    %cst_79 = arith.constant dense<0.000000e+00> : vector<1xf32>
    %143 = vector.multi_reduction <add>, %142, %cst_79 [1, 2] : vector<1x64x1xf32> to vector<1xf32>
    %144 = vector.shape_cast %143 : vector<1xf32> to vector<1x1x1xf32>
    %145 = vector.extract %144[0, 0, 0] : f32 from vector<1x1x1xf32>
    %146 = vector.broadcast %145 : f32 to vector<1x1xf32>
    %147 = vector.broadcast %146 : vector<1x1xf32> to vector<64x1xf32>
    %148 = arith.divf %141, %147 : vector<64x1xf32>
    %149 = vector.broadcast %148 : vector<64x1xf32> to vector<64x32xf32>
    %150 = arith.mulf %149, %126 : vector<64x32xf32>
    %cst_80 = arith.constant dense<0.000000e+00> : vector<32xf32>
    %151 = vector.multi_reduction <add>, %150, %cst_80 [0] : vector<64x32xf32> to vector<32xf32>
    %152 = vector.shape_cast %151 : vector<32xf32> to vector<1x32xf32>
    %c0_81 = arith.constant 0 : index
    %c0_82 = arith.constant 0 : index
    %153 = vector.load %arg9[%c0_81, %c0_82] : memref<32x128xf32, #tpu.memory_space<vmem>>, vector<32x128xf32>
    %cst_83 = arith.constant dense<0.000000e+00> : vector<1x128xf32>
    %154 = tpu.matmul %152, %153, %cst_83 {dimension_numbers = #tpu.dot_dimension_numbers<[1], [0], [0], [1], [0, 0, 1, 1], [], []>, precision = #tpu.contract_precision<fp32>} : vector<1x32xf32>, vector<32x128xf32>, vector<1x128xf32> -> vector<1x128xf32>
    %c0_84 = arith.constant 0 : index
    %c0_85 = arith.constant 0 : index
    %155 = vector.load %arg10[%c0_84, %c0_85] : memref<1x128xf32, #tpu.memory_space<vmem>>, vector<1x128xf32>
    %156 = arith.addf %154, %155 : vector<1x128xf32>
    %c0_86 = arith.constant 0 : index
    %c0_87 = arith.constant 0 : index
    %157 = vector.load %arg11[%c0_86, %c0_87] : memref<1x128xf32, #tpu.memory_space<vmem>>, vector<1x128xf32>
    tpu.vector_store %arg11[%c0_86, %c0_87], %156 {strides = array<i32>} : memref<1x128xf32, #tpu.memory_space<vmem>>, vector<1x128xf32>,
    %c0_88 = arith.constant 0 : index
    %c0_89 = arith.constant 0 : index
    %158 = vector.load %arg12[%c0_88, %c0_89] : memref<64x1xf32, #tpu.memory_space<vmem>>, vector<64x1xf32>
    tpu.vector_store %arg12[%c0_88, %c0_89], %148 {strides = array<i32>} : memref<64x1xf32, #tpu.memory_space<vmem>>, vector<64x1xf32>,
    return
  }
  func.func @transform_0(%arg0: i32) -> (i32, i32) {
    %c0_i32 = arith.constant 0 : i32
    %c0_i32_0 = arith.constant 0 : i32
    %c0_i32_1 = arith.constant 0 : i32
    return %c0_i32, %c0_i32_0 : i32, i32
  }
  func.func @transform_1(%arg0: i32) -> (i32, i32) {
    %c0_i32 = arith.constant 0 : i32
    %c0_i32_0 = arith.constant 0 : i32
    %c0_i32_1 = arith.constant 0 : i32
    return %c0_i32, %c0_i32_0 : i32, i32
  }
  func.func @transform_2(%arg0: i32) -> (i32, i32) {
    %c0_i32 = arith.constant 0 : i32
    %c0_i32_0 = arith.constant 0 : i32
    %c0_i32_1 = arith.constant 0 : i32
    return %c0_i32, %c0_i32_0 : i32, i32
  }
  func.func @transform_3(%arg0: i32) -> (i32, i32) {
    %c0_i32 = arith.constant 0 : i32
    %c0_i32_0 = arith.constant 0 : i32
    %c0_i32_1 = arith.constant 0 : i32
    return %c0_i32, %c0_i32_0 : i32, i32
  }
  func.func @transform_4(%arg0: i32) -> (i32, i32) {
    %c0_i32 = arith.constant 0 : i32
    %c0_i32_0 = arith.constant 0 : i32
    %c0_i32_1 = arith.constant 0 : i32
    return %c0_i32, %c0_i32_0 : i32, i32
  }
  func.func @transform_5(%arg0: i32) -> (i32, i32) {
    %c0_i32 = arith.constant 0 : i32
    %c0_i32_0 = arith.constant 0 : i32
    %c0_i32_1 = arith.constant 0 : i32
    return %c0_i32, %c0_i32_0 : i32, i32
  }
  func.func @transform_6(%arg0: i32) -> (i32, i32) {
    %c0_i32 = arith.constant 0 : i32
    %c0_i32_0 = arith.constant 0 : i32
    %c0_i32_1 = arith.constant 0 : i32
    return %c0_i32, %c0_i32_0 : i32, i32
  }
  func.func @transform_7(%arg0: i32) -> (i32, i32) {
    %c0_i32 = arith.constant 0 : i32
    %c0_i32_0 = arith.constant 0 : i32
    %c0_i32_1 = arith.constant 0 : i32
    return %c0_i32, %c0_i32_0 : i32, i32
  }
  func.func @transform_8(%arg0: i32) -> (i32, i32) {
    %c0_i32 = arith.constant 0 : i32
    %c0_i32_0 = arith.constant 0 : i32
    %c0_i32_1 = arith.constant 0 : i32
    return %c0_i32, %c0_i32_0 : i32, i32
  }
  func.func @transform_9(%arg0: i32) -> (i32, i32) {
    %c0_i32 = arith.constant 0 : i32
    %c0_i32_0 = arith.constant 0 : i32
    %c0_i32_1 = arith.constant 0 : i32
    return %c0_i32, %c0_i32_0 : i32, i32
  }
  func.func @transform_10(%arg0: i32) -> (i32, i32) {
    %c0_i32 = arith.constant 0 : i32
    %c0_i32_0 = arith.constant 0 : i32
    %c0_i32_1 = arith.constant 0 : i32
    return %c0_i32, %c0_i32_0 : i32, i32
  }
  func.func @transform_11(%arg0: i32) -> (i32, i32) {
    %c0_i32 = arith.constant 0 : i32
    %c0_i32_0 = arith.constant 0 : i32
    %c0_i32_1 = arith.constant 0 : i32
    return %c0_i32, %c0_i32_0 : i32, i32
  }
}

</mosaic_0001>

<bundles_post_ra>
// kernel: eaglenet_forward.2
= control target key start
LH: loop header
LB: loop body
LE: loop exit
PB: predicated region body
PF: predicated region fallthrough
CT: control target
= control target key end

     0   :  { %8 = vsyncpa [#allocation3], 0  ;;  %s1714_s0 = inlined_call_operand.hbm [shape: f32[64,64], index: 0, kind: input, shape index: {}]   ;;  %s1715_s1 = inlined_call_operand.vmem [shape: f32[64,32], index: 1, kind: input, shape index: {}]   ;;  %s1716_s2 = inlined_call_operand.hbm [shape: f32[1,32], index: 2, kind: input, shape index: {}]   ;;  %s1717_s3 = inlined_call_operand.vmem [shape: f32[64,32], index: 3, kind: output, shape index: {}]  }
   0x1   :  { %9 = vsyncpa [#allocation5], 0  ;;  %s1402_s12 = smov [#allocation2]   ;;  %s1354_s16 = scalar_lea.hbm %s1714_s0, 1024 }
   0x2   :  { %s15_s13 = sshll.u32 %s1402_s12, 4  ;;  %p1355_p0 = scmp.ne.s32.totalorder %s1714_s0, %s1354_s16  ;;  %s16_s13 = int_to_ptr.vmem [resolvable:$true] %s15_s13 }
   0x3   :  { %p1358_p1 = scmp.lt.u32.totalorder %s1354_s16, %s1714_s0 }
   0x5   :  { %p1360_p2 = pnand %p1358_p1, %p1355_p0 }
   0x7   :  { %1363 = shalt.err (!%p1360_p2)
}
   0x8   :  { %s1364_s21 = scalar_lea.vmem %s16_s13, 1024  ;;  %p1369_p4 = scmp.lt.s32.totalorder %s16_s13, %s16_s13 }
   0x9   :  { %p1365_p3 = scmp.ne.s32.totalorder %s16_s13, %s1364_s21  ;;  %p1370_p5 = scmp.lt.s32.totalorder %s1364_s21, %s1364_s21 }
   0xb   :  { %p1371_p6 = por %p1370_p5, %p1369_p4 }
   0xd   :  { %p1372_p7 = pnand %p1371_p6, %p1365_p3 }
   0xf   :  { %1375 = shalt.err (!%p1372_p7)
}
  0x10   :  { %s1403_s22 = smov 128   ;;  %s1404_s23 = smov 8  }
  0x11   :  { %21 = dma.hbm_to_vmem [thread:$0]  %s1714_s0, 1024, %s16_s13, [#allocation3], %s1403_s22, %s1403_s22, %s1404_s23  }
  0x12   :  { %s1405_s26 = smov [#allocation4]   ;;  %s1376_s30 = scalar_lea.hbm %s1716_s2, 16 }
  0x13   :  { %s30_s27 = sshll.u32 %s1405_s26, 4  ;;  %p1377_p8 = scmp.ne.s32.totalorder %s1716_s2, %s1376_s30  ;;  %s31_s27 = int_to_ptr.vmem [resolvable:$true] %s30_s27 }
  0x14   :  { %p1380_p9 = scmp.lt.u32.totalorder %s1376_s30, %s1716_s2 }
  0x16   :  { %p1382_p10 = pnand %p1380_p9, %p1377_p8 }
  0x18   :  { %1385 = shalt.err (!%p1382_p10)
}
  0x19   :  { %s1386_s8 = scalar_lea.vmem %s31_s27, 16  ;;  %s1390_s0 = scalar_lea.vmem %s31_s27, 32 }
  0x1a   :  { %p1387_p11 = scmp.ne.s32.totalorder %s31_s27, %s1386_s8  ;;  %p1391_p12 = scmp.lt.s32.totalorder %s31_s27, %s31_s27 }
  0x1b   :  { %p1392_p13 = scmp.lt.s32.totalorder %s1390_s0, %s1386_s8 }
  0x1d   :  { %p1393_p0 = por %p1392_p13, %p1391_p12 }
  0x1f   :  { %p1394_p1 = pnand %p1393_p0, %p1387_p11 }
  0x21   :  { %1397 = shalt.err (!%p1394_p1)
}
  0x22   :  { %33 = dma.hbm_to_vmem [thread:$0]  %s1716_s2, 16, %s31_s27, [#allocation5]  }
  0x23   :  { %1398 = dma.done.wait [#allocation3], 1024  }
  0x24   :  { %1399 = vsyncadd [#allocation3], 4294966272 }
  0x25   :  { %1400 = dma.done.wait [#allocation5], 16  }
  0x26   :  { %1401 = vsyncadd [#allocation5], 4294967280  ;;  %v48_v0 = vld [vmem:[%s1715_s1] sm:$0xff]  ;;  %v49_v1 = vld [vmem:[%s1715_s1 + $0x8] sm:$0xff]  ;;  %vm63_vm0 = vcmask 523264   ;;  %vm926_vm1 = vcmask 261120  }
  0x27   :  { %v50_v2 = vld [vmem:[%s1715_s1 + $0x10] sm:$0xff]  ;;  %v89_v3 = vand.u32 4294901760, %v48_v0  ;;  %v92_v4 = vand.u32 4294901760, %v49_v1  ;;  %v51_v5 = vld [vmem:[%s1715_s1 + $0x18] sm:$0xff]  ;;  %v1465_v7 = vld [vmem:[%s1715_s1 + $0x20] sm:$0xff] }
  0x28   :  { %v95_v6 = vand.u32 4294901760, %v50_v2  ;;  %v1470_v8 = vld [vmem:[%s1715_s1 + $0x28] sm:$0xff]  ;;  %v98_v9 = vand.u32 4294901760, %v51_v5  ;;  %v101_v10 = vand.u32 4294901760, %v1465_v7  ;;  %v1477_v12 = vld [vmem:[%s1715_s1 + $0x30] sm:$0xff]  ;;  %v1482_v13 = vld [vmem:[%s1715_s1 + $0x38] sm:$0xff] }
  0x29   :  { %v104_v11 = vand.u32 4294901760, %v1470_v8  ;;  %v40_v14 = vld [vmem:[#allocation2] sm:$0xff]  ;;  %v1484_v15 = vpack.c.bf16 %v92_v4, %v89_v3  ;;  %v107_v16 = vand.u32 4294901760, %v1477_v12  ;;  %v41_v18 = vld [vmem:[#allocation2 + $0x8] sm:$0xff]  ;;  %v42_v19 = vld [vmem:[#allocation2 + $0x10] sm:$0xff]  ;;  %v110_v22 = vand.u32 4294901760, %v1482_v13 }
  0x2a   :  { %v65_v17 = vsel %vm63_vm0, %v40_v14, 0  ;;  %v43_v20 = vld [vmem:[#allocation2 + $0x18] sm:$0xff]  ;;  %v1488_v21 = vpack.c.bf16 %v98_v9, %v95_v6  ;;  %v68_v24 = vsel %vm63_vm0, %v41_v18, 0  ;;  %v1504_v27 = vsub.f32 %v48_v0, %v89_v3  ;;  %v44_v53 = vld [vmem:[#allocation2 + $0x20] sm:$0xff]  ;;  %v45_v58 = vld [vmem:[#allocation2 + $0x28] sm:$0xff] }
  0x2b   :  { %v1491_v23 = vand.u32 4294901760, %v65_v17  ;;  %1207 = vmatprep.subr.bf16.mxu1 %v1484_v15  ;;  %1255 = vmatprep.subr.bf16.mxu0 %v1484_v15  ;;  %v1500_v25 = vpack.c.bf16 %v104_v11, %v101_v10  ;;  %v1502_v26 = vand.u32 4294901760, %v68_v24  ;;  %v1506_v28 = vsub.f32 %v49_v1, %v92_v4  ;;  %v46_v3 = vld [vmem:[#allocation2 + $0x30] sm:$0xff]  ;;  %v47_v14 = vld [vmem:[#allocation2 + $0x38] sm:$0xff] }
  0x2c   :  { %1209 = vmatpush3.bf16.msra.mxu1 %v1484_v15  ;;  %1257 = vmatpush3.bf16.msra.mxu0 %v1484_v15  ;;  %v71_v30 = vsel %vm63_vm0, %v42_v19, 0  ;;  %v74_v31 = vsel %vm63_vm0, %v43_v20, 0  ;;  %v1515_v32 = vsub.f32 %v50_v2, %v95_v6  ;;  %v244_v34 = vand.u32 4294901760, %v1504_v27 }
  0x2d   :  { %v1511_v29 = vsub.f32 %v65_v17, %v1491_v23  ;;  %1211 = vmatprep.subr.bf16.mxu1 %v1488_v21  ;;  %1259 = vmatprep.subr.bf16.mxu0 %v1488_v21  ;;  %v1520_v33 = vsub.f32 %v68_v24, %v1502_v26  ;;  %v251_v35 = vand.u32 4294901760, %v1506_v28  ;;  %v1524_v36 = vand.u32 4294901760, %v71_v30 }
  0x2e   :  { %v1527_v38 = vand.u32 4294901760, %v74_v31  ;;  %v258_v39 = vand.u32 4294901760, %v1515_v32  ;;  %v1530_v40 = vsub.f32 %v51_v5, %v98_v9  ;;  %v1536_v41 = vpack.c.bf16 %v110_v22, %v107_v16 }
  0x2f   :  { %v163_v37 = vand.u32 4294901760, %v1511_v29  ;;  %v173_v42 = vand.u32 4294901760, %v1520_v33  ;;  %v245_v43 = vsub.f32 %v1504_v27, %v244_v34  ;;  %v252_v44 = vsub.f32 %v1506_v28, %v251_v35 }
  0x30   :  { %1213 = vmatpush3.bf16.msra.mxu1 %v1488_v21  ;;  %1261 = vmatpush3.bf16.msra.mxu0 %v1488_v21  ;;  %v1545_v46 = vsub.f32 %v71_v30, %v1524_v36  ;;  %v1548_v47 = vsub.f32 %v74_v31, %v1527_v38  ;;  %v265_v48 = vand.u32 4294901760, %v1530_v40  ;;  %v259_v52 = vsub.f32 %v1515_v32, %v258_v39 }
  0x31   :  { %v164_v45 = vsub.f32 %v1511_v29, %v163_v37  ;;  %1215 = vmatprep.subr.bf16.mxu1 %v1500_v25  ;;  %1263 = vmatprep.subr.bf16.mxu0 %v1500_v25  ;;  %v174_v49 = vsub.f32 %v1520_v33, %v173_v42  ;;  %v246_v50 = vand.u32 4294901760, %v245_v43  ;;  %v253_v51 = vand.u32 4294901760, %v252_v44 }
  0x32   :  { %1138 = vmatprep.mubr.f32.mxu0 %v163_v37  ;;  %v183_v55 = vand.u32 4294901760, %v1545_v46  ;;  %v193_v56 = vand.u32 4294901760, %v1548_v47  ;;  %v266_v57 = vsub.f32 %v1530_v40, %v265_v48  ;;  %v1270_v61 = vpack.c.bf16 %v251_v35, %v244_v34 }
  0x33   :  { %v165_v54 = vand.u32 4294901760, %v164_v45  ;;  %v175_v59 = vand.u32 4294901760, %v174_v49  ;;  %v1222_v60 = vpack.c.bf16 %v253_v51, %v246_v50  ;;  %v260_v62 = vand.u32 4294901760, %v259_v52 }
  0x34   :  { %1217 = vmatpush3.bf16.msra.mxu1 %v1500_v25  ;;  %1265 = vmatpush3.bf16.msra.mxu0 %v1500_v25  ;;  %v184_v63 = vsub.f32 %v1545_v46, %v183_v55  ;;  %v194_v0 = vsub.f32 %v1548_v47, %v193_v56  ;;  %v267_v1 = vand.u32 4294901760, %v266_v57  ;;  %v77_v2 = vsel %vm63_vm0, %v44_v53, 0 }
  0x35   :  { %1219 = vmatprep.subr.bf16.mxu1 %v1536_v41  ;;  %1267 = vmatprep.subr.bf16.mxu0 %v1536_v41  ;;  %v1569_v4 = vand.u32 4294901760, %v77_v2  ;;  %v80_v5 = vsel %vm63_vm0, %v45_v58, 0  ;;  %v1575_v6 = vsub.f32 %v1465_v7, %v101_v10  ;;  %v1580_v9 = vsub.f32 %v1470_v8, %v104_v11 }
  0x36   :  { %1054 = vmatprep.mubr.f32.mxu1 %v165_v54  ;;  %v185_v17 = vand.u32 4294901760, %v184_v63  ;;  %v195_v18 = vand.u32 4294901760, %v194_v0  ;;  %v1274_v19 = vpack.c.bf16 %v265_v48, %v258_v39  ;;  %v1582_v20 = vand.u32 4294901760, %v80_v5 }
  0x37   :  { %v1585_v24 = vsub.f32 %v77_v2, %v1569_v4  ;;  %v272_v30 = vand.u32 4294901760, %v1575_v6  ;;  %v279_v7 = vand.u32 4294901760, %v1580_v9  ;;  %v83_v10 = vsel %vm63_vm0, %v46_v3, 0 }
  0x38   :  { %1221 = vmatpush3.bf16.msra.mxu1 %v1536_v41  ;;  %1269 = vmatpush3.bf16.msra.mxu0 %v1536_v41  ;;  %v1593_v8 = vsub.f32 %v80_v5, %v1582_v20  ;;  %v1595_v11 = vand.u32 4294901760, %v83_v10  ;;  %v86_v31 = vsel %vm63_vm0, %v47_v14, 0  ;;  %v1601_v34 = vsub.f32 %v1477_v12, %v107_v16 }
  0x39   :  { %1223 = vmatprep.subr.bf16.mxu1 %v1222_v60  ;;  %1271 = vmatprep.subr.bf16.mxu0 %v1270_v61  ;;  %v1226_v35 = vpack.c.bf16 %v267_v1, %v260_v62  ;;  %v203_v37 = vand.u32 4294901760, %v1585_v24  ;;  %v273_v39 = vsub.f32 %v1575_v6, %v272_v30  ;;  %v280_v43 = vsub.f32 %v1580_v9, %v279_v7 }
  0x3a   :  { %v213_v44 = vand.u32 4294901760, %v1593_v8  ;;  %v1608_v45 = vsub.f32 %v83_v10, %v1595_v11  ;;  %v1610_v48 = vand.u32 4294901760, %v86_v31  ;;  %v286_v49 = vand.u32 4294901760, %v1601_v34 }
  0x3b   :  { %1055 = vmatmul.mubr.f32.vlgmr.msra.gmra.mrb[0].mxu1 %v175_v59  ;;  %1139 = vmatmul.mubr.f32.vlgmr.msra.gmra.mrb[0].mxu0 %v173_v42  ;;  %v204_v12 = vsub.f32 %v1585_v24, %v203_v37  ;;  %v274_v16 = vand.u32 4294901760, %v273_v39  ;;  %v281_v50 = vand.u32 4294901760, %v280_v43  ;;  %v1619_v51 = vsub.f32 %v1482_v13, %v110_v22 }
  0x3c   :  { %1225 = vmatpush3.bf16.msra.mxu1 %v1222_v60  ;;  %1273 = vmatpush3.bf16.msra.mxu0 %v1270_v61  ;;  %v214_v52 = vsub.f32 %v1593_v8, %v213_v44  ;;  %v223_v53 = vand.u32 4294901760, %v1608_v45  ;;  %v1624_v54 = vsub.f32 %v86_v31, %v1610_v48  ;;  %v287_v42 = vsub.f32 %v1601_v34, %v286_v49 }
  0x3d   :  { %1057 = vmatprep.mubr.f32.mxu1 %v185_v17  ;;  %1141 = vmatprep.mubr.f32.mxu0 %v183_v55  ;;  %v205_v57 = vand.u32 4294901760, %v204_v12  ;;  %v293_v58 = vand.u32 4294901760, %v1619_v51  ;;  %v1230_v13 = vpack.c.bf16 %v281_v50, %v274_v16  ;;  %v1278_v22 = vpack.c.bf16 %v279_v7, %v272_v30 }
  0x3e   :  { %1227 = vmatprep.subr.bf16.mxu1 %v1226_v35  ;;  %1275 = vmatprep.subr.bf16.mxu0 %v1274_v19  ;;  %v224_v59 = vsub.f32 %v1608_v45, %v223_v53  ;;  %v233_v60 = vand.u32 4294901760, %v1624_v54  ;;  %v215_v61 = vand.u32 4294901760, %v214_v52  ;;  %v288_v62 = vand.u32 4294901760, %v287_v42 }
  0x3f   :  { %1058 = vmatmul.mubr.f32.gmra.mrb[2].mxu1 %v195_v18  ;;  %1142 = vmatmul.mubr.f32.gmra.mrb[2].mxu0 %v193_v56  ;;  %v294_v63 = vsub.f32 %v1619_v51, %v293_v58  ;;  %v1282_v2 = vpack.c.bf16 %v293_v58, %v286_v49  ;;  %v1238_v56 = vpack.c.bf16 %v1506_v28, %v1504_v27 }
  0x40   :  { %1229 = vmatpush3.bf16.msra.mxu1 %v1226_v35  ;;  %1277 = vmatpush3.bf16.msra.mxu0 %v1274_v19  ;;  %v234_v55 = vsub.f32 %v1624_v54, %v233_v60  ;;  %v225_v0 = vand.u32 4294901760, %v224_v59  ;;  %v1242_v14 = vpack.c.bf16 %v1530_v40, %v1515_v32  ;;  %v1246_v27 = vpack.c.bf16 %v1580_v9, %v1575_v6 }
  0x41   :  { %1060 = vmatprep.mubr.f32.mxu1 %v205_v57  ;;  %1144 = vmatprep.mubr.f32.mxu0 %v203_v37  ;;  %v295_v1 = vand.u32 4294901760, %v294_v63 }
  0x42   :  { %1231 = vmatprep.subr.bf16.mxu1 %v1230_v13  ;;  %1279 = vmatprep.subr.bf16.mxu0 %v1278_v22  ;;  %v235_v3 = vand.u32 4294901760, %v234_v55 }
  0x43   :  { %1061 = vmatmul.mubr.f32.gmra.mrb[4].mxu1 %v215_v61  ;;  %1145 = vmatmul.mubr.f32.gmra.mrb[4].mxu0 %v213_v44  ;;  %v1234_v5 = vpack.c.bf16 %v295_v1, %v288_v62 }
  0x44   :  { %1233 = vmatpush3.bf16.msra.mxu1 %v1230_v13  ;;  %1281 = vmatpush3.bf16.msra.mxu0 %v1278_v22 }
  0x45   :  { %1063 = vmatprep.mubr.f32.mxu1 %v225_v0  ;;  %1147 = vmatprep.mubr.f32.mxu0 %v223_v53 }
  0x46   :  { %1235 = vmatprep.subr.bf16.mxu1 %v1234_v5  ;;  %1283 = vmatprep.subr.bf16.mxu0 %v1282_v2 }
  0x47   :  { %1064 = vmatmul.mubr.f32.gmra.mrb[6].mxu1 %v235_v3  ;;  %1148 = vmatmul.mubr.f32.gmra.mrb[6].mxu0 %v233_v60 }
  0x48   :  { %1237 = vmatpush3.bf16.msra.mxu1 %v1234_v5  ;;  %1285 = vmatpush3.bf16.msra.mxu0 %v1282_v2 }
  0x49   :  { %1082 = vmatprep.mubr.f32.mxu1 %v1491_v23  ;;  %1166 = vmatprep.mubr.f32.mxu0 %v1491_v23 }
  0x4a   :  { %1239 = vmatprep.subr.bf16.mxu1 %v1238_v56  ;;  %1287 = vmatprep.subr.bf16.mxu0 %v1484_v15 }
  0x4b   :  { %1083 = vmatmul.mubr.f32.vlgmr.msra.gmra.mrb[0].mxu1 %v1502_v26  ;;  %1167 = vmatmul.mubr.f32.vlgmr.msra.gmra.mrb[0].mxu0 %v1502_v26 }
  0x4c   :  { %1241 = vmatpush3.bf16.msra.mxu1 %v1238_v56  ;;  %1289 = vmatpush3.bf16.msra.mxu0 %v1484_v15  ;;  %v1250_v15 = vpack.c.bf16 %v1619_v51, %v1601_v34 }
  0x4d   :  { %1085 = vmatprep.mubr.f32.mxu1 %v1524_v36  ;;  %1169 = vmatprep.mubr.f32.mxu0 %v1524_v36 }
  0x4e   :  { %1243 = vmatprep.subr.bf16.mxu1 %v1242_v14  ;;  %1291 = vmatprep.subr.bf16.mxu0 %v1488_v21 }
  0x4f   :  { %1086 = vmatmul.mubr.f32.gmra.mrb[2].mxu1 %v1527_v38  ;;  %1170 = vmatmul.mubr.f32.gmra.mrb[2].mxu0 %v1527_v38 }
  0x50   :  { %1245 = vmatpush3.bf16.msra.mxu1 %v1242_v14  ;;  %1293 = vmatpush3.bf16.msra.mxu0 %v1488_v21  ;;  %v941_v21 = vld [vmem:[#allocation4] ss:$0 sm:$0xff] }
  0x51   :  { %1088 = vmatprep.mubr.f32.mxu1 %v1569_v4  ;;  %1172 = vmatprep.mubr.f32.mxu0 %v1569_v4 }
  0x52   :  { %1247 = vmatprep.subr.bf16.mxu1 %v1246_v27  ;;  %1295 = vmatprep.subr.bf16.mxu0 %v1500_v25 }
  0x53   :  { %1089 = vmatmul.mubr.f32.gmra.mrb[4].mxu1 %v1582_v20  ;;  %1173 = vmatmul.mubr.f32.gmra.mrb[4].mxu0 %v1582_v20 }
  0x54   :  { %1249 = vmatpush3.bf16.msra.mxu1 %v1246_v27  ;;  %1297 = vmatpush3.bf16.msra.mxu0 %v1500_v25 }
  0x55   :  { %1091 = vmatprep.mubr.f32.mxu1 %v1595_v11  ;;  %1175 = vmatprep.mubr.f32.mxu0 %v1595_v11 }
  0x56   :  { %1251 = vmatprep.subr.bf16.mxu1 %v1250_v15  ;;  %1299 = vmatprep.subr.bf16.mxu0 %v1536_v41 }
  0x57   :  { %1092 = vmatmul.mubr.f32.gmra.mrb[6].mxu1 %v1610_v48  ;;  %1176 = vmatmul.mubr.f32.gmra.mrb[6].mxu0 %v1610_v48 }
  0x58   :  { %1253 = vmatpush3.bf16.msra.mxu1 %v1250_v15  ;;  %1301 = vmatpush3.bf16.msra.mxu0 %v1536_v41 }
  0x59   :  { %1110 = vmatprep.mubr.f32.mxu1 %v1511_v29  ;;  %1194 = vmatprep.mubr.f32.mxu0 %v1491_v23 }
  0x5b   :  { %1111 = vmatmul.mubr.f32.vlgmr.msra.gmra.mrb[0].mxu1 %v1520_v33  ;;  %1195 = vmatmul.mubr.f32.vlgmr.msra.gmra.mrb[0].mxu0 %v1502_v26 }
  0x5c   :  { %1113 = vmatprep.mubr.f32.mxu1 %v1545_v46  ;;  %1197 = vmatprep.mubr.f32.mxu0 %v1524_v36 }
  0x5f   :  { %1114 = vmatmul.mubr.f32.gmra.mrb[2].mxu1 %v1548_v47  ;;  %1198 = vmatmul.mubr.f32.gmra.mrb[2].mxu0 %v1527_v38 }
  0x60   :  { %1116 = vmatprep.mubr.f32.mxu1 %v1585_v24  ;;  %1200 = vmatprep.mubr.f32.mxu0 %v1569_v4 }
  0x63   :  { %1117 = vmatmul.mubr.f32.gmra.mrb[4].mxu1 %v1593_v8  ;;  %1201 = vmatmul.mubr.f32.gmra.mrb[4].mxu0 %v1582_v20 }
  0x64   :  { %1119 = vmatprep.mubr.f32.mxu1 %v1608_v45  ;;  %1203 = vmatprep.mubr.f32.mxu0 %v1595_v11 }
  0x67   :  { %1120 = vmatmul.mubr.f32.gmra.mrb[6].mxu1 %v1624_v54  ;;  %1204 = vmatmul.mubr.f32.gmra.mrb[6].mxu0 %v1610_v48 }
 0x12e   :  { %v1112_v23 = vpop.f32.mrb[0].mxu1  ;;  %v1196_v25 = vpop.f32.mrb[0].mxu0 }
 0x12f   :  { %v1302_v26 = vadd.f32 %v1112_v23, %v941_v21  ;;  %v478_v28 = vpop.f32.mrb[1].mxu1  ;;  %v880_v29 = vpop.f32.mrb[1].mxu0 }
 0x130   :  { %v1304_v32 = vadd.f32 %v941_v21, %v478_v28 }
 0x131   :  { %v1303_v33 = vadd.f32 %v1302_v26, %v1196_v25 }
 0x132   :  { %v1305_v36 = vadd.f32 %v1304_v32, %v880_v29  ;;  %v1115_v38 = vpop.f32.mrb[2].mxu1  ;;  %v1199_v40 = vpop.f32.mrb[2].mxu0 }
 0x133   :  { %928 = vst.msk [vmem:[%s1717_s3 + $0x8] sm:$0xff] %vm926_vm1, %v1303_v33  ;;  %v1306_v41 = vadd.f32 %v1115_v38, %v941_v21  ;;  %v492_v46 = vpop.f32.mrb[3].mxu1  ;;  %v892_v47 = vpop.f32.mrb[3].mxu0 }
 0x134   :  { %927 = vst.msk [vmem:[%s1717_s3] sm:$0xff] %vm926_vm1, %v1305_v36  ;;  %v1308_v4 = vadd.f32 %v941_v21, %v492_v46 }
 0x135   :  { %v1307_v6 = vadd.f32 %v1306_v41, %v1199_v40 }
 0x136   :  { %v1309_v9 = vadd.f32 %v1308_v4, %v892_v47  ;;  %v1118_v17 = vpop.f32.mrb[4].mxu1  ;;  %v1202_v18 = vpop.f32.mrb[4].mxu0 }
 0x137   :  { %930 = vst.msk [vmem:[%s1717_s3 + $0x18] sm:$0xff] %vm926_vm1, %v1307_v6  ;;  %v1310_v19 = vadd.f32 %v1118_v17, %v941_v21  ;;  %v506_v20 = vpop.f32.mrb[5].mxu1  ;;  %v904_v24 = vpop.f32.mrb[5].mxu0 }
 0x138   :  { %929 = vst.msk [vmem:[%s1717_s3 + $0x10] sm:$0xff] %vm926_vm1, %v1309_v9  ;;  %v1312_v30 = vadd.f32 %v941_v21, %v506_v20 }
 0x139   :  { %v1311_v7 = vadd.f32 %v1310_v19, %v1202_v18 }
 0x13a   :  { %v1313_v10 = vadd.f32 %v1312_v30, %v904_v24  ;;  %v1121_v8 = vpop.f32.mrb[6].mxu1  ;;  %v1205_v11 = vpop.f32.mrb[6].mxu0 }
 0x13b   :  { %932 = vst.msk [vmem:[%s1717_s3 + $0x28] sm:$0xff] %vm926_vm1, %v1311_v7  ;;  %v1314_v31 = vadd.f32 %v1121_v8, %v941_v21  ;;  %v520_v34 = vpop.f32.mrb[7].mxu1  ;;  %v916_v35 = vpop.f32.mrb[7].mxu0 }
 0x13c   :  { %931 = vst.msk [vmem:[%s1717_s3 + $0x20] sm:$0xff] %vm926_vm1, %v1313_v10  ;;  %v1316_v37 = vadd.f32 %v941_v21, %v520_v34 }
 0x13d   :  { %v1315_v39 = vadd.f32 %v1314_v31, %v1205_v11 }
 0x13e   :  { %v1317_v43 = vadd.f32 %v1316_v37, %v916_v35 }
 0x13f   :  { %934 = vst.msk [vmem:[%s1717_s3 + $0x38] sm:$0xff] %vm926_vm1, %v1315_v39 }
 0x140   :  { %933 = vst.msk [vmem:[%s1717_s3 + $0x30] sm:$0xff] %vm926_vm1, %v1317_v43 }
 0x141   :  { %939 = vsyncpa [#allocation3], 1 }
 0x142   :  { %940 = vsyncpa [#allocation5], 1 }

// kernel: eaglenet_forward.3
= control target key start
LH: loop header
LB: loop body
LE: loop exit
PB: predicated region body
PF: predicated region fallthrough
CT: control target
= control target key end

     0   :  { %s19463_s0 = inlined_call_operand.vmem [shape: bf16[64,1664], index: 0, kind: input, shape index: {}]   ;;  %s19464_s1 = inlined_call_operand.hbm [shape: bf16[1664,1024], index: 1, kind: input, shape index: {}]   ;;  %s19465_s2 = inlined_call_operand.vmem [shape: f32[1,1024], index: 2, kind: input, shape index: {}]   ;;  %s19466_s3 = inlined_call_operand.hbm [shape: f32[1,1024], index: 3, kind: input, shape index: {}]   ;;  %s19467_s4 = inlined_call_operand.<no memory space> [shape: f32[1,1], index: 4, kind: input, shape index: {}]   ;;  %s19468_s5 = inlined_call_operand.vmem [shape: f32[64,32], index: 5, kind: input, shape index: {}]   ;;  %s19469_s6 = inlined_call_operand.hbm [shape: f32[1,32], index: 6, kind: input, shape index: {}]   ;;  %s19470_s7 = inlined_call_operand.vmem [shape: f32[1,32], index: 7, kind: input, shape index: {}]   ;;  %s19471_s8 = inlined_call_operand.vmem [shape: f32[32,128], index: 8, kind: input, shape index: {}]   ;;  %s19472_s9 = inlined_call_operand.vmem [shape: f32[1,128], index: 9, kind: input, shape index: {}]   ;;  %s19473_s10 = inlined_call_operand.hbm [shape: f32[1,128], index: 10, kind: output, shape index: {0}]   ;;  %s19474_s11 = inlined_call_operand.vmem [shape: f32[64,1], index: 11, kind: output, shape index: {1}]  }
   0x1   :  { %v17_v0 = vstv %s19467_s4 }
   0x2   :  { %18 = vst [vmem:[#allocation2] sm:$0x1] %v17_v0 }
   0x3   :  { %19 = vsyncpa [#allocation4], 0 }
   0x4   :  { %20 = vsyncpa [#allocation7], 0 }
   0x5   :  { %21 = vsyncpa [#allocation5], 0  ;;  %s16810_s19 = smov [#allocation6]   ;;  %s16811_s21 = smov [#allocation3]  }
   0x6   :  { %s44_s20 = sshll.u32 %s16810_s19, 4  ;;  %s29_s22 = sshll.u32 %s16811_s21, 4  ;;  %s45_s20 = int_to_ptr.vmem [resolvable:$true] %s44_s20  ;;  %s16885_s22 = int_to_ptr.vmem [resolvable:$true] %s29_s22 }
   0x7   :  { %s16716_s25 = scalar_lea.hbm %s19466_s3, 128 }
   0x8   :  { %p16717_p0 = scmp.ne.s32.totalorder %s19466_s3, %s16716_s25  ;;  %p16720_p1 = scmp.lt.u32.totalorder %s16716_s25, %s19466_s3 }
   0xa   :  { %p16722_p2 = pnand %p16720_p1, %p16717_p0 }
   0xc   :  { %16725 = shalt.err (!%p16722_p2)
}
   0xd   :  { %s16726_s29 = scalar_lea.vmem %s45_s20, 128  ;;  %p16731_p4 = scmp.lt.s32.totalorder %s45_s20, %s45_s20 }
   0xe   :  { %p16727_p3 = scmp.ne.s32.totalorder %s45_s20, %s16726_s29  ;;  %p16732_p5 = scmp.lt.s32.totalorder %s16726_s29, %s16726_s29 }
  0x10   :  { %p16733_p6 = por %p16732_p5, %p16731_p4 }
  0x12   :  { %p16734_p7 = pnand %p16733_p6, %p16727_p3 }
  0x14   :  { %16737 = shalt.err (!%p16734_p7)
}
  0x15   :  { %47 = dma.hbm_to_vmem [thread:$0]  %s19466_s3, 128, %s45_s20, [#allocation7]  }
  0x16   :  { %s16738_s15 = scalar_lea.hbm %s19464_s1, 106496 }
  0x17   :  { %p16739_p8 = scmp.ne.s32.totalorder %s19464_s1, %s16738_s15  ;;  %p16742_p9 = scmp.lt.u32.totalorder %s16738_s15, %s19464_s1 }
  0x19   :  { %p16744_p10 = pnand %p16742_p9, %p16739_p8 }
  0x1b   :  { %16747 = shalt.err (!%p16744_p10)
}
  0x1c   :  { %s16748_s21 = scalar_lea.vmem %s16885_s22, 106496  ;;  %p16753_p12 = scmp.lt.s32.totalorder %s16885_s22, %s16885_s22 }
  0x1d   :  { %p16749_p11 = scmp.ne.s32.totalorder %s16885_s22, %s16748_s21  ;;  %p16754_p13 = scmp.lt.s32.totalorder %s16748_s21, %s16748_s21 }
  0x1f   :  { %p16755_p0 = por %p16754_p13, %p16753_p12 }
  0x21   :  { %p16756_p1 = pnand %p16755_p0, %p16749_p11 }
  0x23   :  { %16759 = shalt.err (!%p16756_p1)
}
  0x24   :  { %s16812_s3 = smov 512   ;;  %s16813_s20 = smov 32  }
  0x25   :  { %35 = dma.hbm_to_vmem [thread:$0]  %s19464_s1, 106496, %s16885_s22, [#allocation4], %s16812_s3, %s16812_s3, %s16813_s20  }
  0x26   :  { %s16814_s25 = smov [#allocation8]   ;;  %s16760_s28 = scalar_lea.hbm %s19469_s6, 16 }
  0x27   :  { %s58_s26 = sshll.u32 %s16814_s25, 4  ;;  %p16761_p2 = scmp.ne.s32.totalorder %s19469_s6, %s16760_s28  ;;  %s59_s26 = int_to_ptr.vmem [resolvable:$true] %s58_s26 }
  0x28   :  { %p16764_p3 = scmp.lt.u32.totalorder %s16760_s28, %s19469_s6 }
  0x2a   :  { %p16766_p4 = pnand %p16764_p3, %p16761_p2 }
  0x2c   :  { %16769 = shalt.err (!%p16766_p4)
}
  0x2d   :  { %s16770_s14 = scalar_lea.vmem %s59_s26, 16  ;;  %s16774_s1 = scalar_lea.vmem %s59_s26, 32 }
  0x2e   :  { %p16771_p5 = scmp.ne.s32.totalorder %s59_s26, %s16770_s14  ;;  %p16775_p6 = scmp.lt.s32.totalorder %s59_s26, %s59_s26 }
  0x2f   :  { %p16776_p7 = scmp.lt.s32.totalorder %s16774_s1, %s16770_s14 }
  0x31   :  { %p16777_p8 = por %p16776_p7, %p16775_p6 }
  0x33   :  { %p16778_p9 = pnand %p16777_p8, %p16771_p5 }
  0x35   :  { %16781 = shalt.err (!%p16778_p9)
}
  0x36   :  { %61 = dma.hbm_to_vmem [thread:$0]  %s19469_s6, 16, %s59_s26, [#allocation7]  }
  0x37   :  { %16804 = dma.done.wait [#allocation4], 106496  }
  0x38   :  { %16805 = vsyncadd [#allocation4], 4294860800 }
  0x39   :  { %16806 = dma.done.wait [#allocation7], 144  }
  0x3a   :  { %16807 = vsyncadd [#allocation7], 4294967152  ;;  %v150_v1 = vld [vmem:[#allocation3 + $0x200] sm:$0xf]  ;;  %s16817_s16 = smov 96   ;;  %vm11120_vm0 = vcmask 261120  }
  0x3b   :  { %v151_v2 = vld [vmem:[#allocation3 + $0x220] sm:$0xf]  ;;  %vm12134_vm1 = vcmask 7168   ;;  %vm16819_vm2 = vmmov 0  }
  0x3c   :  { %v134_v3 = vld [vmem:[#allocation3] sm:$0xf]  ;;  %v12776_v4 = vcombine.low %v150_v1, %v151_v2 }
  0x3d   :  { %v135_v5 = vld [vmem:[#allocation3 + $0x20] sm:$0xf] }
  0x3e   :  { %v182_v6 = vld [vmem:[#allocation3 + $0x600] sm:$0xf]  ;;  %v12768_v8 = vcombine.low %v134_v3, %v135_v5  ;;  %13618 = vmatprep.subr.bf16.mxu0 %v12776_v4 }
  0x3f   :  { %v183_v7 = vld [vmem:[#allocation3 + $0x620] sm:$0xf] }
  0x40   :  { %v12792_v9 = vcombine.low %v182_v6, %v183_v7  ;;  %v166_v10 = vld [vmem:[#allocation3 + $0x400] sm:$0xf]  ;;  %13619 = vmatpush3.bf16.msra.mxu0 %v12768_v8 }
  0x41   :  { %v167_v11 = vld [vmem:[#allocation3 + $0x420] sm:$0xf] }
  0x42   :  { %v152_v12 = vld [vmem:[#allocation3 + $0x240] sm:$0xf]  ;;  %v12784_v13 = vcombine.low %v166_v10, %v167_v11  ;;  %13658 = vmatprep.subr.bf16.mxu1 %v12792_v9 }
  0x43   :  { %v153_v14 = vld [vmem:[#allocation3 + $0x260] sm:$0xf] }
  0x44   :  { %v136_v15 = vld [vmem:[#allocation3 + $0x40] sm:$0xf]  ;;  %v12777_v17 = vcombine.low %v152_v12, %v153_v14  ;;  %13659 = vmatpush3.bf16.msra.mxu1 %v12784_v13 }
  0x45   :  { %v137_v16 = vld [vmem:[#allocation3 + $0x60] sm:$0xf] }
  0x46   :  { %v12769_v18 = vcombine.low %v136_v15, %v137_v16  ;;  %v184_v19 = vld [vmem:[#allocation3 + $0x640] sm:$0xf]  ;;  %13620 = vmatprep.subr.bf16.mxu0 %v12777_v17 }
  0x47   :  { %v185_v20 = vld [vmem:[#allocation3 + $0x660] sm:$0xf] }
  0x48   :  { %v168_v21 = vld [vmem:[#allocation3 + $0x440] sm:$0xf]  ;;  %v12793_v22 = vcombine.low %v184_v19, %v185_v20  ;;  %13621 = vmatpush3.bf16.msra.mxu0 %v12769_v18 }
  0x49   :  { %v169_v23 = vld [vmem:[#allocation3 + $0x460] sm:$0xf] }
  0x4a   :  { %v154_v24 = vld [vmem:[#allocation3 + $0x280] sm:$0xf]  ;;  %v12785_v26 = vcombine.low %v168_v21, %v169_v23  ;;  %13660 = vmatprep.subr.bf16.mxu1 %v12793_v22 }
  0x4b   :  { %v155_v25 = vld [vmem:[#allocation3 + $0x2a0] sm:$0xf] }
  0x4c   :  { %v12778_v27 = vcombine.low %v154_v24, %v155_v25  ;;  %v138_v28 = vld [vmem:[#allocation3 + $0x80] sm:$0xf]  ;;  %13661 = vmatpush3.bf16.msra.mxu1 %v12785_v26 }
  0x4d   :  { %v139_v29 = vld [vmem:[#allocation3 + $0xa0] sm:$0xf] }
  0x4e   :  { %v186_v30 = vld [vmem:[#allocation3 + $0x680] sm:$0xf]  ;;  %v12770_v34 = vcombine.low %v138_v28, %v139_v29  ;;  %13622 = vmatprep.subr.bf16.mxu0 %v12778_v27 }
  0x4f   :  { %v187_v31 = vld [vmem:[#allocation3 + $0x6a0] sm:$0xf] }
  0x50   :  { %v170_v32 = vld [vmem:[#allocation3 + $0x480] sm:$0xf]  ;;  %v12794_v35 = vcombine.low %v186_v30, %v187_v31  ;;  %13623 = vmatpush3.bf16.msra.mxu0 %v12770_v34 }
  0x51   :  { %v171_v33 = vld [vmem:[#allocation3 + $0x4a0] sm:$0xf] }
  0x52   :  { %v156_v36 = vld [vmem:[#allocation3 + $0x2c0] sm:$0xf]  ;;  %v12786_v39 = vcombine.low %v170_v32, %v171_v33  ;;  %13662 = vmatprep.subr.bf16.mxu1 %v12794_v35 }
  0x53   :  { %v157_v37 = vld [vmem:[#allocation3 + $0x2e0] sm:$0xf] }
  0x54   :  { %v140_v38 = vld [vmem:[#allocation3 + $0xc0] sm:$0xf]  ;;  %v12779_v40 = vcombine.low %v156_v36, %v157_v37  ;;  %13663 = vmatpush3.bf16.msra.mxu1 %v12786_v39 }
  0x55   :  { %v141_v41 = vld [vmem:[#allocation3 + $0xe0] sm:$0xf] }
  0x56   :  { %v188_v42 = vld [vmem:[#allocation3 + $0x6c0] sm:$0xf]  ;;  %v12771_v49 = vcombine.low %v140_v38, %v141_v41  ;;  %13624 = vmatprep.subr.bf16.mxu0 %v12779_v40 }
  0x57   :  { %v189_v43 = vld [vmem:[#allocation3 + $0x6e0] sm:$0xf] }
  0x58   :  { %v12795_v44 = vcombine.low %v188_v42, %v189_v43  ;;  %v172_v45 = vld [vmem:[#allocation3 + $0x4c0] sm:$0xf]  ;;  %13625 = vmatpush3.bf16.msra.mxu0 %v12771_v49 }
  0x59   :  { %v173_v46 = vld [vmem:[#allocation3 + $0x4e0] sm:$0xf] }
  0x5a   :  { %v158_v47 = vld [vmem:[#allocation3 + $0x300] sm:$0xf]  ;;  %v12787_v52 = vcombine.low %v172_v45, %v173_v46  ;;  %13664 = vmatprep.subr.bf16.mxu1 %v12795_v44 }
  0x5b   :  { %v159_v48 = vld [vmem:[#allocation3 + $0x320] sm:$0xf] }
  0x5c   :  { %v190_v50 = vld [vmem:[#allocation3 + $0x700] sm:$0xf]  ;;  %v12780_v53 = vcombine.low %v158_v47, %v159_v48  ;;  %13665 = vmatpush3.bf16.msra.mxu1 %v12787_v52 }
  0x5d   :  { %v191_v51 = vld [vmem:[#allocation3 + $0x720] sm:$0xf] }
  0x5e   :  { %v142_v54 = vld [vmem:[#allocation3 + $0x100] sm:$0xf]  ;;  %v12796_v57 = vcombine.low %v190_v50, %v191_v51  ;;  %13626 = vmatprep.subr.bf16.mxu0 %v12780_v53  ;;  %v16279_v51 = vld [vmem:[%s19463_s0 + $0x8] ss:$52 sps:$4 sm:$0xff]  }
  0x5f   :  { %v143_v55 = vld [vmem:[#allocation3 + $0x120] sm:$0xf] }
  0x60   :  { %v174_v56 = vld [vmem:[#allocation3 + $0x500] sm:$0xf]  ;;  %v12772_v63 = vcombine.low %v142_v54, %v143_v55  ;;  %13666 = vmatprep.subr.bf16.mxu1 %v12796_v57 }
  0x61   :  { %v175_v58 = vld [vmem:[#allocation3 + $0x520] sm:$0xf] }
  0x62   :  { %v160_v59 = vld [vmem:[#allocation3 + $0x340] sm:$0xf]  ;;  %v12788_v0 = vcombine.low %v174_v56, %v175_v58  ;;  %13627 = vmatpush3.bf16.msra.mxu0 %v12772_v63 }
  0x63   :  { %v161_v60 = vld [vmem:[#allocation3 + $0x360] sm:$0xf] }
  0x64   :  { %v192_v61 = vld [vmem:[#allocation3 + $0x740] sm:$0xf]  ;;  %v12781_v1 = vcombine.low %v160_v59, %v161_v60  ;;  %13667 = vmatpush3.bf16.msra.mxu1 %v12788_v0 }
  0x65   :  { %v193_v62 = vld [vmem:[#allocation3 + $0x760] sm:$0xf] }
  0x66   :  { %v144_v2 = vld [vmem:[#allocation3 + $0x140] sm:$0xf]  ;;  %v12797_v5 = vcombine.low %v192_v61, %v193_v62  ;;  %13628 = vmatprep.subr.bf16.mxu0 %v12781_v1  ;;  %v16283_v62 = vld [vmem:[%s19463_s0 + $0x74] ss:$52 sps:$4 sm:$0xff]  }
  0x67   :  { %v145_v3 = vld [vmem:[#allocation3 + $0x160] sm:$0xf] }
  0x68   :  { %v176_v4 = vld [vmem:[#allocation3 + $0x540] sm:$0xf]  ;;  %v12773_v12 = vcombine.low %v144_v2, %v145_v3  ;;  %13668 = vmatprep.subr.bf16.mxu1 %v12797_v5  ;;  %v16282_v5 = vld [vmem:[%s19463_s0 + $0x68] ss:$52 sps:$4 sm:$0xff]  }
  0x69   :  { %v177_v6 = vld [vmem:[#allocation3 + $0x560] sm:$0xf] }
  0x6a   :  { %v162_v7 = vld [vmem:[#allocation3 + $0x380] sm:$0xf]  ;;  %v12789_v15 = vcombine.low %v176_v4, %v177_v6  ;;  %13629 = vmatpush3.bf16.msra.mxu0 %v12773_v12 }
  0x6b   :  { %v163_v8 = vld [vmem:[#allocation3 + $0x3a0] sm:$0xf] }
  0x6c   :  { %v146_v9 = vld [vmem:[#allocation3 + $0x180] sm:$0xf]  ;;  %v12782_v16 = vcombine.low %v162_v7, %v163_v8  ;;  %13669 = vmatpush3.bf16.msra.mxu1 %v12789_v15 }
  0x6d   :  { %v194_v10 = vld [vmem:[#allocation3 + $0x780] sm:$0xf] }
  0x6e   :  { %v195_v11 = vld [vmem:[#allocation3 + $0x7a0] sm:$0xf]  ;;  %13630 = vmatprep.subr.bf16.mxu0 %v12782_v16 }
  0x6f   :  { %v147_v13 = vld [vmem:[#allocation3 + $0x1a0] sm:$0xf]  ;;  %v12798_v19 = vcombine.low %v194_v10, %v195_v11 }
  0x70   :  { %v178_v14 = vld [vmem:[#allocation3 + $0x580] sm:$0xf]  ;;  %v12774_v24 = vcombine.low %v146_v9, %v147_v13 }
  0x71   :  { %v179_v17 = vld [vmem:[#allocation3 + $0x5a0] sm:$0xf]  ;;  %13670 = vmatprep.subr.bf16.mxu1 %v12798_v19 }
  0x72   :  { %v16274_v18 = vld [vmem:[%s19463_s0 + $0x4] ss:$52 sps:$4 sm:$0xff]   ;;  %v16277_v25 = vld [vmem:[%s19463_s0 + $0xc] ss:$52 sps:$4 sm:$0xff]   ;;  %v12790_v26 = vcombine.low %v178_v14, %v179_v17  ;;  %13631 = vmatpush3.bf16.msra.mxu0 %v12774_v24 }
  0x73   :  { %v164_v20 = vld [vmem:[#allocation3 + $0x3c0] sm:$0xf]  ;;  %1269 = vmatprep.mubr.bf16.mxu0 %v16274_v18  ;;  %1334 = vmatprep.mubr.bf16.mxu1 %v16277_v25 }
  0x74   :  { %v165_v21 = vld [vmem:[#allocation3 + $0x3e0] sm:$0xf]  ;;  %13671 = vmatpush3.bf16.msra.mxu1 %v12790_v26  ;;  %v16289_v26 = vld [vmem:[%s19463_s0 + $0xdc] ss:$52 sps:$4 sm:$0xff]  }
  0x75   :  { %v196_v22 = vld [vmem:[#allocation3 + $0x7c0] sm:$0xf]  ;;  %v12783_v27 = vcombine.low %v164_v20, %v165_v21  ;;  %v16286_v20 = vld [vmem:[%s19463_s0 + $0xd4] ss:$52 sps:$4 sm:$0xff]  }
  0x76   :  { %v197_v23 = vld [vmem:[#allocation3 + $0x7e0] sm:$0xf] }
  0x77   :  { %v148_v28 = vld [vmem:[#allocation3 + $0x1c0] sm:$0xf]  ;;  %v12799_v31 = vcombine.low %v196_v22, %v197_v23  ;;  %13632 = vmatprep.subr.bf16.mxu0 %v12783_v27 }
  0x78   :  { %v149_v29 = vld [vmem:[#allocation3 + $0x1e0] sm:$0xf] }
  0x79   :  { %v180_v30 = vld [vmem:[#allocation3 + $0x5c0] sm:$0xf]  ;;  %v12775_v37 = vcombine.low %v148_v28, %v149_v29  ;;  %13672 = vmatprep.subr.bf16.mxu1 %v12799_v31 }
  0x7a   :  { %v181_v32 = vld [vmem:[#allocation3 + $0x5e0] sm:$0xf] }
  0x7b   :  { %v214_v33 = vld [vmem:[#allocation3 + $0xa00] sm:$0xf]  ;;  %v12791_v40 = vcombine.low %v180_v30, %v181_v32  ;;  %13633 = vmatpush3.bf16.msra.mxu0 %v12775_v37 }
  0x7c   :  { %v215_v34 = vld [vmem:[#allocation3 + $0xa20] sm:$0xf] }
  0x7d   :  { %v246_v35 = vld [vmem:[#allocation3 + $0xe00] sm:$0xf]  ;;  %v12808_v42 = vcombine.low %v214_v33, %v215_v34  ;;  %13673 = vmatpush3.bf16.msra.mxu1 %v12791_v40 }
  0x7e   :  { %v247_v36 = vld [vmem:[#allocation3 + $0xe20] sm:$0xf] }
  0x7f   :  { %v198_v38 = vld [vmem:[#allocation3 + $0x800] sm:$0xf]  ;;  %v12824_v45 = vcombine.low %v246_v35, %v247_v36  ;;  %13698 = vmatprep.subr.bf16.mxu0 %v12808_v42 }
  0x80   :  { %v199_v39 = vld [vmem:[#allocation3 + $0x820] sm:$0xf]  ;;  %1335 = vmatmul.mubr.bf16.vlgmr.msra.gmra.mrb[0].mxu1 %v16279_v51 }
  0x81   :  { %v16276_v41 = vld [vmem:[%s19463_s0] ss:$52 sps:$4 sm:$0xff]   ;;  %v12800_v50 = vcombine.low %v198_v38, %v199_v39  ;;  %13738 = vmatprep.subr.bf16.mxu1 %v12824_v45  ;;  %1342 = vmatprep.mubr.bf16.mxu1 %v16283_v62  ;;  %v16285_v15 = vld [vmem:[%s19463_s0 + $0x70] ss:$52 sps:$4 sm:$0xff]  }
  0x82   :  { %v230_v43 = vld [vmem:[#allocation3 + $0xc00] sm:$0xf]  ;;  %1270 = vmatmul.mubr.bf16.vlgmr.msra.gmra.mrb[0].mxu0 %v16276_v41 }
  0x83   :  { %v231_v44 = vld [vmem:[#allocation3 + $0xc20] sm:$0xf]  ;;  %13699 = vmatpush3.bf16.msra.mxu0 %v12800_v50 }
  0x84   :  { %v216_v46 = vld [vmem:[#allocation3 + $0xa40] sm:$0xf]  ;;  %v12816_v53 = vcombine.low %v230_v43, %v231_v44  ;;  %v16291_v43 = vld [vmem:[%s19463_s0 + $0xd8] ss:$52 sps:$4 sm:$0xff]  }
  0x85   :  { %v217_v47 = vld [vmem:[#allocation3 + $0xa60] sm:$0xf] }
  0x86   :  { %v248_v48 = vld [vmem:[#allocation3 + $0xe40] sm:$0xf]  ;;  %v12809_v54 = vcombine.low %v216_v46, %v217_v47  ;;  %13739 = vmatpush3.bf16.msra.mxu1 %v12816_v53 }
  0x87   :  { %v249_v49 = vld [vmem:[#allocation3 + $0xe60] sm:$0xf] }
  0x88   :  { %v200_v52 = vld [vmem:[#allocation3 + $0x840] sm:$0xf]  ;;  %v12825_v58 = vcombine.low %v248_v48, %v249_v49  ;;  %13700 = vmatprep.subr.bf16.mxu0 %v12809_v54  ;;  %1343 = vmatmul.mubr.bf16.gmra.mrb[4].mxu1 %v16285_v15  ;;  %v16967_v48 = vld [vmem:[%s19463_s0 + $0x13c] ss:$52 sps:$4 sm:$0xff]  }
  0x89   :  { %v201_v55 = vld [vmem:[#allocation3 + $0x860] sm:$0xf]  ;;  %1350 = vmatprep.mubr.bf16.mxu1 %v16289_v26 }
  0x8a   :  { %v16280_v56 = vld [vmem:[%s19463_s0 + $0x6c] ss:$52 sps:$4 sm:$0xff]   ;;  %v12801_v1 = vcombine.low %v200_v52, %v201_v55  ;;  %13740 = vmatprep.subr.bf16.mxu1 %v12825_v58  ;;  %v16288_v33 = vld [vmem:[%s19463_s0 + $0xd0] ss:$52 sps:$4 sm:$0xff]  }
  0x8b   :  { %v232_v57 = vld [vmem:[#allocation3 + $0xc40] sm:$0xf]  ;;  %1277 = vmatprep.mubr.bf16.mxu0 %v16280_v56 }
  0x8c   :  { %v233_v59 = vld [vmem:[#allocation3 + $0xc60] sm:$0xf]  ;;  %13701 = vmatpush3.bf16.msra.mxu0 %v12801_v1 }
  0x8d   :  { %v218_v60 = vld [vmem:[#allocation3 + $0xa80] sm:$0xf]  ;;  %v12817_v4 = vcombine.low %v232_v57, %v233_v59  ;;  %1278 = vmatmul.mubr.bf16.gmra.mrb[4].mxu0 %v16282_v5 }
  0x8e   :  { %v219_v61 = vld [vmem:[#allocation3 + $0xaa0] sm:$0xf]  ;;  %1285 = vmatprep.mubr.bf16.mxu0 %v16286_v20 }
  0x8f   :  { %v250_v63 = vld [vmem:[#allocation3 + $0xe80] sm:$0xf]  ;;  %v12810_v6 = vcombine.low %v218_v60, %v219_v61  ;;  %13741 = vmatpush3.bf16.msra.mxu1 %v12817_v4  ;;  %v16975_v61 = vld [vmem:[%s19463_s0 + $0x138] ss:$52 sps:$4 sm:$0xff]  }
  0x90   :  { %v251_v0 = vld [vmem:[#allocation3 + $0xea0] sm:$0xf]  ;;  %1351 = vmatmul.mubr.bf16.gmra.mrb[8].mxu1 %v16291_v43 }
  0x91   :  { %v202_v2 = vld [vmem:[#allocation3 + $0x880] sm:$0xf]  ;;  %v12826_v9 = vcombine.low %v250_v63, %v251_v0  ;;  %13702 = vmatprep.subr.bf16.mxu0 %v12810_v6 }
  0x92   :  { %v203_v3 = vld [vmem:[#allocation3 + $0x8a0] sm:$0xf] }
  0x93   :  { %v234_v7 = vld [vmem:[#allocation3 + $0xc80] sm:$0xf]  ;;  %v12802_v14 = vcombine.low %v202_v2, %v203_v3  ;;  %13742 = vmatprep.subr.bf16.mxu1 %v12826_v9 }
  0x94   :  { %v235_v8 = vld [vmem:[#allocation3 + $0xca0] sm:$0xf] }
  0x95   :  { %v220_v10 = vld [vmem:[#allocation3 + $0xac0] sm:$0xf]  ;;  %v12818_v17 = vcombine.low %v234_v7, %v235_v8  ;;  %13703 = vmatpush3.bf16.msra.mxu0 %v12802_v14 }
  0x96   :  { %v221_v11 = vld [vmem:[#allocation3 + $0xae0] sm:$0xf]  ;;  %1286 = vmatmul.mubr.bf16.gmra.mrb[8].mxu0 %v16288_v33 }
  0x97   :  { %v252_v12 = vld [vmem:[#allocation3 + $0xec0] sm:$0xf]  ;;  %v12811_v18 = vcombine.low %v220_v10, %v221_v11  ;;  %13743 = vmatpush3.bf16.msra.mxu1 %v12818_v17  ;;  %1293 = vmatprep.mubr.bf16.mxu0 %v16967_v48 }
  0x98   :  { %v253_v13 = vld [vmem:[#allocation3 + $0xee0] sm:$0xf] }
  0x99   :  { %v204_v16 = vld [vmem:[#allocation3 + $0x8c0] sm:$0xf]  ;;  %v12827_v22 = vcombine.low %v252_v12, %v253_v13  ;;  %13704 = vmatprep.subr.bf16.mxu0 %v12811_v18  ;;  %v16984_v12 = vld [vmem:[%s19463_s0 + $0x14] ss:$52 sps:$4 sm:$0xff]   ;;  %v16301_v18 = vld [vmem:[%s19463_s0 + $0x1c] ss:$52 sps:$4 sm:$0xff]  }
  0x9a   :  { %v205_v19 = vld [vmem:[#allocation3 + $0x8e0] sm:$0xf] }
  0x9b   :  { %v236_v21 = vld [vmem:[#allocation3 + $0xcc0] sm:$0xf]  ;;  %v12803_v29 = vcombine.low %v204_v16, %v205_v19  ;;  %13744 = vmatprep.subr.bf16.mxu1 %v12827_v22 }
  0x9c   :  { %v237_v23 = vld [vmem:[#allocation3 + $0xce0] sm:$0xf] }
  0x9d   :  { %v222_v24 = vld [vmem:[#allocation3 + $0xb00] sm:$0xf]  ;;  %v12819_v32 = vcombine.low %v236_v21, %v237_v23  ;;  %13705 = vmatpush3.bf16.msra.mxu0 %v12803_v29 }
  0x9e   :  { %v223_v25 = vld [vmem:[#allocation3 + $0xb20] sm:$0xf]  ;;  %1294 = vmatmul.mubr.bf16.gmra.mrb[12].mxu0 %v16975_v61 }
  0x9f   :  { %v254_v27 = vld [vmem:[#allocation3 + $0xf00] sm:$0xf]  ;;  %v12812_v34 = vcombine.low %v222_v24, %v223_v25  ;;  %13745 = vmatpush3.bf16.msra.mxu1 %v12819_v32  ;;  %1399 = vmatprep.mubr.bf16.mxu0 %v16984_v12 }
  0xa0   :  { %v255_v28 = vld [vmem:[#allocation3 + $0xf20] sm:$0xf] }
  0xa1   :  { %v206_v30 = vld [vmem:[#allocation3 + $0x900] sm:$0xf]  ;;  %v12828_v37 = vcombine.low %v254_v27, %v255_v28  ;;  %13706 = vmatprep.subr.bf16.mxu0 %v12812_v34 }
  0xa2   :  { %v207_v31 = vld [vmem:[#allocation3 + $0x920] sm:$0xf] }
  0xa3   :  { %v238_v35 = vld [vmem:[#allocation3 + $0xd00] sm:$0xf]  ;;  %v12804_v42 = vcombine.low %v206_v30, %v207_v31  ;;  %13746 = vmatprep.subr.bf16.mxu1 %v12828_v37 }
  0xa4   :  { %v239_v36 = vld [vmem:[#allocation3 + $0xd20] sm:$0xf] }
  0xa5   :  { %v224_v38 = vld [vmem:[#allocation3 + $0xb40] sm:$0xf]  ;;  %v12820_v45 = vcombine.low %v238_v35, %v239_v36  ;;  %13707 = vmatpush3.bf16.msra.mxu0 %v12804_v42  ;;  %v16303_v35 = vld [vmem:[%s19463_s0 + $0x18] ss:$52 sps:$4 sm:$0xff]  }
  0xa6   :  { %v225_v39 = vld [vmem:[#allocation3 + $0xb60] sm:$0xf] }
  0xa7   :  { %v256_v40 = vld [vmem:[#allocation3 + $0xf40] sm:$0xf]  ;;  %v12813_v46 = vcombine.low %v224_v38, %v225_v39  ;;  %13747 = vmatpush3.bf16.msra.mxu1 %v12820_v45 }
  0xa8   :  { %v257_v41 = vld [vmem:[#allocation3 + $0xf60] sm:$0xf] }
  0xa9   :  { %v208_v44 = vld [vmem:[#allocation3 + $0x940] sm:$0xf]  ;;  %v12829_v50 = vcombine.low %v256_v40, %v257_v41  ;;  %13708 = vmatprep.subr.bf16.mxu0 %v12813_v46  ;;  %v17002_v40 = vld [vmem:[%s19463_s0 + $0x7c] ss:$52 sps:$4 sm:$0xff]  }
  0xaa   :  { %v209_v47 = vld [vmem:[#allocation3 + $0x960] sm:$0xf] }
  0xab   :  { %v240_v49 = vld [vmem:[#allocation3 + $0xd40] sm:$0xf]  ;;  %v12805_v57 = vcombine.low %v208_v44, %v209_v47  ;;  %13748 = vmatprep.subr.bf16.mxu1 %v12829_v50 }
  0xac   :  { %v241_v51 = vld [vmem:[#allocation3 + $0xd60] sm:$0xf] }
  0xad   :  { %v226_v52 = vld [vmem:[#allocation3 + $0xb80] sm:$0xf]  ;;  %v12821_v60 = vcombine.low %v240_v49, %v241_v51  ;;  %13709 = vmatpush3.bf16.msra.mxu0 %v12805_v57 }
  0xae   :  { %v227_v53 = vld [vmem:[#allocation3 + $0xba0] sm:$0xf] }
  0xaf   :  { %v16295_v54 = vld [vmem:[%s19463_s0 + $0x144] ss:$52 sps:$4 sm:$0xff]   ;;  %v12814_v62 = vcombine.low %v226_v52, %v227_v53  ;;  %v16297_v7 = vld [vmem:[%s19463_s0 + $0x140] ss:$52 sps:$4 sm:$0xff]   ;;  %13749 = vmatpush3.bf16.msra.mxu1 %v12821_v60 }
  0xb0   :  { %v258_v55 = vld [vmem:[#allocation3 + $0xf80] sm:$0xf]  ;;  %1358 = vmatprep.mubr.bf16.mxu1 %v16295_v54  ;;  %v17011_v54 = vld [vmem:[%s19463_s0 + $0x78] ss:$52 sps:$4 sm:$0xff]  }
  0xb1   :  { %v259_v56 = vld [vmem:[#allocation3 + $0xfa0] sm:$0xf]  ;;  %13710 = vmatprep.subr.bf16.mxu0 %v12814_v62  ;;  %1359 = vmatmul.mubr.bf16.gmra.mrb[12].mxu1 %v16297_v7 }
  0xb2   :  { %v210_v58 = vld [vmem:[#allocation3 + $0x980] sm:$0xf]  ;;  %v12830_v1 = vcombine.low %v258_v55, %v259_v56  ;;  %1464 = vmatprep.mubr.bf16.mxu1 %v16301_v18 }
  0xb3   :  { %v211_v59 = vld [vmem:[#allocation3 + $0x9a0] sm:$0xf] }
  0xb4   :  { %v242_v63 = vld [vmem:[#allocation3 + $0xd80] sm:$0xf]  ;;  %v12806_v6 = vcombine.low %v210_v58, %v211_v59  ;;  %13750 = vmatprep.subr.bf16.mxu1 %v12830_v1 }
  0xb5   :  { %v243_v0 = vld [vmem:[#allocation3 + $0xda0] sm:$0xf] }
  0xb6   :  { %v228_v2 = vld [vmem:[#allocation3 + $0xbc0] sm:$0xf]  ;;  %v12822_v9 = vcombine.low %v242_v63, %v243_v0  ;;  %13711 = vmatpush3.bf16.msra.mxu0 %v12806_v6 }
  0xb7   :  { %v229_v3 = vld [vmem:[#allocation3 + $0xbe0] sm:$0xf] }
  0xb8   :  { %v260_v4 = vld [vmem:[#allocation3 + $0xfc0] sm:$0xf]  ;;  %v12815_v10 = vcombine.low %v228_v2, %v229_v3  ;;  %13751 = vmatpush3.bf16.msra.mxu1 %v12822_v9 }
  0xb9   :  { %v261_v5 = vld [vmem:[#allocation3 + $0xfe0] sm:$0xf] }
  0xba   :  { %v212_v8 = vld [vmem:[#allocation3 + $0x9c0] sm:$0xf]  ;;  %v12831_v14 = vcombine.low %v260_v4, %v261_v5  ;;  %13712 = vmatprep.subr.bf16.mxu0 %v12815_v10 }
  0xbb   :  { %v213_v11 = vld [vmem:[#allocation3 + $0x9e0] sm:$0xf] }
  0xbc   :  { %v244_v13 = vld [vmem:[#allocation3 + $0xdc0] sm:$0xf]  ;;  %v12807_v21 = vcombine.low %v212_v8, %v213_v11  ;;  %13752 = vmatprep.subr.bf16.mxu1 %v12831_v14 }
  0xbd   :  { %v245_v15 = vld [vmem:[#allocation3 + $0xde0] sm:$0xf] }
  0xbe   :  { %v278_v16 = vld [vmem:[#allocation3 + $0x1200] sm:$0xf]  ;;  %v12823_v24 = vcombine.low %v244_v13, %v245_v15  ;;  %13713 = vmatpush3.bf16.msra.mxu0 %v12807_v21 }
  0xbf   :  { %v279_v17 = vld [vmem:[#allocation3 + $0x1220] sm:$0xf] }
  0xc0   :  { %v310_v19 = vld [vmem:[#allocation3 + $0x1600] sm:$0xf]  ;;  %v12840_v26 = vcombine.low %v278_v16, %v279_v17  ;;  %13753 = vmatpush3.bf16.msra.mxu1 %v12823_v24 }
  0xc1   :  { %v311_v20 = vld [vmem:[#allocation3 + $0x1620] sm:$0xf] }
  0xc2   :  { %v262_v22 = vld [vmem:[#allocation3 + $0x1000] sm:$0xf]  ;;  %v12856_v29 = vcombine.low %v310_v19, %v311_v20  ;;  %13778 = vmatprep.subr.bf16.mxu0 %v12840_v26 }
  0xc3   :  { %v263_v23 = vld [vmem:[#allocation3 + $0x1020] sm:$0xf]  ;;  %1465 = vmatmul.mubr.bf16.vlgmr.msra.gmra.mrb[16].mxu1 %v16303_v35 }
  0xc4   :  { %v16993_v25 = vld [vmem:[%s19463_s0 + $0x10] ss:$52 sps:$4 sm:$0xff]   ;;  %v12832_v34 = vcombine.low %v262_v22, %v263_v23  ;;  %13818 = vmatprep.subr.bf16.mxu1 %v12856_v29  ;;  %v16309_v1 = vld [vmem:[%s19463_s0 + $0x80] ss:$52 sps:$4 sm:$0xff]  }
  0xc5   :  { %v294_v27 = vld [vmem:[#allocation3 + $0x1400] sm:$0xf]  ;;  %1400 = vmatmul.mubr.bf16.vlgmr.msra.gmra.mrb[16].mxu0 %v16993_v25 }
  0xc6   :  { %v295_v28 = vld [vmem:[#allocation3 + $0x1420] sm:$0xf]  ;;  %13779 = vmatpush3.bf16.msra.mxu0 %v12832_v34  ;;  %1407 = vmatprep.mubr.bf16.mxu0 %v17002_v40 }
  0xc7   :  { %v280_v30 = vld [vmem:[#allocation3 + $0x1240] sm:$0xf]  ;;  %v12848_v37 = vcombine.low %v294_v27, %v295_v28 }
  0xc8   :  { %v281_v31 = vld [vmem:[#allocation3 + $0x1260] sm:$0xf] }
  0xc9   :  { %v312_v32 = vld [vmem:[#allocation3 + $0x1640] sm:$0xf]  ;;  %v12841_v38 = vcombine.low %v280_v30, %v281_v31  ;;  %13819 = vmatpush3.bf16.msra.mxu1 %v12848_v37  ;;  %v16315_v31 = vld [vmem:[%s19463_s0 + $0xe8] ss:$52 sps:$4 sm:$0xff]  }
  0xca   :  { %v313_v33 = vld [vmem:[#allocation3 + $0x1660] sm:$0xf] }
  0xcb   :  { %v264_v36 = vld [vmem:[#allocation3 + $0x1040] sm:$0xf]  ;;  %v12857_v42 = vcombine.low %v312_v32, %v313_v33  ;;  %13780 = vmatprep.subr.bf16.mxu0 %v12841_v38 }
  0xcc   :  { %v265_v39 = vld [vmem:[#allocation3 + $0x1060] sm:$0xf] }
  0xcd   :  { %v296_v41 = vld [vmem:[#allocation3 + $0x1440] sm:$0xf]  ;;  %v12833_v50 = vcombine.low %v264_v36, %v265_v39  ;;  %13820 = vmatprep.subr.bf16.mxu1 %v12857_v42  ;;  %1408 = vmatmul.mubr.bf16.gmra.mrb[20].mxu0 %v17011_v54 }
  0xce   :  { %v297_v43 = vld [vmem:[#allocation3 + $0x1460] sm:$0xf] }
  0xcf   :  { %v282_v44 = vld [vmem:[#allocation3 + $0x1280] sm:$0xf]  ;;  %v12849_v53 = vcombine.low %v296_v41, %v297_v43  ;;  %13781 = vmatpush3.bf16.msra.mxu0 %v12833_v50  ;;  %v16319_v43 = vld [vmem:[%s19463_s0 + $0x154] ss:$52 sps:$4 sm:$0xff]  }
  0xd0   :  { %v283_v45 = vld [vmem:[#allocation3 + $0x12a0] sm:$0xf] }
  0xd1   :  { %v16307_v46 = vld [vmem:[%s19463_s0 + $0x84] ss:$52 sps:$4 sm:$0xff]   ;;  %v12842_v55 = vcombine.low %v282_v44, %v283_v45  ;;  %13821 = vmatpush3.bf16.msra.mxu1 %v12849_v53  ;;  %v16313_v13 = vld [vmem:[%s19463_s0 + $0xec] ss:$52 sps:$4 sm:$0xff]  }
  0xd2   :  { %v314_v47 = vld [vmem:[#allocation3 + $0x1680] sm:$0xf]  ;;  %1472 = vmatprep.mubr.bf16.mxu1 %v16307_v46 }
  0xd3   :  { %v315_v49 = vld [vmem:[#allocation3 + $0x16a0] sm:$0xf]  ;;  %13782 = vmatprep.subr.bf16.mxu0 %v12842_v55  ;;  %1473 = vmatmul.mubr.bf16.gmra.mrb[20].mxu1 %v16309_v1 }
  0xd4   :  { %v266_v51 = vld [vmem:[#allocation3 + $0x1080] sm:$0xf]  ;;  %v12858_v58 = vcombine.low %v314_v47, %v315_v49  ;;  %1480 = vmatprep.mubr.bf16.mxu1 %v16313_v13  ;;  %v1739_v13 = vld [vmem:[#allocation3 + $0x204] sm:$0xf] }
  0xd5   :  { %v267_v52 = vld [vmem:[#allocation3 + $0x10a0] sm:$0xf] }
  0xd6   :  { %v298_v56 = vld [vmem:[#allocation3 + $0x1480] sm:$0xf]  ;;  %v12834_v0 = vcombine.low %v266_v51, %v267_v52  ;;  %13822 = vmatprep.subr.bf16.mxu1 %v12858_v58  ;;  %v17047_v51 = vld [vmem:[%s19463_s0 + $0x148] ss:$52 sps:$4 sm:$0xff]  }
  0xd7   :  { %v299_v57 = vld [vmem:[#allocation3 + $0x14a0] sm:$0xf] }
  0xd8   :  { %v284_v59 = vld [vmem:[#allocation3 + $0x12c0] sm:$0xf]  ;;  %v12850_v3 = vcombine.low %v298_v56, %v299_v57  ;;  %13783 = vmatpush3.bf16.msra.mxu0 %v12834_v0 }
  0xd9   :  { %v285_v60 = vld [vmem:[#allocation3 + $0x12e0] sm:$0xf] }
  0xda   :  { %v316_v62 = vld [vmem:[#allocation3 + $0x16c0] sm:$0xf]  ;;  %v12843_v4 = vcombine.low %v284_v59, %v285_v60  ;;  %13823 = vmatpush3.bf16.msra.mxu1 %v12850_v3 }
  0xdb   :  { %v317_v63 = vld [vmem:[#allocation3 + $0x16e0] sm:$0xf]  ;;  %1481 = vmatmul.mubr.bf16.gmra.mrb[24].mxu1 %v16315_v31 }
  0xdc   :  { %v268_v2 = vld [vmem:[#allocation3 + $0x10c0] sm:$0xf]  ;;  %v12859_v8 = vcombine.low %v316_v62, %v317_v63  ;;  %13784 = vmatprep.subr.bf16.mxu0 %v12843_v4  ;;  %1488 = vmatprep.mubr.bf16.mxu1 %v16319_v43  ;;  %v17083_v43 = vld [vmem:[%s19463_s0 + $0x88] ss:$52 sps:$4 sm:$0xff]  }
  0xdd   :  { %v269_v5 = vld [vmem:[#allocation3 + $0x10e0] sm:$0xf] }
  0xde   :  { %v17020_v6 = vld [vmem:[%s19463_s0 + $0xe4] ss:$52 sps:$4 sm:$0xff]   ;;  %v12835_v16 = vcombine.low %v268_v2, %v269_v5  ;;  %v17029_v20 = vld [vmem:[%s19463_s0 + $0xe0] ss:$52 sps:$4 sm:$0xff]   ;;  %13824 = vmatprep.subr.bf16.mxu1 %v12859_v8 }
  0xdf   :  { %v300_v7 = vld [vmem:[#allocation3 + $0x14c0] sm:$0xf]  ;;  %1415 = vmatprep.mubr.bf16.mxu0 %v17020_v6 }
  0xe0   :  { %v301_v9 = vld [vmem:[#allocation3 + $0x14e0] sm:$0xf]  ;;  %13785 = vmatpush3.bf16.msra.mxu0 %v12835_v16 }
  0xe1   :  { %v286_v10 = vld [vmem:[#allocation3 + $0x1300] sm:$0xf]  ;;  %v12851_v19 = vcombine.low %v300_v7, %v301_v9  ;;  %1416 = vmatmul.mubr.bf16.gmra.mrb[24].mxu0 %v17029_v20 }
  0xe2   :  { %v287_v11 = vld [vmem:[#allocation3 + $0x1320] sm:$0xf] }
  0xe3   :  { %v318_v14 = vld [vmem:[#allocation3 + $0x1700] sm:$0xf]  ;;  %v12844_v21 = vcombine.low %v286_v10, %v287_v11  ;;  %13825 = vmatpush3.bf16.msra.mxu1 %v12851_v19  ;;  %v1724_v19 = vld [vmem:[#allocation3 + $0x24] sm:$0xf] }
  0xe4   :  { %v319_v15 = vld [vmem:[#allocation3 + $0x1720] sm:$0xf] }
  0xe5   :  { %v270_v17 = vld [vmem:[#allocation3 + $0x1100] sm:$0xf]  ;;  %v12860_v24 = vcombine.low %v318_v14, %v319_v15  ;;  %13786 = vmatprep.subr.bf16.mxu0 %v12844_v21  ;;  %v1740_v14 = vld [vmem:[#allocation3 + $0x224] sm:$0xf] }
  0xe6   :  { %v271_v18 = vld [vmem:[#allocation3 + $0x1120] sm:$0xf] }
  0xe7   :  { %v302_v22 = vld [vmem:[#allocation3 + $0x1500] sm:$0xf]  ;;  %v12836_v30 = vcombine.low %v270_v17, %v271_v18  ;;  %13826 = vmatprep.subr.bf16.mxu1 %v12860_v24  ;;  %v1723_v18 = vld [vmem:[#allocation3 + $0x4] sm:$0xf] }
  0xe8   :  { %v303_v23 = vld [vmem:[#allocation3 + $0x1520] sm:$0xf] }
  0xe9   :  { %v288_v26 = vld [vmem:[#allocation3 + $0x1340] sm:$0xf]  ;;  %v12852_v33 = vcombine.low %v302_v22, %v303_v23  ;;  %13787 = vmatpush3.bf16.msra.mxu0 %v12836_v30  ;;  %v12882_v22 = vcombine.low %v1739_v13, %v1740_v14  ;;  %v12874_v30 = vcombine.low %v1723_v18, %v1724_v19  ;;  %v17110_v18 = vld [vmem:[%s19463_s0 + $0x15c] ss:$52 sps:$4 sm:$0xff]  }
  0xea   :  { %v289_v27 = vld [vmem:[#allocation3 + $0x1360] sm:$0xf] }
  0xeb   :  { %v320_v28 = vld [vmem:[#allocation3 + $0x1740] sm:$0xf]  ;;  %v12845_v34 = vcombine.low %v288_v26, %v289_v27  ;;  %13827 = vmatpush3.bf16.msra.mxu1 %v12852_v33  ;;  %v1741_v26 = vld [vmem:[#allocation3 + $0x244] sm:$0xf] }
  0xec   :  { %v321_v29 = vld [vmem:[#allocation3 + $0x1760] sm:$0xf]  ;;  %v1742_v27 = vld [vmem:[#allocation3 + $0x264] sm:$0xf] }
  0xed   :  { %v272_v32 = vld [vmem:[#allocation3 + $0x1140] sm:$0xf]  ;;  %v12861_v38 = vcombine.low %v320_v28, %v321_v29  ;;  %13788 = vmatprep.subr.bf16.mxu0 %v12845_v34  ;;  %v16327_v28 = vld [vmem:[%s19463_s0 + $0x28] ss:$52 sps:$4 sm:$0xff]  }
  0xee   :  { %v273_v35 = vld [vmem:[#allocation3 + $0x1160] sm:$0xf]  ;;  %v1726_v33 = vld [vmem:[#allocation3 + $0x64] sm:$0xf] }
  0xef   :  { %v17038_v36 = vld [vmem:[%s19463_s0 + $0x14c] ss:$52 sps:$4 sm:$0xff]   ;;  %v12837_v46 = vcombine.low %v272_v32, %v273_v35  ;;  %13828 = vmatprep.subr.bf16.mxu1 %v12861_v38  ;;  %v16321_v56 = vld [vmem:[%s19463_s0 + $0x150] ss:$52 sps:$4 sm:$0xff]   ;;  %v12883_v35 = vcombine.low %v1741_v26, %v1742_v27  ;;  %v16331_v38 = vld [vmem:[%s19463_s0 + $0x94] ss:$52 sps:$4 sm:$0xff]  }
  0xf0   :  { %v304_v37 = vld [vmem:[#allocation3 + $0x1540] sm:$0xf]  ;;  %1423 = vmatprep.mubr.bf16.mxu0 %v17038_v36  ;;  %1489 = vmatmul.mubr.bf16.gmra.mrb[28].mxu1 %v16321_v56  ;;  %v1725_v32 = vld [vmem:[#allocation3 + $0x44] sm:$0xf] }
  0xf1   :  { %v305_v39 = vld [vmem:[#allocation3 + $0x1560] sm:$0xf]  ;;  %13789 = vmatpush3.bf16.msra.mxu0 %v12837_v46  ;;  %v17092_v56 = vld [vmem:[%s19463_s0 + $0xf4] ss:$52 sps:$4 sm:$0xff]  }
  0xf2   :  { %v290_v41 = vld [vmem:[#allocation3 + $0x1380] sm:$0xf]  ;;  %v12853_v50 = vcombine.low %v304_v37, %v305_v39  ;;  %1424 = vmatmul.mubr.bf16.gmra.mrb[28].mxu0 %v17047_v51  ;;  %v1743_v39 = vld [vmem:[#allocation3 + $0x284] sm:$0xf] }
  0xf3   :  { %v291_v42 = vld [vmem:[#allocation3 + $0x13a0] sm:$0xf]  ;;  %v1734_v26 = vld [vmem:[#allocation3 + $0x164] sm:$0xf] }
  0xf4   :  { %v322_v44 = vld [vmem:[#allocation3 + $0x1780] sm:$0xf]  ;;  %v12846_v52 = vcombine.low %v290_v41, %v291_v42  ;;  %13829 = vmatpush3.bf16.msra.mxu1 %v12853_v50  ;;  %v1744_v41 = vld [vmem:[#allocation3 + $0x2a4] sm:$0xf]  ;;  %v12875_v42 = vcombine.low %v1725_v32, %v1726_v33 }
  0xf5   :  { %v323_v45 = vld [vmem:[#allocation3 + $0x17a0] sm:$0xf]  ;;  %v12884_v46 = vcombine.low %v1743_v39, %v1744_v41  ;;  %v1752_v32 = vld [vmem:[#allocation3 + $0x3a4] sm:$0xf] }
  0xf6   :  { %v274_v47 = vld [vmem:[#allocation3 + $0x1180] sm:$0xf]  ;;  %v12862_v57 = vcombine.low %v322_v44, %v323_v45  ;;  %13790 = vmatprep.subr.bf16.mxu0 %v12846_v52  ;;  %v1727_v45 = vld [vmem:[#allocation3 + $0x84] sm:$0xf] }
  0xf7   :  { %v275_v49 = vld [vmem:[#allocation3 + $0x11a0] sm:$0xf] }
  0xf8   :  { %v306_v53 = vld [vmem:[#allocation3 + $0x1580] sm:$0xf]  ;;  %v12838_v63 = vcombine.low %v274_v47, %v275_v49  ;;  %13830 = vmatprep.subr.bf16.mxu1 %v12862_v57  ;;  %v1728_v47 = vld [vmem:[#allocation3 + $0xa4] sm:$0xf] }
  0xf9   :  { %v307_v55 = vld [vmem:[#allocation3 + $0x15a0] sm:$0xf]  ;;  %v1729_v57 = vld [vmem:[#allocation3 + $0xc4] sm:$0xf] }
  0xfa   :  { %v292_v58 = vld [vmem:[#allocation3 + $0x13c0] sm:$0xf]  ;;  %v12854_v3 = vcombine.low %v306_v53, %v307_v55  ;;  %13791 = vmatpush3.bf16.msra.mxu0 %v12838_v63  ;;  %v1745_v53 = vld [vmem:[#allocation3 + $0x2c4] sm:$0xf] }
  0xfb   :  { %v293_v59 = vld [vmem:[#allocation3 + $0x13e0] sm:$0xf]  ;;  %v1746_v55 = vld [vmem:[#allocation3 + $0x2e4] sm:$0xf] }
  0xfc   :  { %v324_v60 = vld [vmem:[#allocation3 + $0x17c0] sm:$0xf]  ;;  %v12847_v4 = vcombine.low %v292_v58, %v293_v59  ;;  %13831 = vmatpush3.bf16.msra.mxu1 %v12854_v3  ;;  %v12876_v58 = vcombine.low %v1727_v45, %v1728_v47  ;;  %v12885_v63 = vcombine.low %v1745_v53, %v1746_v55  ;;  %v1747_v3 = vld [vmem:[#allocation3 + $0x304] sm:$0xf] }
  0xfd   :  { %v325_v62 = vld [vmem:[#allocation3 + $0x17e0] sm:$0xf]  ;;  %v1754_v45 = vld [vmem:[#allocation3 + $0x3e4] sm:$0xf] }
  0xfe   :  { %v276_v0 = vld [vmem:[#allocation3 + $0x11c0] sm:$0xf]  ;;  %v12863_v9 = vcombine.low %v324_v60, %v325_v62  ;;  %13792 = vmatprep.subr.bf16.mxu0 %v12847_v4  ;;  %v1730_v60 = vld [vmem:[#allocation3 + $0xe4] sm:$0xf] }
  0xff   :  { %v277_v1 = vld [vmem:[#allocation3 + $0x11e0] sm:$0xf]  ;;  %v1748_v4 = vld [vmem:[#allocation3 + $0x324] sm:$0xf] }
 0x100   :  { %v17056_v2 = vld [vmem:[%s19463_s0 + $0x24] ss:$52 sps:$4 sm:$0xff]   ;;  %v16325_v11 = vld [vmem:[%s19463_s0 + $0x2c] ss:$52 sps:$4 sm:$0xff]   ;;  %v12839_v15 = vcombine.low %v276_v0, %v277_v1  ;;  %13832 = vmatprep.subr.bf16.mxu1 %v12863_v9  ;;  %v16337_v1 = vld [vmem:[%s19463_s0 + $0xfc] ss:$52 sps:$4 sm:$0xff]  }
 0x101   :  { %v308_v5 = vld [vmem:[#allocation3 + $0x15c0] sm:$0xf]  ;;  %1529 = vmatprep.mubr.bf16.mxu0 %v17056_v2  ;;  %1594 = vmatprep.mubr.bf16.mxu1 %v16325_v11  ;;  %v1731_v9 = vld [vmem:[#allocation3 + $0x104] sm:$0xf]  ;;  %v12886_v11 = vcombine.low %v1747_v3, %v1748_v4 }
 0x102   :  { %v309_v7 = vld [vmem:[#allocation3 + $0x15e0] sm:$0xf]  ;;  %13793 = vmatpush3.bf16.msra.mxu0 %v12839_v15  ;;  %v1749_v15 = vld [vmem:[#allocation3 + $0x344] sm:$0xf] }
 0x103   :  { %v326_v8 = vld [vmem:[#allocation3 + $0x1800] sm:$0xf]  ;;  %v12855_v16 = vcombine.low %v308_v5, %v309_v7  ;;  %v12877_v5 = vcombine.low %v1729_v57, %v1730_v60  ;;  %v1738_v55 = vld [vmem:[#allocation3 + $0x1e4] sm:$0xf] }
 0x104   :  { %v327_v10 = vld [vmem:[#allocation3 + $0x1820] sm:$0xf]  ;;  %v1771_v57 = vld [vmem:[#allocation3 + $0x604] sm:$0xf] }
 0x105   :  { %v12864_v17 = vcombine.low %v326_v8, %v327_v10  ;;  %v328_v21 = vld [vmem:[#allocation3 + $0x1840] sm:$0xf]  ;;  %13833 = vmatpush3.bf16.msra.mxu1 %v12855_v16  ;;  %v1732_v10 = vld [vmem:[#allocation3 + $0x124] sm:$0xf] }
 0x106   :  { %v329_v23 = vld [vmem:[#allocation3 + $0x1860] sm:$0xf]  ;;  %13870 = vmatprep.subr.bf16.mxu1 %v12882_v22  ;;  %v1750_v16 = vld [vmem:[#allocation3 + $0x364] sm:$0xf]  ;;  %v12878_v19 = vcombine.low %v1731_v9, %v1732_v10  ;;  %v17135_v10 = vld [vmem:[%s19463_s0 + $0x98] ss:$52 sps:$4 sm:$0xff]  }
 0x107   :  { %v17066_v24 = vld [vmem:[%s19463_s0 + $0x20] ss:$52 sps:$4 sm:$0xff]   ;;  %15736 = vmatprep.subr.bf16.mxu0 %v12864_v17  ;;  %v12865_v31 = vcombine.low %v328_v21, %v329_v23  ;;  %v16333_v52 = vld [vmem:[%s19463_s0 + $0x90] ss:$52 sps:$4 sm:$0xff]   ;;  %v12887_v23 = vcombine.low %v1749_v15, %v1750_v16 }
 0x108   :  { %v17074_v29 = vld [vmem:[%s19463_s0 + $0x8c] ss:$52 sps:$4 sm:$0xff]   ;;  %1530 = vmatmul.mubr.bf16.vlgmr.msra.gmra.mrb[32].mxu0 %v17066_v24  ;;  %1595 = vmatmul.mubr.bf16.vlgmr.msra.gmra.mrb[32].mxu1 %v16327_v28  ;;  %v17101_v7 = vld [vmem:[%s19463_s0 + $0xf0] ss:$52 sps:$4 sm:$0xff]  }
 0x109   :  { %v330_v34 = vld [vmem:[#allocation3 + $0x1880] sm:$0xf]  ;;  %15737 = vmatpush3.bf16.msra.mxu0 %v12864_v17  ;;  %13871 = vmatpush3.bf16.msra.mxu1 %v12874_v30  ;;  %v16339_v17 = vld [vmem:[%s19463_s0 + $0xf8] ss:$52 sps:$4 sm:$0xff]   ;;  %v1733_v22 = vld [vmem:[#allocation3 + $0x144] sm:$0xf] }
 0x10a   :  { %v331_v37 = vld [vmem:[#allocation3 + $0x18a0] sm:$0xf]  ;;  %15738 = vmatprep.subr.bf16.mxu0 %v12865_v31  ;;  %13872 = vmatprep.subr.bf16.mxu1 %v12883_v35  ;;  %v12879_v33 = vcombine.low %v1733_v22, %v1734_v26  ;;  %v1804_v60 = vld [vmem:[#allocation3 + $0xa24] sm:$0xf] }
 0x10b   :  { %v12866_v44 = vcombine.low %v330_v34, %v331_v37  ;;  %1537 = vmatprep.mubr.bf16.mxu0 %v17074_v29  ;;  %v332_v49 = vld [vmem:[#allocation3 + $0x18c0] sm:$0xf]  ;;  %1602 = vmatprep.mubr.bf16.mxu1 %v16331_v38  ;;  %v17119_v34 = vld [vmem:[%s19463_s0 + $0x158] ss:$52 sps:$4 sm:$0xff]   ;;  %v1735_v37 = vld [vmem:[#allocation3 + $0x184] sm:$0xf] }
 0x10c   :  { %v333_v50 = vld [vmem:[#allocation3 + $0x18e0] sm:$0xf]  ;;  %v1736_v38 = vld [vmem:[#allocation3 + $0x1a4] sm:$0xf] }
 0x10d   :  { %15739 = vmatpush3.bf16.msra.mxu0 %v12865_v31  ;;  %13873 = vmatpush3.bf16.msra.mxu1 %v12875_v42  ;;  %v12867_v59 = vcombine.low %v332_v49, %v333_v50  ;;  %v334_v62 = vld [vmem:[#allocation3 + $0x1900] sm:$0xf]  ;;  %v1751_v31 = vld [vmem:[#allocation3 + $0x384] sm:$0xf]  ;;  %v12880_v47 = vcombine.low %v1735_v37, %v1736_v38 }
 0x10e   :  { %15740 = vmatprep.subr.bf16.mxu0 %v12866_v44  ;;  %13874 = vmatprep.subr.bf16.mxu1 %v12884_v46  ;;  %v335_v0 = vld [vmem:[#allocation3 + $0x1920] sm:$0xf]  ;;  %v12888_v39 = vcombine.low %v1751_v31, %v1752_v32  ;;  %v1787_v3 = vld [vmem:[#allocation3 + $0x804] sm:$0xf] }
 0x10f   :  { %v12868_v8 = vcombine.low %v334_v62, %v335_v0  ;;  %v336_v13 = vld [vmem:[#allocation3 + $0x1940] sm:$0xf]  ;;  %v1755_v0 = vld [vmem:[#allocation3 + $0x404] sm:$0xf] }
 0x110   :  { %1538 = vmatmul.mubr.bf16.gmra.mrb[36].mxu0 %v17083_v43  ;;  %1603 = vmatmul.mubr.bf16.gmra.mrb[36].mxu1 %v16333_v52  ;;  %v337_v14 = vld [vmem:[#allocation3 + $0x1960] sm:$0xf]  ;;  %v1737_v52 = vld [vmem:[#allocation3 + $0x1c4] sm:$0xf] }
 0x111   :  { %15741 = vmatpush3.bf16.msra.mxu0 %v12866_v44  ;;  %13875 = vmatpush3.bf16.msra.mxu1 %v12876_v58  ;;  %v12869_v21 = vcombine.low %v336_v13, %v337_v14  ;;  %v338_v27 = vld [vmem:[#allocation3 + $0x1980] sm:$0xf]  ;;  %v1753_v44 = vld [vmem:[#allocation3 + $0x3c4] sm:$0xf]  ;;  %v12881_v62 = vcombine.low %v1737_v52, %v1738_v55 }
 0x112   :  { %15742 = vmatprep.subr.bf16.mxu0 %v12867_v59  ;;  %13876 = vmatprep.subr.bf16.mxu1 %v12885_v63  ;;  %v339_v28 = vld [vmem:[#allocation3 + $0x19a0] sm:$0xf]  ;;  %v12889_v53 = vcombine.low %v1753_v44, %v1754_v45  ;;  %v1772_v58 = vld [vmem:[#allocation3 + $0x624] sm:$0xf] }
 0x113   :  { %1545 = vmatprep.mubr.bf16.mxu0 %v17092_v56  ;;  %1610 = vmatprep.mubr.bf16.mxu1 %v16337_v1  ;;  %v16343_v30 = vld [vmem:[%s19463_s0 + $0x164] ss:$52 sps:$4 sm:$0xff]   ;;  %v12870_v35 = vcombine.low %v338_v27, %v339_v28  ;;  %v16345_v46 = vld [vmem:[%s19463_s0 + $0x160] ss:$52 sps:$4 sm:$0xff]   ;;  %v12898_v63 = vcombine.low %v1771_v57, %v1772_v58 }
 0x114   :  { %v340_v41 = vld [vmem:[#allocation3 + $0x19c0] sm:$0xf]  ;;  %v1756_v1 = vld [vmem:[#allocation3 + $0x424] sm:$0xf] }
 0x115   :  { %15743 = vmatpush3.bf16.msra.mxu0 %v12867_v59  ;;  %13877 = vmatpush3.bf16.msra.mxu1 %v12877_v5  ;;  %v341_v42 = vld [vmem:[#allocation3 + $0x19e0] sm:$0xf]  ;;  %v1803_v59 = vld [vmem:[#allocation3 + $0xa04] sm:$0xf]  ;;  %v12890_v15 = vcombine.low %v1755_v0, %v1756_v1 }
 0x116   :  { %15744 = vmatprep.subr.bf16.mxu0 %v12868_v8  ;;  %13878 = vmatprep.subr.bf16.mxu1 %v12886_v11  ;;  %v12871_v49 = vcombine.low %v340_v41, %v341_v42  ;;  %v17128_v50 = vld [vmem:[%s19463_s0 + $0x30] ss:$52 sps:$4 sm:$0xff]   ;;  %v12914_v4 = vcombine.low %v1803_v59, %v1804_v60  ;;  %v17143_v22 = vld [vmem:[%s19463_s0 + $0x100] ss:$52 sps:$4 sm:$0xff]  }
 0x117   :  { %v1788_v5 = vld [vmem:[#allocation3 + $0x824] sm:$0xf]  ;;  %v16386_v52 = vld [vmem:[%s19463_s0 + $0x6c] ss:$52 sps:$4 sm:$0xff]  }
 0x118   :  { %1546 = vmatmul.mubr.bf16.gmra.mrb[40].mxu0 %v17101_v7  ;;  %1611 = vmatmul.mubr.bf16.gmra.mrb[40].mxu1 %v16339_v17  ;;  %v1774_v9 = vld [vmem:[#allocation3 + $0x664] sm:$0xf]  ;;  %v12906_v17 = vcombine.low %v1787_v3, %v1788_v5 }
 0x119   :  { %15745 = vmatpush3.bf16.msra.mxu0 %v12868_v8  ;;  %13879 = vmatpush3.bf16.msra.mxu1 %v12878_v19  ;;  %v1773_v8 = vld [vmem:[#allocation3 + $0x644] sm:$0xf] }
 0x11a   :  { %15746 = vmatprep.subr.bf16.mxu0 %v12869_v21  ;;  %13880 = vmatprep.subr.bf16.mxu1 %v12887_v23  ;;  %v16384_v11 = vld [vmem:[%s19463_s0 + $0x4] ss:$52 sps:$4 sm:$0xff]   ;;  %v12899_v19 = vcombine.low %v1773_v8, %v1774_v9  ;;  %v16387_v9 = vld [vmem:[%s19463_s0 + $0x68] ss:$52 sps:$4 sm:$0xff]  }
 0x11b   :  { %1553 = vmatprep.mubr.bf16.mxu0 %v17110_v18  ;;  %1618 = vmatprep.mubr.bf16.mxu1 %v16343_v30  ;;  %v1805_v13 = vld [vmem:[#allocation3 + $0xa44] sm:$0xf] }
 0x11c   :  { %v1806_v14 = vld [vmem:[#allocation3 + $0xa64] sm:$0xf] }
 0x11d   :  { %15747 = vmatpush3.bf16.msra.mxu0 %v12869_v21  ;;  %13881 = vmatpush3.bf16.msra.mxu1 %v12879_v33  ;;  %v1757_v16 = vld [vmem:[#allocation3 + $0x444] sm:$0xf]  ;;  %v12915_v26 = vcombine.low %v1805_v13, %v1806_v14  ;;  %v16385_v33 = vld [vmem:[%s19463_s0] ss:$52 sps:$4 sm:$0xff]  }
 0x11e   :  { %15748 = vmatprep.subr.bf16.mxu0 %v12870_v35  ;;  %13882 = vmatprep.subr.bf16.mxu1 %v12888_v39  ;;  %v1758_v21 = vld [vmem:[#allocation3 + $0x464] sm:$0xf] }
 0x11f   :  { %v1789_v23 = vld [vmem:[#allocation3 + $0x844] sm:$0xf] }
 0x120   :  { %1554 = vmatmul.mubr.bf16.gmra.mrb[44].mxu0 %v17119_v34  ;;  %1619 = vmatmul.mubr.bf16.gmra.mrb[44].mxu1 %v16345_v46  ;;  %v1790_v27 = vld [vmem:[#allocation3 + $0x864] sm:$0xf] }
 0x121   :  { %15749 = vmatpush3.bf16.msra.mxu0 %v12870_v35  ;;  %13883 = vmatpush3.bf16.msra.mxu1 %v12880_v47  ;;  %v1775_v28 = vld [vmem:[#allocation3 + $0x684] sm:$0xf]  ;;  %v12891_v35 = vcombine.low %v1757_v16, %v1758_v21  ;;  %v12907_v37 = vcombine.low %v1789_v23, %v1790_v27 }
 0x122   :  { %15750 = vmatprep.subr.bf16.mxu0 %v12871_v49  ;;  %13884 = vmatprep.subr.bf16.mxu1 %v12889_v53  ;;  %v1776_v30 = vld [vmem:[#allocation3 + $0x6a4] sm:$0xf] }
 0x123   :  { %15752 = vmatprep.mubr.bf16.mxu0 %v17128_v50  ;;  %2594 = vmatprep.mubr.bf16.mxu1 %v16384_v11  ;;  %v1807_v31 = vld [vmem:[#allocation3 + $0xa84] sm:$0xf]  ;;  %v12900_v38 = vcombine.low %v1775_v28, %v1776_v30 }
 0x124   :  { %v1808_v32 = vld [vmem:[#allocation3 + $0xaa4] sm:$0xf] }
 0x125   :  { %15751 = vmatpush3.bf16.msra.mxu0 %v12871_v49  ;;  %13885 = vmatpush3.bf16.msra.mxu1 %v12881_v62  ;;  %v1759_v39 = vld [vmem:[#allocation3 + $0x484] sm:$0xf]  ;;  %v12916_v44 = vcombine.low %v1807_v31, %v1808_v32  ;;  %v17168_v31 = vld [vmem:[%s19463_s0 + $0xc] ss:$52 sps:$4 sm:$0xff]  }
 0x126   :  { %13910 = vmatprep.subr.bf16.mxu0 %v12898_v63  ;;  %13950 = vmatprep.subr.bf16.mxu1 %v12914_v4  ;;  %v1760_v41 = vld [vmem:[#allocation3 + $0x4a4] sm:$0xf] }
 0x127   :  { %v1791_v42 = vld [vmem:[#allocation3 + $0x884] sm:$0xf]  ;;  %v12892_v57 = vcombine.low %v1759_v39, %v1760_v41 }
 0x128   :  { %15753 = vmatmul.mubr.bf16.vlgmr.msra.gmra.mrb[48].mxu0 %v17135_v10  ;;  %2595 = vmatmul.mubr.bf16.vlgmr.msra.gmra.mrb[48].mxu1 %v16385_v33  ;;  %v1792_v45 = vld [vmem:[#allocation3 + $0x8a4] sm:$0xf] }
 0x129   :  { %13911 = vmatpush3.bf16.msra.mxu0 %v12890_v15  ;;  %13951 = vmatpush3.bf16.msra.mxu1 %v12906_v17  ;;  %v1777_v46 = vld [vmem:[#allocation3 + $0x6c4] sm:$0xf]  ;;  %v12908_v58 = vcombine.low %v1791_v42, %v1792_v45 }
 0x12a   :  { %13912 = vmatprep.subr.bf16.mxu0 %v12899_v19  ;;  %13952 = vmatprep.subr.bf16.mxu1 %v12915_v26  ;;  %v1778_v47 = vld [vmem:[#allocation3 + $0x6e4] sm:$0xf] }
 0x12b   :  { %15756 = vmatprep.mubr.bf16.mxu0 %v17143_v22  ;;  %v17153_v49 = vld [vmem:[%s19463_s0 + $0x168] ss:$52 sps:$4 sm:$0xff]   ;;  %2602 = vmatprep.mubr.bf16.mxu1 %v16386_v52  ;;  %v12901_v59 = vcombine.low %v1777_v46, %v1778_v47  ;;  %v16390_v52 = vld [vmem:[%s19463_s0 + $0xd0] ss:$52 sps:$4 sm:$0xff]  }
 0x12c   :  { %v1809_v53 = vld [vmem:[#allocation3 + $0xac4] sm:$0xf] }
 0x12d   :  { %v1810_v55 = vld [vmem:[#allocation3 + $0xae4] sm:$0xf]  ;;  %13913 = vmatpush3.bf16.msra.mxu0 %v12891_v35  ;;  %13953 = vmatpush3.bf16.msra.mxu1 %v12907_v37 }
 0x12e   :  { %13914 = vmatprep.subr.bf16.mxu0 %v12900_v38  ;;  %v1761_v60 = vld [vmem:[#allocation3 + $0x4c4] sm:$0xf]  ;;  %13954 = vmatprep.subr.bf16.mxu1 %v12916_v44  ;;  %v12917_v0 = vcombine.low %v1809_v53, %v1810_v55 }
 0x12f   :  { %v1762_v62 = vld [vmem:[#allocation3 + $0x4e4] sm:$0xf] }
 0x130   :  { %v1793_v63 = vld [vmem:[#allocation3 + $0x8c4] sm:$0xf]  ;;  %15757 = vmatmul.mubr.bf16.gmra.mrb[52].mxu0 %v17153_v49  ;;  %2603 = vmatmul.mubr.bf16.gmra.mrb[52].mxu1 %v16387_v9  ;;  %v12893_v11 = vcombine.low %v1761_v60, %v1762_v62 }
 0x131   :  { %v1794_v1 = vld [vmem:[#allocation3 + $0x8e4] sm:$0xf]  ;;  %13915 = vmatpush3.bf16.msra.mxu0 %v12892_v57  ;;  %13955 = vmatpush3.bf16.msra.mxu1 %v12908_v58 }
 0x132   :  { %v1779_v3 = vld [vmem:[#allocation3 + $0x704] sm:$0xf]  ;;  %13916 = vmatprep.subr.bf16.mxu0 %v12901_v59  ;;  %v12909_v13 = vcombine.low %v1793_v63, %v1794_v1  ;;  %13956 = vmatprep.subr.bf16.mxu1 %v12917_v0 }
 0x133   :  { %v1780_v4 = vld [vmem:[#allocation3 + $0x724] sm:$0xf]  ;;  %2659 = vmatprep.mubr.bf16.mxu0 %v17168_v31 }
 0x134   :  { %v1811_v5 = vld [vmem:[#allocation3 + $0xb04] sm:$0xf]  ;;  %v12902_v14 = vcombine.low %v1779_v3, %v1780_v4 }
 0x135   :  { %v1812_v8 = vld [vmem:[#allocation3 + $0xb24] sm:$0xf]  ;;  %13917 = vmatpush3.bf16.msra.mxu0 %v12893_v11  ;;  %13957 = vmatpush3.bf16.msra.mxu1 %v12909_v13 }
 0x136   :  { %v1763_v15 = vld [vmem:[#allocation3 + $0x504] sm:$0xf]  ;;  %v12918_v21 = vcombine.low %v1811_v5, %v1812_v8  ;;  %13918 = vmatprep.subr.bf16.mxu0 %v12902_v14 }
 0x137   :  { %v1764_v16 = vld [vmem:[#allocation3 + $0x524] sm:$0xf] }
 0x138   :  { %v1795_v17 = vld [vmem:[#allocation3 + $0x904] sm:$0xf]  ;;  %v12894_v32 = vcombine.low %v1763_v15, %v1764_v16  ;;  %13958 = vmatprep.subr.bf16.mxu1 %v12918_v21 }
 0x139   :  { %v16388_v19 = vld [vmem:[%s19463_s0 + $0xd4] ss:$52 sps:$4 sm:$0xff]  }
 0x13a   :  { %2610 = vmatprep.mubr.bf16.mxu1 %v16388_v19  ;;  %v1796_v23 = vld [vmem:[#allocation3 + $0x924] sm:$0xf]  ;;  %13919 = vmatpush3.bf16.msra.mxu0 %v12894_v32 }
 0x13b   :  { %v1781_v26 = vld [vmem:[#allocation3 + $0x744] sm:$0xf]  ;;  %v12910_v33 = vcombine.low %v1795_v17, %v1796_v23  ;;  %2611 = vmatmul.mubr.bf16.gmra.mrb[56].mxu1 %v16390_v52 }
 0x13c   :  { %v1782_v27 = vld [vmem:[#allocation3 + $0x764] sm:$0xf]  ;;  %2618 = vmatprep.mubr.bf16.mxu1 %v16967_v48 }
 0x13d   :  { %v1813_v28 = vld [vmem:[#allocation3 + $0xb44] sm:$0xf]  ;;  %v12903_v35 = vcombine.low %v1781_v26, %v1782_v27  ;;  %13959 = vmatpush3.bf16.msra.mxu1 %v12910_v33 }
 0x13e   :  { %v1814_v30 = vld [vmem:[#allocation3 + $0xb64] sm:$0xf] }
 0x13f   :  { %v1765_v37 = vld [vmem:[#allocation3 + $0x544] sm:$0xf]  ;;  %v12919_v41 = vcombine.low %v1813_v28, %v1814_v30  ;;  %13920 = vmatprep.subr.bf16.mxu0 %v12903_v35 }
 0x140   :  { %v1766_v38 = vld [vmem:[#allocation3 + $0x564] sm:$0xf] }
 0x141   :  { %v1797_v39 = vld [vmem:[#allocation3 + $0x944] sm:$0xf]  ;;  %v12895_v53 = vcombine.low %v1765_v37, %v1766_v38  ;;  %13960 = vmatprep.subr.bf16.mxu1 %v12919_v41 }
 0x142   :  { %v1798_v42 = vld [vmem:[#allocation3 + $0x964] sm:$0xf] }
 0x143   :  { %v1783_v44 = vld [vmem:[#allocation3 + $0x784] sm:$0xf]  ;;  %v12911_v55 = vcombine.low %v1797_v39, %v1798_v42  ;;  %13921 = vmatpush3.bf16.msra.mxu0 %v12895_v53  ;;  %2619 = vmatmul.mubr.bf16.gmra.mrb[60].mxu1 %v16975_v61 }
 0x144   :  { %v1784_v45 = vld [vmem:[#allocation3 + $0x7a4] sm:$0xf]  ;;  %2724 = vmatprep.mubr.bf16.mxu1 %v16984_v12 }
 0x145   :  { %v1815_v46 = vld [vmem:[#allocation3 + $0xb84] sm:$0xf]  ;;  %v12904_v57 = vcombine.low %v1783_v44, %v1784_v45  ;;  %13961 = vmatpush3.bf16.msra.mxu1 %v12911_v55 }
 0x146   :  { %v1816_v47 = vld [vmem:[#allocation3 + $0xba4] sm:$0xf] }
 0x147   :  { %v1767_v58 = vld [vmem:[#allocation3 + $0x584] sm:$0xf]  ;;  %v12920_v62 = vcombine.low %v1815_v46, %v1816_v47  ;;  %13922 = vmatprep.subr.bf16.mxu0 %v12904_v57 }
 0x148   :  { %v1768_v59 = vld [vmem:[#allocation3 + $0x5a4] sm:$0xf] }
 0x149   :  { %v1799_v60 = vld [vmem:[#allocation3 + $0x984] sm:$0xf]  ;;  %v12896_v5 = vcombine.low %v1767_v58, %v1768_v59  ;;  %13962 = vmatprep.subr.bf16.mxu1 %v12920_v62 }
 0x14a   :  { %v1800_v63 = vld [vmem:[#allocation3 + $0x9a4] sm:$0xf] }
 0x14b   :  { %v1785_v0 = vld [vmem:[#allocation3 + $0x7c4] sm:$0xf]  ;;  %v12912_v8 = vcombine.low %v1799_v60, %v1800_v63  ;;  %13923 = vmatpush3.bf16.msra.mxu0 %v12896_v5 }
 0x14c   :  { %v1786_v1 = vld [vmem:[#allocation3 + $0x7e4] sm:$0xf] }
 0x14d   :  { %v1817_v3 = vld [vmem:[#allocation3 + $0xbc4] sm:$0xf]  ;;  %v12905_v9 = vcombine.low %v1785_v0, %v1786_v1  ;;  %13963 = vmatpush3.bf16.msra.mxu1 %v12912_v8 }
 0x14e   :  { %v1818_v4 = vld [vmem:[#allocation3 + $0xbe4] sm:$0xf] }
 0x14f   :  { %v1769_v11 = vld [vmem:[#allocation3 + $0x5c4] sm:$0xf]  ;;  %v12921_v15 = vcombine.low %v1817_v3, %v1818_v4  ;;  %13924 = vmatprep.subr.bf16.mxu0 %v12905_v9 }
 0x150   :  { %v1770_v13 = vld [vmem:[#allocation3 + $0x5e4] sm:$0xf] }
 0x151   :  { %v1801_v14 = vld [vmem:[#allocation3 + $0x9c4] sm:$0xf]  ;;  %v12897_v23 = vcombine.low %v1769_v11, %v1770_v13  ;;  %13964 = vmatprep.subr.bf16.mxu1 %v12921_v15 }
 0x152   :  { %v1802_v16 = vld [vmem:[#allocation3 + $0x9e4] sm:$0xf] }
 0x153   :  { %v1835_v17 = vld [vmem:[#allocation3 + $0xe04] sm:$0xf]  ;;  %v12913_v26 = vcombine.low %v1801_v14, %v1802_v16  ;;  %13925 = vmatpush3.bf16.msra.mxu0 %v12897_v23 }
 0x154   :  { %v1836_v48 = vld [vmem:[#allocation3 + $0xe24] sm:$0xf] }
 0x155   :  { %v1867_v19 = vld [vmem:[#allocation3 + $0x1204] sm:$0xf]  ;;  %v12930_v27 = vcombine.low %v1835_v17, %v1836_v48  ;;  %13965 = vmatpush3.bf16.msra.mxu1 %v12913_v26 }
 0x156   :  { %v1868_v21 = vld [vmem:[#allocation3 + $0x1224] sm:$0xf] }
 0x157   :  { %v1819_v28 = vld [vmem:[#allocation3 + $0xc04] sm:$0xf]  ;;  %v12946_v33 = vcombine.low %v1867_v19, %v1868_v21  ;;  %13990 = vmatprep.subr.bf16.mxu0 %v12930_v27 }
 0x158   :  { %v1820_v30 = vld [vmem:[#allocation3 + $0xc24] sm:$0xf]  ;;  %2725 = vmatmul.mubr.bf16.vlgmr.msra.gmra.mrb[64].mxu1 %v16993_v25 }
 0x159   :  { %v1851_v32 = vld [vmem:[#allocation3 + $0x1004] sm:$0xf]  ;;  %v12922_v42 = vcombine.low %v1819_v28, %v1820_v30  ;;  %14030 = vmatprep.subr.bf16.mxu1 %v12946_v33  ;;  %2732 = vmatprep.mubr.bf16.mxu1 %v17002_v40 }
 0x15a   :  { %v1852_v35 = vld [vmem:[#allocation3 + $0x1024] sm:$0xf] }
 0x15b   :  { %v1837_v37 = vld [vmem:[#allocation3 + $0xe44] sm:$0xf]  ;;  %v12938_v61 = vcombine.low %v1851_v32, %v1852_v35 }
 0x15c   :  { %v1838_v38 = vld [vmem:[#allocation3 + $0xe64] sm:$0xf] }
 0x15d   :  { %v1869_v39 = vld [vmem:[#allocation3 + $0x1244] sm:$0xf]  ;;  %v12931_v44 = vcombine.low %v1837_v37, %v1838_v38  ;;  %14031 = vmatpush3.bf16.msra.mxu1 %v12938_v61 }
 0x15e   :  { %v1870_v41 = vld [vmem:[#allocation3 + $0x1264] sm:$0xf] }
 0x15f   :  { %v1821_v45 = vld [vmem:[#allocation3 + $0xc44] sm:$0xf]  ;;  %v12947_v52 = vcombine.low %v1869_v39, %v1870_v41  ;;  %v17201_v41 = vld [vmem:[%s19463_s0 + $0xdc] ss:$52 sps:$4 sm:$0xff]  }
 0x160   :  { %v1822_v46 = vld [vmem:[#allocation3 + $0xc64] sm:$0xf]  ;;  %2733 = vmatmul.mubr.bf16.gmra.mrb[68].mxu1 %v17011_v54 }
 0x161   :  { %v1853_v47 = vld [vmem:[#allocation3 + $0x1044] sm:$0xf]  ;;  %v12923_v60 = vcombine.low %v1821_v45, %v1822_v46  ;;  %14032 = vmatprep.subr.bf16.mxu1 %v12947_v52  ;;  %2740 = vmatprep.mubr.bf16.mxu1 %v17020_v6  ;;  %v17208_v6 = vld [vmem:[%s19463_s0 + $0xd8] ss:$52 sps:$4 sm:$0xff]  }
 0x162   :  { %v1854_v53 = vld [vmem:[#allocation3 + $0x1064] sm:$0xf] }
 0x163   :  { %v1839_v55 = vld [vmem:[#allocation3 + $0xe84] sm:$0xf]  ;;  %v12939_v62 = vcombine.low %v1853_v47, %v1854_v53 }
 0x164   :  { %v1840_v12 = vld [vmem:[#allocation3 + $0xea4] sm:$0xf] }
 0x165   :  { %v17180_v57 = vld [vmem:[%s19463_s0 + $0x8] ss:$52 sps:$4 sm:$0xff]   ;;  %v12932_v63 = vcombine.low %v1839_v55, %v1840_v12  ;;  %14033 = vmatpush3.bf16.msra.mxu1 %v12939_v62  ;;  %v17194_v40 = vld [vmem:[%s19463_s0 + $0x70] ss:$52 sps:$4 sm:$0xff]  }
 0x166   :  { %2660 = vmatmul.mubr.bf16.vlgmr.msra.gmra.mrb[56].mxu0 %v17180_v57  ;;  %v1871_v58 = vld [vmem:[#allocation3 + $0x1284] sm:$0xf] }
 0x167   :  { %v1872_v59 = vld [vmem:[#allocation3 + $0x12a4] sm:$0xf]  ;;  %13991 = vmatpush3.bf16.msra.mxu0 %v12922_v42 }
 0x168   :  { %13992 = vmatprep.subr.bf16.mxu0 %v12931_v44  ;;  %v1823_v0 = vld [vmem:[#allocation3 + $0xc84] sm:$0xf]  ;;  %v12948_v5 = vcombine.low %v1871_v58, %v1872_v59  ;;  %2741 = vmatmul.mubr.bf16.gmra.mrb[72].mxu1 %v17029_v20 }
 0x169   :  { %v1824_v1 = vld [vmem:[#allocation3 + $0xca4] sm:$0xf]  ;;  %2748 = vmatprep.mubr.bf16.mxu1 %v17038_v36  ;;  %v17222_v36 = vld [vmem:[%s19463_s0 + $0x140] ss:$52 sps:$4 sm:$0xff]  }
 0x16a   :  { %v1855_v3 = vld [vmem:[#allocation3 + $0x1084] sm:$0xf]  ;;  %v12924_v14 = vcombine.low %v1823_v0, %v1824_v1  ;;  %14034 = vmatprep.subr.bf16.mxu1 %v12948_v5 }
 0x16b   :  { %v17187_v4 = vld [vmem:[%s19463_s0 + $0x74] ss:$52 sps:$4 sm:$0xff]   ;;  %13993 = vmatpush3.bf16.msra.mxu0 %v12923_v60 }
 0x16c   :  { %2667 = vmatprep.mubr.bf16.mxu0 %v17187_v4  ;;  %v1856_v8 = vld [vmem:[#allocation3 + $0x10a4] sm:$0xf]  ;;  %13994 = vmatprep.subr.bf16.mxu0 %v12932_v63 }
 0x16d   :  { %v1841_v9 = vld [vmem:[#allocation3 + $0xec4] sm:$0xf]  ;;  %v12940_v15 = vcombine.low %v1855_v3, %v1856_v8 }
 0x16e   :  { %v1842_v25 = vld [vmem:[#allocation3 + $0xee4] sm:$0xf]  ;;  %2668 = vmatmul.mubr.bf16.gmra.mrb[60].mxu0 %v17194_v40 }
 0x16f   :  { %v1873_v11 = vld [vmem:[#allocation3 + $0x12c4] sm:$0xf]  ;;  %v12933_v16 = vcombine.low %v1841_v9, %v1842_v25  ;;  %13995 = vmatpush3.bf16.msra.mxu0 %v12924_v14  ;;  %14035 = vmatpush3.bf16.msra.mxu1 %v12940_v15 }
 0x170   :  { %v1874_v13 = vld [vmem:[#allocation3 + $0x12e4] sm:$0xf]  ;;  %2675 = vmatprep.mubr.bf16.mxu0 %v17201_v41  ;;  %2749 = vmatmul.mubr.bf16.gmra.mrb[76].mxu1 %v17047_v51 }
 0x171   :  { %v1825_v17 = vld [vmem:[#allocation3 + $0xcc4] sm:$0xf]  ;;  %v12949_v21 = vcombine.low %v1873_v11, %v1874_v13  ;;  %13996 = vmatprep.subr.bf16.mxu0 %v12933_v16  ;;  %2854 = vmatprep.mubr.bf16.mxu1 %v17056_v2 }
 0x172   :  { %v1826_v48 = vld [vmem:[#allocation3 + $0xce4] sm:$0xf] }
 0x173   :  { %v1857_v19 = vld [vmem:[#allocation3 + $0x10c4] sm:$0xf]  ;;  %v12925_v32 = vcombine.low %v1825_v17, %v1826_v48  ;;  %14036 = vmatprep.subr.bf16.mxu1 %v12949_v21 }
 0x174   :  { %v1858_v23 = vld [vmem:[#allocation3 + $0x10e4] sm:$0xf] }
 0x175   :  { %v1843_v26 = vld [vmem:[#allocation3 + $0xf04] sm:$0xf]  ;;  %v12941_v33 = vcombine.low %v1857_v19, %v1858_v23  ;;  %13997 = vmatpush3.bf16.msra.mxu0 %v12925_v32 }
 0x176   :  { %v1844_v27 = vld [vmem:[#allocation3 + $0xf24] sm:$0xf]  ;;  %2676 = vmatmul.mubr.bf16.gmra.mrb[64].mxu0 %v17208_v6 }
 0x177   :  { %v1875_v28 = vld [vmem:[#allocation3 + $0x1304] sm:$0xf]  ;;  %v12934_v35 = vcombine.low %v1843_v26, %v1844_v27  ;;  %14037 = vmatpush3.bf16.msra.mxu1 %v12941_v33 }
 0x178   :  { %v1876_v30 = vld [vmem:[#allocation3 + $0x1324] sm:$0xf] }
 0x179   :  { %v1827_v37 = vld [vmem:[#allocation3 + $0xd04] sm:$0xf]  ;;  %v12950_v42 = vcombine.low %v1875_v28, %v1876_v30  ;;  %13998 = vmatprep.subr.bf16.mxu0 %v12934_v35 }
 0x17a   :  { %v1828_v38 = vld [vmem:[#allocation3 + $0xd24] sm:$0xf] }
 0x17b   :  { %v1859_v39 = vld [vmem:[#allocation3 + $0x1104] sm:$0xf]  ;;  %v12926_v47 = vcombine.low %v1827_v37, %v1828_v38  ;;  %14038 = vmatprep.subr.bf16.mxu1 %v12950_v42 }
 0x17c   :  { %v1860_v61 = vld [vmem:[#allocation3 + $0x1124] sm:$0xf] }
 0x17d   :  { %v1845_v44 = vld [vmem:[#allocation3 + $0xf44] sm:$0xf]  ;;  %v12942_v52 = vcombine.low %v1859_v39, %v1860_v61  ;;  %13999 = vmatpush3.bf16.msra.mxu0 %v12926_v47 }
 0x17e   :  { %v1846_v54 = vld [vmem:[#allocation3 + $0xf64] sm:$0xf] }
 0x17f   :  { %v1877_v45 = vld [vmem:[#allocation3 + $0x1344] sm:$0xf]  ;;  %v12935_v53 = vcombine.low %v1845_v44, %v1846_v54  ;;  %14039 = vmatpush3.bf16.msra.mxu1 %v12942_v52 }
 0x180   :  { %v1878_v46 = vld [vmem:[#allocation3 + $0x1364] sm:$0xf] }
 0x181   :  { %v1829_v55 = vld [vmem:[#allocation3 + $0xd44] sm:$0xf]  ;;  %v12951_v59 = vcombine.low %v1877_v45, %v1878_v46  ;;  %14000 = vmatprep.subr.bf16.mxu0 %v12935_v53  ;;  %v17229_v45 = vld [vmem:[%s19463_s0 + $0x1c] ss:$52 sps:$4 sm:$0xff]  }
 0x182   :  { %v1830_v12 = vld [vmem:[#allocation3 + $0xd64] sm:$0xf] }
 0x183   :  { %v1861_v58 = vld [vmem:[#allocation3 + $0x1144] sm:$0xf]  ;;  %v12927_v3 = vcombine.low %v1829_v55, %v1830_v12  ;;  %14040 = vmatprep.subr.bf16.mxu1 %v12951_v59 }
 0x184   :  { %v1862_v60 = vld [vmem:[#allocation3 + $0x1164] sm:$0xf] }
 0x185   :  { %v1847_v62 = vld [vmem:[#allocation3 + $0xf84] sm:$0xf]  ;;  %v12943_v5 = vcombine.low %v1861_v58, %v1862_v60  ;;  %14001 = vmatpush3.bf16.msra.mxu0 %v12927_v3 }
 0x186   :  { %v1848_v63 = vld [vmem:[#allocation3 + $0xfa4] sm:$0xf] }
 0x187   :  { %v1879_v0 = vld [vmem:[#allocation3 + $0x1384] sm:$0xf]  ;;  %v12936_v8 = vcombine.low %v1847_v62, %v1848_v63  ;;  %14041 = vmatpush3.bf16.msra.mxu1 %v12943_v5 }
 0x188   :  { %v1880_v1 = vld [vmem:[#allocation3 + $0x13a4] sm:$0xf] }
 0x189   :  { %v1831_v9 = vld [vmem:[#allocation3 + $0xd84] sm:$0xf]  ;;  %v12952_v14 = vcombine.low %v1879_v0, %v1880_v1  ;;  %14002 = vmatprep.subr.bf16.mxu0 %v12936_v8  ;;  %v17236_v0 = vld [vmem:[%s19463_s0 + $0x18] ss:$52 sps:$4 sm:$0xff]  }
 0x18a   :  { %v1832_v25 = vld [vmem:[#allocation3 + $0xda4] sm:$0xf] }
 0x18b   :  { %v1863_v11 = vld [vmem:[#allocation3 + $0x1184] sm:$0xf]  ;;  %v12928_v19 = vcombine.low %v1831_v9, %v1832_v25  ;;  %14042 = vmatprep.subr.bf16.mxu1 %v12952_v14 }
 0x18c   :  { %v17215_v13 = vld [vmem:[%s19463_s0 + $0x144] ss:$52 sps:$4 sm:$0xff]  }
 0x18d   :  { %2683 = vmatprep.mubr.bf16.mxu0 %v17215_v13  ;;  %v1864_v15 = vld [vmem:[#allocation3 + $0x11a4] sm:$0xf]  ;;  %14003 = vmatpush3.bf16.msra.mxu0 %v12928_v19 }
 0x18e   :  { %v1849_v16 = vld [vmem:[#allocation3 + $0xfc4] sm:$0xf]  ;;  %v12944_v21 = vcombine.low %v1863_v11, %v1864_v15  ;;  %2684 = vmatmul.mubr.bf16.gmra.mrb[68].mxu0 %v17222_v36 }
 0x18f   :  { %v1850_v20 = vld [vmem:[#allocation3 + $0xfe4] sm:$0xf]  ;;  %2789 = vmatprep.mubr.bf16.mxu0 %v17229_v45 }
 0x190   :  { %v1881_v17 = vld [vmem:[#allocation3 + $0x13c4] sm:$0xf]  ;;  %v12937_v23 = vcombine.low %v1849_v16, %v1850_v20  ;;  %14043 = vmatpush3.bf16.msra.mxu1 %v12944_v21 }
 0x191   :  { %v1882_v48 = vld [vmem:[#allocation3 + $0x13e4] sm:$0xf] }
 0x192   :  { %v1833_v26 = vld [vmem:[#allocation3 + $0xdc4] sm:$0xf]  ;;  %v12953_v30 = vcombine.low %v1881_v17, %v1882_v48  ;;  %14004 = vmatprep.subr.bf16.mxu0 %v12937_v23 }
 0x193   :  { %v1834_v27 = vld [vmem:[#allocation3 + $0xde4] sm:$0xf] }
 0x194   :  { %v1865_v28 = vld [vmem:[#allocation3 + $0x11c4] sm:$0xf]  ;;  %v12929_v39 = vcombine.low %v1833_v26, %v1834_v27  ;;  %14044 = vmatprep.subr.bf16.mxu1 %v12953_v30  ;;  %v16401_v27 = vld [vmem:[%s19463_s0 + $0x80] ss:$52 sps:$4 sm:$0xff]  }
 0x195   :  { %v1866_v32 = vld [vmem:[#allocation3 + $0x11e4] sm:$0xf] }
 0x196   :  { %v1899_v33 = vld [vmem:[#allocation3 + $0x1604] sm:$0xf]  ;;  %v12945_v42 = vcombine.low %v1865_v28, %v1866_v32  ;;  %14005 = vmatpush3.bf16.msra.mxu0 %v12929_v39 }
 0x197   :  { %v1900_v35 = vld [vmem:[#allocation3 + $0x1624] sm:$0xf] }
 0x198   :  { %v1915_v37 = vld [vmem:[#allocation3 + $0x1804] sm:$0xf]  ;;  %v12962_v61 = vcombine.low %v1899_v33, %v1900_v35  ;;  %14045 = vmatpush3.bf16.msra.mxu1 %v12945_v42 }
 0x199   :  { %v1916_v38 = vld [vmem:[#allocation3 + $0x1824] sm:$0xf]  ;;  %2790 = vmatmul.mubr.bf16.vlgmr.msra.gmra.mrb[72].mxu0 %v17236_v0 }
 0x19a   :  { %v1883_v44 = vld [vmem:[#allocation3 + $0x1404] sm:$0xf]  ;;  %v12970_v46 = vcombine.low %v1915_v37, %v1916_v38  ;;  %14070 = vmatprep.subr.bf16.mxu0 %v12962_v61  ;;  %v16402_v37 = vld [vmem:[%s19463_s0 + $0xec] ss:$52 sps:$4 sm:$0xff]  }
 0x19b   :  { %v1884_v54 = vld [vmem:[#allocation3 + $0x1424] sm:$0xf]  ;;  %2855 = vmatmul.mubr.bf16.vlgmr.msra.gmra.mrb[80].mxu1 %v17066_v24 }
 0x19c   :  { %v1901_v47 = vld [vmem:[#allocation3 + $0x1644] sm:$0xf]  ;;  %v12954_v55 = vcombine.low %v1883_v44, %v1884_v54  ;;  %15760 = vmatprep.subr.bf16.mxu1 %v12970_v46  ;;  %2862 = vmatprep.mubr.bf16.mxu1 %v17074_v29 }
 0x19d   :  { %v1902_v52 = vld [vmem:[#allocation3 + $0x1664] sm:$0xf]  ;;  %15761 = vmatpush3.bf16.msra.mxu1 %v12970_v46 }
 0x19e   :  { %v1917_v51 = vld [vmem:[#allocation3 + $0x1844] sm:$0xf]  ;;  %v12963_v12 = vcombine.low %v1901_v47, %v1902_v52  ;;  %14071 = vmatpush3.bf16.msra.mxu0 %v12954_v55 }
 0x19f   :  { %v1918_v53 = vld [vmem:[#allocation3 + $0x1864] sm:$0xf] }
 0x1a0   :  { %v1885_v58 = vld [vmem:[#allocation3 + $0x1444] sm:$0xf]  ;;  %v12971_v60 = vcombine.low %v1917_v51, %v1918_v53  ;;  %14072 = vmatprep.subr.bf16.mxu0 %v12963_v12 }
 0x1a1   :  { %v1886_v59 = vld [vmem:[#allocation3 + $0x1464] sm:$0xf] }
 0x1a2   :  { %v1903_v62 = vld [vmem:[#allocation3 + $0x1684] sm:$0xf]  ;;  %v12955_v3 = vcombine.low %v1885_v58, %v1886_v59  ;;  %15762 = vmatprep.subr.bf16.mxu1 %v12971_v60 }
 0x1a3   :  { %v1904_v63 = vld [vmem:[#allocation3 + $0x16a4] sm:$0xf]  ;;  %15763 = vmatpush3.bf16.msra.mxu1 %v12971_v60 }
 0x1a4   :  { %v1919_v2 = vld [vmem:[#allocation3 + $0x1884] sm:$0xf]  ;;  %v12964_v5 = vcombine.low %v1903_v62, %v1904_v63  ;;  %14073 = vmatpush3.bf16.msra.mxu0 %v12955_v3  ;;  %2863 = vmatmul.mubr.bf16.gmra.mrb[84].mxu1 %v17083_v43 }
 0x1a5   :  { %v1920_v1 = vld [vmem:[#allocation3 + $0x18a4] sm:$0xf]  ;;  %2870 = vmatprep.mubr.bf16.mxu1 %v17092_v56 }
 0x1a6   :  { %v1887_v8 = vld [vmem:[#allocation3 + $0x1484] sm:$0xf]  ;;  %v12972_v11 = vcombine.low %v1919_v2, %v1920_v1  ;;  %14074 = vmatprep.subr.bf16.mxu0 %v12964_v5 }
 0x1a7   :  { %v1888_v9 = vld [vmem:[#allocation3 + $0x14a4] sm:$0xf] }
 0x1a8   :  { %v16400_v25 = vld [vmem:[%s19463_s0 + $0x84] ss:$52 sps:$4 sm:$0xff]   ;;  %v12956_v24 = vcombine.low %v1887_v8, %v1888_v9  ;;  %15764 = vmatprep.subr.bf16.mxu1 %v12972_v11  ;;  %v16403_v55 = vld [vmem:[%s19463_s0 + $0xe8] ss:$52 sps:$4 sm:$0xff]  }
 0x1a9   :  { %2797 = vmatprep.mubr.bf16.mxu0 %v16400_v25  ;;  %v1905_v14 = vld [vmem:[#allocation3 + $0x16c4] sm:$0xf]  ;;  %15765 = vmatpush3.bf16.msra.mxu1 %v12972_v11 }
 0x1aa   :  { %v1906_v15 = vld [vmem:[#allocation3 + $0x16e4] sm:$0xf]  ;;  %2798 = vmatmul.mubr.bf16.gmra.mrb[76].mxu0 %v16401_v27 }
 0x1ab   :  { %v1921_v16 = vld [vmem:[#allocation3 + $0x18c4] sm:$0xf]  ;;  %v12965_v17 = vcombine.low %v1905_v14, %v1906_v15  ;;  %14075 = vmatpush3.bf16.msra.mxu0 %v12956_v24  ;;  %2805 = vmatprep.mubr.bf16.mxu0 %v16402_v37  ;;  %v3064_v15 = vld [vmem:[#allocation3 + $0x208] sm:$0xf] }
 0x1ac   :  { %v1922_v20 = vld [vmem:[#allocation3 + $0x18e4] sm:$0xf]  ;;  %2871 = vmatmul.mubr.bf16.gmra.mrb[88].mxu1 %v17101_v7  ;;  %v3096_v24 = vld [vmem:[#allocation3 + $0x608] sm:$0xf] }
 0x1ad   :  { %v1889_v48 = vld [vmem:[#allocation3 + $0x14c4] sm:$0xf]  ;;  %v12973_v21 = vcombine.low %v1921_v16, %v1922_v20  ;;  %14076 = vmatprep.subr.bf16.mxu0 %v12965_v17  ;;  %2878 = vmatprep.mubr.bf16.mxu1 %v17110_v18  ;;  %v3065_v16 = vld [vmem:[#allocation3 + $0x228] sm:$0xf] }
 0x1ae   :  { %v1890_v19 = vld [vmem:[#allocation3 + $0x14e4] sm:$0xf]  ;;  %v3097_v18 = vld [vmem:[#allocation3 + $0x628] sm:$0xf] }
 0x1af   :  { %v1907_v23 = vld [vmem:[#allocation3 + $0x1704] sm:$0xf]  ;;  %v12957_v30 = vcombine.low %v1889_v48, %v1890_v19  ;;  %15766 = vmatprep.subr.bf16.mxu1 %v12973_v21  ;;  %v12988_v48 = vcombine.low %v3064_v15, %v3065_v16  ;;  %v3048_v19 = vld [vmem:[#allocation3 + $0x8] sm:$0xf]  ;;  %v13004_v27 = vcombine.low %v3096_v24, %v3097_v18  ;;  %v16410_v18 = vld [vmem:[%s19463_s0 + $0xfc] ss:$52 sps:$4 sm:$0xff]  }
 0x1b0   :  { %v1908_v26 = vld [vmem:[#allocation3 + $0x1724] sm:$0xf]  ;;  %15767 = vmatpush3.bf16.msra.mxu1 %v12973_v21  ;;  %v3049_v21 = vld [vmem:[#allocation3 + $0x28] sm:$0xf] }
 0x1b1   :  { %v1923_v28 = vld [vmem:[#allocation3 + $0x1904] sm:$0xf]  ;;  %v12966_v32 = vcombine.low %v1907_v23, %v1908_v26  ;;  %14077 = vmatpush3.bf16.msra.mxu0 %v12957_v30  ;;  %v3080_v23 = vld [vmem:[#allocation3 + $0x408] sm:$0xf] }
 0x1b2   :  { %v1924_v29 = vld [vmem:[#allocation3 + $0x1924] sm:$0xf]  ;;  %2806 = vmatmul.mubr.bf16.gmra.mrb[80].mxu0 %v16403_v55  ;;  %v16406_v26 = vld [vmem:[%s19463_s0 + $0x2c] ss:$52 sps:$4 sm:$0xff]  }
 0x1b3   :  { %v1891_v33 = vld [vmem:[#allocation3 + $0x1504] sm:$0xf]  ;;  %v12974_v38 = vcombine.low %v1923_v28, %v1924_v29  ;;  %14078 = vmatprep.subr.bf16.mxu0 %v12966_v32  ;;  %v3081_v28 = vld [vmem:[#allocation3 + $0x428] sm:$0xf] }
 0x1b4   :  { %v1892_v35 = vld [vmem:[#allocation3 + $0x1524] sm:$0xf]  ;;  %2879 = vmatmul.mubr.bf16.gmra.mrb[92].mxu1 %v17119_v34  ;;  %v3066_v29 = vld [vmem:[#allocation3 + $0x248] sm:$0xf] }
 0x1b5   :  { %v1909_v39 = vld [vmem:[#allocation3 + $0x1744] sm:$0xf]  ;;  %v12958_v43 = vcombine.low %v1891_v33, %v1892_v35  ;;  %15768 = vmatprep.subr.bf16.mxu1 %v12974_v38  ;;  %v3067_v30 = vld [vmem:[#allocation3 + $0x268] sm:$0xf]  ;;  %15776 = vmatprep.mubr.bf16.mxu1 %v17128_v50  ;;  %v12980_v33 = vcombine.low %v3048_v19, %v3049_v21  ;;  %v12996_v35 = vcombine.low %v3080_v23, %v3081_v28 }
 0x1b6   :  { %v1910_v42 = vld [vmem:[#allocation3 + $0x1764] sm:$0xf]  ;;  %15769 = vmatpush3.bf16.msra.mxu1 %v12974_v38  ;;  %v3098_v34 = vld [vmem:[#allocation3 + $0x648] sm:$0xf]  ;;  %v12989_v37 = vcombine.low %v3066_v29, %v3067_v30 }
 0x1b7   :  { %v1925_v61 = vld [vmem:[#allocation3 + $0x1944] sm:$0xf]  ;;  %v12967_v54 = vcombine.low %v1909_v39, %v1910_v42  ;;  %14079 = vmatpush3.bf16.msra.mxu0 %v12958_v43  ;;  %v3099_v32 = vld [vmem:[#allocation3 + $0x668] sm:$0xf] }
 0x1b8   :  { %v1926_v44 = vld [vmem:[#allocation3 + $0x1964] sm:$0xf]  ;;  %v3050_v38 = vld [vmem:[#allocation3 + $0x48] sm:$0xf] }
 0x1b9   :  { %v1893_v46 = vld [vmem:[#allocation3 + $0x1544] sm:$0xf]  ;;  %v12975_v52 = vcombine.low %v1925_v61, %v1926_v44  ;;  %14080 = vmatprep.subr.bf16.mxu0 %v12967_v54  ;;  %v3051_v39 = vld [vmem:[#allocation3 + $0x68] sm:$0xf]  ;;  %v13005_v61 = vcombine.low %v3098_v34, %v3099_v32 }
 0x1ba   :  { %v1894_v47 = vld [vmem:[#allocation3 + $0x1564] sm:$0xf]  ;;  %v3082_v42 = vld [vmem:[#allocation3 + $0x448] sm:$0xf] }
 0x1bb   :  { %v1911_v51 = vld [vmem:[#allocation3 + $0x1784] sm:$0xf]  ;;  %v12959_v58 = vcombine.low %v1893_v46, %v1894_v47  ;;  %15770 = vmatprep.subr.bf16.mxu1 %v12975_v52  ;;  %v3083_v44 = vld [vmem:[#allocation3 + $0x468] sm:$0xf] }
 0x1bc   :  { %v1912_v53 = vld [vmem:[#allocation3 + $0x17a4] sm:$0xf]  ;;  %15771 = vmatpush3.bf16.msra.mxu1 %v12975_v52  ;;  %v3068_v43 = vld [vmem:[#allocation3 + $0x288] sm:$0xf]  ;;  %v12981_v52 = vcombine.low %v3050_v38, %v3051_v39 }
 0x1bd   :  { %v1927_v12 = vld [vmem:[#allocation3 + $0x1984] sm:$0xf]  ;;  %v12968_v59 = vcombine.low %v1911_v51, %v1912_v53  ;;  %14081 = vmatpush3.bf16.msra.mxu0 %v12959_v58  ;;  %v3069_v54 = vld [vmem:[#allocation3 + $0x2a8] sm:$0xf]  ;;  %v12997_v51 = vcombine.low %v3082_v42, %v3083_v44 }
 0x1be   :  { %v1928_v56 = vld [vmem:[#allocation3 + $0x19a4] sm:$0xf]  ;;  %v3100_v46 = vld [vmem:[#allocation3 + $0x688] sm:$0xf]  ;;  %v12990_v53 = vcombine.low %v3068_v43, %v3069_v54 }
 0x1bf   :  { %v1895_v60 = vld [vmem:[#allocation3 + $0x1584] sm:$0xf]  ;;  %v12976_v2 = vcombine.low %v1927_v12, %v1928_v56  ;;  %14082 = vmatprep.subr.bf16.mxu0 %v12968_v59  ;;  %v3101_v47 = vld [vmem:[#allocation3 + $0x6a8] sm:$0xf] }
 0x1c0   :  { %v1896_v62 = vld [vmem:[#allocation3 + $0x15a4] sm:$0xf]  ;;  %v3052_v55 = vld [vmem:[#allocation3 + $0x88] sm:$0xf]  ;;  %v13006_v59 = vcombine.low %v3100_v46, %v3101_v47 }
 0x1c1   :  { %v16404_v63 = vld [vmem:[%s19463_s0 + $0x154] ss:$52 sps:$4 sm:$0xff]   ;;  %v12960_v7 = vcombine.low %v1895_v60, %v1896_v62  ;;  %15772 = vmatprep.subr.bf16.mxu1 %v12976_v2  ;;  %v16405_v20 = vld [vmem:[%s19463_s0 + $0x150] ss:$52 sps:$4 sm:$0xff]   ;;  %v16411_v43 = vld [vmem:[%s19463_s0 + $0xf8] ss:$52 sps:$4 sm:$0xff]  }
 0x1c2   :  { %2813 = vmatprep.mubr.bf16.mxu0 %v16404_v63  ;;  %v1913_v1 = vld [vmem:[#allocation3 + $0x17c4] sm:$0xf]  ;;  %15773 = vmatpush3.bf16.msra.mxu1 %v12976_v2  ;;  %v3053_v12 = vld [vmem:[#allocation3 + $0xa8] sm:$0xf] }
 0x1c3   :  { %v1914_v3 = vld [vmem:[#allocation3 + $0x17e4] sm:$0xf]  ;;  %2814 = vmatmul.mubr.bf16.gmra.mrb[84].mxu0 %v16405_v20  ;;  %v3084_v56 = vld [vmem:[#allocation3 + $0x488] sm:$0xf] }
 0x1c4   :  { %v1929_v5 = vld [vmem:[#allocation3 + $0x19c4] sm:$0xf]  ;;  %v12969_v9 = vcombine.low %v1913_v1, %v1914_v3  ;;  %14083 = vmatpush3.bf16.msra.mxu0 %v12960_v7  ;;  %2919 = vmatprep.mubr.bf16.mxu0 %v16406_v26  ;;  %v3085_v60 = vld [vmem:[#allocation3 + $0x4a8] sm:$0xf]  ;;  %v12982_v1 = vcombine.low %v3052_v55, %v3053_v12 }
 0x1c5   :  { %v1930_v8 = vld [vmem:[#allocation3 + $0x19e4] sm:$0xf]  ;;  %v3070_v62 = vld [vmem:[#allocation3 + $0x2c8] sm:$0xf]  ;;  %v12998_v3 = vcombine.low %v3084_v56, %v3085_v60 }
 0x1c6   :  { %v1897_v25 = vld [vmem:[#allocation3 + $0x15c4] sm:$0xf]  ;;  %v12977_v14 = vcombine.low %v1929_v5, %v1930_v8  ;;  %14084 = vmatprep.subr.bf16.mxu0 %v12969_v9  ;;  %v3071_v63 = vld [vmem:[#allocation3 + $0x2e8] sm:$0xf] }
 0x1c7   :  { %v1898_v11 = vld [vmem:[#allocation3 + $0x15e4] sm:$0xf]  ;;  %v3102_v2 = vld [vmem:[#allocation3 + $0x6c8] sm:$0xf]  ;;  %v12991_v5 = vcombine.low %v3070_v62, %v3071_v63 }
 0x1c8   :  { %v12961_v17 = vcombine.low %v1897_v25, %v1898_v11  ;;  %15774 = vmatprep.subr.bf16.mxu1 %v12977_v14  ;;  %v16407_v50 = vld [vmem:[%s19463_s0 + $0x28] ss:$52 sps:$4 sm:$0xff]   ;;  %v16409_v16 = vld [vmem:[%s19463_s0 + $0x90] ss:$52 sps:$4 sm:$0xff]  }
 0x1c9   :  { %15775 = vmatpush3.bf16.msra.mxu1 %v12977_v14  ;;  %v16408_v58 = vld [vmem:[%s19463_s0 + $0x94] ss:$52 sps:$4 sm:$0xff]   ;;  %v16412_v46 = vld [vmem:[%s19463_s0 + $0x164] ss:$52 sps:$4 sm:$0xff]  }
 0x1ca   :  { %14085 = vmatpush3.bf16.msra.mxu0 %v12961_v17  ;;  %14162 = vmatprep.subr.bf16.mxu1 %v13004_v27  ;;  %v3054_v8 = vld [vmem:[#allocation3 + $0xc8] sm:$0xf] }
 0x1cb   :  { %14122 = vmatprep.subr.bf16.mxu0 %v12988_v48  ;;  %v3055_v7 = vld [vmem:[#allocation3 + $0xe8] sm:$0xf] }
 0x1cc   :  { %15777 = vmatmul.mubr.bf16.vlgmr.msra.gmra.mrb[96].mxu1 %v17135_v10  ;;  %v3103_v10 = vld [vmem:[#allocation3 + $0x6e8] sm:$0xf]  ;;  %v12983_v24 = vcombine.low %v3054_v8, %v3055_v7 }
 0x1cd   :  { %2920 = vmatmul.mubr.bf16.vlgmr.msra.gmra.mrb[88].mxu0 %v16407_v50  ;;  %14163 = vmatpush3.bf16.msra.mxu1 %v12996_v35  ;;  %v3086_v9 = vld [vmem:[#allocation3 + $0x4c8] sm:$0xf]  ;;  %v13007_v25 = vcombine.low %v3102_v2, %v3103_v10  ;;  %v13674_v2 = vpop.f32.mrb[0].mxu1 }
 0x1ce   :  { %14123 = vmatpush3.bf16.msra.mxu0 %v12980_v33  ;;  %14164 = vmatprep.subr.bf16.mxu1 %v13005_v61  ;;  %v3087_v11 = vld [vmem:[#allocation3 + $0x4e8] sm:$0xf]  ;;  %v13675_v8 = vpop.f32.mrb[1].mxu1 }
 0x1cf   :  { %14124 = vmatprep.subr.bf16.mxu0 %v12989_v37  ;;  %2927 = vmatprep.mubr.bf16.mxu0 %v16408_v58  ;;  %v3072_v14 = vld [vmem:[#allocation3 + $0x308] sm:$0xf]  ;;  %v12999_v17 = vcombine.low %v3086_v9, %v3087_v11  ;;  %v13634_v58 = vpop.f32.mrb[0].mxu0 }
 0x1d0   :  { %15780 = vmatprep.mubr.bf16.mxu1 %v17143_v22  ;;  %v3073_v15 = vld [vmem:[#allocation3 + $0x328] sm:$0xf]  ;;  %v13635_v63 = vpop.f32.mrb[1].mxu0 }
 0x1d1   :  { %14165 = vmatpush3.bf16.msra.mxu1 %v12997_v51  ;;  %v3104_v22 = vld [vmem:[#allocation3 + $0x708] sm:$0xf]  ;;  %v12992_v48 = vcombine.low %v3072_v14, %v3073_v15  ;;  %v13676_v14 = vadd.f32 %v13675_v8, %v13674_v2  ;;  %v13677_v15 = vpop.f32.mrb[2].mxu1 }
 0x1d2   :  { %14125 = vmatpush3.bf16.msra.mxu0 %v12981_v52  ;;  %14166 = vmatprep.subr.bf16.mxu1 %v13006_v59  ;;  %v3105_v20 = vld [vmem:[#allocation3 + $0x728] sm:$0xf]  ;;  %v17293_v52 = vld [vmem:[%s19465_s2] ss:$0 sm:$0xff] }
 0x1d3   :  { %14126 = vmatprep.subr.bf16.mxu0 %v12990_v53  ;;  %v3056_v19 = vld [vmem:[#allocation3 + $0x108] sm:$0xf]  ;;  %v13008_v26 = vcombine.low %v3104_v22, %v3105_v20 }
 0x1d4   :  { %v3057_v21 = vld [vmem:[#allocation3 + $0x128] sm:$0xf]  ;;  %15781 = vmatmul.mubr.bf16.gmra.mrb[100].mxu1 %v17153_v49 }
 0x1d5   :  { %2928 = vmatmul.mubr.bf16.gmra.mrb[92].mxu0 %v16409_v16  ;;  %14167 = vmatpush3.bf16.msra.mxu1 %v12998_v3  ;;  %v3088_v23 = vld [vmem:[#allocation3 + $0x508] sm:$0xf]  ;;  %v12984_v32 = vcombine.low %v3056_v19, %v3057_v21  ;;  %v13636_v3 = vadd.f32 %v13635_v63, %v13634_v58 }
 0x1d6   :  { %14127 = vmatpush3.bf16.msra.mxu0 %v12982_v1  ;;  %2935 = vmatprep.mubr.bf16.mxu0 %v16410_v18  ;;  %v3089_v27 = vld [vmem:[#allocation3 + $0x528] sm:$0xf] }
 0x1d7   :  { %14128 = vmatprep.subr.bf16.mxu0 %v12991_v5  ;;  %14168 = vmatprep.subr.bf16.mxu1 %v13007_v25  ;;  %v3074_v28 = vld [vmem:[#allocation3 + $0x348] sm:$0xf]  ;;  %v13000_v33 = vcombine.low %v3088_v23, %v3089_v27  ;;  %v13637_v5 = vpop.f32.mrb[2].mxu0  ;;  %v1272_v18 = vadd.f32 %v13636_v3, %v17293_v52  ;;  %v16413_v27 = vld [vmem:[%s19463_s0 + $0x160] ss:$52 sps:$4 sm:$0xff]  }
 0x1d8   :  { %v3075_v29 = vld [vmem:[#allocation3 + $0x368] sm:$0xf]  ;;  %3984 = vmatprep.mubr.bf16.mxu1 %v17168_v31  ;;  %v13638_v11 = vpop.f32.mrb[3].mxu0 }
 0x1d9   :  { %v3106_v30 = vld [vmem:[#allocation3 + $0x748] sm:$0xf]  ;;  %14169 = vmatpush3.bf16.msra.mxu1 %v12999_v17  ;;  %v12993_v35 = vcombine.low %v3074_v28, %v3075_v29  ;;  %v13639_v17 = vadd.f32 %v13638_v11, %v13637_v5 }
 0x1da   :  { %v3107_v34 = vld [vmem:[#allocation3 + $0x768] sm:$0xf]  ;;  %14129 = vmatpush3.bf16.msra.mxu0 %v12983_v24  ;;  %14170 = vmatprep.subr.bf16.mxu1 %v13008_v26 }
 0x1db   :  { %14130 = vmatprep.subr.bf16.mxu0 %v12992_v48  ;;  %v3058_v37 = vld [vmem:[#allocation3 + $0x148] sm:$0xf]  ;;  %v13009_v42 = vcombine.low %v3106_v30, %v3107_v34  ;;  %v13678_v48 = vpop.f32.mrb[3].mxu1  ;;  %v1275_v30 = vadd.f32 %v13639_v17, %v17293_v52  ;;  %v17300_v34 = vadd.f32 %v13676_v14, %v1272_v18 }
 0x1dc   :  { %v3059_v38 = vld [vmem:[#allocation3 + $0x168] sm:$0xf]  ;;  %v13679_v26 = vadd.f32 %v13678_v48, %v13677_v15  ;;  %v16415_v15 = vld [vmem:[%s19463_s0] ss:$52 sps:$4 sm:$0xff]  }
 0x1dd   :  { %v3090_v39 = vld [vmem:[#allocation3 + $0x548] sm:$0xf]  ;;  %2936 = vmatmul.mubr.bf16.gmra.mrb[96].mxu0 %v16411_v43  ;;  %v12985_v50 = vcombine.low %v3058_v37, %v3059_v38  ;;  %14171 = vmatpush3.bf16.msra.mxu1 %v13000_v33  ;;  %v16414_v33 = vld [vmem:[%s19463_s0 + $0x4] ss:$52 sps:$4 sm:$0xff]  }
 0x1de   :  { %v3091_v61 = vld [vmem:[#allocation3 + $0x568] sm:$0xf]  ;;  %14131 = vmatpush3.bf16.msra.mxu0 %v12984_v32  ;;  %2943 = vmatprep.mubr.bf16.mxu0 %v16412_v46  ;;  %v13680_v46 = vpop.f32.mrb[4].mxu1 }
 0x1df   :  { %v3076_v44 = vld [vmem:[#allocation3 + $0x388] sm:$0xf]  ;;  %14132 = vmatprep.subr.bf16.mxu0 %v12993_v35  ;;  %v13001_v51 = vcombine.low %v3090_v39, %v3091_v61  ;;  %14172 = vmatprep.subr.bf16.mxu1 %v13009_v42 }
 0x1e0   :  { %v3077_v49 = vld [vmem:[#allocation3 + $0x3a8] sm:$0xf] }
 0x1e1   :  { %v3108_v31 = vld [vmem:[#allocation3 + $0x788] sm:$0xf]  ;;  %v12994_v53 = vcombine.low %v3076_v44, %v3077_v49  ;;  %14173 = vmatpush3.bf16.msra.mxu1 %v13001_v51  ;;  %v17305_v44 = vadd.f32 %v13679_v26, %v1275_v30  ;;  %v13640_v49 = vpop.f32.mrb[4].mxu0 }
 0x1e2   :  { %v3109_v54 = vld [vmem:[#allocation3 + $0x7a8] sm:$0xf]  ;;  %14133 = vmatpush3.bf16.msra.mxu0 %v12985_v50  ;;  %v13641_v50 = vpop.f32.mrb[5].mxu0 }
 0x1e3   :  { %v3060_v47 = vld [vmem:[#allocation3 + $0x188] sm:$0xf]  ;;  %v13010_v59 = vcombine.low %v3108_v31, %v3109_v54  ;;  %14134 = vmatprep.subr.bf16.mxu0 %v12994_v53  ;;  %v13642_v53 = vadd.f32 %v13641_v50, %v13640_v49 }
 0x1e4   :  { %v3061_v55 = vld [vmem:[#allocation3 + $0x1a8] sm:$0xf] }
 0x1e5   :  { %v3092_v12 = vld [vmem:[#allocation3 + $0x588] sm:$0xf]  ;;  %v12986_v7 = vcombine.low %v3060_v47, %v3061_v55  ;;  %14174 = vmatprep.subr.bf16.mxu1 %v13010_v59  ;;  %2944 = vmatmul.mubr.bf16.gmra.mrb[100].mxu0 %v16413_v27  ;;  %v13643_v55 = vpop.f32.mrb[6].mxu0  ;;  %v1280_v5 = vadd.f32 %v13642_v53, %v17293_v52 }
 0x1e6   :  { %v3093_v56 = vld [vmem:[#allocation3 + $0x5a8] sm:$0xf]  ;;  %3919 = vmatprep.mubr.bf16.mxu0 %v16414_v33 }
 0x1e7   :  { %v3078_v60 = vld [vmem:[#allocation3 + $0x3c8] sm:$0xf]  ;;  %v13002_v16 = vcombine.low %v3092_v12, %v3093_v56  ;;  %14135 = vmatpush3.bf16.msra.mxu0 %v12986_v7  ;;  %v13681_v12 = vpop.f32.mrb[5].mxu1 }
 0x1e8   :  { %v3079_v62 = vld [vmem:[#allocation3 + $0x3e8] sm:$0xf]  ;;  %v13683_v63 = vpop.f32.mrb[6].mxu1 }
 0x1e9   :  { %v3110_v10 = vld [vmem:[#allocation3 + $0x7c8] sm:$0xf]  ;;  %v12995_v22 = vcombine.low %v3078_v60, %v3079_v62  ;;  %14175 = vmatpush3.bf16.msra.mxu1 %v13002_v16  ;;  %v13644_v60 = vpop.f32.mrb[7].mxu0  ;;  %v13682_v62 = vadd.f32 %v13681_v12, %v13680_v46  ;;  %v13684_v7 = vpop.f32.mrb[7].mxu1 }
 0x1ea   :  { %v3111_v1 = vld [vmem:[#allocation3 + $0x7e8] sm:$0xf]  ;;  %v13645_v8 = vadd.f32 %v13644_v60, %v13643_v55  ;;  %v13685_v14 = vadd.f32 %v13684_v7, %v13683_v63 }
 0x1eb   :  { %v3062_v9 = vld [vmem:[#allocation3 + $0x1c8] sm:$0xf]  ;;  %v13011_v19 = vcombine.low %v3110_v10, %v3111_v1  ;;  %14136 = vmatprep.subr.bf16.mxu0 %v12995_v22 }
 0x1ec   :  { %v3063_v25 = vld [vmem:[#allocation3 + $0x1e8] sm:$0xf] }
 0x1ed   :  { %v3094_v20 = vld [vmem:[#allocation3 + $0x5c8] sm:$0xf]  ;;  %v12987_v32 = vcombine.low %v3062_v9, %v3063_v25  ;;  %14176 = vmatprep.subr.bf16.mxu1 %v13011_v19 }
 0x1ee   :  { %v3095_v24 = vld [vmem:[#allocation3 + $0x5e8] sm:$0xf] }
 0x1ef   :  { %v3128_v21 = vld [vmem:[#allocation3 + $0xa08] sm:$0xf]  ;;  %v13003_v37 = vcombine.low %v3094_v20, %v3095_v24  ;;  %14137 = vmatpush3.bf16.msra.mxu0 %v12987_v32  ;;  %v1283_v20 = vadd.f32 %v13645_v8, %v17293_v52  ;;  %v17312_v24 = vadd.f32 %v13682_v62, %v1280_v5 }
 0x1f0   :  { %v3129_v23 = vld [vmem:[#allocation3 + $0xa28] sm:$0xf] }
 0x1f1   :  { %v3160_v28 = vld [vmem:[#allocation3 + $0xe08] sm:$0xf]  ;;  %v13020_v38 = vcombine.low %v3128_v21, %v3129_v23  ;;  %14177 = vmatpush3.bf16.msra.mxu1 %v13003_v37  ;;  %v17315_v27 = vadd.f32 %v13685_v14, %v1283_v20 }
 0x1f2   :  { %v3161_v29 = vld [vmem:[#allocation3 + $0xe28] sm:$0xf]  ;;  %3920 = vmatmul.mubr.bf16.vlgmr.msra.gmra.mrb[104].mxu0 %v16415_v15 }
 0x1f3   :  { %v3112_v35 = vld [vmem:[#allocation3 + $0x808] sm:$0xf]  ;;  %v13036_v43 = vcombine.low %v3160_v28, %v3161_v29  ;;  %14202 = vmatprep.subr.bf16.mxu0 %v13020_v38  ;;  %v13646_v28 = vpop.f32.mrb[8].mxu0 }
 0x1f4   :  { %v3113_v39 = vld [vmem:[#allocation3 + $0x828] sm:$0xf]  ;;  %3985 = vmatmul.mubr.bf16.vlgmr.msra.gmra.mrb[104].mxu1 %v17180_v57  ;;  %v13647_v33 = vpop.f32.mrb[9].mxu0 }
 0x1f5   :  { %v3144_v42 = vld [vmem:[#allocation3 + $0xc08] sm:$0xf]  ;;  %v13012_v56 = vcombine.low %v3112_v35, %v3113_v39  ;;  %14242 = vmatprep.subr.bf16.mxu1 %v13036_v43  ;;  %v13686_v35 = vpop.f32.mrb[8].mxu1  ;;  %3992 = vmatprep.mubr.bf16.mxu1 %v17187_v4  ;;  %v13648_v39 = vadd.f32 %v13647_v33, %v13646_v28 }
 0x1f6   :  { %v3145_v61 = vld [vmem:[#allocation3 + $0xc28] sm:$0xf] }
 0x1f7   :  { %v3130_v31 = vld [vmem:[#allocation3 + $0xa48] sm:$0xf]  ;;  %v13028_v2 = vcombine.low %v3144_v42, %v3145_v61  ;;  %14203 = vmatpush3.bf16.msra.mxu0 %v13012_v56  ;;  %v13649_v42 = vpop.f32.mrb[10].mxu0  ;;  %v13687_v61 = vpop.f32.mrb[9].mxu1  ;;  %v1288_v4 = vadd.f32 %v13648_v39, %v17293_v52 }
 0x1f8   :  { %v3131_v54 = vld [vmem:[#allocation3 + $0xa68] sm:$0xf]  ;;  %v13688_v50 = vadd.f32 %v13687_v61, %v13686_v35  ;;  %v13689_v46 = vpop.f32.mrb[10].mxu1 }
 0x1f9   :  { %v3162_v47 = vld [vmem:[#allocation3 + $0xe48] sm:$0xf]  ;;  %v13021_v10 = vcombine.low %v3130_v31, %v3131_v54  ;;  %14243 = vmatpush3.bf16.msra.mxu1 %v13028_v2  ;;  %v13650_v54 = vpop.f32.mrb[11].mxu0  ;;  %v13690_v56 = vpop.f32.mrb[11].mxu1 }
 0x1fa   :  { %v3163_v51 = vld [vmem:[#allocation3 + $0xe68] sm:$0xf]  ;;  %v13651_v12 = vadd.f32 %v13650_v54, %v13649_v42  ;;  %v13691_v62 = vadd.f32 %v13690_v56, %v13689_v46  ;;  %v16419_v46 = vld [vmem:[%s19463_s0 + $0xd0] ss:$52 sps:$4 sm:$0xff]  }
 0x1fb   :  { %v3114_v58 = vld [vmem:[#allocation3 + $0x848] sm:$0xf]  ;;  %v13037_v9 = vcombine.low %v3162_v47, %v3163_v51  ;;  %14204 = vmatprep.subr.bf16.mxu0 %v13021_v10 }
 0x1fc   :  { %v3115_v59 = vld [vmem:[#allocation3 + $0x868] sm:$0xf]  ;;  %3993 = vmatmul.mubr.bf16.gmra.mrb[108].mxu1 %v17194_v40 }
 0x1fd   :  { %v3146_v1 = vld [vmem:[#allocation3 + $0xc48] sm:$0xf]  ;;  %v13013_v18 = vcombine.low %v3114_v58, %v3115_v59  ;;  %14244 = vmatprep.subr.bf16.mxu1 %v13037_v9  ;;  %4000 = vmatprep.mubr.bf16.mxu1 %v17201_v41 }
 0x1fe   :  { %v3147_v3 = vld [vmem:[#allocation3 + $0xc68] sm:$0xf] }
 0x1ff   :  { %v3132_v25 = vld [vmem:[#allocation3 + $0xa88] sm:$0xf]  ;;  %v13029_v48 = vcombine.low %v3146_v1, %v3147_v3  ;;  %14205 = vmatpush3.bf16.msra.mxu0 %v13013_v18  ;;  %v1291_v1 = vadd.f32 %v13651_v12, %v17293_v52  ;;  %v17326_v3 = vadd.f32 %v13688_v50, %v1288_v4 }
 0x200   :  { %v3133_v11 = vld [vmem:[#allocation3 + $0xaa8] sm:$0xf] }
 0x201   :  { %v3164_v16 = vld [vmem:[#allocation3 + $0xe88] sm:$0xf]  ;;  %v13022_v19 = vcombine.low %v3132_v25, %v3133_v11  ;;  %14245 = vmatpush3.bf16.msra.mxu1 %v13029_v48  ;;  %v17329_v15 = vadd.f32 %v13691_v62, %v1291_v1  ;;  %v13692_v48 = vpop.f32.mrb[12].mxu1 }
 0x202   :  { %v3165_v22 = vld [vmem:[#allocation3 + $0xea8] sm:$0xf]  ;;  %v13693_v28 = vpop.f32.mrb[13].mxu1 }
 0x203   :  { %v3116_v17 = vld [vmem:[#allocation3 + $0x888] sm:$0xf]  ;;  %v13038_v30 = vcombine.low %v3164_v16, %v3165_v22  ;;  %14206 = vmatprep.subr.bf16.mxu0 %v13022_v19  ;;  %v13652_v16 = vpop.f32.mrb[12].mxu0  ;;  %v13694_v33 = vadd.f32 %v13693_v28, %v13692_v48  ;;  %v13695_v35 = vpop.f32.mrb[14].mxu1 }
 0x204   :  { %v3117_v21 = vld [vmem:[#allocation3 + $0x8a8] sm:$0xf]  ;;  %4001 = vmatmul.mubr.bf16.gmra.mrb[112].mxu1 %v17208_v6 }
 0x205   :  { %v3148_v23 = vld [vmem:[#allocation3 + $0xc88] sm:$0xf]  ;;  %v13014_v49 = vcombine.low %v3116_v17, %v3117_v21  ;;  %14246 = vmatprep.subr.bf16.mxu1 %v13038_v30  ;;  %v13653_v17 = vpop.f32.mrb[13].mxu0  ;;  %4008 = vmatprep.mubr.bf16.mxu1 %v17215_v13 }
 0x206   :  { %v3149_v26 = vld [vmem:[#allocation3 + $0xca8] sm:$0xf] }
 0x207   :  { %v16416_v29 = vld [vmem:[%s19463_s0 + $0x6c] ss:$52 sps:$4 sm:$0xff]   ;;  %v13030_v47 = vcombine.low %v3148_v23, %v3149_v26  ;;  %v16417_v63 = vld [vmem:[%s19463_s0 + $0x68] ss:$52 sps:$4 sm:$0xff]   ;;  %14207 = vmatpush3.bf16.msra.mxu0 %v13014_v49  ;;  %v13654_v23 = vadd.f32 %v13653_v17, %v13652_v16  ;;  %v13655_v26 = vpop.f32.mrb[14].mxu0  ;;  %v13696_v49 = vpop.f32.mrb[15].mxu1 }
 0x208   :  { %3927 = vmatprep.mubr.bf16.mxu0 %v16416_v29  ;;  %v3134_v57 = vld [vmem:[#allocation3 + $0xac8] sm:$0xf]  ;;  %v13697_v50 = vadd.f32 %v13696_v49, %v13695_v35 }
 0x209   :  { %v3135_v32 = vld [vmem:[#allocation3 + $0xae8] sm:$0xf]  ;;  %3928 = vmatmul.mubr.bf16.gmra.mrb[108].mxu0 %v16417_v63  ;;  %14247 = vmatpush3.bf16.msra.mxu1 %v13030_v47  ;;  %v1296_v41 = vadd.f32 %v13654_v23, %v17293_v52 }
 0x20a   :  { %v3166_v37 = vld [vmem:[#allocation3 + $0xec8] sm:$0xf]  ;;  %v13023_v51 = vcombine.low %v3134_v57, %v3135_v32  ;;  %v13656_v32 = vpop.f32.mrb[15].mxu0 }
 0x20b   :  { %v3167_v38 = vld [vmem:[#allocation3 + $0xee8] sm:$0xf]  ;;  %v13657_v61 = vadd.f32 %v13656_v32, %v13655_v26 }
 0x20c   :  { %v3118_v43 = vld [vmem:[#allocation3 + $0x8c8] sm:$0xf]  ;;  %v13039_v58 = vcombine.low %v3166_v37, %v3167_v38  ;;  %14208 = vmatprep.subr.bf16.mxu0 %v13023_v51  ;;  %4009 = vmatmul.mubr.bf16.gmra.mrb[116].mxu1 %v17222_v36 }
 0x20d   :  { %v3119_v31 = vld [vmem:[#allocation3 + $0x8e8] sm:$0xf]  ;;  %4114 = vmatprep.mubr.bf16.mxu1 %v17229_v45 }
 0x20e   :  { %v3150_v53 = vld [vmem:[#allocation3 + $0xcc8] sm:$0xf]  ;;  %v13015_v5 = vcombine.low %v3118_v43, %v3119_v31  ;;  %14248 = vmatprep.subr.bf16.mxu1 %v13039_v58 }
 0x20f   :  { %v3151_v55 = vld [vmem:[#allocation3 + $0xce8] sm:$0xf] }
 0x210   :  { %v3136_v59 = vld [vmem:[#allocation3 + $0xb08] sm:$0xf]  ;;  %v13031_v7 = vcombine.low %v3150_v53, %v3151_v55  ;;  %14209 = vmatpush3.bf16.msra.mxu0 %v13015_v5  ;;  %v1299_v53 = vadd.f32 %v13657_v61, %v17293_v52  ;;  %v17340_v55 = vadd.f32 %v13694_v33, %v1296_v41  ;;  %v16420_v52 = vld [vmem:[%s19463_s0 + $0x13c] ss:$52 sps:$4 sm:$0xff]  }
 0x211   :  { %v3137_v60 = vld [vmem:[#allocation3 + $0xb28] sm:$0xf] }
 0x212   :  { %v3168_v2 = vld [vmem:[#allocation3 + $0xf08] sm:$0xf]  ;;  %v13024_v9 = vcombine.low %v3136_v59, %v3137_v60  ;;  %14249 = vmatpush3.bf16.msra.mxu1 %v13031_v7  ;;  %v17343_v63 = vadd.f32 %v13697_v50, %v1299_v53 }
 0x213   :  { %v3169_v10 = vld [vmem:[#allocation3 + $0xf28] sm:$0xf] }
 0x214   :  { %v3120_v8 = vld [vmem:[#allocation3 + $0x908] sm:$0xf]  ;;  %v13040_v20 = vcombine.low %v3168_v2, %v3169_v10  ;;  %14210 = vmatprep.subr.bf16.mxu0 %v13024_v9  ;;  %v13714_v2 = vpop.f32.mrb[16].mxu0 }
 0x215   :  { %v3121_v25 = vld [vmem:[#allocation3 + $0x928] sm:$0xf]  ;;  %v13715_v5 = vpop.f32.mrb[17].mxu0 }
 0x216   :  { %v3152_v11 = vld [vmem:[#allocation3 + $0xd08] sm:$0xf]  ;;  %v13016_v29 = vcombine.low %v3120_v8, %v3121_v25  ;;  %14250 = vmatprep.subr.bf16.mxu1 %v13040_v20  ;;  %v13754_v8 = vpop.f32.mrb[16].mxu1  ;;  %v13716_v25 = vadd.f32 %v13715_v5, %v13714_v2 }
 0x217   :  { %v3153_v14 = vld [vmem:[#allocation3 + $0xd28] sm:$0xf] }
 0x218   :  { %v16418_v22 = vld [vmem:[%s19463_s0 + $0xd4] ss:$52 sps:$4 sm:$0xff]   ;;  %v13032_v37 = vcombine.low %v3152_v11, %v3153_v14  ;;  %14211 = vmatpush3.bf16.msra.mxu0 %v13016_v29  ;;  %v13717_v11 = vpop.f32.mrb[18].mxu0  ;;  %v13755_v14 = vpop.f32.mrb[17].mxu1  ;;  %v1402_v13 = vadd.f32 %v13716_v25, %v17300_v34  ;;  %v16421_v33 = vld [vmem:[%s19463_s0 + $0x138] ss:$52 sps:$4 sm:$0xff]  }
 0x219   :  { %3935 = vmatprep.mubr.bf16.mxu0 %v16418_v22  ;;  %v3138_v40 = vld [vmem:[#allocation3 + $0xb48] sm:$0xf]  ;;  %v13757_v17 = vpop.f32.mrb[18].mxu1 }
 0x21a   :  { %v3139_v18 = vld [vmem:[#allocation3 + $0xb68] sm:$0xf]  ;;  %3936 = vmatmul.mubr.bf16.gmra.mrb[112].mxu0 %v16419_v46  ;;  %14251 = vmatpush3.bf16.msra.mxu1 %v13032_v37  ;;  %v13758_v28 = vpop.f32.mrb[19].mxu1 }
 0x21b   :  { %v3170_v19 = vld [vmem:[#allocation3 + $0xf48] sm:$0xf]  ;;  %v13025_v38 = vcombine.low %v3138_v40, %v3139_v18  ;;  %3943 = vmatprep.mubr.bf16.mxu0 %v16420_v52  ;;  %v13718_v40 = vpop.f32.mrb[19].mxu0  ;;  %v13756_v18 = vadd.f32 %v13755_v14, %v13754_v8  ;;  %v13759_v32 = vadd.f32 %v13758_v28, %v13757_v17  ;;  %v13760_v53 = vpop.f32.mrb[20].mxu1 }
 0x21c   :  { %v3171_v21 = vld [vmem:[#allocation3 + $0xf68] sm:$0xf]  ;;  %v13719_v26 = vadd.f32 %v13718_v40, %v13717_v11  ;;  %v13720_v50 = vpop.f32.mrb[20].mxu0 }
 0x21d   :  { %v3122_v30 = vld [vmem:[#allocation3 + $0x948] sm:$0xf]  ;;  %v13041_v43 = vcombine.low %v3170_v19, %v3171_v21  ;;  %14212 = vmatprep.subr.bf16.mxu0 %v13025_v38 }
 0x21e   :  { %v3123_v57 = vld [vmem:[#allocation3 + $0x968] sm:$0xf]  ;;  %v1405_v38 = vadd.f32 %v13719_v26, %v17305_v44 }
 0x21f   :  { %v3154_v39 = vld [vmem:[#allocation3 + $0xd48] sm:$0xf]  ;;  %v13017_v4 = vcombine.low %v3122_v30, %v3123_v57  ;;  %14252 = vmatprep.subr.bf16.mxu1 %v13041_v43 }
 0x220   :  { %v3155_v42 = vld [vmem:[#allocation3 + $0xd68] sm:$0xf] }
 0x221   :  { %v3140_v31 = vld [vmem:[#allocation3 + $0xb88] sm:$0xf]  ;;  %v13033_v56 = vcombine.low %v3154_v39, %v3155_v42  ;;  %14213 = vmatpush3.bf16.msra.mxu0 %v13017_v4  ;;  %v17354_v39 = vadd.f32 %v13756_v18, %v1402_v13 }
 0x222   :  { %v3141_v54 = vld [vmem:[#allocation3 + $0xba8] sm:$0xf]  ;;  %3944 = vmatmul.mubr.bf16.gmra.mrb[116].mxu0 %v16421_v33 }
 0x223   :  { %v3172_v47 = vld [vmem:[#allocation3 + $0xf88] sm:$0xf]  ;;  %v13026_v58 = vcombine.low %v3140_v31, %v3141_v54  ;;  %14253 = vmatpush3.bf16.msra.mxu1 %v13033_v56  ;;  %v17357_v54 = vadd.f32 %v13759_v32, %v1405_v38 }
 0x224   :  { %v3173_v51 = vld [vmem:[#allocation3 + $0xfa8] sm:$0xf] }
 0x225   :  { %v3124_v12 = vld [vmem:[#allocation3 + $0x988] sm:$0xf]  ;;  %v13042_v10 = vcombine.low %v3172_v47, %v3173_v51  ;;  %14214 = vmatprep.subr.bf16.mxu0 %v13026_v58  ;;  %v13721_v51 = vpop.f32.mrb[21].mxu0 }
 0x226   :  { %v3125_v59 = vld [vmem:[#allocation3 + $0x9a8] sm:$0xf]  ;;  %v13722_v56 = vadd.f32 %v13721_v51, %v13720_v50  ;;  %v13723_v58 = vpop.f32.mrb[22].mxu0 }
 0x227   :  { %v3156_v60 = vld [vmem:[#allocation3 + $0xd88] sm:$0xf]  ;;  %v13018_v16 = vcombine.low %v3124_v12, %v3125_v59  ;;  %14254 = vmatprep.subr.bf16.mxu1 %v13042_v10  ;;  %v13761_v59 = vpop.f32.mrb[21].mxu1  ;;  %v13724_v52 = vpop.f32.mrb[23].mxu0 }
 0x228   :  { %v3157_v62 = vld [vmem:[#allocation3 + $0xda8] sm:$0xf]  ;;  %v13762_v10 = vadd.f32 %v13761_v59, %v13760_v53  ;;  %v1410_v45 = vadd.f32 %v13722_v56, %v17312_v24 }
 0x229   :  { %v3142_v6 = vld [vmem:[#allocation3 + $0xbc8] sm:$0xf]  ;;  %v13034_v48 = vcombine.low %v3156_v60, %v3157_v62  ;;  %14215 = vmatpush3.bf16.msra.mxu0 %v13018_v16 }
 0x22a   :  { %v3143_v1 = vld [vmem:[#allocation3 + $0xbe8] sm:$0xf] }
 0x22b   :  { %v3174_v7 = vld [vmem:[#allocation3 + $0xfc8] sm:$0xf]  ;;  %v13027_v19 = vcombine.low %v3142_v6, %v3143_v1  ;;  %14255 = vmatpush3.bf16.msra.mxu1 %v13034_v48  ;;  %v13763_v6 = vpop.f32.mrb[22].mxu1  ;;  %v17368_v48 = vadd.f32 %v13762_v10, %v1410_v45 }
 0x22c   :  { %v3175_v9 = vld [vmem:[#allocation3 + $0xfe8] sm:$0xf]  ;;  %v13764_v25 = vpop.f32.mrb[23].mxu1 }
 0x22d   :  { %v3126_v22 = vld [vmem:[#allocation3 + $0x9c8] sm:$0xf]  ;;  %v13043_v29 = vcombine.low %v3174_v7, %v3175_v9  ;;  %14216 = vmatprep.subr.bf16.mxu0 %v13027_v19  ;;  %v13725_v9 = vadd.f32 %v13724_v52, %v13723_v58 }
 0x22e   :  { %v3127_v20 = vld [vmem:[#allocation3 + $0x9e8] sm:$0xf] }
 0x22f   :  { %v3158_v21 = vld [vmem:[#allocation3 + $0xdc8] sm:$0xf]  ;;  %v13019_v34 = vcombine.low %v3126_v22, %v3127_v20  ;;  %14256 = vmatprep.subr.bf16.mxu1 %v13043_v29  ;;  %v13765_v22 = vadd.f32 %v13764_v25, %v13763_v6  ;;  %v16423_v20 = vld [vmem:[%s19463_s0 + $0x10] ss:$52 sps:$4 sm:$0xff]   ;;  %v1413_v17 = vadd.f32 %v13725_v9, %v17315_v27 }
 0x230   :  { %v3159_v23 = vld [vmem:[#allocation3 + $0xde8] sm:$0xf]  ;;  %v16424_v27 = vld [vmem:[%s19463_s0 + $0x7c] ss:$52 sps:$4 sm:$0xff]  }
 0x231   :  { %v3192_v30 = vld [vmem:[#allocation3 + $0x1208] sm:$0xf]  ;;  %v13035_v41 = vcombine.low %v3158_v21, %v3159_v23  ;;  %14217 = vmatpush3.bf16.msra.mxu0 %v13019_v34  ;;  %v17371_v29 = vadd.f32 %v13765_v22, %v1413_v17 }
 0x232   :  { %v3193_v57 = vld [vmem:[#allocation3 + $0x1228] sm:$0xf] }
 0x233   :  { %v3224_v35 = vld [vmem:[#allocation3 + $0x1608] sm:$0xf]  ;;  %v13052_v61 = vcombine.low %v3192_v30, %v3193_v57  ;;  %14257 = vmatpush3.bf16.msra.mxu1 %v13035_v41  ;;  %v13726_v30 = vpop.f32.mrb[24].mxu0 }
 0x234   :  { %v3225_v37 = vld [vmem:[#allocation3 + $0x1628] sm:$0xf]  ;;  %v13727_v33 = vpop.f32.mrb[25].mxu0 }
 0x235   :  { %v3176_v42 = vld [vmem:[#allocation3 + $0x1008] sm:$0xf]  ;;  %v13068_v46 = vcombine.low %v3224_v35, %v3225_v37  ;;  %14282 = vmatprep.subr.bf16.mxu0 %v13052_v61  ;;  %v13766_v35 = vpop.f32.mrb[24].mxu1  ;;  %v16425_v37 = vld [vmem:[%s19463_s0 + $0x84] ss:$52 sps:$4 sm:$0xff]   ;;  %v13729_v41 = vpop.f32.mrb[26].mxu0 }
 0x236   :  { %v3177_v49 = vld [vmem:[#allocation3 + $0x1028] sm:$0xf]  ;;  %4115 = vmatmul.mubr.bf16.vlgmr.msra.gmra.mrb[120].mxu1 %v17236_v0  ;;  %v13767_v61 = vpop.f32.mrb[25].mxu1  ;;  %v13730_v50 = vpop.f32.mrb[27].mxu0 }
 0x237   :  { %v3208_v43 = vld [vmem:[#allocation3 + $0x1408] sm:$0xf]  ;;  %v13044_v60 = vcombine.low %v3176_v42, %v3177_v49  ;;  %14322 = vmatprep.subr.bf16.mxu1 %v13068_v46  ;;  %4122 = vmatprep.mubr.bf16.mxu1 %v16425_v37  ;;  %v13728_v42 = vadd.f32 %v13727_v33, %v13726_v30  ;;  %v13769_v46 = vpop.f32.mrb[26].mxu1 }
 0x238   :  { %v3209_v31 = vld [vmem:[#allocation3 + $0x1428] sm:$0xf]  ;;  %v13770_v56 = vpop.f32.mrb[27].mxu1 }
 0x239   :  { %v16422_v44 = vld [vmem:[%s19463_s0 + $0x14] ss:$52 sps:$4 sm:$0xff]   ;;  %v13060_v1 = vcombine.low %v3208_v43, %v3209_v31  ;;  %v13772_v17 = vpop.f32.mrb[28].mxu1 }
 0x23a   :  { %4049 = vmatprep.mubr.bf16.mxu0 %v16422_v44  ;;  %v3194_v36 = vld [vmem:[#allocation3 + $0x1248] sm:$0xf]  ;;  %v13768_v44 = vadd.f32 %v13767_v61, %v13766_v35 }
 0x23b   :  { %v3195_v47 = vld [vmem:[#allocation3 + $0x1268] sm:$0xf]  ;;  %4050 = vmatmul.mubr.bf16.vlgmr.msra.gmra.mrb[120].mxu0 %v16423_v20  ;;  %14323 = vmatpush3.bf16.msra.mxu1 %v13060_v1 }
 0x23c   :  { %v3226_v4 = vld [vmem:[#allocation3 + $0x1648] sm:$0xf]  ;;  %v13053_v5 = vcombine.low %v3194_v36, %v3195_v47  ;;  %14283 = vmatpush3.bf16.msra.mxu0 %v13044_v60  ;;  %4057 = vmatprep.mubr.bf16.mxu0 %v16424_v27 }
 0x23d   :  { %v3227_v12 = vld [vmem:[#allocation3 + $0x1668] sm:$0xf] }
 0x23e   :  { %v3178_v62 = vld [vmem:[#allocation3 + $0x1048] sm:$0xf]  ;;  %v13069_v11 = vcombine.low %v3226_v4, %v3227_v12  ;;  %14284 = vmatprep.subr.bf16.mxu0 %v13053_v5  ;;  %v1418_v4 = vadd.f32 %v13728_v42, %v17326_v3  ;;  %v13731_v12 = vadd.f32 %v13730_v50, %v13729_v41  ;;  %v16427_v3 = vld [vmem:[%s19463_s0 + $0x80] ss:$52 sps:$4 sm:$0xff]  }
 0x23f   :  { %v3179_v2 = vld [vmem:[#allocation3 + $0x1068] sm:$0xf]  ;;  %4123 = vmatmul.mubr.bf16.gmra.mrb[124].mxu1 %v16427_v3  ;;  %v16430_v50 = vld [vmem:[%s19463_s0 + $0xe0] ss:$52 sps:$4 sm:$0xff]  }
 0x240   :  { %v3210_v8 = vld [vmem:[#allocation3 + $0x1448] sm:$0xf]  ;;  %v13045_v24 = vcombine.low %v3178_v62, %v3179_v2  ;;  %14324 = vmatprep.subr.bf16.mxu1 %v13069_v11  ;;  %v13771_v62 = vadd.f32 %v13770_v56, %v13769_v46  ;;  %v1421_v6 = vadd.f32 %v13731_v12, %v17329_v15  ;;  %v17384_v1 = vadd.f32 %v13768_v44, %v1418_v4  ;;  %v13732_v15 = vpop.f32.mrb[28].mxu0 }
 0x241   :  { %v3211_v7 = vld [vmem:[#allocation3 + $0x1468] sm:$0xf] }
 0x242   :  { %v3196_v14 = vld [vmem:[#allocation3 + $0x1288] sm:$0xf]  ;;  %v13061_v21 = vcombine.low %v3210_v8, %v3211_v7  ;;  %14285 = vmatpush3.bf16.msra.mxu0 %v13045_v24 }
 0x243   :  { %v3197_v16 = vld [vmem:[#allocation3 + $0x12a8] sm:$0xf] }
 0x244   :  { %v3228_v40 = vld [vmem:[#allocation3 + $0x1688] sm:$0xf]  ;;  %v13054_v23 = vcombine.low %v3196_v14, %v3197_v16  ;;  %14325 = vmatpush3.bf16.msra.mxu1 %v13061_v21  ;;  %v17389_v14 = vadd.f32 %v13771_v62, %v1421_v6  ;;  %v16428_v16 = vld [vmem:[%s19463_s0 + $0xe4] ss:$52 sps:$4 sm:$0xff]  }
 0x245   :  { %v3229_v18 = vld [vmem:[#allocation3 + $0x16a8] sm:$0xf] }
 0x246   :  { %v3180_v19 = vld [vmem:[#allocation3 + $0x1088] sm:$0xf]  ;;  %v13070_v57 = vcombine.low %v3228_v40, %v3229_v18  ;;  %14286 = vmatprep.subr.bf16.mxu0 %v13054_v23  ;;  %v13733_v18 = vpop.f32.mrb[29].mxu0 }
 0x247   :  { %v3181_v13 = vld [vmem:[#allocation3 + $0x10a8] sm:$0xf]  ;;  %v13734_v23 = vadd.f32 %v13733_v18, %v13732_v15 }
 0x248   :  { %v3212_v26 = vld [vmem:[#allocation3 + $0x1488] sm:$0xf]  ;;  %v13046_v49 = vcombine.low %v3180_v19, %v3181_v13  ;;  %14326 = vmatprep.subr.bf16.mxu1 %v13070_v57  ;;  %v13735_v13 = vpop.f32.mrb[30].mxu0 }
 0x249   :  { %v3213_v28 = vld [vmem:[#allocation3 + $0x14a8] sm:$0xf]  ;;  %v13736_v57 = vpop.f32.mrb[31].mxu0 }
 0x24a   :  { %v3198_v0 = vld [vmem:[#allocation3 + $0x12c8] sm:$0xf]  ;;  %v13062_v36 = vcombine.low %v3212_v26, %v3213_v28  ;;  %14287 = vmatpush3.bf16.msra.mxu0 %v13046_v49  ;;  %v13773_v26 = vpop.f32.mrb[29].mxu1  ;;  %v13737_v42 = vadd.f32 %v13736_v57, %v13735_v13 }
 0x24b   :  { %v3199_v32 = vld [vmem:[#allocation3 + $0x12e8] sm:$0xf] }
 0x24c   :  { %v3230_v38 = vld [vmem:[#allocation3 + $0x16c8] sm:$0xf]  ;;  %v13055_v47 = vcombine.low %v3198_v0, %v3199_v32  ;;  %14327 = vmatpush3.bf16.msra.mxu1 %v13062_v36  ;;  %v13774_v0 = vadd.f32 %v13773_v26, %v13772_v17  ;;  %v13775_v32 = vpop.f32.mrb[30].mxu1  ;;  %v1429_v36 = vadd.f32 %v13737_v42, %v17343_v63  ;;  %v13794_v63 = vpop.f32.mrb[32].mxu0  ;;  %v4373_v42 = vld [vmem:[#allocation3 + $0xc] sm:$0xf] }
 0x24d   :  { %v3231_v34 = vld [vmem:[#allocation3 + $0x16e8] sm:$0xf]  ;;  %v13776_v41 = vpop.f32.mrb[31].mxu1  ;;  %v13795_v6 = vpop.f32.mrb[33].mxu0 }
 0x24e   :  { %v3182_v43 = vld [vmem:[#allocation3 + $0x10c8] sm:$0xf]  ;;  %v13071_v58 = vcombine.low %v3230_v38, %v3231_v34  ;;  %14288 = vmatprep.subr.bf16.mxu0 %v13055_v47  ;;  %v1426_v34 = vadd.f32 %v13734_v23, %v17340_v55  ;;  %v13834_v3 = vpop.f32.mrb[32].mxu1 }
 0x24f   :  { %v3183_v31 = vld [vmem:[#allocation3 + $0x10e8] sm:$0xf] }
 0x250   :  { %v3214_v51 = vld [vmem:[#allocation3 + $0x14c8] sm:$0xf]  ;;  %v13047_v5 = vcombine.low %v3182_v43, %v3183_v31  ;;  %14328 = vmatprep.subr.bf16.mxu1 %v13071_v58  ;;  %v13777_v31 = vadd.f32 %v13776_v41, %v13775_v32  ;;  %v17402_v47 = vadd.f32 %v13774_v0, %v1426_v34  ;;  %v4389_v0 = vld [vmem:[#allocation3 + $0x20c] sm:$0xf] }
 0x251   :  { %v3215_v53 = vld [vmem:[#allocation3 + $0x14e8] sm:$0xf]  ;;  %v4390_v32 = vld [vmem:[#allocation3 + $0x22c] sm:$0xf] }
 0x252   :  { %v3200_v59 = vld [vmem:[#allocation3 + $0x1308] sm:$0xf]  ;;  %v13063_v7 = vcombine.low %v3214_v51, %v3215_v53  ;;  %14289 = vmatpush3.bf16.msra.mxu0 %v13047_v5  ;;  %v4374_v41 = vld [vmem:[#allocation3 + $0x2c] sm:$0xf] }
 0x253   :  { %v3201_v60 = vld [vmem:[#allocation3 + $0x1328] sm:$0xf] }
 0x254   :  { %v16426_v2 = vld [vmem:[%s19463_s0 + $0x78] ss:$52 sps:$4 sm:$0xff]   ;;  %v13056_v45 = vcombine.low %v3200_v59, %v3201_v60  ;;  %14329 = vmatpush3.bf16.msra.mxu1 %v13063_v7  ;;  %v16431_v55 = vld [vmem:[%s19463_s0 + $0xe8] ss:$52 sps:$4 sm:$0xff]   ;;  %v17407_v60 = vadd.f32 %v13777_v31, %v1429_v36 }
 0x255   :  { %4058 = vmatmul.mubr.bf16.gmra.mrb[124].mxu0 %v16426_v2  ;;  %v3232_v52 = vld [vmem:[#allocation3 + $0x1708] sm:$0xf] }
 0x256   :  { %v3233_v10 = vld [vmem:[#allocation3 + $0x1728] sm:$0xf]  ;;  %4065 = vmatprep.mubr.bf16.mxu0 %v16428_v16  ;;  %14290 = vmatprep.subr.bf16.mxu0 %v13056_v45  ;;  %v13796_v45 = vadd.f32 %v13795_v6, %v13794_v63  ;;  %v13086_v63 = vcombine.low %v4373_v42, %v4374_v41  ;;  %v4379_v42 = vld [vmem:[#allocation3 + $0xcc] sm:$0xf] }
 0x257   :  { %v3184_v8 = vld [vmem:[#allocation3 + $0x1108] sm:$0xf]  ;;  %v13072_v22 = vcombine.low %v3232_v52, %v3233_v10  ;;  %v4380_v41 = vld [vmem:[#allocation3 + $0xec] sm:$0xf] }
 0x258   :  { %v3185_v9 = vld [vmem:[#allocation3 + $0x1128] sm:$0xf] }
 0x259   :  { %v3216_v25 = vld [vmem:[#allocation3 + $0x1508] sm:$0xf]  ;;  %v13048_v28 = vcombine.low %v3184_v8, %v3185_v9  ;;  %14330 = vmatprep.subr.bf16.mxu1 %v13072_v22  ;;  %v13797_v9 = vpop.f32.mrb[34].mxu0 }
 0x25a   :  { %v3217_v11 = vld [vmem:[#allocation3 + $0x1528] sm:$0xf]  ;;  %v13798_v22 = vpop.f32.mrb[35].mxu0 }
 0x25b   :  { %v3202_v20 = vld [vmem:[#allocation3 + $0x1348] sm:$0xf]  ;;  %v13064_v33 = vcombine.low %v3216_v25, %v3217_v11  ;;  %14291 = vmatpush3.bf16.msra.mxu0 %v13048_v28  ;;  %v13835_v25 = vpop.f32.mrb[33].mxu1  ;;  %v13799_v23 = vadd.f32 %v13798_v22, %v13797_v9  ;;  %v16438_v9 = vld [vmem:[%s19463_s0 + $0x20] ss:$52 sps:$4 sm:$0xff]  }
 0x25c   :  { %v3203_v40 = vld [vmem:[#allocation3 + $0x1368] sm:$0xf] }
 0x25d   :  { %v16429_v24 = vld [vmem:[%s19463_s0 + $0xec] ss:$52 sps:$4 sm:$0xff]   ;;  %v13057_v35 = vcombine.low %v3202_v20, %v3203_v40  ;;  %4066 = vmatmul.mubr.bf16.gmra.mrb[128].mxu0 %v16430_v50  ;;  %14331 = vmatpush3.bf16.msra.mxu1 %v13064_v33  ;;  %v16433_v5 = vld [vmem:[%s19463_s0 + $0x154] ss:$52 sps:$4 sm:$0xff]   ;;  %v13836_v20 = vadd.f32 %v13835_v25, %v13834_v3  ;;  %v13837_v40 = vpop.f32.mrb[34].mxu1  ;;  %v1535_v33 = vadd.f32 %v13799_v23, %v17357_v54 }
 0x25e   :  { %4130 = vmatprep.mubr.bf16.mxu1 %v16429_v24  ;;  %v3234_v19 = vld [vmem:[#allocation3 + $0x1748] sm:$0xf]  ;;  %v13838_v13 = vpop.f32.mrb[35].mxu1  ;;  %v16436_v54 = vld [vmem:[%s19463_s0 + $0x24] ss:$52 sps:$4 sm:$0xff]  }
 0x25f   :  { %v3235_v21 = vld [vmem:[#allocation3 + $0x1768] sm:$0xf]  ;;  %4131 = vmatmul.mubr.bf16.gmra.mrb[128].mxu1 %v16431_v55  ;;  %14292 = vmatprep.subr.bf16.mxu0 %v13057_v35  ;;  %v4391_v55 = vld [vmem:[#allocation3 + $0x24c] sm:$0xf] }
 0x260   :  { %v3186_v30 = vld [vmem:[#allocation3 + $0x1148] sm:$0xf]  ;;  %v13073_v61 = vcombine.low %v3234_v19, %v3235_v21  ;;  %4138 = vmatprep.mubr.bf16.mxu1 %v16433_v5  ;;  %v1532_v21 = vadd.f32 %v13796_v45, %v17354_v39  ;;  %v16435_v39 = vld [vmem:[%s19463_s0 + $0x150] ss:$52 sps:$4 sm:$0xff]  }
 0x261   :  { %v3187_v27 = vld [vmem:[#allocation3 + $0x1168] sm:$0xf]  ;;  %v4393_v25 = vld [vmem:[#allocation3 + $0x28c] sm:$0xf] }
 0x262   :  { %v3218_v37 = vld [vmem:[#allocation3 + $0x1548] sm:$0xf]  ;;  %v13049_v51 = vcombine.low %v3186_v30, %v3187_v27  ;;  %14332 = vmatprep.subr.bf16.mxu1 %v13073_v61  ;;  %v13839_v27 = vadd.f32 %v13838_v13, %v13837_v40  ;;  %v13800_v61 = vpop.f32.mrb[36].mxu0  ;;  %v4377_v40 = vld [vmem:[#allocation3 + $0x8c] sm:$0xf] }
 0x263   :  { %v3219_v38 = vld [vmem:[#allocation3 + $0x1568] sm:$0xf] }
 0x264   :  { %v3204_v49 = vld [vmem:[#allocation3 + $0x1388] sm:$0xf]  ;;  %v13065_v4 = vcombine.low %v3218_v37, %v3219_v38  ;;  %14293 = vmatpush3.bf16.msra.mxu0 %v13049_v51  ;;  %v17423_v37 = vadd.f32 %v13836_v20, %v1532_v21  ;;  %v17428_v50 = vadd.f32 %v13839_v27, %v1535_v33  ;;  %v4392_v51 = vld [vmem:[#allocation3 + $0x26c] sm:$0xf] }
 0x265   :  { %v3205_v43 = vld [vmem:[#allocation3 + $0x13a8] sm:$0xf]  ;;  %v13095_v5 = vcombine.low %v4391_v55, %v4392_v51  ;;  %v4396_v27 = vld [vmem:[#allocation3 + $0x2ec] sm:$0xf] }
 0x266   :  { %v3236_v44 = vld [vmem:[#allocation3 + $0x1788] sm:$0xf]  ;;  %v13058_v12 = vcombine.low %v3204_v49, %v3205_v43  ;;  %14333 = vmatpush3.bf16.msra.mxu1 %v13065_v4  ;;  %v13094_v49 = vcombine.low %v4389_v0, %v4390_v32  ;;  %v4397_v55 = vld [vmem:[#allocation3 + $0x30c] sm:$0xf] }
 0x267   :  { %v3237_v46 = vld [vmem:[#allocation3 + $0x17a8] sm:$0xf]  ;;  %4139 = vmatmul.mubr.bf16.gmra.mrb[132].mxu1 %v16435_v39  ;;  %v4398_v51 = vld [vmem:[#allocation3 + $0x32c] sm:$0xf] }
 0x268   :  { %v3188_v53 = vld [vmem:[#allocation3 + $0x1188] sm:$0xf]  ;;  %v13074_v2 = vcombine.low %v3236_v44, %v3237_v46  ;;  %14294 = vmatprep.subr.bf16.mxu0 %v13058_v12  ;;  %v13801_v44 = vpop.f32.mrb[37].mxu0  ;;  %v13840_v46 = vpop.f32.mrb[36].mxu1 }
 0x269   :  { %v3189_v56 = vld [vmem:[#allocation3 + $0x11a8] sm:$0xf]  ;;  %v13803_v4 = vpop.f32.mrb[38].mxu0  ;;  %v13841_v12 = vpop.f32.mrb[37].mxu1 }
 0x26a   :  { %v3220_v58 = vld [vmem:[#allocation3 + $0x1588] sm:$0xf]  ;;  %v13050_v11 = vcombine.low %v3188_v53, %v3189_v56  ;;  %14334 = vmatprep.subr.bf16.mxu1 %v13074_v2  ;;  %v13802_v53 = vadd.f32 %v13801_v44, %v13800_v61  ;;  %v13804_v56 = vpop.f32.mrb[39].mxu0  ;;  %v4375_v2 = vld [vmem:[#allocation3 + $0x4c] sm:$0xf] }
 0x26b   :  { %v3221_v59 = vld [vmem:[#allocation3 + $0x15a8] sm:$0xf]  ;;  %v13805_v6 = vadd.f32 %v13804_v56, %v13803_v4 }
 0x26c   :  { %v16432_v62 = vld [vmem:[%s19463_s0 + $0x14c] ss:$52 sps:$4 sm:$0xff]   ;;  %v13066_v18 = vcombine.low %v3220_v58, %v3221_v59  ;;  %v16434_v57 = vld [vmem:[%s19463_s0 + $0x148] ss:$52 sps:$4 sm:$0xff]   ;;  %14295 = vmatpush3.bf16.msra.mxu0 %v13050_v11  ;;  %v13842_v58 = vadd.f32 %v13841_v12, %v13840_v46  ;;  %v13843_v59 = vpop.f32.mrb[38].mxu1  ;;  %v13089_v12 = vcombine.low %v4379_v42, %v4380_v41 }
 0x26d   :  { %4073 = vmatprep.mubr.bf16.mxu0 %v16432_v62  ;;  %v3206_v52 = vld [vmem:[#allocation3 + $0x13c8] sm:$0xf]  ;;  %v13844_v3 = vpop.f32.mrb[39].mxu1  ;;  %v4394_v11 = vld [vmem:[#allocation3 + $0x2ac] sm:$0xf] }
 0x26e   :  { %v3207_v10 = vld [vmem:[#allocation3 + $0x13e8] sm:$0xf]  ;;  %4074 = vmatmul.mubr.bf16.gmra.mrb[132].mxu0 %v16434_v57  ;;  %14335 = vmatpush3.bf16.msra.mxu1 %v13066_v18  ;;  %v13845_v45 = vadd.f32 %v13844_v3, %v13843_v59  ;;  %v4378_v18 = vld [vmem:[#allocation3 + $0xac] sm:$0xf] }
 0x26f   :  { %v3238_v8 = vld [vmem:[#allocation3 + $0x17c8] sm:$0xf]  ;;  %v13059_v17 = vcombine.low %v3206_v52, %v3207_v10  ;;  %4179 = vmatprep.mubr.bf16.mxu0 %v16436_v54  ;;  %v4376_v52 = vld [vmem:[#allocation3 + $0x6c] sm:$0xf]  ;;  %v1540_v10 = vadd.f32 %v13802_v53, %v17368_v48 }
 0x270   :  { %v3239_v7 = vld [vmem:[#allocation3 + $0x17e8] sm:$0xf]  ;;  %v13087_v22 = vcombine.low %v4375_v2, %v4376_v52  ;;  %v4382_v59 = vld [vmem:[#allocation3 + $0x12c] sm:$0xf] }
 0x271   :  { %v3190_v15 = vld [vmem:[#allocation3 + $0x11c8] sm:$0xf]  ;;  %v13075_v26 = vcombine.low %v3238_v8, %v3239_v7  ;;  %14296 = vmatprep.subr.bf16.mxu0 %v13059_v17  ;;  %v13806_v17 = vpop.f32.mrb[40].mxu0 }
 0x272   :  { %v3191_v16 = vld [vmem:[#allocation3 + $0x11e8] sm:$0xf]  ;;  %v13807_v13 = vpop.f32.mrb[41].mxu0 }
 0x273   :  { %v3222_v24 = vld [vmem:[#allocation3 + $0x15c8] sm:$0xf]  ;;  %v13051_v35 = vcombine.low %v3190_v15, %v3191_v16  ;;  %14336 = vmatprep.subr.bf16.mxu1 %v13075_v26  ;;  %v1543_v15 = vadd.f32 %v13805_v6, %v17371_v29  ;;  %v17441_v16 = vadd.f32 %v13842_v58, %v1540_v10  ;;  %v13846_v26 = vpop.f32.mrb[40].mxu1  ;;  %v13808_v57 = vadd.f32 %v13807_v13, %v13806_v17  ;;  %v13809_v0 = vpop.f32.mrb[42].mxu0  ;;  %v4381_v58 = vld [vmem:[#allocation3 + $0x10c] sm:$0xf] }
 0x274   :  { %v3223_v19 = vld [vmem:[#allocation3 + $0x15e8] sm:$0xf]  ;;  %v13847_v32 = vpop.f32.mrb[41].mxu1  ;;  %v13810_v33 = vpop.f32.mrb[43].mxu0 }
 0x275   :  { %v3240_v28 = vld [vmem:[#allocation3 + $0x1808] sm:$0xf]  ;;  %v13067_v38 = vcombine.low %v3222_v24, %v3223_v19  ;;  %14297 = vmatpush3.bf16.msra.mxu0 %v13051_v35  ;;  %v13096_v24 = vcombine.low %v4393_v25, %v4394_v11  ;;  %v17446_v23 = vadd.f32 %v13845_v45, %v1543_v15  ;;  %v13848_v39 = vadd.f32 %v13847_v32, %v13846_v26  ;;  %v13849_v35 = vpop.f32.mrb[42].mxu1 }
 0x276   :  { %v3241_v30 = vld [vmem:[#allocation3 + $0x1828] sm:$0xf]  ;;  %v1548_v61 = vadd.f32 %v13808_v57, %v17384_v1  ;;  %v13811_v54 = vadd.f32 %v13810_v33, %v13809_v0  ;;  %v16443_v1 = vld [vmem:[%s19463_s0 + $0x90] ss:$52 sps:$4 sm:$0xff]  }
 0x277   :  { %v13076_v34 = vcombine.low %v3240_v28, %v3241_v30  ;;  %v3242_v43 = vld [vmem:[#allocation3 + $0x1848] sm:$0xf]  ;;  %14337 = vmatpush3.bf16.msra.mxu1 %v13067_v38  ;;  %v4395_v30 = vld [vmem:[#allocation3 + $0x2cc] sm:$0xf]  ;;  %v13088_v38 = vcombine.low %v4377_v40, %v4378_v18 }
 0x278   :  { %v3243_v31 = vld [vmem:[#allocation3 + $0x1868] sm:$0xf]  ;;  %14374 = vmatprep.subr.bf16.mxu1 %v13094_v49  ;;  %4180 = vmatmul.mubr.bf16.vlgmr.msra.gmra.mrb[136].mxu0 %v16438_v9  ;;  %v13850_v49 = vpop.f32.mrb[43].mxu1  ;;  %v1551_v53 = vadd.f32 %v13811_v54, %v17389_v14  ;;  %v17459_v4 = vadd.f32 %v13848_v39, %v1548_v61  ;;  %v4383_v40 = vld [vmem:[#allocation3 + $0x14c] sm:$0xf] }
 0x279   :  { %v16437_v36 = vld [vmem:[%s19463_s0 + $0x2c] ss:$52 sps:$4 sm:$0xff]   ;;  %15784 = vmatprep.subr.bf16.mxu0 %v13076_v34  ;;  %v13077_v62 = vcombine.low %v3242_v43, %v3243_v31  ;;  %v16439_v48 = vld [vmem:[%s19463_s0 + $0x28] ss:$52 sps:$4 sm:$0xff]   ;;  %v13097_v43 = vcombine.low %v4395_v30, %v4396_v27  ;;  %v13851_v46 = vadd.f32 %v13850_v49, %v13849_v35  ;;  %v13852_v3 = vpop.f32.mrb[44].mxu1 }
 0x27a   :  { %4244 = vmatprep.mubr.bf16.mxu1 %v16437_v36  ;;  %v3244_v8 = vld [vmem:[#allocation3 + $0x1888] sm:$0xf]  ;;  %15785 = vmatpush3.bf16.msra.mxu0 %v13076_v34  ;;  %v13853_v25 = vpop.f32.mrb[45].mxu1  ;;  %v4384_v18 = vld [vmem:[#allocation3 + $0x16c] sm:$0xf] }
 0x27b   :  { %v3245_v7 = vld [vmem:[#allocation3 + $0x18a8] sm:$0xf]  ;;  %4245 = vmatmul.mubr.bf16.vlgmr.msra.gmra.mrb[136].mxu1 %v16439_v48  ;;  %15786 = vmatprep.subr.bf16.mxu0 %v13077_v62  ;;  %v17464_v10 = vadd.f32 %v13851_v46, %v1551_v53  ;;  %v13854_v15 = vadd.f32 %v13853_v25, %v13852_v3  ;;  %v13855_v48 = vpop.f32.mrb[46].mxu1  ;;  %v4401_v30 = vld [vmem:[#allocation3 + $0x38c] sm:$0xf]  ;;  %v13091_v32 = vcombine.low %v4383_v40, %v4384_v18 }
 0x27c   :  { %14375 = vmatpush3.bf16.msra.mxu1 %v13086_v63  ;;  %v13078_v20 = vcombine.low %v3244_v8, %v3245_v7  ;;  %v16440_v29 = vld [vmem:[%s19463_s0 + $0x8c] ss:$52 sps:$4 sm:$0xff]   ;;  %v16441_v28 = vld [vmem:[%s19463_s0 + $0x94] ss:$52 sps:$4 sm:$0xff]   ;;  %v13812_v63 = vpop.f32.mrb[44].mxu0 }
 0x27d   :  { %14376 = vmatprep.subr.bf16.mxu1 %v13095_v5  ;;  %4187 = vmatprep.mubr.bf16.mxu0 %v16440_v29  ;;  %v3246_v19 = vld [vmem:[#allocation3 + $0x18c8] sm:$0xf]  ;;  %v13813_v6 = vpop.f32.mrb[45].mxu0  ;;  %v16445_v5 = vld [vmem:[%s19463_s0 + $0xfc] ss:$52 sps:$4 sm:$0xff]  }
 0x27e   :  { %v3247_v21 = vld [vmem:[#allocation3 + $0x18e8] sm:$0xf]  ;;  %4252 = vmatprep.mubr.bf16.mxu1 %v16441_v28  ;;  %15787 = vmatpush3.bf16.msra.mxu0 %v13077_v62  ;;  %v13098_v62 = vcombine.low %v4397_v55, %v4398_v51  ;;  %v4399_v8 = vld [vmem:[#allocation3 + $0x34c] sm:$0xf]  ;;  %v13814_v45 = vadd.f32 %v13813_v6, %v13812_v63  ;;  %v13815_v9 = vpop.f32.mrb[46].mxu0 }
 0x27f   :  { %15788 = vmatprep.subr.bf16.mxu0 %v13078_v20  ;;  %v13079_v34 = vcombine.low %v3246_v19, %v3247_v21  ;;  %v3248_v31 = vld [vmem:[#allocation3 + $0x1908] sm:$0xf]  ;;  %v4400_v7 = vld [vmem:[#allocation3 + $0x36c] sm:$0xf]  ;;  %v13816_v11 = vpop.f32.mrb[47].mxu0 }
 0x280   :  { %14377 = vmatpush3.bf16.msra.mxu1 %v13087_v22  ;;  %v3249_v44 = vld [vmem:[#allocation3 + $0x1928] sm:$0xf]  ;;  %v13090_v22 = vcombine.low %v4381_v58, %v4382_v59  ;;  %v1556_v17 = vadd.f32 %v13814_v45, %v17402_v47  ;;  %v13817_v29 = vadd.f32 %v13816_v11, %v13815_v9  ;;  %v13099_v19 = vcombine.low %v4399_v8, %v4400_v7  ;;  %v16446_v28 = vld [vmem:[%s19463_s0 + $0xf0] ss:$52 sps:$4 sm:$0xff]  }
 0x281   :  { %14378 = vmatprep.subr.bf16.mxu1 %v13096_v24  ;;  %v16442_v36 = vld [vmem:[%s19463_s0 + $0x88] ss:$52 sps:$4 sm:$0xff]   ;;  %v13080_v56 = vcombine.low %v3248_v31, %v3249_v44  ;;  %v13856_v24 = vpop.f32.mrb[47].mxu1  ;;  %v4402_v27 = vld [vmem:[#allocation3 + $0x3ac] sm:$0xf] }
 0x282   :  { %4188 = vmatmul.mubr.bf16.gmra.mrb[140].mxu0 %v16442_v36  ;;  %v16444_v14 = vld [vmem:[%s19463_s0 + $0xf4] ss:$52 sps:$4 sm:$0xff]   ;;  %v13857_v26 = vadd.f32 %v13856_v24, %v13855_v48  ;;  %v1559_v57 = vadd.f32 %v13817_v29, %v17407_v60  ;;  %v16447_v47 = vld [vmem:[%s19463_s0 + $0xf8] ss:$52 sps:$4 sm:$0xff]   ;;  %v17477_v0 = vadd.f32 %v13854_v15, %v1556_v17  ;;  %v16448_v60 = vld [vmem:[%s19463_s0 + $0x15c] ss:$52 sps:$4 sm:$0xff]  }
 0x283   :  { %15789 = vmatpush3.bf16.msra.mxu0 %v13078_v20  ;;  %4253 = vmatmul.mubr.bf16.gmra.mrb[140].mxu1 %v16443_v1  ;;  %v3250_v2 = vld [vmem:[#allocation3 + $0x1948] sm:$0xf]  ;;  %v4385_v39 = vld [vmem:[#allocation3 + $0x18c] sm:$0xf]  ;;  %v13886_v46 = vpop.f32.mrb[48].mxu1 }
 0x284   :  { %14379 = vmatpush3.bf16.msra.mxu1 %v13088_v38  ;;  %15790 = vmatprep.subr.bf16.mxu0 %v13079_v34  ;;  %v3251_v52 = vld [vmem:[#allocation3 + $0x1968] sm:$0xf]  ;;  %v4386_v35 = vld [vmem:[#allocation3 + $0x1ac] sm:$0xf]  ;;  %v15754_v38 = vpop.f32.mrb[48].mxu0  ;;  %v17482_v61 = vadd.f32 %v13857_v26, %v1559_v57  ;;  %v13887_v53 = vpop.f32.mrb[49].mxu1 }
 0x285   :  { %14380 = vmatprep.subr.bf16.mxu1 %v13097_v43  ;;  %4195 = vmatprep.mubr.bf16.mxu0 %v16444_v14  ;;  %v13081_v20 = vcombine.low %v3250_v2, %v3251_v52  ;;  %v3252_v21 = vld [vmem:[#allocation3 + $0x1988] sm:$0xf]  ;;  %v17485_v54 = vadd.f32 %v15754_v38, %v17441_v16  ;;  %v1661_v49 = vpop.f32.mrb[49].mxu0  ;;  %v16449_v43 = vld [vmem:[%s19463_s0 + $0x164] ss:$52 sps:$4 sm:$0xff]   ;;  %v13092_v51 = vcombine.low %v4385_v39, %v4386_v35  ;;  %v13889_v63 = vpop.f32.mrb[50].mxu1 }
 0x286   :  { %4260 = vmatprep.mubr.bf16.mxu1 %v16445_v5  ;;  %v3253_v13 = vld [vmem:[#allocation3 + $0x19a8] sm:$0xf]  ;;  %v4403_v31 = vld [vmem:[#allocation3 + $0x3cc] sm:$0xf]  ;;  %v17491_v36 = vadd.f32 %v1661_v49, %v17423_v37  ;;  %v15755_v55 = vpop.f32.mrb[50].mxu0  ;;  %v17496_v59 = vadd.f32 %v13887_v53, %v13886_v46  ;;  %v13890_v52 = vpop.f32.mrb[51].mxu1 }
 0x287   :  { %15791 = vmatpush3.bf16.msra.mxu0 %v13079_v34  ;;  %v13082_v33 = vcombine.low %v3252_v21, %v3253_v13  ;;  %v13100_v34 = vcombine.low %v4401_v30, %v4402_v27  ;;  %v3254_v42 = vld [vmem:[#allocation3 + $0x19c8] sm:$0xf]  ;;  %v4404_v44 = vld [vmem:[#allocation3 + $0x3ec] sm:$0xf]  ;;  %v17494_v1 = vadd.f32 %v15755_v55, %v17446_v23  ;;  %v1664_v16 = vpop.f32.mrb[51].mxu0  ;;  %v17504_v5 = vadd.f32 %v13890_v52, %v13889_v63  ;;  %v13892_v21 = vpop.f32.mrb[52].mxu1 }
 0x288   :  { %14381 = vmatpush3.bf16.msra.mxu1 %v13089_v12  ;;  %15792 = vmatprep.subr.bf16.mxu0 %v13080_v56  ;;  %v3255_v41 = vld [vmem:[#allocation3 + $0x19e8] sm:$0xf]  ;;  %v4388_v58 = vld [vmem:[#allocation3 + $0x1ec] sm:$0xf]  ;;  %v17499_v14 = vadd.f32 %v1664_v16, %v17428_v50  ;;  %v13101_v37 = vcombine.low %v4403_v31, %v4404_v44  ;;  %v16451_v50 = vld [vmem:[%s19463_s0 + $0x160] ss:$52 sps:$4 sm:$0xff]  }
 0x289   :  { %14382 = vmatprep.subr.bf16.mxu1 %v13098_v62  ;;  %v13083_v12 = vcombine.low %v3254_v42, %v3255_v41  ;;  %v4421_v62 = vld [vmem:[#allocation3 + $0x60c] sm:$0xf]  ;;  %v15758_v15 = vpop.f32.mrb[52].mxu0  ;;  %v16453_v29 = vld [vmem:[%s19463_s0 + $0x4] ss:$52 sps:$4 sm:$0xff]  }
 0x28a   :  { %4196 = vmatmul.mubr.bf16.gmra.mrb[144].mxu0 %v16446_v28  ;;  %v4422_v2 = vld [vmem:[#allocation3 + $0x62c] sm:$0xf]  ;;  %v17513_v18 = vadd.f32 %v15758_v15, %v17477_v0  ;;  %v1677_v17 = vpop.f32.mrb[53].mxu0 }
 0x28b   :  { %15793 = vmatpush3.bf16.msra.mxu0 %v13080_v56  ;;  %4261 = vmatmul.mubr.bf16.gmra.mrb[144].mxu1 %v16447_v47  ;;  %v4387_v56 = vld [vmem:[#allocation3 + $0x1cc] sm:$0xf]  ;;  %v13110_v45 = vcombine.low %v4421_v62, %v4422_v2  ;;  %v17519_v13 = vadd.f32 %v1677_v17, %v17459_v4  ;;  %v15759_v26 = vpop.f32.mrb[54].mxu0  ;;  %v13893_v47 = vpop.f32.mrb[53].mxu1 }
 0x28c   :  { %14383 = vmatpush3.bf16.msra.mxu1 %v13090_v22  ;;  %15794 = vmatprep.subr.bf16.mxu0 %v13081_v20  ;;  %v16450_v23 = vld [vmem:[%s19463_s0 + $0x158] ss:$52 sps:$4 sm:$0xff]   ;;  %v13093_v7 = vcombine.low %v4387_v56, %v4388_v58  ;;  %v16452_v48 = vld [vmem:[%s19463_s0 + $0x30] ss:$52 sps:$4 sm:$0xff]   ;;  %v17522_v0 = vadd.f32 %v15759_v26, %v17482_v61  ;;  %v17524_v38 = vadd.f32 %v13893_v47, %v13892_v21  ;;  %v13895_v4 = vpop.f32.mrb[54].mxu1 }
 0x28d   :  { %14384 = vmatprep.subr.bf16.mxu1 %v13099_v19  ;;  %4203 = vmatprep.mubr.bf16.mxu0 %v16448_v60  ;;  %v4453_v6 = vld [vmem:[#allocation3 + $0xa0c] sm:$0xf]  ;;  %v13896_v49 = vpop.f32.mrb[55].mxu1  ;;  %v16456_v56 = vld [vmem:[%s19463_s0 + $0x100] ss:$52 sps:$4 sm:$0xff]  }
 0x28e   :  { %4268 = vmatprep.mubr.bf16.mxu1 %v16449_v43  ;;  %v4454_v3 = vld [vmem:[#allocation3 + $0xa2c] sm:$0xf]  ;;  %v17532_v44 = vadd.f32 %v13896_v49, %v13895_v4  ;;  %v13898_v52 = vpop.f32.mrb[56].mxu1  ;;  %v16459_v26 = vld [vmem:[%s19463_s0 + $0x68] ss:$52 sps:$4 sm:$0xff]  }
 0x28f   :  { %15795 = vmatpush3.bf16.msra.mxu0 %v13081_v20  ;;  %v4405_v8 = vld [vmem:[#allocation3 + $0x40c] sm:$0xf]  ;;  %v13126_v22 = vcombine.low %v4453_v6, %v4454_v3 }
 0x290   :  { %14385 = vmatpush3.bf16.msra.mxu1 %v13091_v32  ;;  %15796 = vmatprep.subr.bf16.mxu0 %v13082_v33  ;;  %v4406_v9 = vld [vmem:[#allocation3 + $0x42c] sm:$0xf]  ;;  %v1680_v32 = vpop.f32.mrb[55].mxu0 }
 0x291   :  { %14386 = vmatprep.subr.bf16.mxu1 %v13100_v34  ;;  %v4437_v25 = vld [vmem:[#allocation3 + $0x80c] sm:$0xf]  ;;  %v13102_v28 = vcombine.low %v4405_v8, %v4406_v9  ;;  %v17527_v60 = vadd.f32 %v1680_v32, %v17464_v10  ;;  %v16455_v10 = vld [vmem:[%s19463_s0] ss:$52 sps:$4 sm:$0xff]  }
 0x292   :  { %4204 = vmatmul.mubr.bf16.gmra.mrb[148].mxu0 %v16450_v23  ;;  %v4438_v11 = vld [vmem:[#allocation3 + $0x82c] sm:$0xf] }
 0x293   :  { %15797 = vmatpush3.bf16.msra.mxu0 %v13082_v33  ;;  %4269 = vmatmul.mubr.bf16.gmra.mrb[148].mxu1 %v16451_v50  ;;  %v4423_v20 = vld [vmem:[#allocation3 + $0x64c] sm:$0xf]  ;;  %v13118_v30 = vcombine.low %v4437_v25, %v4438_v11 }
 0x294   :  { %14387 = vmatpush3.bf16.msra.mxu1 %v13092_v51  ;;  %15798 = vmatprep.subr.bf16.mxu0 %v13083_v12  ;;  %v4424_v40 = vld [vmem:[#allocation3 + $0x66c] sm:$0xf] }
 0x295   :  { %14388 = vmatprep.subr.bf16.mxu1 %v13101_v37  ;;  %15800 = vmatprep.mubr.bf16.mxu0 %v16452_v48  ;;  %v4455_v24 = vld [vmem:[#allocation3 + $0xa4c] sm:$0xf]  ;;  %v13111_v33 = vcombine.low %v4423_v20, %v4424_v40 }
 0x296   :  { %5244 = vmatprep.mubr.bf16.mxu1 %v16453_v29  ;;  %v4456_v19 = vld [vmem:[#allocation3 + $0xa6c] sm:$0xf]  ;;  %v16458_v29 = vld [vmem:[%s19463_s0 + $0x168] ss:$52 sps:$4 sm:$0xff]  }
 0x297   :  { %15799 = vmatpush3.bf16.msra.mxu0 %v13083_v12  ;;  %v4407_v27 = vld [vmem:[#allocation3 + $0x44c] sm:$0xf]  ;;  %v13127_v34 = vcombine.low %v4455_v24, %v4456_v19 }
 0x298   :  { %v4408_v57 = vld [vmem:[#allocation3 + $0x46c] sm:$0xf]  ;;  %14389 = vmatpush3.bf16.msra.mxu1 %v13093_v7  ;;  %14414 = vmatprep.subr.bf16.mxu0 %v13110_v45  ;;  %v13899_v7 = vpop.f32.mrb[57].mxu1 }
 0x299   :  { %v4439_v39 = vld [vmem:[#allocation3 + $0x84c] sm:$0xf]  ;;  %14454 = vmatprep.subr.bf16.mxu1 %v13126_v22  ;;  %v13103_v46 = vcombine.low %v4407_v27, %v4408_v57  ;;  %v17543_v25 = vadd.f32 %v13899_v7, %v13898_v52  ;;  %v13901_v11 = vpop.f32.mrb[58].mxu1 }
 0x29a   :  { %v4440_v35 = vld [vmem:[#allocation3 + $0x86c] sm:$0xf]  ;;  %v13902_v20 = vpop.f32.mrb[59].mxu1 }
 0x29b   :  { %v4425_v42 = vld [vmem:[#allocation3 + $0x68c] sm:$0xf]  ;;  %5245 = vmatmul.mubr.bf16.vlgmr.msra.gmra.mrb[152].mxu1 %v16455_v10  ;;  %v13119_v55 = vcombine.low %v4439_v39, %v4440_v35  ;;  %v17548_v24 = vadd.f32 %v13902_v20, %v13901_v11 }
 0x29c   :  { %v4426_v41 = vld [vmem:[#allocation3 + $0x6ac] sm:$0xf]  ;;  %14455 = vmatpush3.bf16.msra.mxu1 %v13118_v30 }
 0x29d   :  { %v16454_v61 = vld [vmem:[%s19463_s0 + $0x98] ss:$52 sps:$4 sm:$0xff]   ;;  %v13112_v51 = vcombine.low %v4425_v42, %v4426_v41  ;;  %14456 = vmatprep.subr.bf16.mxu1 %v13127_v34  ;;  %v13904_v42 = vpop.f32.mrb[60].mxu1  ;;  %v16463_v20 = vld [vmem:[%s19463_s0 + $0x13c] ss:$52 sps:$4 sm:$0xff]  }
 0x29e   :  { %15801 = vmatmul.mubr.bf16.vlgmr.msra.gmra.mrb[152].mxu0 %v16454_v61  ;;  %v4457_v43 = vld [vmem:[#allocation3 + $0xa8c] sm:$0xf] }
 0x29f   :  { %v4458_v31 = vld [vmem:[#allocation3 + $0xaac] sm:$0xf]  ;;  %14415 = vmatpush3.bf16.msra.mxu0 %v13102_v28  ;;  %15804 = vmatprep.mubr.bf16.mxu0 %v16456_v56 }
 0x2a0   :  { %14416 = vmatprep.subr.bf16.mxu0 %v13111_v33  ;;  %v4409_v53 = vld [vmem:[#allocation3 + $0x48c] sm:$0xf]  ;;  %v13128_v58 = vcombine.low %v4457_v43, %v4458_v31  ;;  %14457 = vmatpush3.bf16.msra.mxu1 %v13119_v55  ;;  %v16460_v33 = vld [vmem:[%s19463_s0 + $0xd4] ss:$52 sps:$4 sm:$0xff]   ;;  %v13905_v31 = vpop.f32.mrb[61].mxu1 }
 0x2a1   :  { %v4410_v16 = vld [vmem:[#allocation3 + $0x4ac] sm:$0xf]  ;;  %v17559_v55 = vadd.f32 %v13905_v31, %v13904_v42 }
 0x2a2   :  { %v4441_v12 = vld [vmem:[#allocation3 + $0x88c] sm:$0xf]  ;;  %v13104_v3 = vcombine.low %v4409_v53, %v4410_v16  ;;  %14458 = vmatprep.subr.bf16.mxu1 %v13128_v58 }
 0x2a3   :  { %v4442_v63 = vld [vmem:[#allocation3 + $0x8ac] sm:$0xf]  ;;  %14417 = vmatpush3.bf16.msra.mxu0 %v13103_v46 }
 0x2a4   :  { %v4427_v37 = vld [vmem:[#allocation3 + $0x6cc] sm:$0xf]  ;;  %14418 = vmatprep.subr.bf16.mxu0 %v13112_v51  ;;  %v13120_v45 = vcombine.low %v4441_v12, %v4442_v63  ;;  %v13907_v51 = vpop.f32.mrb[62].mxu1 }
 0x2a5   :  { %v4428_v62 = vld [vmem:[#allocation3 + $0x6ec] sm:$0xf]  ;;  %v13908_v58 = vpop.f32.mrb[63].mxu1 }
 0x2a6   :  { %v16457_v2 = vld [vmem:[%s19463_s0 + $0x6c] ss:$52 sps:$4 sm:$0xff]   ;;  %v13113_v9 = vcombine.low %v4427_v37, %v4428_v62  ;;  %15805 = vmatmul.mubr.bf16.gmra.mrb[156].mxu0 %v16458_v29  ;;  %14459 = vmatpush3.bf16.msra.mxu1 %v13120_v45  ;;  %v17566_v52 = vadd.f32 %v13908_v58, %v13907_v51 }
 0x2a7   :  { %5252 = vmatprep.mubr.bf16.mxu1 %v16457_v2  ;;  %v4459_v23 = vld [vmem:[#allocation3 + $0xacc] sm:$0xf]  ;;  %14419 = vmatpush3.bf16.msra.mxu0 %v13104_v3  ;;  %v17564_v2 = vld [vmem:[%s19465_s2 + $0x1] ss:$0 sm:$0xff] }
 0x2a8   :  { %v4460_v6 = vld [vmem:[#allocation3 + $0xaec] sm:$0xf]  ;;  %5253 = vmatmul.mubr.bf16.gmra.mrb[156].mxu1 %v16459_v26  ;;  %14420 = vmatprep.subr.bf16.mxu0 %v13113_v9 }
 0x2a9   :  { %v4411_v50 = vld [vmem:[#allocation3 + $0x4cc] sm:$0xf]  ;;  %v13129_v22 = vcombine.low %v4459_v23, %v4460_v6  ;;  %5260 = vmatprep.mubr.bf16.mxu1 %v16460_v33 }
 0x2aa   :  { %v4412_v8 = vld [vmem:[#allocation3 + $0x4ec] sm:$0xf] }
 0x2ab   :  { %v4443_v15 = vld [vmem:[#allocation3 + $0x8cc] sm:$0xf]  ;;  %v13105_v28 = vcombine.low %v4411_v50, %v4412_v8  ;;  %14460 = vmatprep.subr.bf16.mxu1 %v13129_v22  ;;  %v13926_v22 = vpop.f32.mrb[56].mxu0 }
 0x2ac   :  { %v4444_v48 = vld [vmem:[#allocation3 + $0x8ec] sm:$0xf] }
 0x2ad   :  { %v4429_v40 = vld [vmem:[#allocation3 + $0x70c] sm:$0xf]  ;;  %v13121_v30 = vcombine.low %v4443_v15, %v4444_v48  ;;  %14421 = vmatpush3.bf16.msra.mxu0 %v13105_v28  ;;  %v2597_v48 = vadd.f32 %v17496_v59, %v17564_v2 }
 0x2ae   :  { %v4430_v17 = vld [vmem:[#allocation3 + $0x72c] sm:$0xf] }
 0x2af   :  { %v4461_v19 = vld [vmem:[#allocation3 + $0xb0c] sm:$0xf]  ;;  %v13114_v27 = vcombine.low %v4429_v40, %v4430_v17  ;;  %14461 = vmatpush3.bf16.msra.mxu1 %v13121_v30  ;;  %v2600_v30 = vadd.f32 %v17504_v5, %v17564_v2 }
 0x2b0   :  { %v4462_v21 = vld [vmem:[#allocation3 + $0xb2c] sm:$0xf] }
 0x2b1   :  { %v4413_v57 = vld [vmem:[#allocation3 + $0x50c] sm:$0xf]  ;;  %v13130_v39 = vcombine.low %v4461_v19, %v4462_v21  ;;  %14422 = vmatprep.subr.bf16.mxu0 %v13114_v27  ;;  %v13927_v19 = vpop.f32.mrb[57].mxu0  ;;  %v13966_v21 = vpop.f32.mrb[64].mxu1 }
 0x2b2   :  { %v4414_v47 = vld [vmem:[#allocation3 + $0x52c] sm:$0xf]  ;;  %v13928_v27 = vadd.f32 %v13927_v19, %v13926_v22  ;;  %v13967_v59 = vpop.f32.mrb[65].mxu1 }
 0x2b3   :  { %v4445_v32 = vld [vmem:[#allocation3 + $0x90c] sm:$0xf]  ;;  %v13106_v43 = vcombine.low %v4413_v57, %v4414_v47  ;;  %14462 = vmatprep.subr.bf16.mxu1 %v13130_v39  ;;  %v13929_v57 = vpop.f32.mrb[58].mxu0 }
 0x2b4   :  { %v4446_v35 = vld [vmem:[#allocation3 + $0x92c] sm:$0xf]  ;;  %v13930_v39 = vpop.f32.mrb[59].mxu0 }
 0x2b5   :  { %v4431_v4 = vld [vmem:[#allocation3 + $0x74c] sm:$0xf]  ;;  %v13122_v53 = vcombine.low %v4445_v32, %v4446_v35  ;;  %14423 = vmatpush3.bf16.msra.mxu0 %v13106_v43  ;;  %v13968_v35 = vadd.f32 %v13967_v59, %v13966_v21  ;;  %v13931_v43 = vadd.f32 %v13930_v39, %v13929_v57 }
 0x2b6   :  { %v4432_v34 = vld [vmem:[#allocation3 + $0x76c] sm:$0xf] }
 0x2b7   :  { %v4463_v41 = vld [vmem:[#allocation3 + $0xb4c] sm:$0xf]  ;;  %v13115_v16 = vcombine.low %v4431_v4, %v4432_v34  ;;  %14463 = vmatpush3.bf16.msra.mxu1 %v13122_v53  ;;  %v13969_v4 = vpop.f32.mrb[66].mxu1 }
 0x2b8   :  { %v4464_v49 = vld [vmem:[#allocation3 + $0xb6c] sm:$0xf]  ;;  %v13970_v31 = vpop.f32.mrb[67].mxu1 }
 0x2b9   :  { %v16461_v61 = vld [vmem:[%s19463_s0 + $0xc] ss:$52 sps:$4 sm:$0xff]   ;;  %v13131_v63 = vcombine.low %v4463_v41, %v4464_v49  ;;  %v16462_v3 = vld [vmem:[%s19463_s0 + $0xd0] ss:$52 sps:$4 sm:$0xff]   ;;  %14424 = vmatprep.subr.bf16.mxu0 %v13115_v16  ;;  %v13971_v51 = vadd.f32 %v13970_v31, %v13969_v4 }
 0x2ba   :  { %5309 = vmatprep.mubr.bf16.mxu0 %v16461_v61  ;;  %v4415_v10 = vld [vmem:[#allocation3 + $0x54c] sm:$0xf]  ;;  %5261 = vmatmul.mubr.bf16.gmra.mrb[160].mxu1 %v16462_v3  ;;  %v2662_v61 = vadd.f32 %v13928_v27, %v2597_v48 }
 0x2bb   :  { %v4416_v46 = vld [vmem:[#allocation3 + $0x56c] sm:$0xf]  ;;  %14464 = vmatprep.subr.bf16.mxu1 %v13131_v63  ;;  %5268 = vmatprep.mubr.bf16.mxu1 %v16463_v20  ;;  %v13972_v20 = vpop.f32.mrb[68].mxu1 }
 0x2bc   :  { %v4447_v12 = vld [vmem:[#allocation3 + $0x94c] sm:$0xf]  ;;  %v13107_v50 = vcombine.low %v4415_v10, %v4416_v46  ;;  %v13973_v21 = vpop.f32.mrb[69].mxu1 }
 0x2bd   :  { %v4448_v56 = vld [vmem:[#allocation3 + $0x96c] sm:$0xf]  ;;  %v13974_v57 = vadd.f32 %v13973_v21, %v13972_v20  ;;  %v13975_v59 = vpop.f32.mrb[70].mxu1 }
 0x2be   :  { %v4433_v37 = vld [vmem:[#allocation3 + $0x78c] sm:$0xf]  ;;  %v13123_v7 = vcombine.low %v4447_v12, %v4448_v56  ;;  %14425 = vmatpush3.bf16.msra.mxu0 %v13107_v50  ;;  %v2665_v12 = vadd.f32 %v13931_v43, %v2600_v30  ;;  %v17578_v56 = vadd.f32 %v13968_v35, %v2662_v61  ;;  %v16466_v61 = vld [vmem:[%s19463_s0 + $0x8] ss:$52 sps:$4 sm:$0xff]  }
 0x2bf   :  { %v4434_v62 = vld [vmem:[#allocation3 + $0x7ac] sm:$0xf] }
 0x2c0   :  { %v4465_v23 = vld [vmem:[#allocation3 + $0xb8c] sm:$0xf]  ;;  %v13116_v45 = vcombine.low %v4433_v37, %v4434_v62  ;;  %14465 = vmatpush3.bf16.msra.mxu1 %v13123_v7  ;;  %v17585_v7 = vadd.f32 %v13971_v51, %v2665_v12 }
 0x2c1   :  { %v4466_v6 = vld [vmem:[#allocation3 + $0xbac] sm:$0xf] }
 0x2c2   :  { %v4417_v8 = vld [vmem:[#allocation3 + $0x58c] sm:$0xf]  ;;  %v13132_v40 = vcombine.low %v4465_v23, %v4466_v6  ;;  %14426 = vmatprep.subr.bf16.mxu0 %v13116_v45  ;;  %v13932_v45 = vpop.f32.mrb[60].mxu0 }
 0x2c3   :  { %v4418_v9 = vld [vmem:[#allocation3 + $0x5ac] sm:$0xf]  ;;  %v13933_v22 = vpop.f32.mrb[61].mxu0 }
 0x2c4   :  { %v4449_v11 = vld [vmem:[#allocation3 + $0x98c] sm:$0xf]  ;;  %v13108_v47 = vcombine.low %v4417_v8, %v4418_v9  ;;  %14466 = vmatprep.subr.bf16.mxu1 %v13132_v40  ;;  %v2605_v8 = vadd.f32 %v17524_v38, %v17564_v2  ;;  %v16465_v9 = vld [vmem:[%s19463_s0 + $0x14] ss:$52 sps:$4 sm:$0xff]   ;;  %v13934_v38 = vadd.f32 %v13933_v22, %v13932_v45  ;;  %v13935_v19 = vpop.f32.mrb[62].mxu0  ;;  %v2616_v22 = vadd.f32 %v17548_v24, %v17564_v2 }
 0x2c5   :  { %v4450_v15 = vld [vmem:[#allocation3 + $0x9ac] sm:$0xf]  ;;  %v13936_v27 = vpop.f32.mrb[63].mxu0 }
 0x2c6   :  { %v4435_v17 = vld [vmem:[#allocation3 + $0x7cc] sm:$0xf]  ;;  %v13124_v34 = vcombine.low %v4449_v11, %v4450_v15  ;;  %14427 = vmatpush3.bf16.msra.mxu0 %v13108_v47  ;;  %v2670_v35 = vadd.f32 %v13934_v38, %v2605_v8  ;;  %v13937_v4 = vadd.f32 %v13936_v27, %v13935_v19 }
 0x2c7   :  { %v4436_v29 = vld [vmem:[#allocation3 + $0x7ec] sm:$0xf] }
 0x2c8   :  { %v4467_v26 = vld [vmem:[#allocation3 + $0xbcc] sm:$0xf]  ;;  %v13117_v42 = vcombine.low %v4435_v17, %v4436_v29  ;;  %14467 = vmatpush3.bf16.msra.mxu1 %v13124_v34  ;;  %v2608_v29 = vadd.f32 %v17532_v44, %v17564_v2  ;;  %v13976_v34 = vpop.f32.mrb[71].mxu1 }
 0x2c9   :  { %v4468_v28 = vld [vmem:[#allocation3 + $0xbec] sm:$0xf] }
 0x2ca   :  { %v4419_v32 = vld [vmem:[#allocation3 + $0x5cc] sm:$0xf]  ;;  %v13133_v5 = vcombine.low %v4467_v26, %v4468_v28  ;;  %14428 = vmatprep.subr.bf16.mxu0 %v13117_v42 }
 0x2cb   :  { %v4420_v33 = vld [vmem:[#allocation3 + $0x5ec] sm:$0xf] }
 0x2cc   :  { %v4451_v41 = vld [vmem:[#allocation3 + $0x9cc] sm:$0xf]  ;;  %v13109_v63 = vcombine.low %v4419_v32, %v4420_v33  ;;  %14468 = vmatprep.subr.bf16.mxu1 %v13133_v5  ;;  %v2673_v5 = vadd.f32 %v13937_v4, %v2608_v29 }
 0x2cd   :  { %v4452_v49 = vld [vmem:[#allocation3 + $0x9ec] sm:$0xf] }
 0x2ce   :  { %v4485_v10 = vld [vmem:[#allocation3 + $0xe0c] sm:$0xf]  ;;  %v13125_v62 = vcombine.low %v4451_v41, %v4452_v49  ;;  %14429 = vmatpush3.bf16.msra.mxu0 %v13109_v63  ;;  %v13977_v49 = vadd.f32 %v13976_v34, %v13975_v59 }
 0x2cf   :  { %v4486_v46 = vld [vmem:[#allocation3 + $0xe2c] sm:$0xf] }
 0x2d0   :  { %v4517_v53 = vld [vmem:[#allocation3 + $0x120c] sm:$0xf]  ;;  %v13142_v23 = vcombine.low %v4485_v10, %v4486_v46  ;;  %14469 = vmatpush3.bf16.msra.mxu1 %v13125_v62  ;;  %v17595_v10 = vadd.f32 %v13974_v57, %v2670_v35  ;;  %v2613_v62 = vadd.f32 %v17543_v25, %v17564_v2 }
 0x2d1   :  { %v4518_v16 = vld [vmem:[#allocation3 + $0x122c] sm:$0xf]  ;;  %5310 = vmatmul.mubr.bf16.vlgmr.msra.gmra.mrb[160].mxu0 %v16466_v61 }
 0x2d2   :  { %v16464_v58 = vld [vmem:[%s19463_s0 + $0x138] ss:$52 sps:$4 sm:$0xff]   ;;  %v13158_v11 = vcombine.low %v4517_v53, %v4518_v16  ;;  %14494 = vmatprep.subr.bf16.mxu0 %v13142_v23  ;;  %v16467_v46 = vld [vmem:[%s19463_s0 + $0x10] ss:$52 sps:$4 sm:$0xff]   ;;  %v17602_v23 = vadd.f32 %v13977_v49, %v2673_v5 }
 0x2d3   :  { %5269 = vmatmul.mubr.bf16.gmra.mrb[164].mxu1 %v16464_v58  ;;  %v4469_v37 = vld [vmem:[#allocation3 + $0xc0c] sm:$0xf] }
 0x2d4   :  { %v4470_v6 = vld [vmem:[#allocation3 + $0xc2c] sm:$0xf]  ;;  %5374 = vmatprep.mubr.bf16.mxu1 %v16465_v9  ;;  %14534 = vmatprep.subr.bf16.mxu1 %v13158_v11  ;;  %v13978_v11 = vpop.f32.mrb[72].mxu1 }
 0x2d5   :  { %v4501_v3 = vld [vmem:[#allocation3 + $0x100c] sm:$0xf]  ;;  %v13134_v26 = vcombine.low %v4469_v37, %v4470_v6  ;;  %v13938_v6 = vpop.f32.mrb[64].mxu0 }
 0x2d6   :  { %v4502_v50 = vld [vmem:[#allocation3 + $0x102c] sm:$0xf]  ;;  %v13939_v9 = vpop.f32.mrb[65].mxu0 }
 0x2d7   :  { %v4487_v15 = vld [vmem:[#allocation3 + $0xe4c] sm:$0xf]  ;;  %v13150_v47 = vcombine.low %v4501_v3, %v4502_v50  ;;  %14495 = vmatpush3.bf16.msra.mxu0 %v13134_v26  ;;  %v16468_v3 = vld [vmem:[%s19463_s0 + $0x74] ss:$52 sps:$4 sm:$0xff]   ;;  %v13940_v20 = vadd.f32 %v13939_v9, %v13938_v6 }
 0x2d8   :  { %v4488_v48 = vld [vmem:[#allocation3 + $0xe6c] sm:$0xf]  ;;  %5317 = vmatprep.mubr.bf16.mxu0 %v16468_v3 }
 0x2d9   :  { %v4519_v40 = vld [vmem:[#allocation3 + $0x124c] sm:$0xf]  ;;  %v13143_v32 = vcombine.low %v4487_v15, %v4488_v48 }
 0x2da   :  { %v4520_v17 = vld [vmem:[#allocation3 + $0x126c] sm:$0xf] }
 0x2db   :  { %v4471_v28 = vld [vmem:[#allocation3 + $0xc4c] sm:$0xf]  ;;  %v13159_v44 = vcombine.low %v4519_v40, %v4520_v17  ;;  %5375 = vmatmul.mubr.bf16.vlgmr.msra.gmra.mrb[168].mxu1 %v16467_v46  ;;  %14496 = vmatprep.subr.bf16.mxu0 %v13143_v32  ;;  %v13941_v40 = vpop.f32.mrb[66].mxu0  ;;  %v13979_v17 = vpop.f32.mrb[73].mxu1 }
 0x2dc   :  { %v4472_v30 = vld [vmem:[#allocation3 + $0xc6c] sm:$0xf]  ;;  %14535 = vmatpush3.bf16.msra.mxu1 %v13150_v47  ;;  %v13942_v21 = vpop.f32.mrb[67].mxu0  ;;  %v13980_v26 = vadd.f32 %v13979_v17, %v13978_v11  ;;  %v2678_v47 = vadd.f32 %v13940_v20, %v2613_v62  ;;  %v2624_v11 = vadd.f32 %v17566_v52, %v17564_v2 }
 0x2dd   :  { %v4503_v33 = vld [vmem:[#allocation3 + $0x104c] sm:$0xf]  ;;  %v13135_v51 = vcombine.low %v4471_v28, %v4472_v30  ;;  %14536 = vmatprep.subr.bf16.mxu1 %v13159_v44  ;;  %v13981_v28 = vpop.f32.mrb[74].mxu1  ;;  %v13943_v32 = vadd.f32 %v13942_v21, %v13941_v40 }
 0x2de   :  { %v4504_v39 = vld [vmem:[#allocation3 + $0x106c] sm:$0xf]  ;;  %v17615_v49 = vadd.f32 %v13980_v26, %v2678_v47 }
 0x2df   :  { %v4489_v42 = vld [vmem:[#allocation3 + $0xe8c] sm:$0xf]  ;;  %v13151_v16 = vcombine.low %v4503_v33, %v4504_v39  ;;  %14497 = vmatpush3.bf16.msra.mxu0 %v13135_v51  ;;  %v13982_v33 = vpop.f32.mrb[75].mxu1 }
 0x2e0   :  { %v4490_v41 = vld [vmem:[#allocation3 + $0xeac] sm:$0xf]  ;;  %v13983_v4 = vadd.f32 %v13982_v33, %v13981_v28 }
 0x2e1   :  { %v4521_v43 = vld [vmem:[#allocation3 + $0x128c] sm:$0xf]  ;;  %v13144_v12 = vcombine.low %v4489_v42, %v4490_v41  ;;  %14537 = vmatpush3.bf16.msra.mxu1 %v13151_v16  ;;  %v2681_v41 = vadd.f32 %v13943_v32, %v2616_v22 }
 0x2e2   :  { %v4522_v31 = vld [vmem:[#allocation3 + $0x12ac] sm:$0xf] }
 0x2e3   :  { %v4473_v53 = vld [vmem:[#allocation3 + $0xc8c] sm:$0xf]  ;;  %v13160_v50 = vcombine.low %v4521_v43, %v4522_v31  ;;  %14498 = vmatprep.subr.bf16.mxu0 %v13144_v12  ;;  %v2621_v12 = vadd.f32 %v17559_v55, %v17564_v2 }
 0x2e4   :  { %v4474_v58 = vld [vmem:[#allocation3 + $0xcac] sm:$0xf] }
 0x2e5   :  { %v4505_v63 = vld [vmem:[#allocation3 + $0x108c] sm:$0xf]  ;;  %v13136_v29 = vcombine.low %v4473_v53, %v4474_v58  ;;  %14538 = vmatprep.subr.bf16.mxu1 %v13160_v50  ;;  %v17622_v58 = vadd.f32 %v13983_v4, %v2681_v41  ;;  %v16475_v4 = vld [vmem:[%s19463_s0 + $0xe0] ss:$52 sps:$4 sm:$0xff]  }
 0x2e6   :  { %v4506_v37 = vld [vmem:[#allocation3 + $0x10ac] sm:$0xf] }
 0x2e7   :  { %v4491_v8 = vld [vmem:[#allocation3 + $0xecc] sm:$0xf]  ;;  %v13152_v30 = vcombine.low %v4505_v63, %v4506_v37  ;;  %14499 = vmatpush3.bf16.msra.mxu0 %v13136_v29  ;;  %v13944_v63 = vpop.f32.mrb[68].mxu0 }
 0x2e8   :  { %v4492_v45 = vld [vmem:[#allocation3 + $0xeec] sm:$0xf]  ;;  %v13945_v50 = vpop.f32.mrb[69].mxu0 }
 0x2e9   :  { %v16469_v15 = vld [vmem:[%s19463_s0 + $0x7c] ss:$52 sps:$4 sm:$0xff]   ;;  %v13145_v27 = vcombine.low %v4491_v8, %v4492_v45  ;;  %v16471_v61 = vld [vmem:[%s19463_s0 + $0x78] ss:$52 sps:$4 sm:$0xff]   ;;  %14539 = vmatpush3.bf16.msra.mxu1 %v13152_v30  ;;  %v13984_v8 = vpop.f32.mrb[76].mxu1 }
 0x2ea   :  { %5382 = vmatprep.mubr.bf16.mxu1 %v16469_v15  ;;  %v4523_v25 = vld [vmem:[#allocation3 + $0x12cc] sm:$0xf]  ;;  %v16473_v45 = vld [vmem:[%s19463_s0 + $0xe4] ss:$52 sps:$4 sm:$0xff]   ;;  %v13946_v15 = vadd.f32 %v13945_v50, %v13944_v63 }
 0x2eb   :  { %v4524_v48 = vld [vmem:[#allocation3 + $0x12ec] sm:$0xf]  ;;  %5383 = vmatmul.mubr.bf16.gmra.mrb[172].mxu1 %v16471_v61  ;;  %14500 = vmatprep.subr.bf16.mxu0 %v13145_v27 }
 0x2ec   :  { %v4475_v38 = vld [vmem:[#allocation3 + $0xccc] sm:$0xf]  ;;  %v13161_v24 = vcombine.low %v4523_v25, %v4524_v48  ;;  %5390 = vmatprep.mubr.bf16.mxu1 %v16473_v45  ;;  %v13947_v25 = vpop.f32.mrb[70].mxu0  ;;  %v13985_v48 = vpop.f32.mrb[77].mxu1  ;;  %v2686_v30 = vadd.f32 %v13946_v15, %v2621_v12 }
 0x2ed   :  { %v4476_v19 = vld [vmem:[#allocation3 + $0xcec] sm:$0xf]  ;;  %v13948_v17 = vpop.f32.mrb[71].mxu0  ;;  %v13986_v29 = vadd.f32 %v13985_v48, %v13984_v8 }
 0x2ee   :  { %v4507_v57 = vld [vmem:[#allocation3 + $0x10cc] sm:$0xf]  ;;  %v13137_v43 = vcombine.low %v4475_v38, %v4476_v19  ;;  %14540 = vmatprep.subr.bf16.mxu1 %v13161_v24  ;;  %v13987_v38 = vpop.f32.mrb[78].mxu1  ;;  %v13949_v27 = vadd.f32 %v13948_v17, %v13947_v25 }
 0x2ef   :  { %v4508_v59 = vld [vmem:[#allocation3 + $0x10ec] sm:$0xf] }
 0x2f0   :  { %v4493_v39 = vld [vmem:[#allocation3 + $0xf0c] sm:$0xf]  ;;  %v13153_v5 = vcombine.low %v4507_v57, %v4508_v59  ;;  %14501 = vmatpush3.bf16.msra.mxu0 %v13137_v43  ;;  %v13988_v57 = vpop.f32.mrb[79].mxu1 }
 0x2f1   :  { %v4494_v35 = vld [vmem:[#allocation3 + $0xf2c] sm:$0xf]  ;;  %v13989_v47 = vadd.f32 %v13988_v57, %v13987_v38 }
 0x2f2   :  { %v16470_v34 = vld [vmem:[%s19463_s0 + $0x70] ss:$52 sps:$4 sm:$0xff]   ;;  %v13146_v46 = vcombine.low %v4493_v39, %v4494_v35  ;;  %14541 = vmatpush3.bf16.msra.mxu1 %v13153_v5  ;;  %v16474_v32 = vld [vmem:[%s19463_s0 + $0xd8] ss:$52 sps:$4 sm:$0xff]   ;;  %v2689_v39 = vadd.f32 %v13949_v27, %v2624_v11  ;;  %v17635_v35 = vadd.f32 %v13986_v29, %v2686_v30  ;;  %v16478_v27 = vld [vmem:[%s19463_s0 + $0x140] ss:$52 sps:$4 sm:$0xff]  }
 0x2f3   :  { %5318 = vmatmul.mubr.bf16.gmra.mrb[164].mxu0 %v16470_v34  ;;  %v4525_v44 = vld [vmem:[#allocation3 + $0x130c] sm:$0xf]  ;;  %5391 = vmatmul.mubr.bf16.gmra.mrb[176].mxu1 %v16475_v4 }
 0x2f4   :  { %v4526_v42 = vld [vmem:[#allocation3 + $0x132c] sm:$0xf]  ;;  %14502 = vmatprep.subr.bf16.mxu0 %v13146_v46  ;;  %v17640_v5 = vadd.f32 %v13989_v47, %v2689_v39  ;;  %v14006_v46 = vpop.f32.mrb[72].mxu0 }
 0x2f5   :  { %v4477_v31 = vld [vmem:[#allocation3 + $0xd0c] sm:$0xf]  ;;  %v13162_v62 = vcombine.low %v4525_v44, %v4526_v42  ;;  %v14007_v63 = vpop.f32.mrb[73].mxu0 }
 0x2f6   :  { %v4478_v51 = vld [vmem:[#allocation3 + $0xd2c] sm:$0xf]  ;;  %v14008_v50 = vadd.f32 %v14007_v63, %v14006_v46  ;;  %v14009_v8 = vpop.f32.mrb[74].mxu0 }
 0x2f7   :  { %v4509_v53 = vld [vmem:[#allocation3 + $0x110c] sm:$0xf]  ;;  %v13138_v22 = vcombine.low %v4477_v31, %v4478_v51  ;;  %14542 = vmatprep.subr.bf16.mxu1 %v13162_v62  ;;  %v16476_v51 = vld [vmem:[%s19463_s0 + $0x144] ss:$52 sps:$4 sm:$0xff]   ;;  %v14010_v15 = vpop.f32.mrb[75].mxu0 }
 0x2f8   :  { %v4510_v16 = vld [vmem:[#allocation3 + $0x112c] sm:$0xf]  ;;  %v2792_v29 = vadd.f32 %v14008_v50, %v17578_v56  ;;  %v14011_v38 = vadd.f32 %v14010_v15, %v14009_v8  ;;  %v16479_v56 = vld [vmem:[%s19463_s0 + $0x148] ss:$52 sps:$4 sm:$0xff]  }
 0x2f9   :  { %v16472_v37 = vld [vmem:[%s19463_s0 + $0xdc] ss:$52 sps:$4 sm:$0xff]   ;;  %v13154_v19 = vcombine.low %v4509_v53, %v4510_v16  ;;  %14503 = vmatpush3.bf16.msra.mxu0 %v13138_v22  ;;  %v16477_v62 = vld [vmem:[%s19463_s0 + $0x14c] ss:$52 sps:$4 sm:$0xff]  }
 0x2fa   :  { %5325 = vmatprep.mubr.bf16.mxu0 %v16472_v37  ;;  %v4495_v6 = vld [vmem:[#allocation3 + $0xf4c] sm:$0xf]  ;;  %v14046_v37 = vpop.f32.mrb[80].mxu1  ;;  %5398 = vmatprep.mubr.bf16.mxu1 %v16477_v62 }
 0x2fb   :  { %v4496_v3 = vld [vmem:[#allocation3 + $0xf6c] sm:$0xf]  ;;  %5326 = vmatmul.mubr.bf16.gmra.mrb[168].mxu0 %v16474_v32  ;;  %14543 = vmatpush3.bf16.msra.mxu1 %v13154_v19  ;;  %v14047_v45 = vpop.f32.mrb[81].mxu1 }
 0x2fc   :  { %v4527_v55 = vld [vmem:[#allocation3 + $0x134c] sm:$0xf]  ;;  %v13147_v21 = vcombine.low %v4495_v6, %v4496_v3  ;;  %5333 = vmatprep.mubr.bf16.mxu0 %v16476_v51  ;;  %v14048_v25 = vadd.f32 %v14047_v45, %v14046_v37  ;;  %v14049_v48 = vpop.f32.mrb[82].mxu1  ;;  %5399 = vmatmul.mubr.bf16.gmra.mrb[180].mxu1 %v16479_v56 }
 0x2fd   :  { %v4528_v9 = vld [vmem:[#allocation3 + $0x136c] sm:$0xf]  ;;  %v14050_v19 = vpop.f32.mrb[83].mxu1 }
 0x2fe   :  { %v4479_v20 = vld [vmem:[#allocation3 + $0xd4c] sm:$0xf]  ;;  %v13163_v2 = vcombine.low %v4527_v55, %v4528_v9  ;;  %14504 = vmatprep.subr.bf16.mxu0 %v13147_v21  ;;  %v14051_v30 = vadd.f32 %v14050_v19, %v14049_v48 }
 0x2ff   :  { %v4480_v40 = vld [vmem:[#allocation3 + $0xd6c] sm:$0xf] }
 0x300   :  { %v4511_v26 = vld [vmem:[#allocation3 + $0x114c] sm:$0xf]  ;;  %v13139_v34 = vcombine.low %v4479_v20, %v4480_v40  ;;  %14544 = vmatprep.subr.bf16.mxu1 %v13163_v2 }
 0x301   :  { %v4512_v28 = vld [vmem:[#allocation3 + $0x116c] sm:$0xf] }
 0x302   :  { %v4497_v52 = vld [vmem:[#allocation3 + $0xf8c] sm:$0xf]  ;;  %v13155_v42 = vcombine.low %v4511_v26, %v4512_v28  ;;  %14505 = vmatpush3.bf16.msra.mxu0 %v13139_v34  ;;  %v14012_v34 = vpop.f32.mrb[76].mxu0 }
 0x303   :  { %v4498_v59 = vld [vmem:[#allocation3 + $0xfac] sm:$0xf]  ;;  %5334 = vmatmul.mubr.bf16.gmra.mrb[172].mxu0 %v16478_v27 }
 0x304   :  { %v4529_v33 = vld [vmem:[#allocation3 + $0x138c] sm:$0xf]  ;;  %v13148_v41 = vcombine.low %v4497_v52, %v4498_v59  ;;  %14545 = vmatpush3.bf16.msra.mxu1 %v13155_v42  ;;  %v2795_v52 = vadd.f32 %v14011_v38, %v17585_v7  ;;  %v17653_v59 = vadd.f32 %v14048_v25, %v2792_v29 }
 0x305   :  { %v4530_v24 = vld [vmem:[#allocation3 + $0x13ac] sm:$0xf] }
 0x306   :  { %v4481_v44 = vld [vmem:[#allocation3 + $0xd8c] sm:$0xf]  ;;  %v13164_v53 = vcombine.low %v4529_v33, %v4530_v24  ;;  %14506 = vmatprep.subr.bf16.mxu0 %v13148_v41  ;;  %v17658_v4 = vadd.f32 %v14051_v30, %v2795_v52 }
 0x307   :  { %v4482_v61 = vld [vmem:[#allocation3 + $0xdac] sm:$0xf] }
 0x308   :  { %v4513_v43 = vld [vmem:[#allocation3 + $0x118c] sm:$0xf]  ;;  %v13140_v55 = vcombine.low %v4481_v44, %v4482_v61  ;;  %14546 = vmatprep.subr.bf16.mxu1 %v13164_v53  ;;  %v14013_v61 = vpop.f32.mrb[77].mxu0 }
 0x309   :  { %v4514_v31 = vld [vmem:[#allocation3 + $0x11ac] sm:$0xf]  ;;  %v14014_v53 = vadd.f32 %v14013_v61, %v14012_v34 }
 0x30a   :  { %v4499_v16 = vld [vmem:[#allocation3 + $0xfcc] sm:$0xf]  ;;  %v13156_v22 = vcombine.low %v4513_v43, %v4514_v31  ;;  %14507 = vmatpush3.bf16.msra.mxu0 %v13140_v55  ;;  %v14052_v43 = vpop.f32.mrb[84].mxu1  ;;  %v16481_v31 = vld [vmem:[%s19463_s0 + $0x24] ss:$52 sps:$4 sm:$0xff]  }
 0x30b   :  { %v4500_v12 = vld [vmem:[#allocation3 + $0xfec] sm:$0xf]  ;;  %5504 = vmatprep.mubr.bf16.mxu1 %v16481_v31  ;;  %v2800_v45 = vadd.f32 %v14014_v53, %v17595_v10  ;;  %v16483_v10 = vld [vmem:[%s19463_s0 + $0x20] ss:$52 sps:$4 sm:$0xff]  }
 0x30c   :  { %v4531_v6 = vld [vmem:[#allocation3 + $0x13cc] sm:$0xf]  ;;  %v13149_v20 = vcombine.low %v4499_v16, %v4500_v12  ;;  %14547 = vmatpush3.bf16.msra.mxu1 %v13156_v22  ;;  %v14015_v16 = vpop.f32.mrb[78].mxu0  ;;  %v14053_v12 = vpop.f32.mrb[85].mxu1 }
 0x30d   :  { %v4532_v3 = vld [vmem:[#allocation3 + $0x13ec] sm:$0xf]  ;;  %v14016_v37 = vpop.f32.mrb[79].mxu0  ;;  %v14054_v62 = vadd.f32 %v14053_v12, %v14052_v43 }
 0x30e   :  { %v4483_v9 = vld [vmem:[#allocation3 + $0xdcc] sm:$0xf]  ;;  %v13165_v21 = vcombine.low %v4531_v6, %v4532_v3  ;;  %14508 = vmatprep.subr.bf16.mxu0 %v13149_v20  ;;  %v14055_v6 = vpop.f32.mrb[86].mxu1  ;;  %v14017_v55 = vadd.f32 %v14016_v37, %v14015_v16  ;;  %v14018_v30 = vpop.f32.mrb[80].mxu0 }
 0x30f   :  { %v4484_v11 = vld [vmem:[#allocation3 + $0xdec] sm:$0xf]  ;;  %v17671_v29 = vadd.f32 %v14054_v62, %v2800_v45  ;;  %v14019_v52 = vpop.f32.mrb[81].mxu0  ;;  %v16486_v62 = vld [vmem:[%s19463_s0 + $0x80] ss:$52 sps:$4 sm:$0xff]  }
 0x310   :  { %v4515_v40 = vld [vmem:[#allocation3 + $0x11cc] sm:$0xf]  ;;  %v13141_v47 = vcombine.low %v4483_v9, %v4484_v11  ;;  %14548 = vmatprep.subr.bf16.mxu1 %v13165_v21  ;;  %v14056_v9 = vpop.f32.mrb[87].mxu1 }
 0x311   :  { %v4516_v17 = vld [vmem:[#allocation3 + $0x11ec] sm:$0xf]  ;;  %v14057_v48 = vadd.f32 %v14056_v9, %v14055_v6  ;;  %v14058_v56 = vpop.f32.mrb[88].mxu1 }
 0x312   :  { %v4549_v26 = vld [vmem:[#allocation3 + $0x160c] sm:$0xf]  ;;  %v13157_v32 = vcombine.low %v4515_v40, %v4516_v17  ;;  %14509 = vmatpush3.bf16.msra.mxu0 %v13141_v47  ;;  %v2803_v17 = vadd.f32 %v14017_v55, %v17602_v23  ;;  %v16484_v23 = vld [vmem:[%s19463_s0 + $0x84] ss:$52 sps:$4 sm:$0xff]   ;;  %v14059_v34 = vpop.f32.mrb[89].mxu1 }
 0x313   :  { %v4550_v28 = vld [vmem:[#allocation3 + $0x162c] sm:$0xf] }
 0x314   :  { %v4565_v57 = vld [vmem:[#allocation3 + $0x180c] sm:$0xf]  ;;  %v13174_v33 = vcombine.low %v4549_v26, %v4550_v28  ;;  %14549 = vmatpush3.bf16.msra.mxu1 %v13157_v32  ;;  %v17676_v28 = vadd.f32 %v14057_v48, %v2803_v17 }
 0x315   :  { %v4566_v2 = vld [vmem:[#allocation3 + $0x182c] sm:$0xf] }
 0x316   :  { %v4533_v24 = vld [vmem:[#allocation3 + $0x140c] sm:$0xf]  ;;  %v13182_v44 = vcombine.low %v4565_v57, %v4566_v2  ;;  %14574 = vmatprep.subr.bf16.mxu0 %v13174_v33 }
 0x317   :  { %v4534_v39 = vld [vmem:[#allocation3 + $0x142c] sm:$0xf]  ;;  %5505 = vmatmul.mubr.bf16.vlgmr.msra.gmra.mrb[184].mxu1 %v16483_v10  ;;  %v16489_v10 = vld [vmem:[%s19463_s0 + $0xf4] ss:$52 sps:$4 sm:$0xff]  }
 0x318   :  { %v16480_v7 = vld [vmem:[%s19463_s0 + $0x1c] ss:$52 sps:$4 sm:$0xff]   ;;  %v13166_v63 = vcombine.low %v4533_v24, %v4534_v39  ;;  %15808 = vmatprep.subr.bf16.mxu1 %v13182_v44  ;;  %v16482_v22 = vld [vmem:[%s19463_s0 + $0x18] ss:$52 sps:$4 sm:$0xff]   ;;  %v14020_v24 = vadd.f32 %v14019_v52, %v14018_v30  ;;  %v14021_v39 = vpop.f32.mrb[82].mxu0 }
 0x319   :  { %5439 = vmatprep.mubr.bf16.mxu0 %v16480_v7  ;;  %v4551_v42 = vld [vmem:[#allocation3 + $0x164c] sm:$0xf]  ;;  %15809 = vmatpush3.bf16.msra.mxu1 %v13182_v44  ;;  %v14022_v44 = vpop.f32.mrb[83].mxu0 }
 0x31a   :  { %v4552_v41 = vld [vmem:[#allocation3 + $0x166c] sm:$0xf]  ;;  %5440 = vmatmul.mubr.bf16.vlgmr.msra.gmra.mrb[176].mxu0 %v16482_v22 }
 0x31b   :  { %v4567_v46 = vld [vmem:[#allocation3 + $0x184c] sm:$0xf]  ;;  %v13175_v3 = vcombine.low %v4551_v42, %v4552_v41  ;;  %14575 = vmatpush3.bf16.msra.mxu0 %v13166_v63  ;;  %5447 = vmatprep.mubr.bf16.mxu0 %v16484_v23  ;;  %v14060_v42 = vadd.f32 %v14059_v34, %v14058_v56  ;;  %v14061_v41 = vpop.f32.mrb[90].mxu1 }
 0x31c   :  { %v4568_v51 = vld [vmem:[#allocation3 + $0x186c] sm:$0xf]  ;;  %v14062_v53 = vpop.f32.mrb[91].mxu1 }
 0x31d   :  { %v4535_v50 = vld [vmem:[#allocation3 + $0x144c] sm:$0xf]  ;;  %v13183_v11 = vcombine.low %v4567_v46, %v4568_v51  ;;  %14576 = vmatprep.subr.bf16.mxu0 %v13175_v3  ;;  %v2808_v46 = vadd.f32 %v14020_v24, %v17615_v49  ;;  %v14023_v51 = vadd.f32 %v14022_v44, %v14021_v39  ;;  %v14063_v37 = vadd.f32 %v14062_v53, %v14061_v41  ;;  %v16487_v49 = vld [vmem:[%s19463_s0 + $0x88] ss:$52 sps:$4 sm:$0xff]   ;;  %v14064_v17 = vpop.f32.mrb[92].mxu1 }
 0x31e   :  { %v4536_v8 = vld [vmem:[#allocation3 + $0x146c] sm:$0xf]  ;;  %v14065_v30 = vpop.f32.mrb[93].mxu1 }
 0x31f   :  { %v4553_v15 = vld [vmem:[#allocation3 + $0x168c] sm:$0xf]  ;;  %v13167_v38 = vcombine.low %v4535_v50, %v4536_v8  ;;  %15810 = vmatprep.subr.bf16.mxu1 %v13183_v11  ;;  %v2811_v50 = vadd.f32 %v14023_v51, %v17622_v58  ;;  %v17689_v8 = vadd.f32 %v14060_v42, %v2808_v46  ;;  %v16490_v42 = vld [vmem:[%s19463_s0 + $0xe8] ss:$52 sps:$4 sm:$0xff]  }
 0x320   :  { %v4554_v25 = vld [vmem:[#allocation3 + $0x16ac] sm:$0xf]  ;;  %15811 = vmatpush3.bf16.msra.mxu1 %v13183_v11 }
 0x321   :  { %v4569_v20 = vld [vmem:[#allocation3 + $0x188c] sm:$0xf]  ;;  %v13176_v19 = vcombine.low %v4553_v15, %v4554_v25  ;;  %14577 = vmatpush3.bf16.msra.mxu0 %v13167_v38  ;;  %v17694_v15 = vadd.f32 %v14063_v37, %v2811_v50  ;;  %v14024_v25 = vpop.f32.mrb[84].mxu0 }
 0x322   :  { %v4570_v40 = vld [vmem:[#allocation3 + $0x18ac] sm:$0xf]  ;;  %5448 = vmatmul.mubr.bf16.gmra.mrb[180].mxu0 %v16486_v62 }
 0x323   :  { %v4537_v21 = vld [vmem:[#allocation3 + $0x148c] sm:$0xf]  ;;  %v13184_v27 = vcombine.low %v4569_v20, %v4570_v40  ;;  %14578 = vmatprep.subr.bf16.mxu0 %v13176_v19  ;;  %v14025_v40 = vpop.f32.mrb[85].mxu0 }
 0x324   :  { %v4538_v26 = vld [vmem:[#allocation3 + $0x14ac] sm:$0xf] }
 0x325   :  { %v4555_v57 = vld [vmem:[#allocation3 + $0x16cc] sm:$0xf]  ;;  %v13168_v7 = vcombine.low %v4537_v21, %v4538_v26  ;;  %15812 = vmatprep.subr.bf16.mxu1 %v13184_v27  ;;  %v14026_v21 = vadd.f32 %v14025_v40, %v14024_v25  ;;  %v14027_v26 = vpop.f32.mrb[86].mxu0 }
 0x326   :  { %v4556_v2 = vld [vmem:[#allocation3 + $0x16ec] sm:$0xf]  ;;  %15813 = vmatpush3.bf16.msra.mxu1 %v13184_v27  ;;  %v14028_v27 = vpop.f32.mrb[87].mxu0 }
 0x327   :  { %v16485_v47 = vld [vmem:[%s19463_s0 + $0x8c] ss:$52 sps:$4 sm:$0xff]   ;;  %v13177_v61 = vcombine.low %v4555_v57, %v4556_v2  ;;  %14579 = vmatpush3.bf16.msra.mxu0 %v13168_v7  ;;  %v14066_v57 = vadd.f32 %v14065_v30, %v14064_v17  ;;  %v14067_v2 = vpop.f32.mrb[94].mxu1  ;;  %v5715_v30 = vld [vmem:[#allocation3 + $0x230] sm:$0xf] }
 0x328   :  { %5512 = vmatprep.mubr.bf16.mxu1 %v16485_v47  ;;  %v4571_v32 = vld [vmem:[#allocation3 + $0x18cc] sm:$0xf]  ;;  %v14068_v24 = vpop.f32.mrb[95].mxu1 }
 0x329   :  { %v4572_v33 = vld [vmem:[#allocation3 + $0x18ec] sm:$0xf]  ;;  %5513 = vmatmul.mubr.bf16.gmra.mrb[188].mxu1 %v16487_v49  ;;  %14580 = vmatprep.subr.bf16.mxu0 %v13177_v61  ;;  %v14069_v44 = vadd.f32 %v14068_v24, %v14067_v2  ;;  %v17717_v50 = vpop.f32.mrb[96].mxu1 }
 0x32a   :  { %v4539_v43 = vld [vmem:[#allocation3 + $0x14cc] sm:$0xf]  ;;  %v13185_v16 = vcombine.low %v4571_v32, %v4572_v33  ;;  %5520 = vmatprep.mubr.bf16.mxu1 %v16489_v10  ;;  %v2816_v32 = vadd.f32 %v14026_v21, %v17635_v35  ;;  %v14029_v33 = vadd.f32 %v14028_v27, %v14027_v26  ;;  %v2986_v25 = vpop.f32.mrb[97].mxu1  ;;  %v5714_v10 = vld [vmem:[#allocation3 + $0x210] sm:$0xf] }
 0x32b   :  { %v4540_v31 = vld [vmem:[#allocation3 + $0x14ec] sm:$0xf]  ;;  %v17727_v27 = vld [vmem:[#allocation6] ss:$0 sm:$0xff] }
 0x32c   :  { %v4557_v12 = vld [vmem:[#allocation3 + $0x170c] sm:$0xf]  ;;  %v13169_v45 = vcombine.low %v4539_v43, %v4540_v31  ;;  %15814 = vmatprep.subr.bf16.mxu1 %v13185_v16  ;;  %v2819_v43 = vadd.f32 %v14029_v33, %v17640_v5  ;;  %v17707_v31 = vadd.f32 %v14066_v57, %v2816_v32  ;;  %v16492_v5 = vld [vmem:[%s19463_s0 + $0x154] ss:$52 sps:$4 sm:$0xff]   ;;  %v17729_v57 = vld [vmem:[#allocation6 + $0x1] ss:$0 sm:$0xff] }
 0x32d   :  { %v4558_v63 = vld [vmem:[#allocation3 + $0x172c] sm:$0xf]  ;;  %15815 = vmatpush3.bf16.msra.mxu1 %v13185_v16 }
 0x32e   :  { %v4573_v6 = vld [vmem:[#allocation3 + $0x190c] sm:$0xf]  ;;  %v13178_v55 = vcombine.low %v4557_v12, %v4558_v63  ;;  %14581 = vmatpush3.bf16.msra.mxu0 %v13169_v45  ;;  %v17712_v12 = vadd.f32 %v14069_v44, %v2819_v43  ;;  %v14086_v63 = vpop.f32.mrb[88].mxu0  ;;  %v1693_v44 = vmax.f32 %v17499_v14, 0.0 }
 0x32f   :  { %v4574_v3 = vld [vmem:[#allocation3 + $0x192c] sm:$0xf] }
 0x330   :  { %v4541_v9 = vld [vmem:[#allocation3 + $0x150c] sm:$0xf]  ;;  %v13186_v48 = vcombine.low %v4573_v6, %v4574_v3  ;;  %14582 = vmatprep.subr.bf16.mxu0 %v13178_v55  ;;  %v14087_v3 = vpop.f32.mrb[89].mxu0 }
 0x331   :  { %v4542_v11 = vld [vmem:[#allocation3 + $0x152c] sm:$0xf] }
 0x332   :  { %v16488_v58 = vld [vmem:[%s19463_s0 + $0xec] ss:$52 sps:$4 sm:$0xff]   ;;  %v13170_v23 = vcombine.low %v4541_v9, %v4542_v11  ;;  %15816 = vmatprep.subr.bf16.mxu1 %v13186_v48  ;;  %v16491_v35 = vld [vmem:[%s19463_s0 + $0xf0] ss:$52 sps:$4 sm:$0xff]   ;;  %v14088_v9 = vadd.f32 %v14087_v3, %v14086_v63  ;;  %v14089_v11 = vpop.f32.mrb[90].mxu0 }
 0x333   :  { %5455 = vmatprep.mubr.bf16.mxu0 %v16488_v58  ;;  %v4559_v22 = vld [vmem:[#allocation3 + $0x174c] sm:$0xf]  ;;  %5521 = vmatmul.mubr.bf16.gmra.mrb[192].mxu1 %v16491_v35 }
 0x334   :  { %v4560_v20 = vld [vmem:[#allocation3 + $0x176c] sm:$0xf]  ;;  %5456 = vmatmul.mubr.bf16.gmra.mrb[184].mxu0 %v16490_v42  ;;  %15817 = vmatpush3.bf16.msra.mxu1 %v13186_v48  ;;  %v13200_v42 = vcombine.low %v5714_v10, %v5715_v30  ;;  %v5719_v10 = vld [vmem:[#allocation3 + $0x2b0] sm:$0xf] }
 0x335   :  { %v4575_v38 = vld [vmem:[#allocation3 + $0x194c] sm:$0xf]  ;;  %v13179_v52 = vcombine.low %v4559_v22, %v4560_v20  ;;  %14583 = vmatpush3.bf16.msra.mxu0 %v13170_v23  ;;  %5463 = vmatprep.mubr.bf16.mxu0 %v16492_v5  ;;  %v14090_v22 = vpop.f32.mrb[91].mxu0  ;;  %v17722_v20 = vpop.f32.mrb[98].mxu1  ;;  %v17725_v23 = vld [vmem:[#allocation3 + $0x10] sm:$0xf] }
 0x336   :  { %v4576_v19 = vld [vmem:[#allocation3 + $0x196c] sm:$0xf]  ;;  %v2989_v21 = vpop.f32.mrb[99].mxu1 }
 0x337   :  { %v4543_v56 = vld [vmem:[#allocation3 + $0x154c] sm:$0xf]  ;;  %v13187_v39 = vcombine.low %v4575_v38, %v4576_v19  ;;  %14584 = vmatprep.subr.bf16.mxu0 %v13179_v52  ;;  %v14091_v38 = vadd.f32 %v14090_v22, %v14089_v11  ;;  %v2922_v19 = vadd.f32 %v14088_v9, %v17653_v59  ;;  %v17734_v52 = vld [vmem:[#allocation3 + $0x30] sm:$0xf]  ;;  %v1692_v59 = vmax.f32 %v17491_v36, 0.0 }
 0x338   :  { %v4544_v47 = vld [vmem:[#allocation3 + $0x156c] sm:$0xf]  ;;  %v5716_v36 = vld [vmem:[#allocation3 + $0x250] sm:$0xf]  ;;  %v13192_v14 = vcombine.low %v17725_v23, %v17734_v52  ;;  %v16498_v52 = vld [vmem:[%s19463_s0 + $0x28] ss:$52 sps:$4 sm:$0xff]  }
 0x339   :  { %v4561_v34 = vld [vmem:[#allocation3 + $0x178c] sm:$0xf]  ;;  %v13171_v46 = vcombine.low %v4543_v56, %v4544_v47  ;;  %15818 = vmatprep.subr.bf16.mxu1 %v13187_v39  ;;  %v5746_v56 = vld [vmem:[#allocation3 + $0x610] sm:$0xf]  ;;  %v2987_v32 = vadd.f32 %v2986_v25, %v2922_v19  ;;  %v2925_v33 = vadd.f32 %v14091_v38, %v17658_v4  ;;  %v14092_v4 = vpop.f32.mrb[92].mxu0  ;;  %v1708_v25 = vmul.f32 %v17727_v27, %v1693_v44 }
 0x33a   :  { %v4562_v7 = vld [vmem:[#allocation3 + $0x17ac] sm:$0xf]  ;;  %15819 = vmatpush3.bf16.msra.mxu1 %v13187_v39  ;;  %v5747_v47 = vld [vmem:[#allocation3 + $0x630] sm:$0xf] }
 0x33b   :  { %v4577_v41 = vld [vmem:[#allocation3 + $0x198c] sm:$0xf]  ;;  %v13180_v51 = vcombine.low %v4561_v34, %v4562_v7  ;;  %14585 = vmatpush3.bf16.msra.mxu0 %v13171_v46  ;;  %v17741_v34 = vld [vmem:[#allocation3 + $0x410] sm:$0xf]  ;;  %v2990_v43 = vadd.f32 %v2989_v21, %v2925_v33  ;;  %v13216_v46 = vcombine.low %v5746_v56, %v5747_v47 }
 0x33c   :  { %v4578_v61 = vld [vmem:[#allocation3 + $0x19ac] sm:$0xf]  ;;  %v17743_v7 = vld [vmem:[#allocation3 + $0x430] sm:$0xf] }
 0x33d   :  { %v4545_v53 = vld [vmem:[#allocation3 + $0x158c] sm:$0xf]  ;;  %v13188_v37 = vcombine.low %v4577_v41, %v4578_v61  ;;  %14586 = vmatprep.subr.bf16.mxu0 %v13180_v51  ;;  %v5717_v41 = vld [vmem:[#allocation3 + $0x270] sm:$0xf]  ;;  %v3017_v61 = vmax.f32 %v2987_v32, 0.0  ;;  %v13208_v5 = vcombine.low %v17741_v34, %v17743_v7  ;;  %v1694_v32 = vmax.f32 %v17485_v54, 0.0 }
 0x33e   :  { %v4546_v16 = vld [vmem:[#allocation3 + $0x15ac] sm:$0xf]  ;;  %v5748_v51 = vld [vmem:[#allocation3 + $0x650] sm:$0xf] }
 0x33f   :  { %v4563_v62 = vld [vmem:[#allocation3 + $0x17cc] sm:$0xf]  ;;  %v13172_v58 = vcombine.low %v4545_v53, %v4546_v16  ;;  %15820 = vmatprep.subr.bf16.mxu1 %v13188_v37  ;;  %v5749_v53 = vld [vmem:[#allocation3 + $0x670] sm:$0xf]  ;;  %v14093_v16 = vpop.f32.mrb[93].mxu0  ;;  %v3032_v3 = vmul.f32 %v17729_v57, %v3017_v61 }
 0x340   :  { %v4564_v6 = vld [vmem:[#allocation3 + $0x17ec] sm:$0xf]  ;;  %15821 = vmatpush3.bf16.msra.mxu1 %v13188_v37  ;;  %v17756_v37 = vld [vmem:[#allocation3 + $0x50] sm:$0xf]  ;;  %v13217_v22 = vcombine.low %v5748_v51, %v5749_v53 }
 0x341   :  { %v16493_v49 = vld [vmem:[%s19463_s0 + $0x15c] ss:$52 sps:$4 sm:$0xff]   ;;  %v13181_v40 = vcombine.low %v4563_v62, %v4564_v6  ;;  %14587 = vmatpush3.bf16.msra.mxu0 %v13172_v58  ;;  %v16495_v24 = vld [vmem:[%s19463_s0 + $0x158] ss:$52 sps:$4 sm:$0xff]   ;;  %v1707_v6 = vmul.f32 %v17727_v27, %v1692_v59 }
 0x342   :  { %5528 = vmatprep.mubr.bf16.mxu1 %v16493_v49  ;;  %v4579_v45 = vld [vmem:[#allocation3 + $0x19cc] sm:$0xf]  ;;  %v17758_v62 = vld [vmem:[#allocation3 + $0x70] sm:$0xf]  ;;  %v3018_v49 = vmax.f32 %v2990_v43, 0.0 }
 0x343   :  { %v4580_v55 = vld [vmem:[#allocation3 + $0x19ec] sm:$0xf]  ;;  %5529 = vmatmul.mubr.bf16.gmra.mrb[196].mxu1 %v16495_v24  ;;  %14588 = vmatprep.subr.bf16.mxu0 %v13181_v40  ;;  %v17762_v9 = vld [vmem:[#allocation3 + $0x450] sm:$0xf]  ;;  %v17767_v40 = vpop.f32.mrb[100].mxu1  ;;  %v17769_v38 = vadd.f32 %v3032_v3, %v1707_v6  ;;  %v13193_v56 = vcombine.low %v17756_v37, %v17758_v62 }
 0x344   :  { %v4547_v48 = vld [vmem:[#allocation3 + $0x15cc] sm:$0xf]  ;;  %v13189_v26 = vcombine.low %v4579_v45, %v4580_v55  ;;  %v14094_v45 = vadd.f32 %v14093_v16, %v14092_v4  ;;  %v14095_v55 = vpop.f32.mrb[94].mxu0  ;;  %v17764_v11 = vld [vmem:[#allocation3 + $0x470] sm:$0xf]  ;;  %v3033_v19 = vmul.f32 %v17729_v57, %v3018_v49  ;;  %v17773_v23 = vpop.f32.mrb[101].mxu1 }
 0x345   :  { %v4548_v17 = vld [vmem:[#allocation3 + $0x15ec] sm:$0xf]  ;;  %v14096_v58 = vpop.f32.mrb[95].mxu0  ;;  %v17784_v47 = vpop.f32.mrb[102].mxu1  ;;  %v5750_v59 = vld [vmem:[#allocation3 + $0x690] sm:$0xf]  ;;  %v13209_v54 = vcombine.low %v17762_v9, %v17764_v11 }
 0x346   :  { %v16494_v2 = vld [vmem:[%s19463_s0 + $0x150] ss:$52 sps:$4 sm:$0xff]   ;;  %v13173_v39 = vcombine.low %v4547_v48, %v4548_v17  ;;  %15822 = vmatprep.subr.bf16.mxu1 %v13189_v26  ;;  %v16496_v35 = vld [vmem:[%s19463_s0 + $0x2c] ss:$52 sps:$4 sm:$0xff]   ;;  %v13201_v48 = vcombine.low %v5716_v36, %v5717_v41  ;;  %v2930_v21 = vadd.f32 %v14094_v45, %v17671_v29  ;;  %v14097_v30 = vadd.f32 %v14096_v58, %v14095_v55  ;;  %v17794_v7 = vpop.f32.mrb[103].mxu1  ;;  %v14098_v4 = vpop.f32.mrb[96].mxu0 }
 0x347   :  { %5464 = vmatmul.mubr.bf16.gmra.mrb[188].mxu0 %v16494_v2  ;;  %v16497_v63 = vld [vmem:[%s19463_s0 + $0x30] ss:$52 sps:$4 sm:$0xff]   ;;  %15823 = vmatpush3.bf16.msra.mxu1 %v13189_v26  ;;  %v17787_v33 = vadd.f32 %v3033_v19, %v1708_v25  ;;  %v16499_v34 = vld [vmem:[%s19463_s0 + $0x98] ss:$52 sps:$4 sm:$0xff]   ;;  %v1695_v36 = vmax.f32 %v17494_v1, 0.0  ;;  %v14099_v53 = vpop.f32.mrb[97].mxu0 }
 0x348   :  { %5569 = vmatprep.mubr.bf16.mxu0 %v16496_v35  ;;  %15824 = vmatprep.mubr.bf16.mxu1 %v16497_v63  ;;  %v5718_v17 = vld [vmem:[#allocation3 + $0x290] sm:$0xf]  ;;  %v2995_v24 = vadd.f32 %v17717_v50, %v2930_v21  ;;  %v1709_v63 = vmul.f32 %v17727_v27, %v1694_v32  ;;  %v14100_v62 = vadd.f32 %v14099_v53, %v14098_v4  ;;  %v14101_v6 = vpop.f32.mrb[98].mxu0 }
 0x349   :  { %14589 = vmatpush3.bf16.msra.mxu0 %v13173_v39  ;;  %14666 = vmatprep.subr.bf16.mxu1 %v13216_v46  ;;  %v17775_v2 = vld [vmem:[#allocation3 + $0x90] sm:$0xf]  ;;  %v2933_v39 = vadd.f32 %v14097_v30, %v17676_v28  ;;  %v13202_v50 = vcombine.low %v5718_v17, %v5719_v10  ;;  %v1710_v45 = vmul.f32 %v17727_v27, %v1695_v36  ;;  %v14102_v55 = vpop.f32.mrb[99].mxu0 }
 0x34a   :  { %14626 = vmatprep.subr.bf16.mxu0 %v13200_v42  ;;  %v17777_v26 = vld [vmem:[#allocation3 + $0xb0] sm:$0xf]  ;;  %v3019_v61 = vmax.f32 %v2995_v24, 0.0  ;;  %v2938_v17 = vadd.f32 %v14100_v62, %v17689_v8 }
 0x34b   :  { %v5751_v29 = vld [vmem:[#allocation3 + $0x6b0] sm:$0xf]  ;;  %15825 = vmatmul.mubr.bf16.vlgmr.msra.gmra.mrb[200].mxu1 %v16499_v34  ;;  %v2998_v43 = vadd.f32 %v17722_v20, %v2933_v39  ;;  %v13194_v16 = vcombine.low %v17775_v2, %v17777_v26 }
 0x34c   :  { %v17796_v44 = vld [vmem:[#allocation3 + $0x490] sm:$0xf]  ;;  %14667 = vmatpush3.bf16.msra.mxu1 %v13208_v5  ;;  %v13218_v46 = vcombine.low %v5750_v59, %v5751_v29  ;;  %v3034_v5 = vmul.f32 %v17729_v57, %v3019_v61  ;;  %v1696_v29 = vmax.f32 %v17519_v13, 0.0  ;;  %v3003_v8 = vadd.f32 %v17773_v23, %v2938_v17  ;;  %v16504_v61 = vld [vmem:[%s19463_s0 + $0x168] ss:$52 sps:$4 sm:$0xff]  }
 0x34d   :  { %v5735_v42 = vld [vmem:[#allocation3 + $0x4b0] sm:$0xf]  ;;  %14668 = vmatprep.subr.bf16.mxu1 %v13217_v22  ;;  %v3020_v37 = vmax.f32 %v2998_v43, 0.0  ;;  %v14103_v22 = vadd.f32 %v14102_v55, %v14101_v6  ;;  %v16506_v17 = vld [vmem:[%s19463_s0 + $0xf8] ss:$52 sps:$4 sm:$0xff]  }
 0x34e   :  { %v5720_v28 = vld [vmem:[#allocation3 + $0x2d0] sm:$0xf]  ;;  %v17818_v30 = vadd.f32 %v3034_v5, %v1709_v63 }
 0x34f   :  { %5570 = vmatmul.mubr.bf16.vlgmr.msra.gmra.mrb[192].mxu0 %v16498_v52  ;;  %v5721_v41 = vld [vmem:[#allocation3 + $0x2f0] sm:$0xf]  ;;  %v2941_v32 = vadd.f32 %v14103_v22, %v17694_v15  ;;  %v1699_v22 = vmax.f32 %v17522_v0, 0.0 }
 0x350   :  { %14627 = vmatpush3.bf16.msra.mxu0 %v13192_v14  ;;  %v16500_v35 = vld [vmem:[%s19463_s0 + $0x94] ss:$52 sps:$4 sm:$0xff]   ;;  %v13210_v14 = vcombine.low %v17796_v44, %v5735_v42  ;;  %14669 = vmatpush3.bf16.msra.mxu1 %v13209_v54  ;;  %v13203_v9 = vcombine.low %v5720_v28, %v5721_v41  ;;  %v16502_v2 = vld [vmem:[%s19463_s0 + $0x90] ss:$52 sps:$4 sm:$0xff]   ;;  %v1697_v42 = vmax.f32 %v17527_v60, 0.0  ;;  %v14104_v28 = vpop.f32.mrb[100].mxu0 }
 0x351   :  { %14628 = vmatprep.subr.bf16.mxu0 %v13201_v48  ;;  %5577 = vmatprep.mubr.bf16.mxu0 %v16500_v35  ;;  %v5752_v1 = vld [vmem:[#allocation3 + $0x6d0] sm:$0xf]  ;;  %v3035_v48 = vmul.f32 %v17729_v57, %v3020_v37  ;;  %v3006_v15 = vadd.f32 %v17794_v7, %v2941_v32  ;;  %v14105_v60 = vpop.f32.mrb[101].mxu0  ;;  %v16505_v7 = vld [vmem:[%s19463_s0 + $0xc] ss:$52 sps:$4 sm:$0xff]  }
 0x352   :  { %v5753_v51 = vld [vmem:[#allocation3 + $0x6f0] sm:$0xf]  ;;  %14670 = vmatprep.subr.bf16.mxu1 %v13218_v46  ;;  %v1712_v5 = vmul.f32 %v17727_v27, %v1697_v42 }
 0x353   :  { %v16501_v20 = vld [vmem:[%s19463_s0 + $0x100] ss:$52 sps:$4 sm:$0xff]   ;;  %v13219_v11 = vcombine.low %v5752_v1, %v5753_v51  ;;  %v16503_v24 = vld [vmem:[%s19463_s0 + $0xfc] ss:$52 sps:$4 sm:$0xff]   ;;  %v17833_v44 = vadd.f32 %v3035_v48, %v1710_v45  ;;  %v1711_v1 = vmul.f32 %v17727_v27, %v1696_v29  ;;  %v3022_v53 = vmax.f32 %v3006_v15, 0.0  ;;  %v14178_v15 = vpop.f32.mrb[104].mxu1 }
 0x354   :  { %15828 = vmatprep.mubr.bf16.mxu1 %v16501_v20  ;;  %14629 = vmatpush3.bf16.msra.mxu0 %v13193_v56  ;;  %v5704_v3 = vld [vmem:[#allocation3 + $0xd0] sm:$0xf]  ;;  %v1698_v48 = vmax.f32 %v17513_v18, 0.0  ;;  %v16507_v18 = vld [vmem:[%s19463_s0 + $0x164] ss:$52 sps:$4 sm:$0xff]  }
 0x355   :  { %v5705_v49 = vld [vmem:[#allocation3 + $0xf0] sm:$0xf]  ;;  %14630 = vmatprep.subr.bf16.mxu0 %v13202_v50  ;;  %14671 = vmatpush3.bf16.msra.mxu1 %v13210_v14  ;;  %v3021_v50 = vmax.f32 %v3003_v8, 0.0  ;;  %v14107_v14 = vpop.f32.mrb[102].mxu0  ;;  %v3037_v45 = vmul.f32 %v17729_v57, %v3022_v53 }
 0x356   :  { %v5736_v25 = vld [vmem:[#allocation3 + $0x4d0] sm:$0xf]  ;;  %v13195_v26 = vcombine.low %v5704_v3, %v5705_v49  ;;  %14672 = vmatprep.subr.bf16.mxu1 %v13219_v11  ;;  %15829 = vmatmul.mubr.bf16.gmra.mrb[204].mxu1 %v16504_v61  ;;  %v14108_v37 = vpop.f32.mrb[103].mxu0 }
 0x357   :  { %v5737_v58 = vld [vmem:[#allocation3 + $0x4f0] sm:$0xf]  ;;  %5578 = vmatmul.mubr.bf16.gmra.mrb[196].mxu0 %v16502_v2  ;;  %6634 = vmatprep.mubr.bf16.mxu1 %v16505_v7  ;;  %v3036_v51 = vmul.f32 %v17729_v57, %v3021_v50  ;;  %v17858_v2 = vadd.f32 %v3037_v45, %v1712_v5 }
 0x358   :  { %v5722_v10 = vld [vmem:[#allocation3 + $0x310] sm:$0xf]  ;;  %14631 = vmatpush3.bf16.msra.mxu0 %v13194_v16  ;;  %5585 = vmatprep.mubr.bf16.mxu0 %v16503_v24  ;;  %v13211_v13 = vcombine.low %v5736_v25, %v5737_v58  ;;  %v14106_v16 = vadd.f32 %v14105_v60, %v14104_v28  ;;  %v14179_v60 = vpop.f32.mrb[105].mxu1 }
 0x359   :  { %v5723_v19 = vld [vmem:[#allocation3 + $0x330] sm:$0xf]  ;;  %14632 = vmatprep.subr.bf16.mxu0 %v13203_v9  ;;  %v17849_v49 = vadd.f32 %v3036_v51, %v1711_v1  ;;  %v14109_v9 = vadd.f32 %v14108_v37, %v14107_v14  ;;  %v14181_v1 = vpop.f32.mrb[106].mxu1 }
 0x35a   :  { %v17816_v21 = vld [vmem:[#allocation3 + $0x110] sm:$0xf]  ;;  %v13204_v36 = vcombine.low %v5722_v10, %v5723_v19  ;;  %14673 = vmatpush3.bf16.msra.mxu1 %v13211_v13  ;;  %v2946_v55 = vadd.f32 %v14106_v16, %v17707_v31  ;;  %v14182_v37 = vpop.f32.mrb[107].mxu1 }
 0x35b   :  { %v17823_v52 = vld [vmem:[#allocation3 + $0x130] sm:$0xf]  ;;  %v14183_v45 = vadd.f32 %v14182_v37, %v14181_v1 }
 0x35c   :  { %v5754_v56 = vld [vmem:[#allocation3 + $0x710] sm:$0xf]  ;;  %v13196_v35 = vcombine.low %v17816_v21, %v17823_v52  ;;  %14633 = vmatpush3.bf16.msra.mxu0 %v13195_v26  ;;  %v3011_v31 = vadd.f32 %v17767_v40, %v2946_v55  ;;  %v2949_v26 = vadd.f32 %v14109_v9, %v17712_v12  ;;  %v14138_v12 = vpop.f32.mrb[104].mxu0 }
 0x35d   :  { %v5755_v59 = vld [vmem:[#allocation3 + $0x730] sm:$0xf]  ;;  %14634 = vmatprep.subr.bf16.mxu0 %v13204_v36  ;;  %v1713_v36 = vmul.f32 %v17727_v27, %v1698_v48  ;;  %v14139_v50 = vpop.f32.mrb[105].mxu0  ;;  %v16509_v48 = vld [vmem:[%s19463_s0 + $0x4] ss:$52 sps:$4 sm:$0xff]  }
 0x35e   :  { %v17831_v39 = vld [vmem:[#allocation3 + $0x510] sm:$0xf]  ;;  %v13220_v41 = vcombine.low %v5754_v56, %v5755_v59  ;;  %v3014_v40 = vadd.f32 %v17784_v47, %v2949_v26 }
 0x35f   :  { %v5739_v34 = vld [vmem:[#allocation3 + $0x530] sm:$0xf]  ;;  %5586 = vmatmul.mubr.bf16.gmra.mrb[200].mxu0 %v16506_v17 }
 0x360   :  { %v5724_v23 = vld [vmem:[#allocation3 + $0x350] sm:$0xf]  ;;  %v13212_v46 = vcombine.low %v17831_v39, %v5739_v34  ;;  %14674 = vmatprep.subr.bf16.mxu1 %v13220_v41  ;;  %14635 = vmatpush3.bf16.msra.mxu0 %v13196_v35  ;;  %v3023_v39 = vmax.f32 %v3011_v31, 0.0  ;;  %v3024_v61 = vmax.f32 %v3014_v40, 0.0 }
 0x361   :  { %v5725_v54 = vld [vmem:[#allocation3 + $0x370] sm:$0xf]  ;;  %5593 = vmatprep.mubr.bf16.mxu0 %v16507_v18 }
 0x362   :  { %v5756_v43 = vld [vmem:[#allocation3 + $0x750] sm:$0xf]  ;;  %v13205_v62 = vcombine.low %v5724_v23, %v5725_v54  ;;  %14675 = vmatpush3.bf16.msra.mxu1 %v13212_v46  ;;  %v1714_v23 = vmul.f32 %v17727_v27, %v1699_v22  ;;  %v17871_v54 = vld [vmem:[%s19465_s2 + $0x2] ss:$0 sm:$0xff]  ;;  %v3038_v47 = vmul.f32 %v17729_v57, %v3023_v39  ;;  %v14180_v27 = vadd.f32 %v14179_v60, %v14178_v15 }
 0x363   :  { %v5757_v4 = vld [vmem:[#allocation3 + $0x770] sm:$0xf] }
 0x364   :  { %v5708_v20 = vld [vmem:[#allocation3 + $0x150] sm:$0xf]  ;;  %v13221_v6 = vcombine.low %v5756_v43, %v5757_v4  ;;  %14636 = vmatprep.subr.bf16.mxu0 %v13205_v62  ;;  %v14140_v43 = vadd.f32 %v14139_v50, %v14138_v12  ;;  %v14141_v4 = vpop.f32.mrb[106].mxu0 }
 0x365   :  { %v5709_v63 = vld [vmem:[#allocation3 + $0x170] sm:$0xf]  ;;  %v14142_v7 = vpop.f32.mrb[107].mxu0 }
 0x366   :  { %v5740_v3 = vld [vmem:[#allocation3 + $0x550] sm:$0xf]  ;;  %v13197_v10 = vcombine.low %v5708_v20, %v5709_v63  ;;  %14676 = vmatprep.subr.bf16.mxu1 %v13221_v6  ;;  %v3039_v20 = vmul.f32 %v17729_v57, %v3024_v61  ;;  %v3922_v63 = vadd.f32 %v14140_v43, %v17871_v54  ;;  %v14143_v5 = vadd.f32 %v14142_v7, %v14141_v4 }
 0x367   :  { %v5741_v11 = vld [vmem:[#allocation3 + $0x570] sm:$0xf] }
 0x368   :  { %v5726_v25 = vld [vmem:[#allocation3 + $0x390] sm:$0xf]  ;;  %v13213_v59 = vcombine.low %v5740_v3, %v5741_v11  ;;  %14637 = vmatpush3.bf16.msra.mxu0 %v13197_v10  ;;  %v17876_v3 = vadd.f32 %v3038_v47, %v1713_v36  ;;  %v3925_v57 = vadd.f32 %v14143_v5, %v17871_v54  ;;  %v17887_v17 = vadd.f32 %v3039_v20, %v1714_v23 }
 0x369   :  { %v5727_v58 = vld [vmem:[#allocation3 + $0x3b0] sm:$0xf] }
 0x36a   :  { %v5758_v19 = vld [vmem:[#allocation3 + $0x790] sm:$0xf]  ;;  %v13206_v29 = vcombine.low %v5726_v25, %v5727_v58  ;;  %14677 = vmatpush3.bf16.msra.mxu1 %v13213_v59  ;;  %v17882_v58 = vadd.f32 %v14180_v27, %v3922_v63  ;;  %v17889_v18 = vadd.f32 %v14183_v45, %v3925_v57 }
 0x36b   :  { %v5759_v21 = vld [vmem:[#allocation3 + $0x7b0] sm:$0xf] }
 0x36c   :  { %v5710_v0 = vld [vmem:[#allocation3 + $0x190] sm:$0xf]  ;;  %v13222_v34 = vcombine.low %v5758_v19, %v5759_v21  ;;  %14638 = vmatprep.subr.bf16.mxu0 %v13206_v29 }
 0x36d   :  { %v5711_v52 = vld [vmem:[#allocation3 + $0x1b0] sm:$0xf] }
 0x36e   :  { %v5742_v56 = vld [vmem:[#allocation3 + $0x590] sm:$0xf]  ;;  %v13198_v28 = vcombine.low %v5710_v0, %v5711_v52  ;;  %14678 = vmatprep.subr.bf16.mxu1 %v13222_v34  ;;  %v14144_v0 = vpop.f32.mrb[108].mxu0 }
 0x36f   :  { %v5743_v8 = vld [vmem:[#allocation3 + $0x5b0] sm:$0xf]  ;;  %v14145_v29 = vpop.f32.mrb[109].mxu0 }
 0x370   :  { %v5728_v32 = vld [vmem:[#allocation3 + $0x3d0] sm:$0xf]  ;;  %v13214_v35 = vcombine.low %v5742_v56, %v5743_v8  ;;  %14639 = vmatpush3.bf16.msra.mxu0 %v13198_v28  ;;  %v14184_v8 = vpop.f32.mrb[108].mxu1  ;;  %v14146_v39 = vadd.f32 %v14145_v29, %v14144_v0  ;;  %v14147_v40 = vpop.f32.mrb[110].mxu0 }
 0x371   :  { %v5729_v24 = vld [vmem:[#allocation3 + $0x3f0] sm:$0xf]  ;;  %v14185_v12 = vpop.f32.mrb[109].mxu1  ;;  %v14148_v36 = vpop.f32.mrb[111].mxu0 }
 0x372   :  { %v5760_v42 = vld [vmem:[#allocation3 + $0x7d0] sm:$0xf]  ;;  %v13207_v51 = vcombine.low %v5728_v32, %v5729_v24  ;;  %14679 = vmatpush3.bf16.msra.mxu1 %v13214_v35  ;;  %v14186_v23 = vadd.f32 %v14185_v12, %v14184_v8  ;;  %v14187_v50 = vpop.f32.mrb[110].mxu1  ;;  %v3930_v61 = vadd.f32 %v14146_v39, %v17871_v54  ;;  %v14149_v43 = vadd.f32 %v14148_v36, %v14147_v40 }
 0x373   :  { %v5761_v13 = vld [vmem:[#allocation3 + $0x7f0] sm:$0xf]  ;;  %v14188_v4 = vpop.f32.mrb[111].mxu1 }
 0x374   :  { %v5712_v41 = vld [vmem:[#allocation3 + $0x1d0] sm:$0xf]  ;;  %v13223_v53 = vcombine.low %v5760_v42, %v5761_v13  ;;  %14640 = vmatprep.subr.bf16.mxu0 %v13207_v51  ;;  %v14189_v7 = vadd.f32 %v14188_v4, %v14187_v50 }
 0x375   :  { %v5713_v46 = vld [vmem:[#allocation3 + $0x1f0] sm:$0xf] }
 0x376   :  { %v5744_v16 = vld [vmem:[#allocation3 + $0x5d0] sm:$0xf]  ;;  %v13199_v9 = vcombine.low %v5712_v41, %v5713_v46  ;;  %14680 = vmatprep.subr.bf16.mxu1 %v13223_v53  ;;  %v3933_v53 = vadd.f32 %v14149_v43, %v17871_v54 }
 0x377   :  { %v5745_v14 = vld [vmem:[#allocation3 + $0x5f0] sm:$0xf] }
 0x378   :  { %v5778_v62 = vld [vmem:[#allocation3 + $0xa10] sm:$0xf]  ;;  %v13215_v10 = vcombine.low %v5744_v16, %v5745_v14  ;;  %14641 = vmatpush3.bf16.msra.mxu0 %v13199_v9  ;;  %v17896_v16 = vadd.f32 %v14186_v23, %v3930_v61  ;;  %v16511_v14 = vld [vmem:[%s19463_s0 + $0x8] ss:$52 sps:$4 sm:$0xff]   ;;  %v14150_v9 = vpop.f32.mrb[112].mxu0 }
 0x379   :  { %v5779_v6 = vld [vmem:[#allocation3 + $0xa30] sm:$0xf] }
 0x37a   :  { %v16508_v55 = vld [vmem:[%s19463_s0 + $0x160] ss:$52 sps:$4 sm:$0xff]   ;;  %v13232_v19 = vcombine.low %v5778_v62, %v5779_v6  ;;  %14681 = vmatpush3.bf16.msra.mxu1 %v13215_v10  ;;  %v14190_v10 = vpop.f32.mrb[112].mxu1 }
 0x37b   :  { %5594 = vmatmul.mubr.bf16.gmra.mrb[204].mxu0 %v16508_v55  ;;  %v5810_v11 = vld [vmem:[#allocation3 + $0xe10] sm:$0xf]  ;;  %v17901_v55 = vadd.f32 %v14189_v7, %v3933_v53 }
 0x37c   :  { %v5811_v25 = vld [vmem:[#allocation3 + $0xe30] sm:$0xf]  ;;  %6569 = vmatprep.mubr.bf16.mxu0 %v16509_v48  ;;  %14706 = vmatprep.subr.bf16.mxu0 %v13232_v19 }
 0x37d   :  { %v5762_v22 = vld [vmem:[#allocation3 + $0x810] sm:$0xf]  ;;  %v13248_v52 = vcombine.low %v5810_v11, %v5811_v25  ;;  %6635 = vmatmul.mubr.bf16.vlgmr.msra.gmra.mrb[208].mxu1 %v16511_v14  ;;  %v16512_v11 = vld [vmem:[%s19463_s0 + $0x6c] ss:$52 sps:$4 sm:$0xff]  }
 0x37e   :  { %v5763_v21 = vld [vmem:[#allocation3 + $0x830] sm:$0xf] }
 0x37f   :  { %v5794_v31 = vld [vmem:[#allocation3 + $0xc10] sm:$0xf]  ;;  %v13224_v34 = vcombine.low %v5762_v22, %v5763_v21  ;;  %14746 = vmatprep.subr.bf16.mxu1 %v13248_v52  ;;  %v14151_v22 = vpop.f32.mrb[113].mxu0  ;;  %v14191_v52 = vpop.f32.mrb[113].mxu1 }
 0x380   :  { %v5795_v26 = vld [vmem:[#allocation3 + $0xc30] sm:$0xf]  ;;  %v14153_v0 = vpop.f32.mrb[114].mxu0 }
 0x381   :  { %v5780_v56 = vld [vmem:[#allocation3 + $0xa50] sm:$0xf]  ;;  %v13240_v15 = vcombine.low %v5794_v31, %v5795_v26  ;;  %v14152_v26 = vadd.f32 %v14151_v22, %v14150_v9  ;;  %v14154_v8 = vpop.f32.mrb[115].mxu0 }
 0x382   :  { %v5781_v59 = vld [vmem:[#allocation3 + $0xa70] sm:$0xf] }
 0x383   :  { %v5812_v32 = vld [vmem:[#allocation3 + $0xe50] sm:$0xf]  ;;  %v13233_v28 = vcombine.low %v5780_v56, %v5781_v59  ;;  %14747 = vmatpush3.bf16.msra.mxu1 %v13240_v15 }
 0x384   :  { %v5813_v24 = vld [vmem:[#allocation3 + $0xe70] sm:$0xf] }
 0x385   :  { %v5764_v42 = vld [vmem:[#allocation3 + $0x850] sm:$0xf]  ;;  %v13249_v60 = vcombine.low %v5812_v32, %v5813_v24  ;;  %v14192_v32 = vadd.f32 %v14191_v52, %v14190_v10  ;;  %v14193_v24 = vpop.f32.mrb[114].mxu1 }
 0x386   :  { %v5765_v13 = vld [vmem:[#allocation3 + $0x870] sm:$0xf]  ;;  %v14194_v36 = vpop.f32.mrb[115].mxu1 }
 0x387   :  { %v5796_v41 = vld [vmem:[#allocation3 + $0xc50] sm:$0xf]  ;;  %v13225_v20 = vcombine.low %v5764_v42, %v5765_v13  ;;  %14748 = vmatprep.subr.bf16.mxu1 %v13249_v60  ;;  %v3938_v42 = vadd.f32 %v14152_v26, %v17871_v54  ;;  %v14155_v13 = vadd.f32 %v14154_v8, %v14153_v0 }
 0x388   :  { %v5797_v47 = vld [vmem:[#allocation3 + $0xc70] sm:$0xf] }
 0x389   :  { %v5782_v35 = vld [vmem:[#allocation3 + $0xa90] sm:$0xf]  ;;  %v13241_v5 = vcombine.low %v5796_v41, %v5797_v47  ;;  %v16514_v41 = vld [vmem:[%s19463_s0 + $0x68] ss:$52 sps:$4 sm:$0xff]   ;;  %v3941_v43 = vadd.f32 %v14155_v13, %v17871_v54  ;;  %v17914_v4 = vadd.f32 %v14192_v32, %v3938_v42 }
 0x38a   :  { %v5783_v46 = vld [vmem:[#allocation3 + $0xab0] sm:$0xf] }
 0x38b   :  { %v16510_v27 = vld [vmem:[%s19463_s0] ss:$52 sps:$4 sm:$0xff]   ;;  %v13234_v37 = vcombine.low %v5782_v35, %v5783_v46  ;;  %14749 = vmatpush3.bf16.msra.mxu1 %v13241_v5  ;;  %v16515_v60 = vld [vmem:[%s19463_s0 + $0x70] ss:$52 sps:$4 sm:$0xff]  }
 0x38c   :  { %6570 = vmatmul.mubr.bf16.vlgmr.msra.gmra.mrb[208].mxu0 %v16510_v27  ;;  %v5814_v1 = vld [vmem:[#allocation3 + $0xe90] sm:$0xf] }
 0x38d   :  { %v5815_v51 = vld [vmem:[#allocation3 + $0xeb0] sm:$0xf]  ;;  %14707 = vmatpush3.bf16.msra.mxu0 %v13224_v34  ;;  %6577 = vmatprep.mubr.bf16.mxu0 %v16512_v11 }
 0x38e   :  { %v5766_v63 = vld [vmem:[#allocation3 + $0x890] sm:$0xf]  ;;  %14708 = vmatprep.subr.bf16.mxu0 %v13233_v28  ;;  %v13250_v25 = vcombine.low %v5814_v1, %v5815_v51  ;;  %v14195_v28 = vadd.f32 %v14194_v36, %v14193_v24 }
 0x38f   :  { %v5767_v62 = vld [vmem:[#allocation3 + $0x8b0] sm:$0xf] }
 0x390   :  { %v5798_v6 = vld [vmem:[#allocation3 + $0xc90] sm:$0xf]  ;;  %v13226_v56 = vcombine.low %v5766_v63, %v5767_v62  ;;  %14750 = vmatprep.subr.bf16.mxu1 %v13250_v25  ;;  %v17919_v14 = vadd.f32 %v14195_v28, %v3941_v43 }
 0x391   :  { %v5799_v45 = vld [vmem:[#allocation3 + $0xcb0] sm:$0xf]  ;;  %14709 = vmatpush3.bf16.msra.mxu0 %v13225_v20  ;;  %v14156_v20 = vpop.f32.mrb[116].mxu0 }
 0x392   :  { %v5784_v57 = vld [vmem:[#allocation3 + $0xad0] sm:$0xf]  ;;  %14710 = vmatprep.subr.bf16.mxu0 %v13234_v37  ;;  %v13242_v39 = vcombine.low %v5798_v6, %v5799_v45  ;;  %v14157_v6 = vpop.f32.mrb[117].mxu0  ;;  %v14196_v45 = vpop.f32.mrb[116].mxu1 }
 0x393   :  { %v5785_v48 = vld [vmem:[#allocation3 + $0xaf0] sm:$0xf]  ;;  %v14197_v22 = vpop.f32.mrb[117].mxu1 }
 0x394   :  { %v16513_v19 = vld [vmem:[%s19463_s0 + $0x74] ss:$52 sps:$4 sm:$0xff]   ;;  %v13235_v40 = vcombine.low %v5784_v57, %v5785_v48  ;;  %6578 = vmatmul.mubr.bf16.gmra.mrb[212].mxu0 %v16514_v41  ;;  %14751 = vmatpush3.bf16.msra.mxu1 %v13242_v39  ;;  %v16517_v9 = vld [vmem:[%s19463_s0 + $0xdc] ss:$52 sps:$4 sm:$0xff]   ;;  %v14158_v57 = vadd.f32 %v14157_v6, %v14156_v20  ;;  %v14159_v48 = vpop.f32.mrb[118].mxu0  ;;  %v14198_v26 = vadd.f32 %v14197_v22, %v14196_v45  ;;  %v14199_v0 = vpop.f32.mrb[118].mxu1 }
 0x395   :  { %6642 = vmatprep.mubr.bf16.mxu1 %v16513_v19  ;;  %v5816_v21 = vld [vmem:[#allocation3 + $0xed0] sm:$0xf]  ;;  %14711 = vmatpush3.bf16.msra.mxu0 %v13226_v56  ;;  %v14200_v24 = vpop.f32.mrb[119].mxu1 }
 0x396   :  { %v5817_v31 = vld [vmem:[#allocation3 + $0xef0] sm:$0xf]  ;;  %6643 = vmatmul.mubr.bf16.gmra.mrb[212].mxu1 %v16515_v60  ;;  %14712 = vmatprep.subr.bf16.mxu0 %v13235_v40  ;;  %v3946_v8 = vadd.f32 %v14158_v57, %v17871_v54  ;;  %v14258_v20 = vpop.f32.mrb[120].mxu1 }
 0x397   :  { %v5768_v59 = vld [vmem:[#allocation3 + $0x8d0] sm:$0xf]  ;;  %v13251_v23 = vcombine.low %v5816_v21, %v5817_v31  ;;  %6650 = vmatprep.mubr.bf16.mxu1 %v16517_v9  ;;  %v14160_v31 = vpop.f32.mrb[119].mxu0  ;;  %v14259_v45 = vpop.f32.mrb[121].mxu1 }
 0x398   :  { %v5769_v29 = vld [vmem:[#allocation3 + $0x8f0] sm:$0xf]  ;;  %v14161_v32 = vadd.f32 %v14160_v31, %v14159_v48  ;;  %v14260_v48 = vadd.f32 %v14259_v45, %v14258_v20  ;;  %v14261_v22 = vpop.f32.mrb[122].mxu1 }
 0x399   :  { %v5800_v12 = vld [vmem:[#allocation3 + $0xcd0] sm:$0xf]  ;;  %v13227_v35 = vcombine.low %v5768_v59, %v5769_v29  ;;  %14752 = vmatprep.subr.bf16.mxu1 %v13251_v23 }
 0x39a   :  { %v5801_v34 = vld [vmem:[#allocation3 + $0xcf0] sm:$0xf]  ;;  %v3949_v23 = vadd.f32 %v14161_v32, %v17871_v54  ;;  %v14218_v54 = vpop.f32.mrb[120].mxu0  ;;  %v16522_v32 = vld [vmem:[%s19463_s0 + $0x138] ss:$52 sps:$4 sm:$0xff]  }
 0x39b   :  { %v5786_v50 = vld [vmem:[#allocation3 + $0xb10] sm:$0xf]  ;;  %v13243_v7 = vcombine.low %v5800_v12, %v5801_v34  ;;  %14713 = vmatpush3.bf16.msra.mxu0 %v13227_v35  ;;  %v14201_v34 = vadd.f32 %v14200_v24, %v14199_v0 }
 0x39c   :  { %v5787_v15 = vld [vmem:[#allocation3 + $0xb30] sm:$0xf] }
 0x39d   :  { %v5818_v47 = vld [vmem:[#allocation3 + $0xf10] sm:$0xf]  ;;  %v13236_v27 = vcombine.low %v5786_v50, %v5787_v15  ;;  %14753 = vmatpush3.bf16.msra.mxu1 %v13243_v7  ;;  %v17932_v50 = vadd.f32 %v14198_v26, %v3946_v8  ;;  %v16519_v15 = vld [vmem:[%s19463_s0 + $0xd8] ss:$52 sps:$4 sm:$0xff]  }
 0x39e   :  { %v5819_v61 = vld [vmem:[#allocation3 + $0xf30] sm:$0xf]  ;;  %6651 = vmatmul.mubr.bf16.gmra.mrb[216].mxu1 %v16519_v15 }
 0x39f   :  { %v5770_v46 = vld [vmem:[#allocation3 + $0x910] sm:$0xf]  ;;  %v13252_v5 = vcombine.low %v5818_v47, %v5819_v61  ;;  %14714 = vmatprep.subr.bf16.mxu0 %v13236_v27 }
 0x3a0   :  { %v5771_v1 = vld [vmem:[#allocation3 + $0x930] sm:$0xf] }
 0x3a1   :  { %v5802_v51 = vld [vmem:[#allocation3 + $0xd10] sm:$0xf]  ;;  %v13228_v10 = vcombine.low %v5770_v46, %v5771_v1  ;;  %14754 = vmatprep.subr.bf16.mxu1 %v13252_v5  ;;  %v17937_v46 = vadd.f32 %v14201_v34, %v3949_v23 }
 0x3a2   :  { %v5803_v53 = vld [vmem:[#allocation3 + $0xd30] sm:$0xf] }
 0x3a3   :  { %v16516_v63 = vld [vmem:[%s19463_s0 + $0xd4] ss:$52 sps:$4 sm:$0xff]   ;;  %v13244_v52 = vcombine.low %v5802_v51, %v5803_v53  ;;  %v16518_v42 = vld [vmem:[%s19463_s0 + $0xd0] ss:$52 sps:$4 sm:$0xff]   ;;  %14715 = vmatpush3.bf16.msra.mxu0 %v13228_v10  ;;  %v14219_v53 = vpop.f32.mrb[121].mxu0 }
 0x3a4   :  { %6585 = vmatprep.mubr.bf16.mxu0 %v16516_v63  ;;  %v5788_v37 = vld [vmem:[#allocation3 + $0xb50] sm:$0xf]  ;;  %v16521_v63 = vld [vmem:[%s19463_s0 + $0x144] ss:$52 sps:$4 sm:$0xff]   ;;  %v14221_v6 = vpop.f32.mrb[122].mxu0 }
 0x3a5   :  { %v5789_v62 = vld [vmem:[#allocation3 + $0xb70] sm:$0xf]  ;;  %6586 = vmatmul.mubr.bf16.gmra.mrb[216].mxu0 %v16518_v42  ;;  %14755 = vmatpush3.bf16.msra.mxu1 %v13244_v52  ;;  %v14222_v57 = vpop.f32.mrb[123].mxu0  ;;  %v14262_v52 = vpop.f32.mrb[123].mxu1 }
 0x3a6   :  { %v5820_v11 = vld [vmem:[#allocation3 + $0xf50] sm:$0xf]  ;;  %v13237_v56 = vcombine.low %v5788_v37, %v5789_v62  ;;  %6658 = vmatprep.mubr.bf16.mxu1 %v16521_v63  ;;  %v14220_v62 = vadd.f32 %v14219_v53, %v14218_v54  ;;  %v14223_v0 = vadd.f32 %v14222_v57, %v14221_v6  ;;  %v14263_v8 = vadd.f32 %v14262_v52, %v14261_v22  ;;  %v14264_v54 = vpop.f32.mrb[124].mxu1 }
 0x3a7   :  { %v5821_v25 = vld [vmem:[#allocation3 + $0xf70] sm:$0xf]  ;;  %v14265_v20 = vpop.f32.mrb[125].mxu1 }
 0x3a8   :  { %v5772_v19 = vld [vmem:[#allocation3 + $0x950] sm:$0xf]  ;;  %v13253_v39 = vcombine.low %v5820_v11, %v5821_v25  ;;  %14716 = vmatprep.subr.bf16.mxu0 %v13237_v56  ;;  %v4052_v26 = vadd.f32 %v14220_v62, %v17882_v58  ;;  %v14266_v6 = vadd.f32 %v14265_v20, %v14264_v54  ;;  %v14267_v45 = vpop.f32.mrb[126].mxu1 }
 0x3a9   :  { %v5773_v21 = vld [vmem:[#allocation3 + $0x970] sm:$0xf] }
 0x3aa   :  { %v5804_v59 = vld [vmem:[#allocation3 + $0xd50] sm:$0xf]  ;;  %v13229_v28 = vcombine.low %v5772_v19, %v5773_v21  ;;  %14756 = vmatprep.subr.bf16.mxu1 %v13253_v39 }
 0x3ab   :  { %v5805_v29 = vld [vmem:[#allocation3 + $0xd70] sm:$0xf] }
 0x3ac   :  { %v5790_v40 = vld [vmem:[#allocation3 + $0xb90] sm:$0xf]  ;;  %v13245_v47 = vcombine.low %v5804_v59, %v5805_v29  ;;  %14717 = vmatpush3.bf16.msra.mxu0 %v13229_v28 }
 0x3ad   :  { %v5791_v12 = vld [vmem:[#allocation3 + $0xbb0] sm:$0xf] }
 0x3ae   :  { %v5822_v13 = vld [vmem:[#allocation3 + $0xf90] sm:$0xf]  ;;  %v13238_v61 = vcombine.low %v5790_v40, %v5791_v12  ;;  %14757 = vmatpush3.bf16.msra.mxu1 %v13245_v47  ;;  %v4055_v40 = vadd.f32 %v14223_v0, %v17889_v18  ;;  %v17950_v12 = vadd.f32 %v14260_v48, %v4052_v26  ;;  %v14224_v18 = vpop.f32.mrb[124].mxu0 }
 0x3af   :  { %v5823_v36 = vld [vmem:[#allocation3 + $0xfb0] sm:$0xf] }
 0x3b0   :  { %v5774_v41 = vld [vmem:[#allocation3 + $0x990] sm:$0xf]  ;;  %v13254_v27 = vcombine.low %v5822_v13, %v5823_v36  ;;  %14718 = vmatprep.subr.bf16.mxu0 %v13238_v61 }
 0x3b1   :  { %v5775_v43 = vld [vmem:[#allocation3 + $0x9b0] sm:$0xf] }
 0x3b2   :  { %v5806_v60 = vld [vmem:[#allocation3 + $0xd90] sm:$0xf]  ;;  %v13230_v9 = vcombine.low %v5774_v41, %v5775_v43  ;;  %14758 = vmatprep.subr.bf16.mxu1 %v13254_v27  ;;  %v17955_v41 = vadd.f32 %v14263_v8, %v4055_v40 }
 0x3b3   :  { %v5807_v35 = vld [vmem:[#allocation3 + $0xdb0] sm:$0xf] }
 0x3b4   :  { %v16520_v7 = vld [vmem:[%s19463_s0 + $0x13c] ss:$52 sps:$4 sm:$0xff]   ;;  %v13246_v10 = vcombine.low %v5806_v60, %v5807_v35  ;;  %14719 = vmatpush3.bf16.msra.mxu0 %v13230_v9  ;;  %v16523_v58 = vld [vmem:[%s19463_s0 + $0x140] ss:$52 sps:$4 sm:$0xff]   ;;  %v14225_v35 = vpop.f32.mrb[125].mxu0 }
 0x3b5   :  { %6593 = vmatprep.mubr.bf16.mxu0 %v16520_v7  ;;  %v5792_v1 = vld [vmem:[#allocation3 + $0xbd0] sm:$0xf]  ;;  %6659 = vmatmul.mubr.bf16.gmra.mrb[220].mxu1 %v16523_v58  ;;  %v14227_v53 = vpop.f32.mrb[126].mxu0 }
 0x3b6   :  { %v5793_v51 = vld [vmem:[#allocation3 + $0xbf0] sm:$0xf]  ;;  %6594 = vmatmul.mubr.bf16.gmra.mrb[220].mxu0 %v16522_v32  ;;  %14759 = vmatpush3.bf16.msra.mxu1 %v13246_v10  ;;  %v14228_v62 = vpop.f32.mrb[127].mxu0  ;;  %v14268_v10 = vpop.f32.mrb[127].mxu1 }
 0x3b7   :  { %v5824_v5 = vld [vmem:[#allocation3 + $0xfd0] sm:$0xf]  ;;  %v13239_v19 = vcombine.low %v5792_v1, %v5793_v51  ;;  %v14226_v51 = vadd.f32 %v14225_v35, %v14224_v18  ;;  %v14229_v22 = vadd.f32 %v14228_v62, %v14227_v53  ;;  %v14269_v26 = vadd.f32 %v14268_v10, %v14267_v45  ;;  %v14270_v18 = vpop.f32.mrb[128].mxu1 }
 0x3b8   :  { %v5825_v37 = vld [vmem:[#allocation3 + $0xff0] sm:$0xf]  ;;  %v14271_v54 = vpop.f32.mrb[129].mxu1 }
 0x3b9   :  { %v5776_v11 = vld [vmem:[#allocation3 + $0x9d0] sm:$0xf]  ;;  %v13255_v56 = vcombine.low %v5824_v5, %v5825_v37  ;;  %14720 = vmatprep.subr.bf16.mxu0 %v13239_v19  ;;  %v4060_v48 = vadd.f32 %v14226_v51, %v17896_v16  ;;  %v16527_v16 = vld [vmem:[%s19463_s0 + $0x18] ss:$52 sps:$4 sm:$0xff]   ;;  %v14272_v53 = vadd.f32 %v14271_v54, %v14270_v18  ;;  %v14273_v20 = vpop.f32.mrb[130].mxu1 }
 0x3ba   :  { %v5777_v25 = vld [vmem:[#allocation3 + $0x9f0] sm:$0xf] }
 0x3bb   :  { %v5808_v21 = vld [vmem:[#allocation3 + $0xdd0] sm:$0xf]  ;;  %v13231_v34 = vcombine.low %v5776_v11, %v5777_v25  ;;  %14760 = vmatprep.subr.bf16.mxu1 %v13255_v56 }
 0x3bc   :  { %v5809_v31 = vld [vmem:[#allocation3 + $0xdf0] sm:$0xf] }
 0x3bd   :  { %v5842_v59 = vld [vmem:[#allocation3 + $0x1210] sm:$0xf]  ;;  %v13247_v13 = vcombine.low %v5808_v21, %v5809_v31  ;;  %14721 = vmatpush3.bf16.msra.mxu0 %v13231_v34 }
 0x3be   :  { %v5843_v29 = vld [vmem:[#allocation3 + $0x1230] sm:$0xf] }
 0x3bf   :  { %v5874_v24 = vld [vmem:[#allocation3 + $0x1610] sm:$0xf]  ;;  %v13264_v36 = vcombine.low %v5842_v59, %v5843_v29  ;;  %14761 = vmatpush3.bf16.msra.mxu1 %v13247_v13  ;;  %v4063_v59 = vadd.f32 %v14229_v22, %v17901_v55  ;;  %v17968_v29 = vadd.f32 %v14266_v6, %v4060_v48  ;;  %v14230_v55 = vpop.f32.mrb[128].mxu0  ;;  %v16530_v22 = vld [vmem:[%s19463_s0 + $0x78] ss:$52 sps:$4 sm:$0xff]  }
 0x3c0   :  { %v5875_v39 = vld [vmem:[#allocation3 + $0x1630] sm:$0xf] }
 0x3c1   :  { %v5826_v42 = vld [vmem:[#allocation3 + $0x1010] sm:$0xf]  ;;  %v13280_v61 = vcombine.low %v5874_v24, %v5875_v39  ;;  %14786 = vmatprep.subr.bf16.mxu0 %v13264_v36 }
 0x3c2   :  { %v5827_v23 = vld [vmem:[#allocation3 + $0x1030] sm:$0xf] }
 0x3c3   :  { %v5858_v15 = vld [vmem:[#allocation3 + $0x1410] sm:$0xf]  ;;  %v13256_v63 = vcombine.low %v5826_v42, %v5827_v23  ;;  %14826 = vmatprep.subr.bf16.mxu1 %v13280_v61  ;;  %v17973_v42 = vadd.f32 %v14269_v26, %v4063_v59 }
 0x3c4   :  { %v5859_v28 = vld [vmem:[#allocation3 + $0x1430] sm:$0xf] }
 0x3c5   :  { %v16524_v47 = vld [vmem:[%s19463_s0 + $0x14] ss:$52 sps:$4 sm:$0xff]   ;;  %v16525_v7 = vld [vmem:[%s19463_s0 + $0x1c] ss:$52 sps:$4 sm:$0xff]   ;;  %v13272_v9 = vcombine.low %v5858_v15, %v5859_v28  ;;  %v14231_v28 = vpop.f32.mrb[129].mxu0 }
 0x3c6   :  { %6699 = vmatprep.mubr.bf16.mxu0 %v16524_v47  ;;  %v5844_v43 = vld [vmem:[#allocation3 + $0x1250] sm:$0xf]  ;;  %6764 = vmatprep.mubr.bf16.mxu1 %v16525_v7  ;;  %v16529_v47 = vld [vmem:[%s19463_s0 + $0x84] ss:$52 sps:$4 sm:$0xff]   ;;  %v14233_v35 = vpop.f32.mrb[130].mxu0 }
 0x3c7   :  { %v5845_v60 = vld [vmem:[#allocation3 + $0x1270] sm:$0xf]  ;;  %6765 = vmatmul.mubr.bf16.vlgmr.msra.gmra.mrb[224].mxu1 %v16527_v16  ;;  %v14234_v51 = vpop.f32.mrb[131].mxu0 }
 0x3c8   :  { %v5876_v27 = vld [vmem:[#allocation3 + $0x1650] sm:$0xf]  ;;  %v13265_v11 = vcombine.low %v5844_v43, %v5845_v60  ;;  %14827 = vmatpush3.bf16.msra.mxu1 %v13272_v9  ;;  %6772 = vmatprep.mubr.bf16.mxu1 %v16529_v47  ;;  %v14232_v60 = vadd.f32 %v14231_v28, %v14230_v55  ;;  %v14235_v45 = vadd.f32 %v14234_v51, %v14233_v35  ;;  %v14274_v9 = vpop.f32.mrb[131].mxu1 }
 0x3c9   :  { %v5877_v1 = vld [vmem:[#allocation3 + $0x1670] sm:$0xf]  ;;  %v14275_v48 = vadd.f32 %v14274_v9, %v14273_v20  ;;  %v14276_v55 = vpop.f32.mrb[132].mxu1 }
 0x3ca   :  { %v5828_v5 = vld [vmem:[#allocation3 + $0x1050] sm:$0xf]  ;;  %v13281_v19 = vcombine.low %v5876_v27, %v5877_v1  ;;  %v4068_v6 = vadd.f32 %v14232_v60, %v17914_v4  ;;  %v14277_v18 = vpop.f32.mrb[133].mxu1 }
 0x3cb   :  { %v5829_v37 = vld [vmem:[#allocation3 + $0x1070] sm:$0xf]  ;;  %v14278_v35 = vadd.f32 %v14277_v18, %v14276_v55  ;;  %v14279_v54 = vpop.f32.mrb[134].mxu1 }
 0x3cc   :  { %v5860_v25 = vld [vmem:[#allocation3 + $0x1450] sm:$0xf]  ;;  %v13257_v8 = vcombine.low %v5828_v5, %v5829_v37  ;;  %14828 = vmatprep.subr.bf16.mxu1 %v13281_v19 }
 0x3cd   :  { %v5861_v57 = vld [vmem:[#allocation3 + $0x1470] sm:$0xf] }
 0x3ce   :  { %v5846_v21 = vld [vmem:[#allocation3 + $0x1290] sm:$0xf]  ;;  %v13273_v24 = vcombine.low %v5860_v25, %v5861_v57 }
 0x3cf   :  { %v5847_v31 = vld [vmem:[#allocation3 + $0x12b0] sm:$0xf] }
 0x3d0   :  { %v16526_v0 = vld [vmem:[%s19463_s0 + $0x10] ss:$52 sps:$4 sm:$0xff]   ;;  %v13266_v39 = vcombine.low %v5846_v21, %v5847_v31  ;;  %14829 = vmatpush3.bf16.msra.mxu1 %v13273_v24  ;;  %v4071_v21 = vadd.f32 %v14235_v45, %v17919_v14  ;;  %v17986_v31 = vadd.f32 %v14272_v53, %v4068_v6  ;;  %v16531_v4 = vld [vmem:[%s19463_s0 + $0x80] ss:$52 sps:$4 sm:$0xff]   ;;  %v14236_v14 = vpop.f32.mrb[132].mxu0 }
 0x3d1   :  { %6700 = vmatmul.mubr.bf16.vlgmr.msra.gmra.mrb[224].mxu0 %v16526_v0  ;;  %v5878_v52 = vld [vmem:[#allocation3 + $0x1690] sm:$0xf]  ;;  %6773 = vmatmul.mubr.bf16.gmra.mrb[228].mxu1 %v16531_v4  ;;  %v16532_v24 = vld [vmem:[%s19463_s0 + $0xe4] ss:$52 sps:$4 sm:$0xff]  }
 0x3d2   :  { %v5879_v56 = vld [vmem:[#allocation3 + $0x16b0] sm:$0xf]  ;;  %14787 = vmatpush3.bf16.msra.mxu0 %v13256_v63 }
 0x3d3   :  { %v5830_v32 = vld [vmem:[#allocation3 + $0x1090] sm:$0xf]  ;;  %14788 = vmatprep.subr.bf16.mxu0 %v13265_v11  ;;  %v13282_v36 = vcombine.low %v5878_v52, %v5879_v56 }
 0x3d4   :  { %v5831_v40 = vld [vmem:[#allocation3 + $0x10b0] sm:$0xf] }
 0x3d5   :  { %v5862_v58 = vld [vmem:[#allocation3 + $0x1490] sm:$0xf]  ;;  %v13258_v7 = vcombine.low %v5830_v32, %v5831_v40  ;;  %14830 = vmatprep.subr.bf16.mxu1 %v13282_v36  ;;  %v17991_v32 = vadd.f32 %v14275_v48, %v4071_v21 }
 0x3d6   :  { %v5863_v34 = vld [vmem:[#allocation3 + $0x14b0] sm:$0xf]  ;;  %14789 = vmatpush3.bf16.msra.mxu0 %v13257_v8 }
 0x3d7   :  { %v16528_v13 = vld [vmem:[%s19463_s0 + $0x7c] ss:$52 sps:$4 sm:$0xff]   ;;  %14790 = vmatprep.subr.bf16.mxu0 %v13266_v39  ;;  %v13274_v63 = vcombine.low %v5862_v58, %v5863_v34  ;;  %v14237_v34 = vpop.f32.mrb[133].mxu0  ;;  %v16534_v45 = vld [vmem:[%s19463_s0 + $0xe0] ss:$52 sps:$4 sm:$0xff]  }
 0x3d8   :  { %6707 = vmatprep.mubr.bf16.mxu0 %v16528_v13  ;;  %v5848_v23 = vld [vmem:[#allocation3 + $0x12d0] sm:$0xf]  ;;  %v16533_v13 = vld [vmem:[%s19463_s0 + $0xec] ss:$52 sps:$4 sm:$0xff]   ;;  %v14239_v28 = vpop.f32.mrb[134].mxu0 }
 0x3d9   :  { %v5849_v15 = vld [vmem:[#allocation3 + $0x12f0] sm:$0xf]  ;;  %6708 = vmatmul.mubr.bf16.gmra.mrb[228].mxu0 %v16530_v22  ;;  %14831 = vmatpush3.bf16.msra.mxu1 %v13274_v63  ;;  %v14240_v60 = vpop.f32.mrb[135].mxu0  ;;  %v14280_v63 = vpop.f32.mrb[135].mxu1 }
 0x3da   :  { %v5880_v61 = vld [vmem:[#allocation3 + $0x16d0] sm:$0xf]  ;;  %v13267_v5 = vcombine.low %v5848_v23, %v5849_v15  ;;  %14791 = vmatpush3.bf16.msra.mxu0 %v13258_v7  ;;  %6715 = vmatprep.mubr.bf16.mxu0 %v16532_v24  ;;  %v14238_v15 = vadd.f32 %v14237_v34, %v14236_v14  ;;  %v14241_v20 = vadd.f32 %v14240_v60, %v14239_v28  ;;  %v14338_v14 = vpop.f32.mrb[136].mxu1 }
 0x3db   :  { %v5881_v43 = vld [vmem:[#allocation3 + $0x16f0] sm:$0xf]  ;;  %6780 = vmatprep.mubr.bf16.mxu1 %v16533_v13  ;;  %v14281_v6 = vadd.f32 %v14280_v63, %v14279_v54  ;;  %v14339_v55 = vpop.f32.mrb[137].mxu1  ;;  %v7039_v63 = vld [vmem:[#allocation3 + $0x214] sm:$0xf] }
 0x3dc   :  { %v5832_v27 = vld [vmem:[#allocation3 + $0x10d0] sm:$0xf]  ;;  %v13283_v11 = vcombine.low %v5880_v61, %v5881_v43  ;;  %14792 = vmatprep.subr.bf16.mxu0 %v13267_v5  ;;  %v4076_v53 = vadd.f32 %v14238_v15, %v17932_v50  ;;  %v16535_v50 = vld [vmem:[%s19463_s0 + $0xe8] ss:$52 sps:$4 sm:$0xff]   ;;  %v14340_v28 = vadd.f32 %v14339_v55, %v14338_v14  ;;  %v14341_v18 = vpop.f32.mrb[138].mxu1 }
 0x3dd   :  { %v5833_v1 = vld [vmem:[#allocation3 + $0x10f0] sm:$0xf]  ;;  %6781 = vmatmul.mubr.bf16.gmra.mrb[232].mxu1 %v16535_v50 }
 0x3de   :  { %v5864_v37 = vld [vmem:[#allocation3 + $0x14d0] sm:$0xf]  ;;  %v13259_v26 = vcombine.low %v5832_v27, %v5833_v1  ;;  %14832 = vmatprep.subr.bf16.mxu1 %v13283_v11 }
 0x3df   :  { %v5865_v62 = vld [vmem:[#allocation3 + $0x14f0] sm:$0xf] }
 0x3e0   :  { %v5850_v25 = vld [vmem:[#allocation3 + $0x1310] sm:$0xf]  ;;  %v13275_v52 = vcombine.low %v5864_v37, %v5865_v62  ;;  %14793 = vmatpush3.bf16.msra.mxu0 %v13259_v26 }
 0x3e1   :  { %v5851_v57 = vld [vmem:[#allocation3 + $0x1330] sm:$0xf]  ;;  %6716 = vmatmul.mubr.bf16.gmra.mrb[232].mxu0 %v16534_v45 }
 0x3e2   :  { %v5882_v10 = vld [vmem:[#allocation3 + $0x1710] sm:$0xf]  ;;  %v13268_v56 = vcombine.low %v5850_v25, %v5851_v57  ;;  %14833 = vmatpush3.bf16.msra.mxu1 %v13275_v52  ;;  %v4079_v25 = vadd.f32 %v14241_v20, %v17937_v46  ;;  %v18004_v57 = vadd.f32 %v14278_v35, %v4076_v53  ;;  %v14298_v46 = vpop.f32.mrb[136].mxu0  ;;  %v16536_v52 = vld [vmem:[%s19463_s0 + $0x14c] ss:$52 sps:$4 sm:$0xff]  }
 0x3e3   :  { %v5883_v19 = vld [vmem:[#allocation3 + $0x1730] sm:$0xf]  ;;  %6723 = vmatprep.mubr.bf16.mxu0 %v16536_v52  ;;  %v16538_v20 = vld [vmem:[%s19463_s0 + $0x148] ss:$52 sps:$4 sm:$0xff]   ;;  %v7042_v52 = vld [vmem:[#allocation3 + $0x274] sm:$0xf] }
 0x3e4   :  { %v5834_v0 = vld [vmem:[#allocation3 + $0x1110] sm:$0xf]  ;;  %v13284_v39 = vcombine.low %v5882_v10, %v5883_v19  ;;  %14794 = vmatprep.subr.bf16.mxu0 %v13268_v56 }
 0x3e5   :  { %v5835_v59 = vld [vmem:[#allocation3 + $0x1130] sm:$0xf] }
 0x3e6   :  { %v5866_v16 = vld [vmem:[#allocation3 + $0x1510] sm:$0xf]  ;;  %v13260_v47 = vcombine.low %v5834_v0, %v5835_v59  ;;  %14834 = vmatprep.subr.bf16.mxu1 %v13284_v39  ;;  %v18009_v0 = vadd.f32 %v14281_v6, %v4079_v25  ;;  %v7024_v25 = vld [vmem:[#allocation3 + $0x34] sm:$0xf] }
 0x3e7   :  { %v5867_v8 = vld [vmem:[#allocation3 + $0x1530] sm:$0xf] }
 0x3e8   :  { %v5852_v40 = vld [vmem:[#allocation3 + $0x1350] sm:$0xf]  ;;  %v13276_v7 = vcombine.low %v5866_v16, %v5867_v8  ;;  %14795 = vmatpush3.bf16.msra.mxu0 %v13260_v47  ;;  %v14299_v8 = vpop.f32.mrb[137].mxu0 }
 0x3e9   :  { %v5853_v58 = vld [vmem:[#allocation3 + $0x1370] sm:$0xf]  ;;  %v14301_v34 = vpop.f32.mrb[138].mxu0  ;;  %6724 = vmatmul.mubr.bf16.gmra.mrb[236].mxu0 %v16538_v20 }
 0x3ea   :  { %v5884_v36 = vld [vmem:[#allocation3 + $0x1750] sm:$0xf]  ;;  %v13269_v27 = vcombine.low %v5852_v40, %v5853_v58  ;;  %14835 = vmatpush3.bf16.msra.mxu1 %v13276_v7  ;;  %v14300_v58 = vadd.f32 %v14299_v8, %v14298_v46  ;;  %v14302_v15 = vpop.f32.mrb[139].mxu0  ;;  %v14342_v7 = vpop.f32.mrb[139].mxu1  ;;  %v7041_v46 = vld [vmem:[#allocation3 + $0x254] sm:$0xf] }
 0x3eb   :  { %v5885_v23 = vld [vmem:[#allocation3 + $0x1770] sm:$0xf]  ;;  %v14303_v54 = vadd.f32 %v14302_v15, %v14301_v34  ;;  %v14343_v53 = vadd.f32 %v14342_v7, %v14341_v18  ;;  %v14304_v50 = vpop.f32.mrb[140].mxu0  ;;  %v7026_v34 = vld [vmem:[#allocation3 + $0x74] sm:$0xf] }
 0x3ec   :  { %v5836_v61 = vld [vmem:[#allocation3 + $0x1150] sm:$0xf]  ;;  %v13285_v5 = vcombine.low %v5884_v36, %v5885_v23  ;;  %14796 = vmatprep.subr.bf16.mxu0 %v13269_v27  ;;  %v4182_v35 = vadd.f32 %v14300_v58, %v17950_v12  ;;  %v7025_v58 = vld [vmem:[#allocation3 + $0x54] sm:$0xf] }
 0x3ed   :  { %v5837_v43 = vld [vmem:[#allocation3 + $0x1170] sm:$0xf] }
 0x3ee   :  { %v5868_v1 = vld [vmem:[#allocation3 + $0x1550] sm:$0xf]  ;;  %v13261_v48 = vcombine.low %v5836_v61, %v5837_v43  ;;  %14836 = vmatprep.subr.bf16.mxu1 %v13285_v5  ;;  %v7040_v5 = vld [vmem:[#allocation3 + $0x234] sm:$0xf]  ;;  %v18025_v6 = vadd.f32 %v14340_v28, %v4182_v35 }
 0x3ef   :  { %v5869_v51 = vld [vmem:[#allocation3 + $0x1570] sm:$0xf] }
 0x3f0   :  { %v5854_v37 = vld [vmem:[#allocation3 + $0x1390] sm:$0xf]  ;;  %v13277_v10 = vcombine.low %v5868_v1, %v5869_v51  ;;  %14797 = vmatpush3.bf16.msra.mxu0 %v13261_v48  ;;  %v13306_v48 = vcombine.low %v7039_v63, %v7040_v5 }
 0x3f1   :  { %v5855_v62 = vld [vmem:[#allocation3 + $0x13b0] sm:$0xf] }
 0x3f2   :  { %v5886_v9 = vld [vmem:[#allocation3 + $0x1790] sm:$0xf]  ;;  %v13270_v19 = vcombine.low %v5854_v37, %v5855_v62  ;;  %14837 = vmatpush3.bf16.msra.mxu1 %v13277_v10  ;;  %v4185_v37 = vadd.f32 %v14303_v54, %v17955_v41  ;;  %v16540_v41 = vld [vmem:[%s19463_s0 + $0x24] ss:$52 sps:$4 sm:$0xff]   ;;  %v13299_v54 = vcombine.low %v7025_v58, %v7026_v34 }
 0x3f3   :  { %v5887_v11 = vld [vmem:[#allocation3 + $0x17b0] sm:$0xf]  ;;  %6829 = vmatprep.mubr.bf16.mxu0 %v16540_v41 }
 0x3f4   :  { %v5838_v22 = vld [vmem:[#allocation3 + $0x1190] sm:$0xf]  ;;  %v13286_v56 = vcombine.low %v5886_v9, %v5887_v11  ;;  %14798 = vmatprep.subr.bf16.mxu0 %v13270_v19  ;;  %v7023_v11 = vld [vmem:[#allocation3 + $0x14] sm:$0xf]  ;;  %v18030_v19 = vadd.f32 %v14343_v53, %v4185_v37 }
 0x3f5   :  { %v5839_v21 = vld [vmem:[#allocation3 + $0x11b0] sm:$0xf] }
 0x3f6   :  { %v5870_v4 = vld [vmem:[#allocation3 + $0x1590] sm:$0xf]  ;;  %v13262_v13 = vcombine.low %v5838_v22, %v5839_v21  ;;  %14838 = vmatprep.subr.bf16.mxu1 %v13286_v56  ;;  %v14305_v21 = vpop.f32.mrb[141].mxu0 }
 0x3f7   :  { %v5871_v26 = vld [vmem:[#allocation3 + $0x15b0] sm:$0xf]  ;;  %v14306_v56 = vadd.f32 %v14305_v21, %v14304_v50 }
 0x3f8   :  { %v5856_v59 = vld [vmem:[#allocation3 + $0x13d0] sm:$0xf]  ;;  %v13278_v47 = vcombine.low %v5870_v4, %v5871_v26  ;;  %14799 = vmatpush3.bf16.msra.mxu0 %v13262_v13  ;;  %v14344_v4 = vpop.f32.mrb[140].mxu1  ;;  %v16541_v26 = vld [vmem:[%s19463_s0 + $0x2c] ss:$52 sps:$4 sm:$0xff]  }
 0x3f9   :  { %v5857_v16 = vld [vmem:[#allocation3 + $0x13f0] sm:$0xf]  ;;  %v4190_v55 = vadd.f32 %v14306_v56, %v17968_v29  ;;  %v16543_v29 = vld [vmem:[%s19463_s0 + $0x28] ss:$52 sps:$4 sm:$0xff]  }
 0x3fa   :  { %v16537_v24 = vld [vmem:[%s19463_s0 + $0x154] ss:$52 sps:$4 sm:$0xff]   ;;  %v13271_v61 = vcombine.low %v5856_v59, %v5857_v16  ;;  %v16539_v12 = vld [vmem:[%s19463_s0 + $0x150] ss:$52 sps:$4 sm:$0xff]   ;;  %14839 = vmatpush3.bf16.msra.mxu1 %v13278_v47  ;;  %v14307_v59 = vpop.f32.mrb[142].mxu0  ;;  %v14345_v16 = vpop.f32.mrb[141].mxu1 }
 0x3fb   :  { %6788 = vmatprep.mubr.bf16.mxu1 %v16537_v24  ;;  %v5888_v39 = vld [vmem:[#allocation3 + $0x17d0] sm:$0xf]  ;;  %v14308_v8 = vpop.f32.mrb[143].mxu0  ;;  %v14346_v14 = vadd.f32 %v14345_v16, %v14344_v4  ;;  %v14347_v24 = vpop.f32.mrb[142].mxu1  ;;  %v7029_v4 = vld [vmem:[#allocation3 + $0xd4] sm:$0xf] }
 0x3fc   :  { %v5889_v40 = vld [vmem:[#allocation3 + $0x17f0] sm:$0xf]  ;;  %6789 = vmatmul.mubr.bf16.gmra.mrb[236].mxu1 %v16539_v12  ;;  %14800 = vmatprep.subr.bf16.mxu0 %v13271_v61  ;;  %v14309_v13 = vadd.f32 %v14308_v8, %v14307_v59  ;;  %v7043_v61 = vld [vmem:[#allocation3 + $0x294] sm:$0xf] }
 0x3fd   :  { %v5840_v36 = vld [vmem:[#allocation3 + $0x11d0] sm:$0xf]  ;;  %v13287_v27 = vcombine.low %v5888_v39, %v5889_v40  ;;  %6894 = vmatprep.mubr.bf16.mxu1 %v16541_v26  ;;  %v13298_v39 = vcombine.low %v7023_v11, %v7024_v25  ;;  %v18043_v35 = vadd.f32 %v14346_v14, %v4190_v55  ;;  %v7030_v26 = vld [vmem:[#allocation3 + $0xf4] sm:$0xf] }
 0x3fe   :  { %v5841_v23 = vld [vmem:[#allocation3 + $0x11f0] sm:$0xf]  ;;  %v13301_v55 = vcombine.low %v7029_v4, %v7030_v26 }
 0x3ff   :  { %v5872_v43 = vld [vmem:[#allocation3 + $0x15d0] sm:$0xf]  ;;  %v13263_v62 = vcombine.low %v5840_v36, %v5841_v23  ;;  %14840 = vmatprep.subr.bf16.mxu1 %v13287_v27  ;;  %v14348_v36 = vpop.f32.mrb[143].mxu1  ;;  %v13307_v23 = vcombine.low %v7041_v46, %v7042_v52  ;;  %v7027_v27 = vld [vmem:[#allocation3 + $0x94] sm:$0xf] }
 0x400   :  { %v5873_v60 = vld [vmem:[#allocation3 + $0x15f0] sm:$0xf]  ;;  %v14349_v18 = vadd.f32 %v14348_v36, %v14347_v24  ;;  %v14350_v12 = vpop.f32.mrb[144].mxu1  ;;  %v16546_v24 = vld [vmem:[%s19463_s0 + $0x88] ss:$52 sps:$4 sm:$0xff]  }
 0x401   :  { %v5890_v1 = vld [vmem:[#allocation3 + $0x1810] sm:$0xf]  ;;  %v13279_v45 = vcombine.low %v5872_v43, %v5873_v60  ;;  %14801 = vmatpush3.bf16.msra.mxu0 %v13263_v62  ;;  %v7044_v43 = vld [vmem:[#allocation3 + $0x2b4] sm:$0xf]  ;;  %v4193_v60 = vadd.f32 %v14309_v13, %v17973_v42  ;;  %v16544_v42 = vld [vmem:[%s19463_s0 + $0x8c] ss:$52 sps:$4 sm:$0xff]  }
 0x402   :  { %v5891_v51 = vld [vmem:[#allocation3 + $0x1830] sm:$0xf]  ;;  %v13308_v53 = vcombine.low %v7043_v61, %v7044_v43  ;;  %v14351_v50 = vpop.f32.mrb[145].mxu1  ;;  %v7031_v36 = vld [vmem:[#allocation3 + $0x114] sm:$0xf] }
 0x403   :  { %v13288_v9 = vcombine.low %v5890_v1, %v5891_v51  ;;  %v5892_v22 = vld [vmem:[#allocation3 + $0x1850] sm:$0xf]  ;;  %14841 = vmatpush3.bf16.msra.mxu1 %v13279_v45  ;;  %v7028_v1 = vld [vmem:[#allocation3 + $0xb4] sm:$0xf]  ;;  %v14310_v51 = vpop.f32.mrb[144].mxu0  ;;  %v18048_v5 = vadd.f32 %v14349_v18, %v4193_v60 }
 0x404   :  { %v5893_v10 = vld [vmem:[#allocation3 + $0x1870] sm:$0xf]  ;;  %14878 = vmatprep.subr.bf16.mxu1 %v13306_v48  ;;  %v14311_v37 = vpop.f32.mrb[145].mxu0  ;;  %v7045_v45 = vld [vmem:[#allocation3 + $0x2d4] sm:$0xf]  ;;  %v14352_v48 = vadd.f32 %v14351_v50, %v14350_v12 }
 0x405   :  { %15832 = vmatprep.subr.bf16.mxu0 %v13288_v9  ;;  %v13289_v40 = vcombine.low %v5892_v22, %v5893_v10  ;;  %v5894_v15 = vld [vmem:[#allocation3 + $0x1890] sm:$0xf]  ;;  %v14312_v11 = vadd.f32 %v14311_v37, %v14310_v51  ;;  %v14313_v25 = vpop.f32.mrb[146].mxu0  ;;  %v14353_v22 = vpop.f32.mrb[146].mxu1  ;;  %v13300_v10 = vcombine.low %v7027_v27, %v7028_v1  ;;  %v7033_v12 = vld [vmem:[#allocation3 + $0x154] sm:$0xf] }
 0x406   :  { %v5895_v28 = vld [vmem:[#allocation3 + $0x18b0] sm:$0xf]  ;;  %6895 = vmatmul.mubr.bf16.vlgmr.msra.gmra.mrb[240].mxu1 %v16543_v29  ;;  %v14314_v41 = vpop.f32.mrb[147].mxu0  ;;  %v14354_v56 = vpop.f32.mrb[147].mxu1 }
 0x407   :  { %v16542_v47 = vld [vmem:[%s19463_s0 + $0x20] ss:$52 sps:$4 sm:$0xff]   ;;  %14879 = vmatpush3.bf16.msra.mxu1 %v13298_v39  ;;  %v13290_v7 = vcombine.low %v5894_v15, %v5895_v28  ;;  %v4198_v46 = vadd.f32 %v14312_v11, %v17986_v31  ;;  %v14315_v52 = vadd.f32 %v14314_v41, %v14313_v25  ;;  %v14355_v14 = vadd.f32 %v14354_v56, %v14353_v22  ;;  %v16547_v31 = vld [vmem:[%s19463_s0 + $0x90] ss:$52 sps:$4 sm:$0xff]   ;;  %v14316_v15 = vpop.f32.mrb[148].mxu0  ;;  %v14356_v60 = vpop.f32.mrb[148].mxu1 }
 0x408   :  { %6830 = vmatmul.mubr.bf16.vlgmr.msra.gmra.mrb[240].mxu0 %v16542_v47  ;;  %14880 = vmatprep.subr.bf16.mxu1 %v13307_v23  ;;  %v5896_v20 = vld [vmem:[#allocation3 + $0x18d0] sm:$0xf]  ;;  %v7047_v39 = vld [vmem:[#allocation3 + $0x314] sm:$0xf]  ;;  %v14317_v43 = vpop.f32.mrb[149].mxu0  ;;  %v14357_v51 = vpop.f32.mrb[149].mxu1 }
 0x409   :  { %15833 = vmatpush3.bf16.msra.mxu0 %v13288_v9  ;;  %6837 = vmatprep.mubr.bf16.mxu0 %v16544_v42  ;;  %v5897_v63 = vld [vmem:[#allocation3 + $0x18f0] sm:$0xf]  ;;  %v7046_v9 = vld [vmem:[#allocation3 + $0x2f4] sm:$0xf]  ;;  %v4201_v58 = vadd.f32 %v14315_v52, %v17991_v32  ;;  %v18061_v34 = vadd.f32 %v14352_v48, %v4198_v46  ;;  %v14318_v27 = vadd.f32 %v14317_v43, %v14316_v15  ;;  %v14319_v1 = vpop.f32.mrb[150].mxu0 }
 0x40a   :  { %15834 = vmatprep.subr.bf16.mxu0 %v13289_v40  ;;  %v16545_v62 = vld [vmem:[%s19463_s0 + $0x94] ss:$52 sps:$4 sm:$0xff]   ;;  %v13291_v21 = vcombine.low %v5896_v20, %v5897_v63  ;;  %v13309_v59 = vcombine.low %v7045_v45, %v7046_v9  ;;  %v16549_v29 = vld [vmem:[%s19463_s0 + $0xfc] ss:$52 sps:$4 sm:$0xff]   ;;  %v14320_v42 = vpop.f32.mrb[151].mxu0  ;;  %v14359_v20 = vpop.f32.mrb[150].mxu1 }
 0x40b   :  { %6902 = vmatprep.mubr.bf16.mxu1 %v16545_v62  ;;  %14881 = vmatpush3.bf16.msra.mxu1 %v13299_v54  ;;  %v5898_v16 = vld [vmem:[#allocation3 + $0x1910] sm:$0xf]  ;;  %v7032_v23 = vld [vmem:[#allocation3 + $0x134] sm:$0xf]  ;;  %v18066_v61 = vadd.f32 %v14355_v14, %v4201_v58  ;;  %v4206_v45 = vadd.f32 %v14318_v27, %v18004_v57  ;;  %v14321_v9 = vadd.f32 %v14320_v42, %v14319_v1  ;;  %v14360_v11 = vpop.f32.mrb[151].mxu1 }
 0x40c   :  { %14882 = vmatprep.subr.bf16.mxu1 %v13308_v53  ;;  %v5899_v8 = vld [vmem:[#allocation3 + $0x1930] sm:$0xf]  ;;  %v7049_v54 = vld [vmem:[#allocation3 + $0x354] sm:$0xf]  ;;  %v14358_v53 = vadd.f32 %v14357_v51, %v14356_v60  ;;  %v13302_v63 = vcombine.low %v7031_v36, %v7032_v23  ;;  %v14361_v48 = vadd.f32 %v14360_v11, %v14359_v20  ;;  %v14390_v36 = vpop.f32.mrb[152].mxu1 }
 0x40d   :  { %15835 = vmatpush3.bf16.msra.mxu0 %v13289_v40  ;;  %v7048_v40 = vld [vmem:[#allocation3 + $0x334] sm:$0xf]  ;;  %v13292_v13 = vcombine.low %v5898_v16, %v5899_v8  ;;  %v5900_v18 = vld [vmem:[#allocation3 + $0x1950] sm:$0xf]  ;;  %v4209_v4 = vadd.f32 %v14321_v9, %v18009_v0  ;;  %v15802_v16 = vpop.f32.mrb[152].mxu0 }
 0x40e   :  { %15836 = vmatprep.subr.bf16.mxu0 %v13290_v7  ;;  %6903 = vmatmul.mubr.bf16.gmra.mrb[244].mxu1 %v16547_v31  ;;  %v16548_v32 = vld [vmem:[%s19463_s0 + $0xf4] ss:$52 sps:$4 sm:$0xff]   ;;  %v13310_v28 = vcombine.low %v7047_v39, %v7048_v40  ;;  %v16550_v22 = vld [vmem:[%s19463_s0 + $0xf0] ss:$52 sps:$4 sm:$0xff]   ;;  %v16551_v57 = vld [vmem:[%s19463_s0 + $0xf8] ss:$52 sps:$4 sm:$0xff]   ;;  %v18079_v26 = vadd.f32 %v14358_v53, %v4206_v45  ;;  %v4320_v40 = vadd.f32 %v15802_v16, %v18043_v35 }
 0x40f   :  { %14883 = vmatpush3.bf16.msra.mxu1 %v13300_v10  ;;  %v5901_v47 = vld [vmem:[#allocation3 + $0x1970] sm:$0xf]  ;;  %6910 = vmatprep.mubr.bf16.mxu1 %v16549_v29  ;;  %v7034_v62 = vld [vmem:[#allocation3 + $0x174] sm:$0xf]  ;;  %v18084_v39 = vadd.f32 %v14361_v48, %v4209_v4  ;;  %v4311_v58 = vpop.f32.mrb[153].mxu0 }
 0x410   :  { %6838 = vmatmul.mubr.bf16.gmra.mrb[244].mxu0 %v16546_v24  ;;  %14884 = vmatprep.subr.bf16.mxu1 %v13309_v59  ;;  %v13293_v37 = vcombine.low %v5900_v18, %v5901_v47  ;;  %v5902_v50 = vld [vmem:[#allocation3 + $0x1990] sm:$0xf]  ;;  %v7051_v10 = vld [vmem:[#allocation3 + $0x394] sm:$0xf]  ;;  %v13303_v46 = vcombine.low %v7033_v12, %v7034_v62  ;;  %v18090_v23 = vld [vmem:[#allocation6 + $0x2] ss:$0 sm:$0xff]  ;;  %v4312_v15 = vadd.f32 %v4311_v58, %v18025_v6 }
 0x411   :  { %15837 = vmatpush3.bf16.msra.mxu0 %v13290_v7  ;;  %6845 = vmatprep.mubr.bf16.mxu0 %v16548_v32  ;;  %v7050_v7 = vld [vmem:[#allocation3 + $0x374] sm:$0xf]  ;;  %v5903_v41 = vld [vmem:[#allocation3 + $0x19b0] sm:$0xf]  ;;  %v15803_v32 = vpop.f32.mrb[154].mxu0  ;;  %v14391_v47 = vpop.f32.mrb[153].mxu1 }
 0x412   :  { %15838 = vmatprep.subr.bf16.mxu0 %v13291_v21  ;;  %v13311_v25 = vcombine.low %v7049_v54, %v7050_v7  ;;  %v13294_v52 = vcombine.low %v5902_v50, %v5903_v41  ;;  %v7035_v56 = vld [vmem:[#allocation3 + $0x194] sm:$0xf]  ;;  %v16552_v0 = vld [vmem:[%s19463_s0 + $0x15c] ss:$52 sps:$4 sm:$0xff]   ;;  %v4344_v35 = vmax.f32 %v4320_v40, 0.0  ;;  %v4323_v43 = vadd.f32 %v15803_v32, %v18048_v5  ;;  %v4314_v60 = vpop.f32.mrb[155].mxu0 }
 0x413   :  { %14885 = vmatpush3.bf16.msra.mxu1 %v13301_v55  ;;  %v7036_v59 = vld [vmem:[#allocation3 + $0x1b4] sm:$0xf]  ;;  %v5904_v14 = vld [vmem:[#allocation3 + $0x19d0] sm:$0xf]  ;;  %v14393_v7 = vpop.f32.mrb[154].mxu1  ;;  %v18096_v27 = vadd.f32 %v14391_v47, %v14390_v36  ;;  %v4342_v1 = vmax.f32 %v4312_v15, 0.0  ;;  %v4315_v6 = vadd.f32 %v4314_v60, %v18030_v19 }
 0x414   :  { %14886 = vmatprep.subr.bf16.mxu1 %v13310_v28  ;;  %v5905_v24 = vld [vmem:[#allocation3 + $0x19f0] sm:$0xf]  ;;  %v16553_v31 = vld [vmem:[%s19463_s0 + $0x164] ss:$52 sps:$4 sm:$0xff]   ;;  %v13304_v28 = vcombine.low %v7035_v56, %v7036_v59  ;;  %v14394_v20 = vpop.f32.mrb[155].mxu1 }
 0x415   :  { %15839 = vmatpush3.bf16.msra.mxu0 %v13291_v21  ;;  %v7052_v21 = vld [vmem:[#allocation3 + $0x3b4] sm:$0xf]  ;;  %v13295_v29 = vcombine.low %v5904_v14, %v5905_v24  ;;  %v18103_v45 = vadd.f32 %v14394_v20, %v14393_v7  ;;  %v4357_v9 = vmul.f32 %v18090_v23, %v4342_v1  ;;  %v4343_v19 = vmax.f32 %v4315_v6, 0.0 }
 0x416   :  { %15840 = vmatprep.subr.bf16.mxu0 %v13292_v13  ;;  %6911 = vmatmul.mubr.bf16.gmra.mrb[248].mxu1 %v16551_v57  ;;  %v13312_v8 = vcombine.low %v7051_v10, %v7052_v21  ;;  %v7053_v55 = vld [vmem:[#allocation3 + $0x3d4] sm:$0xf] }
 0x417   :  { %14887 = vmatpush3.bf16.msra.mxu1 %v13302_v63  ;;  %6918 = vmatprep.mubr.bf16.mxu1 %v16553_v31  ;;  %v18093_v18 = vld [vmem:[#allocation3 + $0x1d4] sm:$0xf]  ;;  %v4359_v63 = vmul.f32 %v18090_v23, %v4344_v35  ;;  %v4358_v57 = vmul.f32 %v18090_v23, %v4343_v19  ;;  %v18119_v16 = vadd.f32 %v4357_v9, %v17769_v38 }
 0x418   :  { %6846 = vmatmul.mubr.bf16.gmra.mrb[248].mxu0 %v16550_v22  ;;  %14888 = vmatprep.subr.bf16.mxu1 %v13311_v25  ;;  %v7038_v54 = vld [vmem:[#allocation3 + $0x1f4] sm:$0xf] }
 0x419   :  { %15841 = vmatpush3.bf16.msra.mxu0 %v13292_v13  ;;  %6853 = vmatprep.mubr.bf16.mxu0 %v16552_v0  ;;  %v7054_v13 = vld [vmem:[#allocation3 + $0x3f4] sm:$0xf]  ;;  %v13305_v25 = vcombine.low %v18093_v18, %v7038_v54  ;;  %v18111_v41 = vadd.f32 %v4359_v63, %v17818_v30 }
 0x41a   :  { %15842 = vmatprep.subr.bf16.mxu0 %v13293_v37  ;;  %v13313_v51 = vcombine.low %v7053_v55, %v7054_v13  ;;  %v7071_v42 = vld [vmem:[#allocation3 + $0x614] sm:$0xf]  ;;  %v14396_v55 = vpop.f32.mrb[156].mxu1 }
 0x41b   :  { %14889 = vmatpush3.bf16.msra.mxu1 %v13303_v46  ;;  %v7072_v53 = vld [vmem:[#allocation3 + $0x634] sm:$0xf]  ;;  %v15806_v46 = vpop.f32.mrb[156].mxu0 }
 0x41c   :  { %14890 = vmatprep.subr.bf16.mxu1 %v13312_v8  ;;  %v16554_v5 = vld [vmem:[%s19463_s0 + $0x158] ss:$52 sps:$4 sm:$0xff]   ;;  %v16555_v11 = vld [vmem:[%s19463_s0 + $0x160] ss:$52 sps:$4 sm:$0xff]   ;;  %v13322_v22 = vcombine.low %v7071_v42, %v7072_v53  ;;  %v4336_v8 = vadd.f32 %v15806_v46, %v18079_v26  ;;  %v4327_v14 = vpop.f32.mrb[157].mxu0  ;;  %v14397_v26 = vpop.f32.mrb[157].mxu1 }
 0x41d   :  { %15843 = vmatpush3.bf16.msra.mxu0 %v13293_v37  ;;  %v4345_v37 = vmax.f32 %v4323_v43, 0.0  ;;  %v7103_v12 = vld [vmem:[#allocation3 + $0xa14] sm:$0xf]  ;;  %v4328_v13 = vadd.f32 %v4327_v14, %v18061_v34  ;;  %v15807_v38 = vpop.f32.mrb[158].mxu0  ;;  %v14399_v54 = vpop.f32.mrb[158].mxu1  ;;  %v18135_v34 = vadd.f32 %v14397_v26, %v14396_v55 }
 0x41e   :  { %15844 = vmatprep.subr.bf16.mxu0 %v13294_v52  ;;  %v7104_v62 = vld [vmem:[#allocation3 + $0xa34] sm:$0xf]  ;;  %6919 = vmatmul.mubr.bf16.gmra.mrb[252].mxu1 %v16555_v11  ;;  %v4348_v18 = vmax.f32 %v4336_v8, 0.0  ;;  %v4339_v47 = vadd.f32 %v15807_v38, %v18084_v39  ;;  %v4330_v35 = vpop.f32.mrb[159].mxu0 }
 0x41f   :  { %v7055_v50 = vld [vmem:[#allocation3 + $0x414] sm:$0xf]  ;;  %v4360_v48 = vmul.f32 %v18090_v23, %v4345_v37  ;;  %14891 = vmatpush3.bf16.msra.mxu1 %v13304_v28  ;;  %v13338_v56 = vcombine.low %v7103_v12, %v7104_v62  ;;  %v18132_v28 = vadd.f32 %v4358_v57, %v17787_v33  ;;  %v4331_v7 = vadd.f32 %v4330_v35, %v18066_v61  ;;  %v14400_v33 = vpop.f32.mrb[159].mxu1 }
 0x420   :  { %6854 = vmatmul.mubr.bf16.gmra.mrb[252].mxu0 %v16554_v5  ;;  %v7056_v10 = vld [vmem:[#allocation3 + $0x434] sm:$0xf]  ;;  %14892 = vmatprep.subr.bf16.mxu1 %v13313_v51  ;;  %v4363_v42 = vmul.f32 %v18090_v23, %v4348_v18  ;;  %v4349_v53 = vmax.f32 %v4339_v47, 0.0  ;;  %v18142_v37 = vadd.f32 %v14400_v33, %v14399_v54  ;;  %v16562_v18 = vld [vmem:[%s19463_s0 + $0x168] ss:$52 sps:$4 sm:$0xff]  }
 0x421   :  { %15845 = vmatpush3.bf16.msra.mxu0 %v13294_v52  ;;  %v7087_v21 = vld [vmem:[#allocation3 + $0x814] sm:$0xf]  ;;  %v16556_v52 = vld [vmem:[%s19463_s0 + $0x30] ss:$52 sps:$4 sm:$0xff]   ;;  %v18122_v0 = vadd.f32 %v4360_v48, %v17833_v44  ;;  %v13314_v36 = vcombine.low %v7055_v50, %v7056_v10  ;;  %v4347_v61 = vmax.f32 %v4331_v7, 0.0 }
 0x422   :  { %15846 = vmatprep.subr.bf16.mxu0 %v13295_v29  ;;  %v7088_v4 = vld [vmem:[#allocation3 + $0x834] sm:$0xf]  ;;  %15848 = vmatprep.mubr.bf16.mxu0 %v16556_v52  ;;  %v18150_v19 = vadd.f32 %v4363_v42, %v17876_v3  ;;  %v4364_v11 = vmul.f32 %v18090_v23, %v4349_v53 }
 0x423   :  { %v7073_v30 = vld [vmem:[#allocation3 + $0x654] sm:$0xf]  ;;  %v13330_v44 = vcombine.low %v7087_v21, %v7088_v4  ;;  %14893 = vmatpush3.bf16.msra.mxu1 %v13305_v25  ;;  %v4362_v10 = vmul.f32 %v18090_v23, %v4347_v61  ;;  %v16565_v61 = vld [vmem:[%s19463_s0 + $0xc] ss:$52 sps:$4 sm:$0xff]  }
 0x424   :  { %v7074_v59 = vld [vmem:[#allocation3 + $0x674] sm:$0xf]  ;;  %14958 = vmatprep.subr.bf16.mxu1 %v13338_v56  ;;  %v18161_v56 = vadd.f32 %v4364_v11, %v17887_v17 }
 0x425   :  { %v16557_v24 = vld [vmem:[%s19463_s0 + $0x4] ss:$52 sps:$4 sm:$0xff]   ;;  %15847 = vmatpush3.bf16.msra.mxu0 %v13295_v29  ;;  %v13323_v43 = vcombine.low %v7073_v30, %v7074_v59  ;;  %v4346_v29 = vmax.f32 %v4328_v13, 0.0  ;;  %v16559_v12 = vld [vmem:[%s19463_s0] ss:$52 sps:$4 sm:$0xff]   ;;  %v14402_v30 = vpop.f32.mrb[160].mxu1 }
 0x426   :  { %7894 = vmatprep.mubr.bf16.mxu1 %v16557_v24  ;;  %v18128_v40 = vld [vmem:[#allocation3 + $0x454] sm:$0xf]  ;;  %14918 = vmatprep.subr.bf16.mxu0 %v13322_v22 }
 0x427   :  { %v7105_v58 = vld [vmem:[#allocation3 + $0xa54] sm:$0xf]  ;;  %v4361_v5 = vmul.f32 %v18090_v23, %v4346_v29  ;;  %7895 = vmatmul.mubr.bf16.vlgmr.msra.gmra.mrb[0].mxu1 %v16559_v12  ;;  %v16561_v23 = vld [vmem:[%s19463_s0 + $0x6c] ss:$52 sps:$4 sm:$0xff]  }
 0x428   :  { %v7106_v31 = vld [vmem:[#allocation3 + $0xa74] sm:$0xf]  ;;  %14959 = vmatpush3.bf16.msra.mxu1 %v13330_v44  ;;  %7902 = vmatprep.mubr.bf16.mxu1 %v16561_v23  ;;  %v18190_v23 = vld [vmem:[%s19465_s2 + $0x3] ss:$0 sm:$0xff] }
 0x429   :  { %v7058_v15 = vld [vmem:[#allocation3 + $0x474] sm:$0xf]  ;;  %v13339_v1 = vcombine.low %v7105_v58, %v7106_v31  ;;  %v18158_v52 = vadd.f32 %v4361_v5, %v17849_v49  ;;  %v14403_v58 = vpop.f32.mrb[161].mxu1  ;;  %v18167_v31 = vadd.f32 %v4362_v10, %v17858_v2 }
 0x42a   :  { %v7089_v32 = vld [vmem:[#allocation3 + $0x854] sm:$0xf]  ;;  %v13315_v62 = vcombine.low %v18128_v40, %v7058_v15  ;;  %v18169_v55 = vadd.f32 %v14403_v58, %v14402_v30  ;;  %v14405_v13 = vpop.f32.mrb[162].mxu1 }
 0x42b   :  { %v7090_v60 = vld [vmem:[#allocation3 + $0x874] sm:$0xf]  ;;  %14960 = vmatprep.subr.bf16.mxu1 %v13339_v1  ;;  %v14406_v15 = vpop.f32.mrb[163].mxu1 }
 0x42c   :  { %v7075_v6 = vld [vmem:[#allocation3 + $0x694] sm:$0xf]  ;;  %v13331_v9 = vcombine.low %v7089_v32, %v7090_v60  ;;  %v18174_v2 = vadd.f32 %v14406_v15, %v14405_v13  ;;  %v16567_v15 = vld [vmem:[%s19463_s0 + $0x13c] ss:$52 sps:$4 sm:$0xff]  }
 0x42d   :  { %v7076_v51 = vld [vmem:[#allocation3 + $0x6b4] sm:$0xf] }
 0x42e   :  { %v16558_v39 = vld [vmem:[%s19463_s0 + $0x98] ss:$52 sps:$4 sm:$0xff]   ;;  %v13324_v25 = vcombine.low %v7075_v6, %v7076_v51  ;;  %v16560_v21 = vld [vmem:[%s19463_s0 + $0x100] ss:$52 sps:$4 sm:$0xff]   ;;  %14961 = vmatpush3.bf16.msra.mxu1 %v13331_v9 }
 0x42f   :  { %15849 = vmatmul.mubr.bf16.vlgmr.msra.gmra.mrb[0].mxu0 %v16558_v39  ;;  %v7107_v20 = vld [vmem:[#allocation3 + $0xa94] sm:$0xf] }
 0x430   :  { %v7108_v63 = vld [vmem:[#allocation3 + $0xab4] sm:$0xf]  ;;  %14919 = vmatpush3.bf16.msra.mxu0 %v13314_v36  ;;  %15852 = vmatprep.mubr.bf16.mxu0 %v16560_v21 }
 0x431   :  { %14920 = vmatprep.subr.bf16.mxu0 %v13323_v43  ;;  %v7059_v50 = vld [vmem:[#allocation3 + $0x494] sm:$0xf]  ;;  %v13340_v4 = vcombine.low %v7107_v20, %v7108_v63  ;;  %v16563_v43 = vld [vmem:[%s19463_s0 + $0x68] ss:$52 sps:$4 sm:$0xff]   ;;  %v14408_v20 = vpop.f32.mrb[164].mxu1 }
 0x432   :  { %v7060_v48 = vld [vmem:[#allocation3 + $0x4b4] sm:$0xf]  ;;  %7903 = vmatmul.mubr.bf16.gmra.mrb[4].mxu1 %v16563_v43 }
 0x433   :  { %v7091_v22 = vld [vmem:[#allocation3 + $0x894] sm:$0xf]  ;;  %v13316_v14 = vcombine.low %v7059_v50, %v7060_v48  ;;  %14962 = vmatprep.subr.bf16.mxu1 %v13340_v4 }
 0x434   :  { %v7092_v57 = vld [vmem:[#allocation3 + $0x8b4] sm:$0xf]  ;;  %14921 = vmatpush3.bf16.msra.mxu0 %v13315_v62  ;;  %v14409_v62 = vpop.f32.mrb[165].mxu1 }
 0x435   :  { %v7077_v3 = vld [vmem:[#allocation3 + $0x6d4] sm:$0xf]  ;;  %14922 = vmatprep.subr.bf16.mxu0 %v13324_v25  ;;  %v13332_v49 = vcombine.low %v7091_v22, %v7092_v57  ;;  %v18185_v25 = vadd.f32 %v14409_v62, %v14408_v20  ;;  %v14411_v50 = vpop.f32.mrb[166].mxu1 }
 0x436   :  { %v7078_v46 = vld [vmem:[#allocation3 + $0x6f4] sm:$0xf]  ;;  %v14412_v4 = vpop.f32.mrb[167].mxu1 }
 0x437   :  { %v7109_v59 = vld [vmem:[#allocation3 + $0xad4] sm:$0xf]  ;;  %v13325_v17 = vcombine.low %v7077_v3, %v7078_v46  ;;  %15853 = vmatmul.mubr.bf16.gmra.mrb[4].mxu0 %v16562_v18  ;;  %14963 = vmatpush3.bf16.msra.mxu1 %v13332_v49  ;;  %v18192_v30 = vadd.f32 %v14412_v4, %v14411_v50 }
 0x438   :  { %v7110_v8 = vld [vmem:[#allocation3 + $0xaf4] sm:$0xf]  ;;  %14923 = vmatpush3.bf16.msra.mxu0 %v13316_v14  ;;  %7959 = vmatprep.mubr.bf16.mxu0 %v16565_v61  ;;  %v16566_v14 = vld [vmem:[%s19463_s0 + $0xd0] ss:$52 sps:$4 sm:$0xff]  }
 0x439   :  { %v7061_v24 = vld [vmem:[#allocation3 + $0x4d4] sm:$0xf]  ;;  %v13341_v44 = vcombine.low %v7109_v59, %v7110_v8  ;;  %14924 = vmatprep.subr.bf16.mxu0 %v13325_v17 }
 0x43a   :  { %v7062_v40 = vld [vmem:[#allocation3 + $0x4f4] sm:$0xf] }
 0x43b   :  { %v7093_v38 = vld [vmem:[#allocation3 + $0x8d4] sm:$0xf]  ;;  %v13317_v60 = vcombine.low %v7061_v24, %v7062_v40  ;;  %14964 = vmatprep.subr.bf16.mxu1 %v13341_v44  ;;  %v5247_v44 = vadd.f32 %v18096_v27, %v18190_v23  ;;  %v5250_v27 = vadd.f32 %v18103_v45, %v18190_v23 }
 0x43c   :  { %v7094_v36 = vld [vmem:[#allocation3 + $0x8f4] sm:$0xf] }
 0x43d   :  { %v7079_v32 = vld [vmem:[#allocation3 + $0x714] sm:$0xf]  ;;  %v13333_v54 = vcombine.low %v7093_v38, %v7094_v36  ;;  %14925 = vmatpush3.bf16.msra.mxu0 %v13317_v60  ;;  %v14430_v36 = vpop.f32.mrb[160].mxu0 }
 0x43e   :  { %v7080_v26 = vld [vmem:[#allocation3 + $0x734] sm:$0xf] }
 0x43f   :  { %v7111_v47 = vld [vmem:[#allocation3 + $0xb14] sm:$0xf]  ;;  %v13326_v29 = vcombine.low %v7079_v32, %v7080_v26  ;;  %14965 = vmatpush3.bf16.msra.mxu1 %v13333_v54 }
 0x440   :  { %v7112_v35 = vld [vmem:[#allocation3 + $0xb34] sm:$0xf] }
 0x441   :  { %v7063_v7 = vld [vmem:[#allocation3 + $0x514] sm:$0xf]  ;;  %v13342_v33 = vcombine.low %v7111_v47, %v7112_v35  ;;  %14926 = vmatprep.subr.bf16.mxu0 %v13326_v29  ;;  %v14431_v47 = vpop.f32.mrb[161].mxu0  ;;  %v14470_v35 = vpop.f32.mrb[168].mxu1 }
 0x442   :  { %v7064_v1 = vld [vmem:[#allocation3 + $0x534] sm:$0xf]  ;;  %v14432_v54 = vadd.f32 %v14431_v47, %v14430_v36  ;;  %v14433_v29 = vpop.f32.mrb[162].mxu0 }
 0x443   :  { %v7095_v6 = vld [vmem:[#allocation3 + $0x914] sm:$0xf]  ;;  %v13318_v12 = vcombine.low %v7063_v7, %v7064_v1  ;;  %14966 = vmatprep.subr.bf16.mxu1 %v13342_v33  ;;  %v14471_v7 = vpop.f32.mrb[169].mxu1  ;;  %v14434_v33 = vpop.f32.mrb[163].mxu0 }
 0x444   :  { %v16564_v51 = vld [vmem:[%s19463_s0 + $0xd4] ss:$52 sps:$4 sm:$0xff]   ;;  %v14435_v61 = vadd.f32 %v14434_v33, %v14433_v29  ;;  %v16568_v4 = vld [vmem:[%s19463_s0 + $0x138] ss:$52 sps:$4 sm:$0xff]  }
 0x445   :  { %7910 = vmatprep.mubr.bf16.mxu1 %v16564_v51  ;;  %v7096_v42 = vld [vmem:[#allocation3 + $0x934] sm:$0xf]  ;;  %14927 = vmatpush3.bf16.msra.mxu0 %v13318_v12  ;;  %v5312_v12 = vadd.f32 %v14432_v54, %v5247_v44 }
 0x446   :  { %v7081_v53 = vld [vmem:[#allocation3 + $0x754] sm:$0xf]  ;;  %v13334_v48 = vcombine.low %v7095_v6, %v7096_v42  ;;  %7911 = vmatmul.mubr.bf16.gmra.mrb[8].mxu1 %v16566_v14  ;;  %v14472_v42 = vadd.f32 %v14471_v7, %v14470_v35 }
 0x447   :  { %v7082_v39 = vld [vmem:[#allocation3 + $0x774] sm:$0xf]  ;;  %7918 = vmatprep.mubr.bf16.mxu1 %v16567_v15 }
 0x448   :  { %v7113_v63 = vld [vmem:[#allocation3 + $0xb54] sm:$0xf]  ;;  %v13327_v22 = vcombine.low %v7081_v53, %v7082_v39  ;;  %14967 = vmatpush3.bf16.msra.mxu1 %v13334_v48  ;;  %v14473_v53 = vpop.f32.mrb[170].mxu1 }
 0x449   :  { %v7114_v5 = vld [vmem:[#allocation3 + $0xb74] sm:$0xf]  ;;  %v14474_v62 = vpop.f32.mrb[171].mxu1 }
 0x44a   :  { %v7065_v9 = vld [vmem:[#allocation3 + $0x554] sm:$0xf]  ;;  %v13343_v57 = vcombine.low %v7113_v63, %v7114_v5  ;;  %14928 = vmatprep.subr.bf16.mxu0 %v13327_v22  ;;  %v14475_v45 = vadd.f32 %v14474_v62, %v14473_v53  ;;  %v14476_v15 = vpop.f32.mrb[172].mxu1 }
 0x44b   :  { %v7066_v11 = vld [vmem:[#allocation3 + $0x574] sm:$0xf]  ;;  %v14477_v35 = vpop.f32.mrb[173].mxu1 }
 0x44c   :  { %v7097_v10 = vld [vmem:[#allocation3 + $0x954] sm:$0xf]  ;;  %v13319_v24 = vcombine.low %v7065_v9, %v7066_v11  ;;  %14968 = vmatprep.subr.bf16.mxu1 %v13343_v57  ;;  %v14478_v7 = vadd.f32 %v14477_v35, %v14476_v15 }
 0x44d   :  { %v7098_v21 = vld [vmem:[#allocation3 + $0x974] sm:$0xf] }
 0x44e   :  { %v7083_v3 = vld [vmem:[#allocation3 + $0x794] sm:$0xf]  ;;  %v13335_v58 = vcombine.low %v7097_v10, %v7098_v21  ;;  %14929 = vmatpush3.bf16.msra.mxu0 %v13319_v24  ;;  %v18204_v10 = vadd.f32 %v14472_v42, %v5312_v12  ;;  %v5315_v21 = vadd.f32 %v14435_v61, %v5250_v27  ;;  %7919 = vmatmul.mubr.bf16.gmra.mrb[12].mxu1 %v16568_v4  ;;  %v14479_v27 = vpop.f32.mrb[174].mxu1  ;;  %v16570_v61 = vld [vmem:[%s19463_s0 + $0x8] ss:$52 sps:$4 sm:$0xff]  }
 0x44f   :  { %v7084_v46 = vld [vmem:[#allocation3 + $0x7b4] sm:$0xf] }
 0x450   :  { %v7115_v59 = vld [vmem:[#allocation3 + $0xb94] sm:$0xf]  ;;  %v13328_v49 = vcombine.low %v7083_v3, %v7084_v46  ;;  %14969 = vmatpush3.bf16.msra.mxu1 %v13335_v58  ;;  %v14436_v58 = vpop.f32.mrb[164].mxu0 }
 0x451   :  { %v7116_v8 = vld [vmem:[#allocation3 + $0xbb4] sm:$0xf]  ;;  %v14437_v44 = vpop.f32.mrb[165].mxu0 }
 0x452   :  { %v7067_v40 = vld [vmem:[#allocation3 + $0x594] sm:$0xf]  ;;  %v13344_v32 = vcombine.low %v7115_v59, %v7116_v8  ;;  %14930 = vmatprep.subr.bf16.mxu0 %v13328_v49  ;;  %v5255_v49 = vadd.f32 %v18135_v34, %v18190_v23  ;;  %v14439_v47 = vpop.f32.mrb[166].mxu0  ;;  %v5258_v34 = vadd.f32 %v18142_v37, %v18190_v23 }
 0x453   :  { %v7068_v17 = vld [vmem:[#allocation3 + $0x5b4] sm:$0xf]  ;;  %v14440_v29 = vpop.f32.mrb[167].mxu0 }
 0x454   :  { %v7099_v13 = vld [vmem:[#allocation3 + $0x994] sm:$0xf]  ;;  %v13320_v1 = vcombine.low %v7067_v40, %v7068_v17  ;;  %14970 = vmatprep.subr.bf16.mxu1 %v13344_v32  ;;  %v18209_v40 = vadd.f32 %v14475_v45, %v5315_v21  ;;  %v14441_v42 = vadd.f32 %v14440_v29, %v14439_v47 }
 0x455   :  { %v7100_v38 = vld [vmem:[#allocation3 + $0x9b4] sm:$0xf] }
 0x456   :  { %v7085_v26 = vld [vmem:[#allocation3 + $0x7d4] sm:$0xf]  ;;  %v13336_v39 = vcombine.low %v7099_v13, %v7100_v38  ;;  %14931 = vmatpush3.bf16.msra.mxu0 %v13320_v1 }
 0x457   :  { %v7086_v18 = vld [vmem:[#allocation3 + $0x7f4] sm:$0xf] }
 0x458   :  { %v7117_v43 = vld [vmem:[#allocation3 + $0xbd4] sm:$0xf]  ;;  %v13329_v20 = vcombine.low %v7085_v26, %v7086_v18  ;;  %14971 = vmatpush3.bf16.msra.mxu1 %v13336_v39  ;;  %v14438_v18 = vadd.f32 %v14437_v44, %v14436_v58  ;;  %v14480_v39 = vpop.f32.mrb[175].mxu1  ;;  %v5266_v44 = vadd.f32 %v18174_v2, %v18190_v23 }
 0x459   :  { %v7118_v60 = vld [vmem:[#allocation3 + $0xbf4] sm:$0xf]  ;;  %v14481_v37 = vadd.f32 %v14480_v39, %v14479_v27  ;;  %v16574_v39 = vld [vmem:[%s19463_s0 + $0x70] ss:$52 sps:$4 sm:$0xff]  }
 0x45a   :  { %v7069_v6 = vld [vmem:[#allocation3 + $0x5d4] sm:$0xf]  ;;  %v13345_v9 = vcombine.low %v7117_v43, %v7118_v60  ;;  %14932 = vmatprep.subr.bf16.mxu0 %v13329_v20  ;;  %v5320_v53 = vadd.f32 %v14438_v18, %v5255_v49 }
 0x45b   :  { %v7070_v51 = vld [vmem:[#allocation3 + $0x5f4] sm:$0xf] }
 0x45c   :  { %v7101_v63 = vld [vmem:[#allocation3 + $0x9d4] sm:$0xf]  ;;  %v13321_v57 = vcombine.low %v7069_v6, %v7070_v51  ;;  %14972 = vmatprep.subr.bf16.mxu1 %v13345_v9  ;;  %v18221_v9 = vadd.f32 %v14478_v7, %v5320_v53 }
 0x45d   :  { %v7102_v5 = vld [vmem:[#allocation3 + $0x9f4] sm:$0xf] }
 0x45e   :  { %v7135_v11 = vld [vmem:[#allocation3 + $0xe14] sm:$0xf]  ;;  %v13337_v46 = vcombine.low %v7101_v63, %v7102_v5  ;;  %14933 = vmatpush3.bf16.msra.mxu0 %v13321_v57 }
 0x45f   :  { %v7136_v50 = vld [vmem:[#allocation3 + $0xe34] sm:$0xf] }
 0x460   :  { %v7167_v48 = vld [vmem:[#allocation3 + $0x1214] sm:$0xf]  ;;  %v13354_v59 = vcombine.low %v7135_v11, %v7136_v50  ;;  %14973 = vmatpush3.bf16.msra.mxu1 %v13337_v46  ;;  %v5323_v11 = vadd.f32 %v14441_v42, %v5258_v34  ;;  %v16571_v50 = vld [vmem:[%s19463_s0 + $0x10] ss:$52 sps:$4 sm:$0xff]   ;;  %v5263_v46 = vadd.f32 %v18169_v55, %v18190_v23 }
 0x461   :  { %v7168_v22 = vld [vmem:[#allocation3 + $0x1234] sm:$0xf]  ;;  %7960 = vmatmul.mubr.bf16.vlgmr.msra.gmra.mrb[8].mxu0 %v16570_v61 }
 0x462   :  { %v7119_v3 = vld [vmem:[#allocation3 + $0xc14] sm:$0xf]  ;;  %v13370_v13 = vcombine.low %v7167_v48, %v7168_v22  ;;  %14998 = vmatprep.subr.bf16.mxu0 %v13354_v59  ;;  %v18228_v59 = vadd.f32 %v14481_v37, %v5323_v11 }
 0x463   :  { %v7120_v8 = vld [vmem:[#allocation3 + $0xc34] sm:$0xf] }
 0x464   :  { %v7151_v14 = vld [vmem:[#allocation3 + $0x1014] sm:$0xf]  ;;  %v13346_v43 = vcombine.low %v7119_v3, %v7120_v8  ;;  %15038 = vmatprep.subr.bf16.mxu1 %v13370_v13  ;;  %v14442_v8 = vpop.f32.mrb[168].mxu0  ;;  %v14482_v13 = vpop.f32.mrb[176].mxu1 }
 0x465   :  { %v7152_v24 = vld [vmem:[#allocation3 + $0x1034] sm:$0xf] }
 0x466   :  { %v16569_v17 = vld [vmem:[%s19463_s0 + $0x14] ss:$52 sps:$4 sm:$0xff]   ;;  %v13362_v1 = vcombine.low %v7151_v14, %v7152_v24  ;;  %14999 = vmatpush3.bf16.msra.mxu0 %v13346_v43  ;;  %v16575_v61 = vld [vmem:[%s19463_s0 + $0x78] ss:$52 sps:$4 sm:$0xff]  }
 0x467   :  { %8024 = vmatprep.mubr.bf16.mxu1 %v16569_v17  ;;  %v7137_v38 = vld [vmem:[#allocation3 + $0xe54] sm:$0xf]  ;;  %v14443_v17 = vpop.f32.mrb[169].mxu0 }
 0x468   :  { %v7138_v36 = vld [vmem:[#allocation3 + $0xe74] sm:$0xf]  ;;  %8025 = vmatmul.mubr.bf16.vlgmr.msra.gmra.mrb[16].mxu1 %v16571_v50  ;;  %v14445_v15 = vpop.f32.mrb[170].mxu0 }
 0x469   :  { %v7169_v32 = vld [vmem:[#allocation3 + $0x1254] sm:$0xf]  ;;  %v13355_v6 = vcombine.low %v7137_v38, %v7138_v36  ;;  %15039 = vmatpush3.bf16.msra.mxu1 %v13362_v1  ;;  %v16573_v38 = vld [vmem:[%s19463_s0 + $0x7c] ss:$52 sps:$4 sm:$0xff]   ;;  %v14446_v34 = vpop.f32.mrb[171].mxu0 }
 0x46a   :  { %v7170_v26 = vld [vmem:[#allocation3 + $0x1274] sm:$0xf]  ;;  %8032 = vmatprep.mubr.bf16.mxu1 %v16573_v38  ;;  %v14447_v1 = vadd.f32 %v14446_v34, %v14445_v15 }
 0x46b   :  { %v7121_v60 = vld [vmem:[#allocation3 + $0xc54] sm:$0xf]  ;;  %v13371_v20 = vcombine.low %v7169_v32, %v7170_v26  ;;  %15000 = vmatprep.subr.bf16.mxu0 %v13355_v6  ;;  %v14444_v32 = vadd.f32 %v14443_v17, %v14442_v8  ;;  %v14483_v26 = vpop.f32.mrb[177].mxu1 }
 0x46c   :  { %v7122_v54 = vld [vmem:[#allocation3 + $0xc74] sm:$0xf]  ;;  %v14484_v43 = vadd.f32 %v14483_v26, %v14482_v13  ;;  %v5274_v13 = vadd.f32 %v18192_v30, %v18190_v23 }
 0x46d   :  { %v7153_v51 = vld [vmem:[#allocation3 + $0x1054] sm:$0xf]  ;;  %v13347_v45 = vcombine.low %v7121_v60, %v7122_v54  ;;  %15040 = vmatprep.subr.bf16.mxu1 %v13371_v20  ;;  %v14485_v60 = vpop.f32.mrb[178].mxu1  ;;  %v5328_v6 = vadd.f32 %v14444_v32, %v5263_v46 }
 0x46e   :  { %v7154_v33 = vld [vmem:[#allocation3 + $0x1074] sm:$0xf] }
 0x46f   :  { %v7139_v63 = vld [vmem:[#allocation3 + $0xe94] sm:$0xf]  ;;  %v13363_v22 = vcombine.low %v7153_v51, %v7154_v33  ;;  %15001 = vmatpush3.bf16.msra.mxu0 %v13347_v45  ;;  %v14486_v51 = vpop.f32.mrb[179].mxu1  ;;  %v18241_v37 = vadd.f32 %v14484_v43, %v5328_v6 }
 0x470   :  { %v7140_v5 = vld [vmem:[#allocation3 + $0xeb4] sm:$0xf]  ;;  %v14487_v53 = vadd.f32 %v14486_v51, %v14485_v60  ;;  %8033 = vmatmul.mubr.bf16.gmra.mrb[20].mxu1 %v16575_v61 }
 0x471   :  { %v7171_v12 = vld [vmem:[#allocation3 + $0x1294] sm:$0xf]  ;;  %v13356_v21 = vcombine.low %v7139_v63, %v7140_v5  ;;  %15041 = vmatpush3.bf16.msra.mxu1 %v13363_v22  ;;  %v5331_v5 = vadd.f32 %v14447_v1, %v5266_v44 }
 0x472   :  { %v7172_v62 = vld [vmem:[#allocation3 + $0x12b4] sm:$0xf] }
 0x473   :  { %v7123_v48 = vld [vmem:[#allocation3 + $0xc94] sm:$0xf]  ;;  %v13372_v24 = vcombine.low %v7171_v12, %v7172_v62  ;;  %15002 = vmatprep.subr.bf16.mxu0 %v13356_v21  ;;  %v5271_v21 = vadd.f32 %v18185_v25, %v18190_v23 }
 0x474   :  { %v7124_v4 = vld [vmem:[#allocation3 + $0xcb4] sm:$0xf] }
 0x475   :  { %v7155_v57 = vld [vmem:[#allocation3 + $0x1094] sm:$0xf]  ;;  %v13348_v18 = vcombine.low %v7123_v48, %v7124_v4  ;;  %15042 = vmatprep.subr.bf16.mxu1 %v13372_v24  ;;  %v18248_v4 = vadd.f32 %v14487_v53, %v5331_v5 }
 0x476   :  { %v7156_v3 = vld [vmem:[#allocation3 + $0x10b4] sm:$0xf] }
 0x477   :  { %v16572_v14 = vld [vmem:[%s19463_s0 + $0x74] ss:$52 sps:$4 sm:$0xff]   ;;  %v13364_v54 = vcombine.low %v7155_v57, %v7156_v3  ;;  %15003 = vmatpush3.bf16.msra.mxu0 %v13348_v18  ;;  %v14448_v57 = vpop.f32.mrb[172].mxu0  ;;  %v16576_v3 = vld [vmem:[%s19463_s0 + $0xdc] ss:$52 sps:$4 sm:$0xff]  }
 0x478   :  { %7967 = vmatprep.mubr.bf16.mxu0 %v16572_v14  ;;  %v7141_v58 = vld [vmem:[#allocation3 + $0xed4] sm:$0xf]  ;;  %v14449_v24 = vpop.f32.mrb[173].mxu0 }
 0x479   :  { %v7142_v49 = vld [vmem:[#allocation3 + $0xef4] sm:$0xf]  ;;  %7968 = vmatmul.mubr.bf16.gmra.mrb[12].mxu0 %v16574_v39  ;;  %15043 = vmatpush3.bf16.msra.mxu1 %v13364_v54  ;;  %v14450_v38 = vadd.f32 %v14449_v24, %v14448_v57 }
 0x47a   :  { %v7173_v55 = vld [vmem:[#allocation3 + $0x12d4] sm:$0xf]  ;;  %v13357_v29 = vcombine.low %v7141_v58, %v7142_v49  ;;  %7975 = vmatprep.mubr.bf16.mxu0 %v16576_v3  ;;  %v14488_v58 = vpop.f32.mrb[180].mxu1 }
 0x47b   :  { %v7174_v36 = vld [vmem:[#allocation3 + $0x12f4] sm:$0xf]  ;;  %v5336_v54 = vadd.f32 %v14450_v38, %v5271_v21 }
 0x47c   :  { %v7125_v47 = vld [vmem:[#allocation3 + $0xcd4] sm:$0xf]  ;;  %v13373_v2 = vcombine.low %v7173_v55, %v7174_v36  ;;  %15004 = vmatprep.subr.bf16.mxu0 %v13357_v29  ;;  %v14451_v55 = vpop.f32.mrb[174].mxu0  ;;  %v14489_v36 = vpop.f32.mrb[181].mxu1 }
 0x47d   :  { %v7126_v35 = vld [vmem:[#allocation3 + $0xcf4] sm:$0xf]  ;;  %v14452_v26 = vpop.f32.mrb[175].mxu0  ;;  %v14490_v18 = vadd.f32 %v14489_v36, %v14488_v58 }
 0x47e   :  { %v7157_v7 = vld [vmem:[#allocation3 + $0x10d4] sm:$0xf]  ;;  %v13349_v12 = vcombine.low %v7125_v47, %v7126_v35  ;;  %15044 = vmatprep.subr.bf16.mxu1 %v13373_v2  ;;  %v14491_v47 = vpop.f32.mrb[182].mxu1  ;;  %v14453_v29 = vadd.f32 %v14452_v26, %v14451_v55 }
 0x47f   :  { %v7158_v27 = vld [vmem:[#allocation3 + $0x10f4] sm:$0xf] }
 0x480   :  { %v7143_v33 = vld [vmem:[#allocation3 + $0xf14] sm:$0xf]  ;;  %v13365_v11 = vcombine.low %v7157_v7, %v7158_v27  ;;  %15005 = vmatpush3.bf16.msra.mxu0 %v13349_v12  ;;  %v14492_v7 = vpop.f32.mrb[183].mxu1 }
 0x481   :  { %v7144_v42 = vld [vmem:[#allocation3 + $0xf34] sm:$0xf]  ;;  %v14493_v1 = vadd.f32 %v14492_v7, %v14491_v47  ;;  %v14550_v3 = vpop.f32.mrb[184].mxu1 }
 0x482   :  { %v7175_v20 = vld [vmem:[#allocation3 + $0x1314] sm:$0xf]  ;;  %v13358_v50 = vcombine.low %v7143_v33, %v7144_v42  ;;  %15045 = vmatpush3.bf16.msra.mxu1 %v13365_v11  ;;  %v5339_v33 = vadd.f32 %v14453_v29, %v5274_v13  ;;  %v18261_v42 = vadd.f32 %v14490_v18, %v5336_v54 }
 0x483   :  { %v7176_v63 = vld [vmem:[#allocation3 + $0x1334] sm:$0xf] }
 0x484   :  { %v7127_v62 = vld [vmem:[#allocation3 + $0xd14] sm:$0xf]  ;;  %v13374_v46 = vcombine.low %v7175_v20, %v7176_v63  ;;  %15006 = vmatprep.subr.bf16.mxu0 %v13358_v50  ;;  %v18266_v11 = vadd.f32 %v14493_v1, %v5339_v33  ;;  %v14510_v50 = vpop.f32.mrb[176].mxu0 }
 0x485   :  { %v7128_v45 = vld [vmem:[#allocation3 + $0xd34] sm:$0xf]  ;;  %v14511_v57 = vpop.f32.mrb[177].mxu0 }
 0x486   :  { %v7159_v48 = vld [vmem:[#allocation3 + $0x1114] sm:$0xf]  ;;  %v13350_v44 = vcombine.low %v7127_v62, %v7128_v45  ;;  %15046 = vmatprep.subr.bf16.mxu1 %v13374_v46  ;;  %v16581_v46 = vld [vmem:[%s19463_s0 + $0x14c] ss:$52 sps:$4 sm:$0xff]   ;;  %v14512_v24 = vadd.f32 %v14511_v57, %v14510_v50  ;;  %v14513_v58 = vpop.f32.mrb[178].mxu0 }
 0x487   :  { %v7160_v22 = vld [vmem:[#allocation3 + $0x1134] sm:$0xf]  ;;  %v14514_v38 = vpop.f32.mrb[179].mxu0 }
 0x488   :  { %v7145_v8 = vld [vmem:[#allocation3 + $0xf54] sm:$0xf]  ;;  %v13366_v35 = vcombine.low %v7159_v48, %v7160_v22  ;;  %15007 = vmatpush3.bf16.msra.mxu0 %v13350_v44  ;;  %v5442_v18 = vadd.f32 %v14512_v24, %v18204_v10  ;;  %v14515_v47 = vadd.f32 %v14514_v38, %v14513_v58  ;;  %v16583_v10 = vld [vmem:[%s19463_s0 + $0x148] ss:$52 sps:$4 sm:$0xff]  }
 0x489   :  { %v7146_v14 = vld [vmem:[#allocation3 + $0xf74] sm:$0xf] }
 0x48a   :  { %v16577_v49 = vld [vmem:[%s19463_s0 + $0xe4] ss:$52 sps:$4 sm:$0xff]   ;;  %v13359_v34 = vcombine.low %v7145_v8, %v7146_v14  ;;  %v16579_v53 = vld [vmem:[%s19463_s0 + $0xe0] ss:$52 sps:$4 sm:$0xff]   ;;  %15047 = vmatpush3.bf16.msra.mxu1 %v13366_v35 }
 0x48b   :  { %8040 = vmatprep.mubr.bf16.mxu1 %v16577_v49  ;;  %v7177_v25 = vld [vmem:[#allocation3 + $0x1354] sm:$0xf]  ;;  %v14551_v49 = vpop.f32.mrb[185].mxu1 }
 0x48c   :  { %v7178_v17 = vld [vmem:[#allocation3 + $0x1374] sm:$0xf]  ;;  %8041 = vmatmul.mubr.bf16.gmra.mrb[24].mxu1 %v16579_v53  ;;  %15008 = vmatprep.subr.bf16.mxu0 %v13359_v34  ;;  %v14552_v55 = vadd.f32 %v14551_v49, %v14550_v3  ;;  %v14553_v36 = vpop.f32.mrb[186].mxu1 }
 0x48d   :  { %v7129_v15 = vld [vmem:[#allocation3 + $0xd54] sm:$0xf]  ;;  %v13375_v23 = vcombine.low %v7177_v25, %v7178_v17  ;;  %8048 = vmatprep.mubr.bf16.mxu1 %v16581_v46  ;;  %v14554_v35 = vpop.f32.mrb[187].mxu1 }
 0x48e   :  { %v7130_v32 = vld [vmem:[#allocation3 + $0xd74] sm:$0xf]  ;;  %v14555_v54 = vadd.f32 %v14554_v35, %v14553_v36 }
 0x48f   :  { %v7161_v43 = vld [vmem:[#allocation3 + $0x1154] sm:$0xf]  ;;  %v13351_v39 = vcombine.low %v7129_v15, %v7130_v32  ;;  %15048 = vmatprep.subr.bf16.mxu1 %v13375_v23 }
 0x490   :  { %v7162_v60 = vld [vmem:[#allocation3 + $0x1174] sm:$0xf] }
 0x491   :  { %v7147_v30 = vld [vmem:[#allocation3 + $0xf94] sm:$0xf]  ;;  %v13367_v63 = vcombine.low %v7161_v43, %v7162_v60  ;;  %15009 = vmatpush3.bf16.msra.mxu0 %v13351_v39  ;;  %v14516_v39 = vpop.f32.mrb[180].mxu0 }
 0x492   :  { %v7148_v27 = vld [vmem:[#allocation3 + $0xfb4] sm:$0xf] }
 0x493   :  { %v16578_v6 = vld [vmem:[%s19463_s0 + $0xd8] ss:$52 sps:$4 sm:$0xff]   ;;  %v13360_v5 = vcombine.low %v7147_v30, %v7148_v27  ;;  %15049 = vmatpush3.bf16.msra.mxu1 %v13367_v63  ;;  %v16582_v29 = vld [vmem:[%s19463_s0 + $0x140] ss:$52 sps:$4 sm:$0xff]   ;;  %v5445_v30 = vadd.f32 %v14515_v47, %v18209_v40  ;;  %v18279_v27 = vadd.f32 %v14552_v55, %v5442_v18  ;;  %v16584_v40 = vld [vmem:[%s19463_s0 + $0x1c] ss:$52 sps:$4 sm:$0xff]  }
 0x494   :  { %7976 = vmatmul.mubr.bf16.gmra.mrb[16].mxu0 %v16578_v6  ;;  %v7179_v51 = vld [vmem:[#allocation3 + $0x1394] sm:$0xf]  ;;  %8049 = vmatmul.mubr.bf16.gmra.mrb[28].mxu1 %v16583_v10 }
 0x495   :  { %v7180_v2 = vld [vmem:[#allocation3 + $0x13b4] sm:$0xf]  ;;  %15010 = vmatprep.subr.bf16.mxu0 %v13360_v5  ;;  %v18284_v53 = vadd.f32 %v14555_v54, %v5445_v30 }
 0x496   :  { %v7131_v20 = vld [vmem:[#allocation3 + $0xd94] sm:$0xf]  ;;  %v13376_v48 = vcombine.low %v7179_v51, %v7180_v2 }
 0x497   :  { %v7132_v61 = vld [vmem:[#allocation3 + $0xdb4] sm:$0xf] }
 0x498   :  { %v7163_v12 = vld [vmem:[#allocation3 + $0x1194] sm:$0xf]  ;;  %v13352_v25 = vcombine.low %v7131_v20, %v7132_v61  ;;  %15050 = vmatprep.subr.bf16.mxu1 %v13376_v48  ;;  %v14517_v61 = vpop.f32.mrb[181].mxu0 }
 0x499   :  { %v7164_v62 = vld [vmem:[#allocation3 + $0x11b4] sm:$0xf]  ;;  %v14518_v48 = vadd.f32 %v14517_v61, %v14516_v39 }
 0x49a   :  { %v16580_v45 = vld [vmem:[%s19463_s0 + $0x144] ss:$52 sps:$4 sm:$0xff]   ;;  %v13368_v44 = vcombine.low %v7163_v12, %v7164_v62  ;;  %15011 = vmatpush3.bf16.msra.mxu0 %v13352_v25  ;;  %v14556_v12 = vpop.f32.mrb[188].mxu1 }
 0x49b   :  { %7983 = vmatprep.mubr.bf16.mxu0 %v16580_v45  ;;  %v7149_v22 = vld [vmem:[#allocation3 + $0xfd4] sm:$0xf]  ;;  %v5450_v49 = vadd.f32 %v14518_v48, %v18221_v9 }
 0x49c   :  { %v7150_v21 = vld [vmem:[#allocation3 + $0xff4] sm:$0xf]  ;;  %7984 = vmatmul.mubr.bf16.gmra.mrb[20].mxu0 %v16582_v29  ;;  %15051 = vmatpush3.bf16.msra.mxu1 %v13368_v44 }
 0x49d   :  { %v7181_v8 = vld [vmem:[#allocation3 + $0x13d4] sm:$0xf]  ;;  %v13361_v15 = vcombine.low %v7149_v22, %v7150_v21  ;;  %8089 = vmatprep.mubr.bf16.mxu0 %v16584_v40  ;;  %v14519_v22 = vpop.f32.mrb[182].mxu0  ;;  %v14557_v21 = vpop.f32.mrb[189].mxu1 }
 0x49e   :  { %v7182_v14 = vld [vmem:[#allocation3 + $0x13f4] sm:$0xf]  ;;  %v14520_v3 = vpop.f32.mrb[183].mxu0  ;;  %v14558_v46 = vadd.f32 %v14557_v21, %v14556_v12 }
 0x49f   :  { %v7133_v17 = vld [vmem:[#allocation3 + $0xdd4] sm:$0xf]  ;;  %v13377_v34 = vcombine.low %v7181_v8, %v7182_v14  ;;  %15012 = vmatprep.subr.bf16.mxu0 %v13361_v15  ;;  %v14559_v8 = vpop.f32.mrb[190].mxu1  ;;  %v14521_v25 = vadd.f32 %v14520_v3, %v14519_v22  ;;  %v14522_v54 = vpop.f32.mrb[184].mxu0 }
 0x4a0   :  { %v7134_v13 = vld [vmem:[#allocation3 + $0xdf4] sm:$0xf]  ;;  %v18297_v18 = vadd.f32 %v14558_v46, %v5450_v49  ;;  %v14523_v30 = vpop.f32.mrb[185].mxu0 }
 0x4a1   :  { %v7165_v32 = vld [vmem:[#allocation3 + $0x11d4] sm:$0xf]  ;;  %v13353_v1 = vcombine.low %v7133_v17, %v7134_v13  ;;  %15052 = vmatprep.subr.bf16.mxu1 %v13377_v34  ;;  %v14560_v17 = vpop.f32.mrb[191].mxu1 }
 0x4a2   :  { %v7166_v26 = vld [vmem:[#allocation3 + $0x11f4] sm:$0xf]  ;;  %v14561_v36 = vadd.f32 %v14560_v17, %v14559_v8  ;;  %v14562_v10 = vpop.f32.mrb[192].mxu1 }
 0x4a3   :  { %v7199_v43 = vld [vmem:[#allocation3 + $0x1614] sm:$0xf]  ;;  %v13369_v6 = vcombine.low %v7165_v32, %v7166_v26  ;;  %15013 = vmatpush3.bf16.msra.mxu0 %v13353_v1  ;;  %v5453_v26 = vadd.f32 %v14521_v25, %v18228_v59  ;;  %v16589_v1 = vld [vmem:[%s19463_s0 + $0x8c] ss:$52 sps:$4 sm:$0xff]   ;;  %v14563_v39 = vpop.f32.mrb[193].mxu1 }
 0x4a4   :  { %v7200_v60 = vld [vmem:[#allocation3 + $0x1634] sm:$0xf] }
 0x4a5   :  { %v7215_v7 = vld [vmem:[#allocation3 + $0x1814] sm:$0xf]  ;;  %v13386_v51 = vcombine.low %v7199_v43, %v7200_v60  ;;  %15053 = vmatpush3.bf16.msra.mxu1 %v13369_v6  ;;  %v18302_v60 = vadd.f32 %v14561_v36, %v5453_v26 }
 0x4a6   :  { %v7216_v23 = vld [vmem:[#allocation3 + $0x1834] sm:$0xf] }
 0x4a7   :  { %v7183_v2 = vld [vmem:[#allocation3 + $0x1414] sm:$0xf]  ;;  %v13394_v20 = vcombine.low %v7215_v7, %v7216_v23  ;;  %15078 = vmatprep.subr.bf16.mxu0 %v13386_v51 }
 0x4a8   :  { %v7184_v33 = vld [vmem:[#allocation3 + $0x1434] sm:$0xf] }
 0x4a9   :  { %v7201_v63 = vld [vmem:[#allocation3 + $0x1654] sm:$0xf]  ;;  %v13378_v57 = vcombine.low %v7183_v2, %v7184_v33  ;;  %15856 = vmatprep.subr.bf16.mxu1 %v13394_v20  ;;  %v14524_v2 = vadd.f32 %v14523_v30, %v14522_v54  ;;  %v14525_v33 = vpop.f32.mrb[186].mxu0 }
 0x4aa   :  { %v7202_v5 = vld [vmem:[#allocation3 + $0x1674] sm:$0xf] }
 0x4ab   :  { %v16585_v62 = vld [vmem:[%s19463_s0 + $0x24] ss:$52 sps:$4 sm:$0xff]   ;;  %v13387_v14 = vcombine.low %v7201_v63, %v7202_v5  ;;  %v16587_v9 = vld [vmem:[%s19463_s0 + $0x20] ss:$52 sps:$4 sm:$0xff]   ;;  %v14564_v63 = vadd.f32 %v14563_v39, %v14562_v10  ;;  %v14565_v5 = vpop.f32.mrb[194].mxu1 }
 0x4ac   :  { %8154 = vmatprep.mubr.bf16.mxu1 %v16585_v62  ;;  %v7217_v50 = vld [vmem:[#allocation3 + $0x1854] sm:$0xf]  ;;  %v14566_v48 = vpop.f32.mrb[195].mxu1 }
 0x4ad   :  { %v7218_v45 = vld [vmem:[#allocation3 + $0x1874] sm:$0xf]  ;;  %8155 = vmatmul.mubr.bf16.vlgmr.msra.gmra.mrb[32].mxu1 %v16587_v9  ;;  %v14567_v3 = vadd.f32 %v14566_v48, %v14565_v5  ;;  %v14568_v26 = vpop.f32.mrb[196].mxu1 }
 0x4ae   :  { %v7185_v24 = vld [vmem:[#allocation3 + $0x1454] sm:$0xf]  ;;  %v13395_v13 = vcombine.low %v7217_v50, %v7218_v45  ;;  %15857 = vmatpush3.bf16.msra.mxu1 %v13394_v20  ;;  %8162 = vmatprep.mubr.bf16.mxu1 %v16589_v1  ;;  %v14526_v20 = vpop.f32.mrb[187].mxu0  ;;  %v5458_v50 = vadd.f32 %v14524_v2, %v18241_v37  ;;  %v16591_v37 = vld [vmem:[%s19463_s0 + $0x88] ss:$52 sps:$4 sm:$0xff]   ;;  %v14569_v54 = vpop.f32.mrb[197].mxu1 }
 0x4af   :  { %v7186_v58 = vld [vmem:[#allocation3 + $0x1474] sm:$0xf]  ;;  %v14527_v45 = vadd.f32 %v14526_v20, %v14525_v33 }
 0x4b0   :  { %v7203_v38 = vld [vmem:[#allocation3 + $0x1694] sm:$0xf]  ;;  %v13379_v47 = vcombine.low %v7185_v24, %v7186_v58  ;;  %15858 = vmatprep.subr.bf16.mxu1 %v13395_v13  ;;  %v18315_v58 = vadd.f32 %v14564_v63, %v5458_v50  ;;  %v16594_v63 = vld [vmem:[%s19463_s0 + $0xe8] ss:$52 sps:$4 sm:$0xff]  }
 0x4b1   :  { %v7204_v55 = vld [vmem:[#allocation3 + $0x16b4] sm:$0xf]  ;;  %v5461_v24 = vadd.f32 %v14527_v45, %v18248_v4  ;;  %v16592_v4 = vld [vmem:[%s19463_s0 + $0xec] ss:$52 sps:$4 sm:$0xff]  }
 0x4b2   :  { %v16586_v44 = vld [vmem:[%s19463_s0 + $0x18] ss:$52 sps:$4 sm:$0xff]   ;;  %v13388_v35 = vcombine.low %v7203_v38, %v7204_v55  ;;  %15859 = vmatpush3.bf16.msra.mxu1 %v13395_v13  ;;  %v16590_v46 = vld [vmem:[%s19463_s0 + $0x80] ss:$52 sps:$4 sm:$0xff]   ;;  %v14528_v55 = vpop.f32.mrb[188].mxu0 }
 0x4b3   :  { %8090 = vmatmul.mubr.bf16.vlgmr.msra.gmra.mrb[24].mxu0 %v16586_v44  ;;  %v7219_v15 = vld [vmem:[#allocation3 + $0x1894] sm:$0xf]  ;;  %v18320_v38 = vadd.f32 %v14567_v3, %v5461_v24 }
 0x4b4   :  { %v7220_v32 = vld [vmem:[#allocation3 + $0x18b4] sm:$0xf]  ;;  %15079 = vmatpush3.bf16.msra.mxu0 %v13378_v57 }
 0x4b5   :  { %15080 = vmatprep.subr.bf16.mxu0 %v13387_v14  ;;  %v7187_v34 = vld [vmem:[#allocation3 + $0x1494] sm:$0xf]  ;;  %v13396_v29 = vcombine.low %v7219_v15, %v7220_v32  ;;  %8163 = vmatmul.mubr.bf16.gmra.mrb[36].mxu1 %v16591_v37  ;;  %v14529_v32 = vpop.f32.mrb[189].mxu0  ;;  %v16597_v37 = vld [vmem:[%s19463_s0 + $0x15c] ss:$52 sps:$4 sm:$0xff]  }
 0x4b6   :  { %v7188_v43 = vld [vmem:[#allocation3 + $0x14b4] sm:$0xf] }
 0x4b7   :  { %v16588_v59 = vld [vmem:[%s19463_s0 + $0x84] ss:$52 sps:$4 sm:$0xff]   ;;  %v13380_v40 = vcombine.low %v7187_v34, %v7188_v43  ;;  %15860 = vmatprep.subr.bf16.mxu1 %v13396_v29  ;;  %v16593_v9 = vld [vmem:[%s19463_s0 + $0xf4] ss:$52 sps:$4 sm:$0xff]   ;;  %v14530_v34 = vadd.f32 %v14529_v32, %v14528_v55  ;;  %v14531_v43 = vpop.f32.mrb[190].mxu0 }
 0x4b8   :  { %8097 = vmatprep.mubr.bf16.mxu0 %v16588_v59  ;;  %v7205_v7 = vld [vmem:[#allocation3 + $0x16d4] sm:$0xf]  ;;  %15081 = vmatpush3.bf16.msra.mxu0 %v13379_v47 }
 0x4b9   :  { %v7206_v23 = vld [vmem:[#allocation3 + $0x16f4] sm:$0xf]  ;;  %15082 = vmatprep.subr.bf16.mxu0 %v13388_v35  ;;  %15861 = vmatpush3.bf16.msra.mxu1 %v13396_v29  ;;  %v14532_v29 = vpop.f32.mrb[191].mxu0 }
 0x4ba   :  { %v7221_v6 = vld [vmem:[#allocation3 + $0x18d4] sm:$0xf]  ;;  %v13389_v61 = vcombine.low %v7205_v7, %v7206_v23  ;;  %8170 = vmatprep.mubr.bf16.mxu1 %v16593_v9  ;;  %v14570_v7 = vadd.f32 %v14569_v54, %v14568_v26  ;;  %v14571_v23 = vpop.f32.mrb[198].mxu1  ;;  %v8365_v54 = vld [vmem:[#allocation3 + $0x238] sm:$0xf] }
 0x4bb   :  { %v7222_v51 = vld [vmem:[#allocation3 + $0x18f4] sm:$0xf]  ;;  %8098 = vmatmul.mubr.bf16.gmra.mrb[28].mxu0 %v16590_v46  ;;  %v14572_v2 = vpop.f32.mrb[199].mxu1 }
 0x4bc   :  { %v7189_v12 = vld [vmem:[#allocation3 + $0x14d4] sm:$0xf]  ;;  %v13397_v22 = vcombine.low %v7221_v6, %v7222_v51  ;;  %15083 = vmatpush3.bf16.msra.mxu0 %v13380_v40  ;;  %8105 = vmatprep.mubr.bf16.mxu0 %v16592_v4  ;;  %v5466_v6 = vadd.f32 %v14530_v34, %v18261_v42  ;;  %v14533_v51 = vadd.f32 %v14532_v29, %v14531_v43  ;;  %v16595_v42 = vld [vmem:[%s19463_s0 + $0xf0] ss:$52 sps:$4 sm:$0xff]   ;;  %v18343_v24 = vpop.f32.mrb[200].mxu1 }
 0x4bd   :  { %v7190_v62 = vld [vmem:[#allocation3 + $0x14f4] sm:$0xf]  ;;  %15084 = vmatprep.subr.bf16.mxu0 %v13389_v61  ;;  %v14573_v20 = vadd.f32 %v14572_v2, %v14571_v23  ;;  %8171 = vmatmul.mubr.bf16.gmra.mrb[40].mxu1 %v16595_v42  ;;  %v5636_v55 = vpop.f32.mrb[201].mxu1  ;;  %v8364_v43 = vld [vmem:[#allocation3 + $0x218] sm:$0xf] }
 0x4be   :  { %v7207_v21 = vld [vmem:[#allocation3 + $0x1714] sm:$0xf]  ;;  %v13381_v49 = vcombine.low %v7189_v12, %v7190_v62  ;;  %15862 = vmatprep.subr.bf16.mxu1 %v13397_v22  ;;  %v5469_v12 = vadd.f32 %v14533_v51, %v18266_v11  ;;  %v18333_v62 = vadd.f32 %v14570_v7, %v5466_v6  ;;  %8178 = vmatprep.mubr.bf16.mxu1 %v16597_v37  ;;  %v16598_v29 = vld [vmem:[%s19463_s0 + $0x150] ss:$52 sps:$4 sm:$0xff]   ;;  %v8396_v7 = vld [vmem:[#allocation3 + $0x618] sm:$0xf] }
 0x4bf   :  { %v7208_v57 = vld [vmem:[#allocation3 + $0x1734] sm:$0xf]  ;;  %15863 = vmatpush3.bf16.msra.mxu1 %v13397_v22  ;;  %v8397_v23 = vld [vmem:[#allocation3 + $0x638] sm:$0xf] }
 0x4c0   :  { %v7223_v8 = vld [vmem:[#allocation3 + $0x1914] sm:$0xf]  ;;  %v13390_v25 = vcombine.low %v7207_v21, %v7208_v57  ;;  %15085 = vmatpush3.bf16.msra.mxu0 %v13381_v49  ;;  %v18338_v21 = vadd.f32 %v14573_v20, %v5469_v12  ;;  %v14590_v57 = vpop.f32.mrb[192].mxu0  ;;  %v8348_v6 = vld [vmem:[#allocation3 + $0x18] sm:$0xf]  ;;  %v13428_v12 = vcombine.low %v8396_v7, %v8397_v23 }
 0x4c1   :  { %v7224_v14 = vld [vmem:[#allocation3 + $0x1934] sm:$0xf]  ;;  %v8349_v51 = vld [vmem:[#allocation3 + $0x38] sm:$0xf] }
 0x4c2   :  { %v7191_v17 = vld [vmem:[#allocation3 + $0x1514] sm:$0xf]  ;;  %v13398_v36 = vcombine.low %v7223_v8, %v7224_v14  ;;  %15086 = vmatprep.subr.bf16.mxu0 %v13390_v25  ;;  %v14591_v14 = vpop.f32.mrb[193].mxu0  ;;  %v8380_v2 = vld [vmem:[#allocation3 + $0x418] sm:$0xf] }
 0x4c3   :  { %v7192_v13 = vld [vmem:[#allocation3 + $0x1534] sm:$0xf]  ;;  %8106 = vmatmul.mubr.bf16.gmra.mrb[32].mxu0 %v16594_v63  ;;  %v8367_v20 = vld [vmem:[#allocation3 + $0x278] sm:$0xf] }
 0x4c4   :  { %v7209_v44 = vld [vmem:[#allocation3 + $0x1754] sm:$0xf]  ;;  %v13382_v59 = vcombine.low %v7191_v17, %v7192_v13  ;;  %15864 = vmatprep.subr.bf16.mxu1 %v13398_v36  ;;  %v14592_v17 = vadd.f32 %v14591_v14, %v14590_v57  ;;  %v14593_v13 = vpop.f32.mrb[194].mxu0  ;;  %v8398_v42 = vld [vmem:[#allocation3 + $0x658] sm:$0xf] }
 0x4c5   :  { %v7210_v15 = vld [vmem:[#allocation3 + $0x1774] sm:$0xf]  ;;  %15865 = vmatpush3.bf16.msra.mxu1 %v13398_v36  ;;  %v14594_v36 = vpop.f32.mrb[195].mxu0  ;;  %v8351_v14 = vld [vmem:[#allocation3 + $0x78] sm:$0xf] }
 0x4c6   :  { %v7225_v47 = vld [vmem:[#allocation3 + $0x1954] sm:$0xf]  ;;  %v13391_v30 = vcombine.low %v7209_v44, %v7210_v15  ;;  %15087 = vmatpush3.bf16.msra.mxu0 %v13382_v59  ;;  %v18348_v44 = vpop.f32.mrb[202].mxu1  ;;  %v14595_v9 = vadd.f32 %v14594_v36, %v14593_v13  ;;  %v18351_v59 = vld [vmem:[#allocation6 + $0x3] ss:$0 sm:$0xff] }
 0x4c7   :  { %v7226_v35 = vld [vmem:[#allocation3 + $0x1974] sm:$0xf]  ;;  %v8401_v7 = vld [vmem:[#allocation3 + $0x6b8] sm:$0xf] }
 0x4c8   :  { %v7193_v10 = vld [vmem:[#allocation3 + $0x1554] sm:$0xf]  ;;  %v13399_v33 = vcombine.low %v7225_v47, %v7226_v35  ;;  %15088 = vmatprep.subr.bf16.mxu0 %v13391_v30  ;;  %v5572_v47 = vadd.f32 %v14592_v17, %v18279_v27  ;;  %v5639_v35 = vpop.f32.mrb[203].mxu1 }
 0x4c9   :  { %v7194_v1 = vld [vmem:[#allocation3 + $0x1574] sm:$0xf]  ;;  %v18367_v13 = vpop.f32.mrb[204].mxu1 }
 0x4ca   :  { %v7211_v39 = vld [vmem:[#allocation3 + $0x1794] sm:$0xf]  ;;  %v13383_v50 = vcombine.low %v7193_v10, %v7194_v1  ;;  %15866 = vmatprep.subr.bf16.mxu1 %v13399_v33  ;;  %v5637_v30 = vadd.f32 %v5636_v55, %v5572_v47  ;;  %v5575_v10 = vadd.f32 %v14595_v9, %v18284_v53  ;;  %v16600_v53 = vld [vmem:[%s19463_s0 + $0x2c] ss:$52 sps:$4 sm:$0xff]   ;;  %v8382_v55 = vld [vmem:[#allocation3 + $0x458] sm:$0xf] }
 0x4cb   :  { %v7212_v40 = vld [vmem:[#allocation3 + $0x17b4] sm:$0xf]  ;;  %15867 = vmatpush3.bf16.msra.mxu1 %v13399_v33  ;;  %v13412_v33 = vcombine.low %v8364_v43, %v8365_v54  ;;  %v18374_v9 = vpop.f32.mrb[205].mxu1  ;;  %v8368_v47 = vld [vmem:[#allocation3 + $0x298] sm:$0xf] }
 0x4cc   :  { %v7227_v5 = vld [vmem:[#allocation3 + $0x1994] sm:$0xf]  ;;  %v13392_v45 = vcombine.low %v7211_v39, %v7212_v40  ;;  %15089 = vmatpush3.bf16.msra.mxu0 %v13383_v50  ;;  %v8381_v39 = vld [vmem:[#allocation3 + $0x438] sm:$0xf]  ;;  %v5667_v63 = vmax.f32 %v5637_v30, 0.0  ;;  %v18379_v54 = vpop.f32.mrb[206].mxu1 }
 0x4cd   :  { %v7228_v61 = vld [vmem:[#allocation3 + $0x19b4] sm:$0xf]  ;;  %v8366_v40 = vld [vmem:[#allocation3 + $0x258] sm:$0xf] }
 0x4ce   :  { %v7195_v48 = vld [vmem:[#allocation3 + $0x1594] sm:$0xf]  ;;  %v13400_v3 = vcombine.low %v7227_v5, %v7228_v61  ;;  %15090 = vmatprep.subr.bf16.mxu0 %v13392_v45  ;;  %v5640_v5 = vadd.f32 %v5639_v35, %v5575_v10  ;;  %v14596_v61 = vpop.f32.mrb[196].mxu0  ;;  %v8399_v50 = vld [vmem:[#allocation3 + $0x678] sm:$0xf] }
 0x4cf   :  { %v7196_v22 = vld [vmem:[#allocation3 + $0x15b4] sm:$0xf]  ;;  %v14597_v45 = vpop.f32.mrb[197].mxu0  ;;  %v13429_v17 = vcombine.low %v8398_v42, %v8399_v50  ;;  %v8369_v35 = vld [vmem:[#allocation3 + $0x2b8] sm:$0xf] }
 0x4d0   :  { %v16596_v11 = vld [vmem:[%s19463_s0 + $0x154] ss:$52 sps:$4 sm:$0xff]   ;;  %v13384_v4 = vcombine.low %v7195_v48, %v7196_v22  ;;  %15868 = vmatprep.subr.bf16.mxu1 %v13400_v3  ;;  %v16599_v27 = vld [vmem:[%s19463_s0 + $0x158] ss:$52 sps:$4 sm:$0xff]   ;;  %v16601_v48 = vld [vmem:[%s19463_s0 + $0x30] ss:$52 sps:$4 sm:$0xff]   ;;  %v5682_v22 = vmul.f32 %v18351_v59, %v5667_v63 }
 0x4d1   :  { %8113 = vmatprep.mubr.bf16.mxu0 %v16596_v11  ;;  %v7213_v46 = vld [vmem:[#allocation3 + $0x17d4] sm:$0xf]  ;;  %8179 = vmatmul.mubr.bf16.gmra.mrb[44].mxu1 %v16599_v27  ;;  %v5668_v57 = vmax.f32 %v5640_v5, 0.0  ;;  %v14598_v11 = vadd.f32 %v14597_v45, %v14596_v61  ;;  %v8353_v27 = vld [vmem:[#allocation3 + $0xb8] sm:$0xf] }
 0x4d2   :  { %v7214_v8 = vld [vmem:[#allocation3 + $0x17f4] sm:$0xf]  ;;  %8114 = vmatmul.mubr.bf16.gmra.mrb[36].mxu0 %v16598_v29  ;;  %15869 = vmatpush3.bf16.msra.mxu1 %v13400_v3  ;;  %v14599_v3 = vpop.f32.mrb[198].mxu0  ;;  %v18370_v36 = vadd.f32 %v5682_v22, %v18119_v16  ;;  %v8352_v16 = vld [vmem:[#allocation3 + $0x98] sm:$0xf] }
 0x4d3   :  { %v7229_v49 = vld [vmem:[#allocation3 + $0x19d4] sm:$0xf]  ;;  %v13393_v15 = vcombine.low %v7213_v46, %v7214_v8  ;;  %15091 = vmatpush3.bf16.msra.mxu0 %v13384_v4  ;;  %8219 = vmatprep.mubr.bf16.mxu0 %v16600_v53  ;;  %v13404_v46 = vcombine.low %v8348_v6, %v8349_v51  ;;  %v8350_v8 = vld [vmem:[#allocation3 + $0x58] sm:$0xf]  ;;  %v14600_v37 = vpop.f32.mrb[199].mxu0 }
 0x4d4   :  { %v7230_v25 = vld [vmem:[#allocation3 + $0x19f4] sm:$0xf]  ;;  %15872 = vmatprep.mubr.bf16.mxu1 %v16601_v48  ;;  %v8383_v4 = vld [vmem:[#allocation3 + $0x478] sm:$0xf]  ;;  %v13405_v43 = vcombine.low %v8350_v8, %v8351_v14  ;;  %v13406_v48 = vcombine.low %v8352_v16, %v8353_v27 }
 0x4d5   :  { %v7197_v32 = vld [vmem:[#allocation3 + $0x15d4] sm:$0xf]  ;;  %v13401_v34 = vcombine.low %v7229_v49, %v7230_v25  ;;  %15092 = vmatprep.subr.bf16.mxu0 %v13393_v15  ;;  %v13420_v49 = vcombine.low %v8380_v2, %v8381_v39  ;;  %v13413_v25 = vcombine.low %v8366_v40, %v8367_v20  ;;  %v5683_v15 = vmul.f32 %v18351_v59, %v5668_v57  ;;  %v8400_v29 = vld [vmem:[#allocation3 + $0x698] sm:$0xf]  ;;  %v14602_v40 = vpop.f32.mrb[200].mxu0 }
 0x4d6   :  { %v7198_v26 = vld [vmem:[#allocation3 + $0x15f4] sm:$0xf]  ;;  %v8384_v6 = vld [vmem:[#allocation3 + $0x498] sm:$0xf]  ;;  %v13421_v51 = vcombine.low %v8382_v55, %v8383_v4  ;;  %v13414_v2 = vcombine.low %v8368_v47, %v8369_v35  ;;  %v13430_v63 = vcombine.low %v8400_v29, %v8401_v7  ;;  %v14603_v53 = vpop.f32.mrb[201].mxu0 }
 0x4d7   :  { %v13385_v1 = vcombine.low %v7197_v32, %v7198_v26  ;;  %15870 = vmatprep.subr.bf16.mxu1 %v13401_v34  ;;  %v5580_v32 = vadd.f32 %v14598_v11, %v18297_v18  ;;  %v14601_v26 = vadd.f32 %v14600_v37, %v14599_v3  ;;  %v18382_v23 = vadd.f32 %v5683_v15, %v18132_v28  ;;  %v16603_v10 = vld [vmem:[%s19463_s0 + $0x98] ss:$52 sps:$4 sm:$0xff]   ;;  %v16604_v20 = vld [vmem:[%s19463_s0 + $0x94] ss:$52 sps:$4 sm:$0xff]   ;;  %v14605_v45 = vpop.f32.mrb[202].mxu0 }
 0x4d8   :  { %15871 = vmatpush3.bf16.msra.mxu1 %v13401_v34  ;;  %v16602_v34 = vld [vmem:[%s19463_s0 + $0x28] ss:$52 sps:$4 sm:$0xff]   ;;  %v14606_v11 = vpop.f32.mrb[203].mxu0 }
 0x4d9   :  { %15093 = vmatpush3.bf16.msra.mxu0 %v13385_v1  ;;  %15170 = vmatprep.subr.bf16.mxu1 %v13428_v12  ;;  %v5645_v18 = vadd.f32 %v18343_v24, %v5580_v32  ;;  %v5583_v30 = vadd.f32 %v14601_v26, %v18302_v60  ;;  %v18389_v1 = vpop.f32.mrb[207].mxu1  ;;  %v8385_v28 = vld [vmem:[#allocation3 + $0x4b8] sm:$0xf]  ;;  %v16605_v12 = vld [vmem:[%s19463_s0 + $0x100] ss:$52 sps:$4 sm:$0xff]  }
 0x4da   :  { %15130 = vmatprep.subr.bf16.mxu0 %v13412_v33  ;;  %v8370_v33 = vld [vmem:[#allocation3 + $0x2d8] sm:$0xf]  ;;  %v13422_v3 = vcombine.low %v8384_v6, %v8385_v28  ;;  %v16606_v32 = vld [vmem:[%s19463_s0 + $0x90] ss:$52 sps:$4 sm:$0xff]  }
 0x4db   :  { %15873 = vmatmul.mubr.bf16.vlgmr.msra.gmra.mrb[48].mxu1 %v16603_v10  ;;  %v8371_v39 = vld [vmem:[#allocation3 + $0x2f8] sm:$0xf]  ;;  %v5669_v24 = vmax.f32 %v5645_v18, 0.0  ;;  %v5648_v60 = vadd.f32 %v18348_v44, %v5583_v30  ;;  %v14604_v44 = vadd.f32 %v14603_v53, %v14602_v40 }
 0x4dc   :  { %8220 = vmatmul.mubr.bf16.vlgmr.msra.gmra.mrb[40].mxu0 %v16602_v34  ;;  %15171 = vmatpush3.bf16.msra.mxu1 %v13420_v49  ;;  %v8402_v5 = vld [vmem:[#allocation3 + $0x6d8] sm:$0xf]  ;;  %v14607_v49 = vadd.f32 %v14606_v11, %v14605_v45 }
 0x4dd   :  { %15131 = vmatpush3.bf16.msra.mxu0 %v13404_v46  ;;  %15172 = vmatprep.subr.bf16.mxu1 %v13429_v17  ;;  %v8403_v61 = vld [vmem:[#allocation3 + $0x6f8] sm:$0xf]  ;;  %v5684_v42 = vmul.f32 %v18351_v59, %v5669_v24  ;;  %v5670_v50 = vmax.f32 %v5648_v60, 0.0  ;;  %v13415_v46 = vcombine.low %v8370_v33, %v8371_v39  ;;  %v16609_v24 = vld [vmem:[%s19463_s0 + $0xc] ss:$52 sps:$4 sm:$0xff]  }
 0x4de   :  { %15132 = vmatprep.subr.bf16.mxu0 %v13413_v25  ;;  %8227 = vmatprep.mubr.bf16.mxu0 %v16604_v20  ;;  %v8354_v22 = vld [vmem:[#allocation3 + $0xd8] sm:$0xf]  ;;  %v13431_v8 = vcombine.low %v8402_v5, %v8403_v61  ;;  %v5588_v25 = vadd.f32 %v14604_v44, %v18315_v58  ;;  %v5591_v58 = vadd.f32 %v14607_v49, %v18320_v38 }
 0x4df   :  { %15876 = vmatprep.mubr.bf16.mxu1 %v16605_v12  ;;  %v8355_v57 = vld [vmem:[#allocation3 + $0xf8] sm:$0xf]  ;;  %v5685_v37 = vmul.f32 %v18351_v59, %v5670_v50  ;;  %v18402_v15 = vadd.f32 %v5684_v42, %v18111_v41 }
 0x4e0   :  { %15173 = vmatpush3.bf16.msra.mxu1 %v13421_v51  ;;  %v8386_v14 = vld [vmem:[#allocation3 + $0x4d8] sm:$0xf]  ;;  %v13407_v26 = vcombine.low %v8354_v22, %v8355_v57  ;;  %v5653_v34 = vadd.f32 %v18374_v9, %v5588_v25  ;;  %v5656_v38 = vadd.f32 %v18389_v1, %v5591_v58  ;;  %v14608_v51 = vpop.f32.mrb[204].mxu0 }
 0x4e1   :  { %15133 = vmatpush3.bf16.msra.mxu0 %v13405_v43  ;;  %15174 = vmatprep.subr.bf16.mxu1 %v13430_v63  ;;  %v8387_v17 = vld [vmem:[#allocation3 + $0x4f8] sm:$0xf]  ;;  %v18413_v7 = vadd.f32 %v5685_v37, %v18122_v0  ;;  %v14609_v39 = vpop.f32.mrb[205].mxu0 }
 0x4e2   :  { %15134 = vmatprep.subr.bf16.mxu0 %v13414_v2  ;;  %v8372_v55 = vld [vmem:[#allocation3 + $0x318] sm:$0xf]  ;;  %v13423_v18 = vcombine.low %v8386_v14, %v8387_v17  ;;  %v5671_v6 = vmax.f32 %v5653_v34, 0.0  ;;  %v5672_v40 = vmax.f32 %v5656_v38, 0.0  ;;  %v14610_v1 = vadd.f32 %v14609_v39, %v14608_v51  ;;  %v14611_v20 = vpop.f32.mrb[206].mxu0 }
 0x4e3   :  { %v8373_v4 = vld [vmem:[#allocation3 + $0x338] sm:$0xf]  ;;  %v14612_v53 = vpop.f32.mrb[207].mxu0 }
 0x4e4   :  { %8228 = vmatmul.mubr.bf16.gmra.mrb[44].mxu0 %v16606_v32  ;;  %v8404_v47 = vld [vmem:[#allocation3 + $0x718] sm:$0xf]  ;;  %15175 = vmatpush3.bf16.msra.mxu1 %v13422_v3  ;;  %v13416_v30 = vcombine.low %v8372_v55, %v8373_v4  ;;  %v5686_v60 = vmul.f32 %v18351_v59, %v5671_v6  ;;  %v5596_v22 = vadd.f32 %v14610_v1, %v18333_v62 }
 0x4e5   :  { %v8405_v35 = vld [vmem:[#allocation3 + $0x738] sm:$0xf]  ;;  %15135 = vmatpush3.bf16.msra.mxu0 %v13406_v48  ;;  %15176 = vmatprep.subr.bf16.mxu1 %v13431_v8  ;;  %v5687_v48 = vmul.f32 %v18351_v59, %v5672_v40  ;;  %v14613_v57 = vadd.f32 %v14612_v53, %v14611_v20 }
 0x4e6   :  { %v16607_v43 = vld [vmem:[%s19463_s0 + $0xfc] ss:$52 sps:$4 sm:$0xff]   ;;  %15136 = vmatprep.subr.bf16.mxu0 %v13415_v46  ;;  %v13432_v2 = vcombine.low %v8404_v47, %v8405_v35  ;;  %v18424_v45 = vadd.f32 %v5686_v60, %v18158_v52  ;;  %v16610_v8 = vld [vmem:[%s19463_s0 + $0xf8] ss:$52 sps:$4 sm:$0xff]   ;;  %v5661_v25 = vadd.f32 %v18367_v13, %v5596_v22 }
 0x4e7   :  { %8235 = vmatprep.mubr.bf16.mxu0 %v16607_v43  ;;  %v8356_v41 = vld [vmem:[#allocation3 + $0x118] sm:$0xf]  ;;  %v18432_v52 = vadd.f32 %v5687_v48, %v18167_v31  ;;  %v5599_v62 = vadd.f32 %v14613_v57, %v18338_v21  ;;  %v14642_v21 = vpop.f32.mrb[208].mxu0 }
 0x4e8   :  { %v8357_v16 = vld [vmem:[#allocation3 + $0x138] sm:$0xf]  ;;  %15177 = vmatpush3.bf16.msra.mxu1 %v13423_v18  ;;  %v5673_v58 = vmax.f32 %v5661_v25, 0.0  ;;  %v14643_v18 = vpop.f32.mrb[209].mxu0 }
 0x4e9   :  { %v8388_v29 = vld [vmem:[#allocation3 + $0x518] sm:$0xf]  ;;  %15137 = vmatpush3.bf16.msra.mxu0 %v13407_v26  ;;  %v13408_v63 = vcombine.low %v8356_v41, %v8357_v16  ;;  %15178 = vmatprep.subr.bf16.mxu1 %v13432_v2  ;;  %v5664_v13 = vadd.f32 %v18379_v54, %v5599_v62  ;;  %v14644_v38 = vadd.f32 %v14643_v18, %v14642_v21  ;;  %v14645_v51 = vpop.f32.mrb[210].mxu0 }
 0x4ea   :  { %v8389_v10 = vld [vmem:[#allocation3 + $0x538] sm:$0xf]  ;;  %15138 = vmatprep.subr.bf16.mxu0 %v13416_v30  ;;  %v14682_v30 = vpop.f32.mrb[208].mxu1 }
 0x4eb   :  { %v8374_v9 = vld [vmem:[#allocation3 + $0x358] sm:$0xf]  ;;  %v13424_v12 = vcombine.low %v8388_v29, %v8389_v10  ;;  %v18443_v29 = vld [vmem:[%s19465_s2 + $0x4] ss:$0 sm:$0xff]  ;;  %v5674_v6 = vmax.f32 %v5664_v13, 0.0  ;;  %v14683_v54 = vpop.f32.mrb[209].mxu1 }
 0x4ec   :  { %v8375_v27 = vld [vmem:[#allocation3 + $0x378] sm:$0xf]  ;;  %8236 = vmatmul.mubr.bf16.gmra.mrb[48].mxu0 %v16610_v8  ;;  %v14685_v39 = vpop.f32.mrb[210].mxu1 }
 0x4ed   :  { %v16608_v28 = vld [vmem:[%s19463_s0 + $0x168] ss:$52 sps:$4 sm:$0xff]   ;;  %v13417_v42 = vcombine.low %v8374_v9, %v8375_v27  ;;  %15139 = vmatpush3.bf16.msra.mxu0 %v13408_v63  ;;  %v16611_v17 = vld [vmem:[%s19463_s0 + $0x164] ss:$52 sps:$4 sm:$0xff]   ;;  %15179 = vmatpush3.bf16.msra.mxu1 %v13424_v12  ;;  %v5688_v27 = vmul.f32 %v18351_v59, %v5673_v58  ;;  %v5689_v20 = vmul.f32 %v18351_v59, %v5674_v6 }
 0x4ee   :  { %15877 = vmatmul.mubr.bf16.gmra.mrb[52].mxu1 %v16608_v28  ;;  %v8406_v0 = vld [vmem:[#allocation3 + $0x758] sm:$0xf]  ;;  %8243 = vmatprep.mubr.bf16.mxu0 %v16611_v17  ;;  %v6572_v63 = vadd.f32 %v14644_v38, %v18443_v29 }
 0x4ef   :  { %v8407_v33 = vld [vmem:[#allocation3 + $0x778] sm:$0xf]  ;;  %9284 = vmatprep.mubr.bf16.mxu1 %v16609_v24  ;;  %15140 = vmatprep.subr.bf16.mxu0 %v13417_v42  ;;  %v18449_v42 = vadd.f32 %v5688_v27, %v18150_v19 }
 0x4f0   :  { %v8358_v5 = vld [vmem:[#allocation3 + $0x158] sm:$0xf]  ;;  %v13433_v50 = vcombine.low %v8406_v0, %v8407_v33  ;;  %v14646_v0 = vpop.f32.mrb[211].mxu0  ;;  %v14684_v33 = vadd.f32 %v14683_v54, %v14682_v30 }
 0x4f1   :  { %v8359_v61 = vld [vmem:[#allocation3 + $0x178] sm:$0xf]  ;;  %v14648_v17 = vpop.f32.mrb[212].mxu0 }
 0x4f2   :  { %v8390_v44 = vld [vmem:[#allocation3 + $0x558] sm:$0xf]  ;;  %v13409_v14 = vcombine.low %v8358_v5, %v8359_v61  ;;  %15180 = vmatprep.subr.bf16.mxu1 %v13433_v50  ;;  %v14647_v5 = vadd.f32 %v14646_v0, %v14645_v51  ;;  %v14686_v61 = vpop.f32.mrb[211].mxu1 }
 0x4f3   :  { %v8391_v11 = vld [vmem:[#allocation3 + $0x578] sm:$0xf]  ;;  %v14687_v50 = vadd.f32 %v14686_v61, %v14685_v39 }
 0x4f4   :  { %v8376_v3 = vld [vmem:[#allocation3 + $0x398] sm:$0xf]  ;;  %v13425_v26 = vcombine.low %v8390_v44, %v8391_v11  ;;  %15141 = vmatpush3.bf16.msra.mxu0 %v13409_v14  ;;  %v16612_v44 = vld [vmem:[%s19463_s0 + $0x160] ss:$52 sps:$4 sm:$0xff]   ;;  %v6575_v59 = vadd.f32 %v14647_v5, %v18443_v29  ;;  %v18455_v11 = vadd.f32 %v14684_v33, %v6572_v63 }
 0x4f5   :  { %v8377_v46 = vld [vmem:[#allocation3 + $0x3b8] sm:$0xf]  ;;  %8244 = vmatmul.mubr.bf16.gmra.mrb[52].mxu0 %v16612_v44  ;;  %v16614_v33 = vld [vmem:[%s19463_s0] ss:$52 sps:$4 sm:$0xff]  }
 0x4f6   :  { %v8408_v37 = vld [vmem:[#allocation3 + $0x798] sm:$0xf]  ;;  %v13418_v47 = vcombine.low %v8376_v3, %v8377_v46  ;;  %15181 = vmatpush3.bf16.msra.mxu1 %v13425_v26  ;;  %v18461_v46 = vadd.f32 %v5689_v20, %v18161_v56  ;;  %v18463_v62 = vadd.f32 %v14687_v50, %v6575_v59  ;;  %v14649_v26 = vpop.f32.mrb[213].mxu0 }
 0x4f7   :  { %v8409_v49 = vld [vmem:[#allocation3 + $0x7b8] sm:$0xf]  ;;  %v14650_v56 = vadd.f32 %v14649_v26, %v14648_v17 }
 0x4f8   :  { %v8360_v55 = vld [vmem:[#allocation3 + $0x198] sm:$0xf]  ;;  %v13434_v43 = vcombine.low %v8408_v37, %v8409_v49  ;;  %15142 = vmatprep.subr.bf16.mxu0 %v13418_v47  ;;  %v14688_v47 = vpop.f32.mrb[212].mxu1 }
 0x4f9   :  { %v8361_v4 = vld [vmem:[#allocation3 + $0x1b8] sm:$0xf]  ;;  %v14689_v58 = vpop.f32.mrb[213].mxu1  ;;  %v6580_v6 = vadd.f32 %v14650_v56, %v18443_v29 }
 0x4fa   :  { %v8392_v32 = vld [vmem:[#allocation3 + $0x598] sm:$0xf]  ;;  %v13410_v10 = vcombine.low %v8360_v55, %v8361_v4  ;;  %15182 = vmatprep.subr.bf16.mxu1 %v13434_v43  ;;  %v14691_v18 = vpop.f32.mrb[214].mxu1 }
 0x4fb   :  { %v8393_v35 = vld [vmem:[#allocation3 + $0x5b8] sm:$0xf]  ;;  %v14692_v51 = vpop.f32.mrb[215].mxu1 }
 0x4fc   :  { %v8378_v31 = vld [vmem:[#allocation3 + $0x3d8] sm:$0xf]  ;;  %v13426_v2 = vcombine.low %v8392_v32, %v8393_v35  ;;  %15143 = vmatpush3.bf16.msra.mxu0 %v13410_v10  ;;  %v14693_v0 = vadd.f32 %v14692_v51, %v14691_v18 }
 0x4fd   :  { %v8379_v34 = vld [vmem:[#allocation3 + $0x3f8] sm:$0xf] }
 0x4fe   :  { %v8410_v41 = vld [vmem:[#allocation3 + $0x7d8] sm:$0xf]  ;;  %v13419_v24 = vcombine.low %v8378_v31, %v8379_v34  ;;  %15183 = vmatpush3.bf16.msra.mxu1 %v13426_v2  ;;  %v14651_v34 = vpop.f32.mrb[214].mxu0 }
 0x4ff   :  { %v8411_v16 = vld [vmem:[#allocation3 + $0x7f8] sm:$0xf] }
 0x500   :  { %v8362_v9 = vld [vmem:[#allocation3 + $0x1d8] sm:$0xf]  ;;  %v13435_v60 = vcombine.low %v8410_v41, %v8411_v16  ;;  %15144 = vmatprep.subr.bf16.mxu0 %v13419_v24  ;;  %v14652_v41 = vpop.f32.mrb[215].mxu0  ;;  %v14690_v16 = vadd.f32 %v14689_v58, %v14688_v47 }
 0x501   :  { %v8363_v28 = vld [vmem:[#allocation3 + $0x1f8] sm:$0xf]  ;;  %v14653_v38 = vadd.f32 %v14652_v41, %v14651_v34 }
 0x502   :  { %v8394_v40 = vld [vmem:[#allocation3 + $0x5d8] sm:$0xf]  ;;  %v13411_v48 = vcombine.low %v8362_v9, %v8363_v28  ;;  %15184 = vmatprep.subr.bf16.mxu1 %v13435_v60 }
 0x503   :  { %v8395_v1 = vld [vmem:[#allocation3 + $0x5f8] sm:$0xf]  ;;  %v6583_v60 = vadd.f32 %v14653_v38, %v18443_v29 }
 0x504   :  { %v8428_v53 = vld [vmem:[#allocation3 + $0xa18] sm:$0xf]  ;;  %v13427_v8 = vcombine.low %v8394_v40, %v8395_v1  ;;  %15145 = vmatpush3.bf16.msra.mxu0 %v13411_v48  ;;  %v18470_v40 = vadd.f32 %v14690_v16, %v6580_v6  ;;  %v14654_v48 = vpop.f32.mrb[216].mxu0 }
 0x505   :  { %v8429_v12 = vld [vmem:[#allocation3 + $0xa38] sm:$0xf]  ;;  %v18475_v44 = vadd.f32 %v14693_v0, %v6583_v60 }
 0x506   :  { %v8460_v22 = vld [vmem:[#allocation3 + $0xe18] sm:$0xf]  ;;  %v13444_v14 = vcombine.low %v8428_v53, %v8429_v12  ;;  %15185 = vmatpush3.bf16.msra.mxu1 %v13427_v8  ;;  %v14694_v8 = vpop.f32.mrb[216].mxu1 }
 0x507   :  { %v8461_v57 = vld [vmem:[#allocation3 + $0xe38] sm:$0xf] }
 0x508   :  { %v16613_v3 = vld [vmem:[%s19463_s0 + $0x4] ss:$52 sps:$4 sm:$0xff]   ;;  %v13460_v55 = vcombine.low %v8460_v22, %v8461_v57  ;;  %15210 = vmatprep.subr.bf16.mxu0 %v13444_v14  ;;  %v16615_v1 = vld [vmem:[%s19463_s0 + $0x8] ss:$52 sps:$4 sm:$0xff]   ;;  %v16616_v22 = vld [vmem:[%s19463_s0 + $0x6c] ss:$52 sps:$4 sm:$0xff]  }
 0x509   :  { %9219 = vmatprep.mubr.bf16.mxu0 %v16613_v3  ;;  %v8412_v19 = vld [vmem:[#allocation3 + $0x818] sm:$0xf]  ;;  %9285 = vmatmul.mubr.bf16.vlgmr.msra.gmra.mrb[56].mxu1 %v16615_v1  ;;  %v16617_v14 = vld [vmem:[%s19463_s0 + $0x74] ss:$52 sps:$4 sm:$0xff]  }
 0x50a   :  { %v8413_v37 = vld [vmem:[#allocation3 + $0x838] sm:$0xf]  ;;  %15250 = vmatprep.subr.bf16.mxu1 %v13460_v55  ;;  %9220 = vmatmul.mubr.bf16.vlgmr.msra.gmra.mrb[56].mxu0 %v16614_v33  ;;  %v14695_v55 = vpop.f32.mrb[217].mxu1 }
 0x50b   :  { %v8444_v49 = vld [vmem:[#allocation3 + $0xc18] sm:$0xf]  ;;  %v13436_v13 = vcombine.low %v8412_v19, %v8413_v37  ;;  %9227 = vmatprep.mubr.bf16.mxu0 %v16616_v22  ;;  %v14655_v19 = vpop.f32.mrb[217].mxu0  ;;  %9292 = vmatprep.mubr.bf16.mxu1 %v16617_v14 }
 0x50c   :  { %v8445_v25 = vld [vmem:[#allocation3 + $0xc38] sm:$0xf]  ;;  %v14657_v17 = vpop.f32.mrb[218].mxu0 }
 0x50d   :  { %v8430_v4 = vld [vmem:[#allocation3 + $0xa58] sm:$0xf]  ;;  %v13452_v30 = vcombine.low %v8444_v49, %v8445_v25  ;;  %15211 = vmatpush3.bf16.msra.mxu0 %v13436_v13  ;;  %v14656_v25 = vadd.f32 %v14655_v19, %v14654_v48  ;;  %v14658_v47 = vpop.f32.mrb[219].mxu0 }
 0x50e   :  { %v8431_v32 = vld [vmem:[#allocation3 + $0xa78] sm:$0xf] }
 0x50f   :  { %v8462_v35 = vld [vmem:[#allocation3 + $0xe58] sm:$0xf]  ;;  %v13445_v10 = vcombine.low %v8430_v4, %v8431_v32  ;;  %15251 = vmatpush3.bf16.msra.mxu1 %v13452_v30 }
 0x510   :  { %v8463_v31 = vld [vmem:[#allocation3 + $0xe78] sm:$0xf] }
 0x511   :  { %v8414_v21 = vld [vmem:[#allocation3 + $0x858] sm:$0xf]  ;;  %v13461_v54 = vcombine.low %v8462_v35, %v8463_v31  ;;  %15212 = vmatprep.subr.bf16.mxu0 %v13445_v10  ;;  %v14696_v35 = vadd.f32 %v14695_v55, %v14694_v8  ;;  %v14697_v31 = vpop.f32.mrb[218].mxu1 }
 0x512   :  { %v8415_v43 = vld [vmem:[#allocation3 + $0x878] sm:$0xf]  ;;  %v14698_v41 = vpop.f32.mrb[219].mxu1 }
 0x513   :  { %v8446_v9 = vld [vmem:[#allocation3 + $0xc58] sm:$0xf]  ;;  %v13437_v20 = vcombine.low %v8414_v21, %v8415_v43  ;;  %15252 = vmatprep.subr.bf16.mxu1 %v13461_v54  ;;  %v6588_v21 = vadd.f32 %v14656_v25, %v18443_v29  ;;  %v14659_v43 = vadd.f32 %v14658_v47, %v14657_v17  ;;  %v14699_v10 = vadd.f32 %v14698_v41, %v14697_v31  ;;  %v16619_v54 = vld [vmem:[%s19463_s0 + $0x70] ss:$52 sps:$4 sm:$0xff]  }
 0x514   :  { %v8447_v27 = vld [vmem:[#allocation3 + $0xc78] sm:$0xf]  ;;  %9293 = vmatmul.mubr.bf16.gmra.mrb[60].mxu1 %v16619_v54 }
 0x515   :  { %v8432_v2 = vld [vmem:[#allocation3 + $0xa98] sm:$0xf]  ;;  %v13453_v5 = vcombine.low %v8446_v9, %v8447_v27  ;;  %15213 = vmatpush3.bf16.msra.mxu0 %v13437_v20  ;;  %v6591_v38 = vadd.f32 %v14659_v43, %v18443_v29  ;;  %v18488_v51 = vadd.f32 %v14696_v35, %v6588_v21  ;;  %v14660_v20 = vpop.f32.mrb[220].mxu0  ;;  %v16622_v21 = vld [vmem:[%s19463_s0 + $0xd0] ss:$52 sps:$4 sm:$0xff]  }
 0x516   :  { %v8433_v28 = vld [vmem:[#allocation3 + $0xab8] sm:$0xf] }
 0x517   :  { %v8464_v39 = vld [vmem:[#allocation3 + $0xe98] sm:$0xf]  ;;  %v13446_v61 = vcombine.low %v8432_v2, %v8433_v28  ;;  %15253 = vmatpush3.bf16.msra.mxu1 %v13453_v5  ;;  %v18493_v1 = vadd.f32 %v14699_v10, %v6591_v38 }
 0x518   :  { %v8465_v24 = vld [vmem:[#allocation3 + $0xeb8] sm:$0xf] }
 0x519   :  { %v8416_v63 = vld [vmem:[#allocation3 + $0x898] sm:$0xf]  ;;  %v13462_v57 = vcombine.low %v8464_v39, %v8465_v24  ;;  %15214 = vmatprep.subr.bf16.mxu0 %v13446_v61 }
 0x51a   :  { %v8417_v53 = vld [vmem:[#allocation3 + $0x8b8] sm:$0xf] }
 0x51b   :  { %v8448_v12 = vld [vmem:[#allocation3 + $0xc98] sm:$0xf]  ;;  %v13438_v4 = vcombine.low %v8416_v63, %v8417_v53  ;;  %15254 = vmatprep.subr.bf16.mxu1 %v13462_v57  ;;  %v16620_v63 = vld [vmem:[%s19463_s0 + $0xd4] ss:$52 sps:$4 sm:$0xff]  }
 0x51c   :  { %v8449_v50 = vld [vmem:[#allocation3 + $0xcb8] sm:$0xf] }
 0x51d   :  { %v8434_v59 = vld [vmem:[#allocation3 + $0xad8] sm:$0xf]  ;;  %v13454_v56 = vcombine.low %v8448_v12, %v8449_v50  ;;  %15215 = vmatpush3.bf16.msra.mxu0 %v13438_v4  ;;  %v14661_v12 = vpop.f32.mrb[221].mxu0  ;;  %v14700_v50 = vpop.f32.mrb[220].mxu1 }
 0x51e   :  { %v8435_v3 = vld [vmem:[#allocation3 + $0xaf8] sm:$0xf]  ;;  %v14701_v19 = vpop.f32.mrb[221].mxu1 }
 0x51f   :  { %v8466_v37 = vld [vmem:[#allocation3 + $0xed8] sm:$0xf]  ;;  %v13447_v34 = vcombine.low %v8434_v59, %v8435_v3  ;;  %15255 = vmatpush3.bf16.msra.mxu1 %v13454_v56  ;;  %v14662_v59 = vadd.f32 %v14661_v12, %v14660_v20  ;;  %v14663_v3 = vpop.f32.mrb[222].mxu0  ;;  %v14702_v25 = vadd.f32 %v14701_v19, %v14700_v50  ;;  %v14703_v17 = vpop.f32.mrb[222].mxu1 }
 0x520   :  { %v8467_v49 = vld [vmem:[#allocation3 + $0xef8] sm:$0xf]  ;;  %v14704_v31 = vpop.f32.mrb[223].mxu1 }
 0x521   :  { %v8418_v32 = vld [vmem:[#allocation3 + $0x8d8] sm:$0xf]  ;;  %v13463_v16 = vcombine.low %v8466_v37, %v8467_v49  ;;  %15216 = vmatprep.subr.bf16.mxu0 %v13447_v34  ;;  %v14664_v49 = vpop.f32.mrb[223].mxu0  ;;  %v6596_v47 = vadd.f32 %v14662_v59, %v18443_v29  ;;  %v14762_v20 = vpop.f32.mrb[224].mxu1 }
 0x522   :  { %v8419_v26 = vld [vmem:[#allocation3 + $0x8f8] sm:$0xf]  ;;  %v14665_v35 = vadd.f32 %v14664_v49, %v14663_v3  ;;  %v14763_v50 = vpop.f32.mrb[225].mxu1 }
 0x523   :  { %v8450_v58 = vld [vmem:[#allocation3 + $0xcd8] sm:$0xf]  ;;  %v13439_v2 = vcombine.low %v8418_v32, %v8419_v26  ;;  %15256 = vmatprep.subr.bf16.mxu1 %v13463_v16  ;;  %v14764_v3 = vadd.f32 %v14763_v50, %v14762_v20  ;;  %v14765_v19 = vpop.f32.mrb[226].mxu1 }
 0x524   :  { %v8451_v13 = vld [vmem:[#allocation3 + $0xcf8] sm:$0xf]  ;;  %v6599_v16 = vadd.f32 %v14665_v35, %v18443_v29  ;;  %v14722_v29 = vpop.f32.mrb[224].mxu0 }
 0x525   :  { %v8436_v18 = vld [vmem:[#allocation3 + $0xb18] sm:$0xf]  ;;  %v13455_v0 = vcombine.low %v8450_v58, %v8451_v13  ;;  %15217 = vmatpush3.bf16.msra.mxu0 %v13439_v2  ;;  %v14705_v13 = vadd.f32 %v14704_v31, %v14703_v17 }
 0x526   :  { %v8437_v30 = vld [vmem:[#allocation3 + $0xb38] sm:$0xf] }
 0x527   :  { %v16618_v9 = vld [vmem:[%s19463_s0 + $0x68] ss:$52 sps:$4 sm:$0xff]   ;;  %v13448_v33 = vcombine.low %v8436_v18, %v8437_v30  ;;  %15257 = vmatpush3.bf16.msra.mxu1 %v13455_v0  ;;  %v18506_v18 = vadd.f32 %v14702_v25, %v6596_v47  ;;  %v16623_v30 = vld [vmem:[%s19463_s0 + $0xd8] ss:$52 sps:$4 sm:$0xff]  }
 0x528   :  { %9228 = vmatmul.mubr.bf16.gmra.mrb[60].mxu0 %v16618_v9  ;;  %v8468_v27 = vld [vmem:[#allocation3 + $0xf18] sm:$0xf] }
 0x529   :  { %v8469_v6 = vld [vmem:[#allocation3 + $0xf38] sm:$0xf]  ;;  %9235 = vmatprep.mubr.bf16.mxu0 %v16620_v63  ;;  %15218 = vmatprep.subr.bf16.mxu0 %v13448_v33 }
 0x52a   :  { %v8420_v28 = vld [vmem:[#allocation3 + $0x918] sm:$0xf]  ;;  %v13464_v5 = vcombine.low %v8468_v27, %v8469_v6 }
 0x52b   :  { %v8421_v39 = vld [vmem:[#allocation3 + $0x938] sm:$0xf] }
 0x52c   :  { %v8452_v24 = vld [vmem:[#allocation3 + $0xd18] sm:$0xf]  ;;  %v13440_v8 = vcombine.low %v8420_v28, %v8421_v39  ;;  %15258 = vmatprep.subr.bf16.mxu1 %v13464_v5  ;;  %v18511_v28 = vadd.f32 %v14705_v13, %v6599_v16 }
 0x52d   :  { %v8453_v60 = vld [vmem:[#allocation3 + $0xd38] sm:$0xf] }
 0x52e   :  { %v8438_v61 = vld [vmem:[#allocation3 + $0xb58] sm:$0xf]  ;;  %v13456_v55 = vcombine.low %v8452_v24, %v8453_v60  ;;  %15219 = vmatpush3.bf16.msra.mxu0 %v13440_v8  ;;  %v14723_v60 = vpop.f32.mrb[225].mxu0 }
 0x52f   :  { %v8439_v53 = vld [vmem:[#allocation3 + $0xb78] sm:$0xf]  ;;  %v14725_v12 = vpop.f32.mrb[226].mxu0 }
 0x530   :  { %v16621_v48 = vld [vmem:[%s19463_s0 + $0xdc] ss:$52 sps:$4 sm:$0xff]   ;;  %v13449_v4 = vcombine.low %v8438_v61, %v8439_v53  ;;  %9236 = vmatmul.mubr.bf16.gmra.mrb[64].mxu0 %v16622_v21  ;;  %15259 = vmatpush3.bf16.msra.mxu1 %v13456_v55  ;;  %v16625_v63 = vld [vmem:[%s19463_s0 + $0x144] ss:$52 sps:$4 sm:$0xff]   ;;  %v14724_v53 = vadd.f32 %v14723_v60, %v14722_v29  ;;  %v14726_v59 = vpop.f32.mrb[227].mxu0  ;;  %v14766_v55 = vpop.f32.mrb[227].mxu1 }
 0x531   :  { %9300 = vmatprep.mubr.bf16.mxu1 %v16621_v48  ;;  %v8470_v22 = vld [vmem:[#allocation3 + $0xf58] sm:$0xf]  ;;  %v14727_v17 = vadd.f32 %v14726_v59, %v14725_v12  ;;  %v14767_v47 = vadd.f32 %v14766_v55, %v14765_v19  ;;  %v14768_v29 = vpop.f32.mrb[228].mxu1 }
 0x532   :  { %v8471_v57 = vld [vmem:[#allocation3 + $0xf78] sm:$0xf]  ;;  %9301 = vmatmul.mubr.bf16.gmra.mrb[64].mxu1 %v16623_v30  ;;  %15220 = vmatprep.subr.bf16.mxu0 %v13449_v4  ;;  %v6702_v25 = vadd.f32 %v14724_v53, %v18455_v11  ;;  %v16627_v11 = vld [vmem:[%s19463_s0 + $0x140] ss:$52 sps:$4 sm:$0xff]   ;;  %v14769_v20 = vpop.f32.mrb[229].mxu1 }
 0x533   :  { %v8422_v14 = vld [vmem:[#allocation3 + $0x958] sm:$0xf]  ;;  %v13465_v56 = vcombine.low %v8470_v22, %v8471_v57  ;;  %9308 = vmatprep.mubr.bf16.mxu1 %v16625_v63  ;;  %v14770_v12 = vadd.f32 %v14769_v20, %v14768_v29  ;;  %v14771_v50 = vpop.f32.mrb[230].mxu1 }
 0x534   :  { %v8423_v37 = vld [vmem:[#allocation3 + $0x978] sm:$0xf] }
 0x535   :  { %v8454_v32 = vld [vmem:[#allocation3 + $0xd58] sm:$0xf]  ;;  %v13441_v10 = vcombine.low %v8422_v14, %v8423_v37  ;;  %15260 = vmatprep.subr.bf16.mxu1 %v13465_v56 }
 0x536   :  { %v8455_v26 = vld [vmem:[#allocation3 + $0xd78] sm:$0xf] }
 0x537   :  { %v8440_v34 = vld [vmem:[#allocation3 + $0xb98] sm:$0xf]  ;;  %v13457_v27 = vcombine.low %v8454_v32, %v8455_v26  ;;  %15221 = vmatpush3.bf16.msra.mxu0 %v13441_v10 }
 0x538   :  { %v8441_v58 = vld [vmem:[#allocation3 + $0xbb8] sm:$0xf] }
 0x539   :  { %v8472_v43 = vld [vmem:[#allocation3 + $0xf98] sm:$0xf]  ;;  %v13450_v6 = vcombine.low %v8440_v34, %v8441_v58  ;;  %15261 = vmatpush3.bf16.msra.mxu1 %v13457_v27  ;;  %v6705_v34 = vadd.f32 %v14727_v17, %v18463_v62  ;;  %v18524_v58 = vadd.f32 %v14764_v3, %v6702_v25  ;;  %v14728_v62 = vpop.f32.mrb[228].mxu0  ;;  %v16628_v27 = vld [vmem:[%s19463_s0 + $0x14] ss:$52 sps:$4 sm:$0xff]  }
 0x53a   :  { %v8473_v41 = vld [vmem:[#allocation3 + $0xfb8] sm:$0xf]  ;;  %9309 = vmatmul.mubr.bf16.gmra.mrb[68].mxu1 %v16627_v11  ;;  %v16630_v17 = vld [vmem:[%s19463_s0 + $0x10] ss:$52 sps:$4 sm:$0xff]  }
 0x53b   :  { %v8424_v9 = vld [vmem:[#allocation3 + $0x998] sm:$0xf]  ;;  %v13466_v33 = vcombine.low %v8472_v43, %v8473_v41  ;;  %15222 = vmatprep.subr.bf16.mxu0 %v13450_v6 }
 0x53c   :  { %v8425_v38 = vld [vmem:[#allocation3 + $0x9b8] sm:$0xf] }
 0x53d   :  { %v8456_v54 = vld [vmem:[#allocation3 + $0xd98] sm:$0xf]  ;;  %v13442_v48 = vcombine.low %v8424_v9, %v8425_v38  ;;  %15262 = vmatprep.subr.bf16.mxu1 %v13466_v33  ;;  %v18529_v9 = vadd.f32 %v14767_v47, %v6705_v34 }
 0x53e   :  { %v8457_v2 = vld [vmem:[#allocation3 + $0xdb8] sm:$0xf] }
 0x53f   :  { %v16624_v0 = vld [vmem:[%s19463_s0 + $0x13c] ss:$52 sps:$4 sm:$0xff]   ;;  %v13458_v8 = vcombine.low %v8456_v54, %v8457_v2  ;;  %v16626_v35 = vld [vmem:[%s19463_s0 + $0x138] ss:$52 sps:$4 sm:$0xff]   ;;  %15223 = vmatpush3.bf16.msra.mxu0 %v13442_v48  ;;  %v14729_v2 = vpop.f32.mrb[229].mxu0 }
 0x540   :  { %9243 = vmatprep.mubr.bf16.mxu0 %v16624_v0  ;;  %v8442_v39 = vld [vmem:[#allocation3 + $0xbd8] sm:$0xf]  ;;  %v14731_v60 = vpop.f32.mrb[230].mxu0 }
 0x541   :  { %v8443_v24 = vld [vmem:[#allocation3 + $0xbf8] sm:$0xf]  ;;  %9244 = vmatmul.mubr.bf16.gmra.mrb[68].mxu0 %v16626_v35  ;;  %15263 = vmatpush3.bf16.msra.mxu1 %v13458_v8  ;;  %v14732_v53 = vpop.f32.mrb[231].mxu0  ;;  %v14772_v8 = vpop.f32.mrb[231].mxu1 }
 0x542   :  { %v8474_v5 = vld [vmem:[#allocation3 + $0xfd8] sm:$0xf]  ;;  %v13451_v14 = vcombine.low %v8442_v39, %v8443_v24  ;;  %9349 = vmatprep.mubr.bf16.mxu0 %v16628_v27  ;;  %v14730_v24 = vadd.f32 %v14729_v2, %v14728_v62  ;;  %v14733_v19 = vadd.f32 %v14732_v53, %v14731_v60  ;;  %v14773_v25 = vadd.f32 %v14772_v8, %v14771_v50  ;;  %v14774_v62 = vpop.f32.mrb[232].mxu1 }
 0x543   :  { %v8475_v61 = vld [vmem:[#allocation3 + $0xff8] sm:$0xf]  ;;  %v14775_v29 = vpop.f32.mrb[233].mxu1 }
 0x544   :  { %v8426_v22 = vld [vmem:[#allocation3 + $0x9d8] sm:$0xf]  ;;  %v13467_v4 = vcombine.low %v8474_v5, %v8475_v61  ;;  %15224 = vmatprep.subr.bf16.mxu0 %v13451_v14  ;;  %v6710_v3 = vadd.f32 %v14730_v24, %v18470_v40  ;;  %v14776_v60 = vadd.f32 %v14775_v29, %v14774_v62  ;;  %v14777_v20 = vpop.f32.mrb[234].mxu1 }
 0x545   :  { %v8427_v57 = vld [vmem:[#allocation3 + $0x9f8] sm:$0xf] }
 0x546   :  { %v8458_v37 = vld [vmem:[#allocation3 + $0xdd8] sm:$0xf]  ;;  %v13443_v13 = vcombine.low %v8426_v22, %v8427_v57  ;;  %15264 = vmatprep.subr.bf16.mxu1 %v13467_v4 }
 0x547   :  { %v8459_v49 = vld [vmem:[#allocation3 + $0xdf8] sm:$0xf] }
 0x548   :  { %v8492_v32 = vld [vmem:[#allocation3 + $0x1218] sm:$0xf]  ;;  %v13459_v43 = vcombine.low %v8458_v37, %v8459_v49  ;;  %15225 = vmatpush3.bf16.msra.mxu0 %v13443_v13 }
 0x549   :  { %v8493_v26 = vld [vmem:[#allocation3 + $0x1238] sm:$0xf] }
 0x54a   :  { %v8524_v31 = vld [vmem:[#allocation3 + $0x1618] sm:$0xf]  ;;  %v13476_v41 = vcombine.low %v8492_v32, %v8493_v26  ;;  %15265 = vmatpush3.bf16.msra.mxu1 %v13459_v43  ;;  %v6713_v32 = vadd.f32 %v14733_v19, %v18475_v44  ;;  %v18542_v26 = vadd.f32 %v14770_v12, %v6710_v3  ;;  %v14734_v44 = vpop.f32.mrb[232].mxu0 }
 0x54b   :  { %v8525_v56 = vld [vmem:[#allocation3 + $0x1638] sm:$0xf]  ;;  %9350 = vmatmul.mubr.bf16.vlgmr.msra.gmra.mrb[72].mxu0 %v16630_v17 }
 0x54c   :  { %v8476_v21 = vld [vmem:[#allocation3 + $0x1018] sm:$0xf]  ;;  %v13492_v6 = vcombine.low %v8524_v31, %v8525_v56  ;;  %15290 = vmatprep.subr.bf16.mxu0 %v13476_v41 }
 0x54d   :  { %v8477_v16 = vld [vmem:[#allocation3 + $0x1038] sm:$0xf] }
 0x54e   :  { %v8508_v30 = vld [vmem:[#allocation3 + $0x1418] sm:$0xf]  ;;  %v13468_v63 = vcombine.low %v8476_v21, %v8477_v16  ;;  %15330 = vmatprep.subr.bf16.mxu1 %v13492_v6  ;;  %v18547_v21 = vadd.f32 %v14773_v25, %v6713_v32 }
 0x54f   :  { %v8509_v10 = vld [vmem:[#allocation3 + $0x1438] sm:$0xf] }
 0x550   :  { %v8494_v38 = vld [vmem:[#allocation3 + $0x1258] sm:$0xf]  ;;  %v13484_v48 = vcombine.low %v8508_v30, %v8509_v10  ;;  %15291 = vmatpush3.bf16.msra.mxu0 %v13468_v63  ;;  %v14735_v10 = vpop.f32.mrb[233].mxu0 }
 0x551   :  { %v8495_v54 = vld [vmem:[#allocation3 + $0x1278] sm:$0xf]  ;;  %v14737_v2 = vpop.f32.mrb[234].mxu0 }
 0x552   :  { %v16629_v0 = vld [vmem:[%s19463_s0 + $0x1c] ss:$52 sps:$4 sm:$0xff]   ;;  %v13477_v22 = vcombine.low %v8494_v38, %v8495_v54  ;;  %v16631_v40 = vld [vmem:[%s19463_s0 + $0x18] ss:$52 sps:$4 sm:$0xff]   ;;  %v14736_v54 = vadd.f32 %v14735_v10, %v14734_v44  ;;  %v14738_v24 = vpop.f32.mrb[235].mxu0 }
 0x553   :  { %9414 = vmatprep.mubr.bf16.mxu1 %v16629_v0  ;;  %v8526_v33 = vld [vmem:[#allocation3 + $0x1658] sm:$0xf]  ;;  %v14739_v50 = vadd.f32 %v14738_v24, %v14737_v2 }
 0x554   :  { %v8527_v39 = vld [vmem:[#allocation3 + $0x1678] sm:$0xf]  ;;  %9415 = vmatmul.mubr.bf16.vlgmr.msra.gmra.mrb[72].mxu1 %v16631_v40  ;;  %15292 = vmatprep.subr.bf16.mxu0 %v13477_v22  ;;  %v6718_v12 = vadd.f32 %v14736_v54, %v18488_v51  ;;  %v16635_v51 = vld [vmem:[%s19463_s0 + $0x80] ss:$52 sps:$4 sm:$0xff]  }
 0x555   :  { %v8478_v5 = vld [vmem:[#allocation3 + $0x1058] sm:$0xf]  ;;  %v13493_v14 = vcombine.low %v8526_v33, %v8527_v39  ;;  %15331 = vmatpush3.bf16.msra.mxu1 %v13484_v48  ;;  %v14778_v48 = vpop.f32.mrb[235].mxu1 }
 0x556   :  { %v8479_v61 = vld [vmem:[#allocation3 + $0x1078] sm:$0xf]  ;;  %v14779_v3 = vadd.f32 %v14778_v48, %v14777_v20  ;;  %v14780_v44 = vpop.f32.mrb[236].mxu1 }
 0x557   :  { %v8510_v57 = vld [vmem:[#allocation3 + $0x1458] sm:$0xf]  ;;  %v13469_v47 = vcombine.low %v8478_v5, %v8479_v61  ;;  %15332 = vmatprep.subr.bf16.mxu1 %v13493_v14  ;;  %v14781_v62 = vpop.f32.mrb[237].mxu1 }
 0x558   :  { %v8511_v59 = vld [vmem:[#allocation3 + $0x1478] sm:$0xf]  ;;  %v14782_v2 = vadd.f32 %v14781_v62, %v14780_v44  ;;  %v14783_v29 = vpop.f32.mrb[238].mxu1 }
 0x559   :  { %v8496_v37 = vld [vmem:[#allocation3 + $0x1298] sm:$0xf]  ;;  %v13485_v31 = vcombine.low %v8510_v57, %v8511_v59  ;;  %15293 = vmatpush3.bf16.msra.mxu0 %v13469_v47 }
 0x55a   :  { %v8497_v49 = vld [vmem:[#allocation3 + $0x12b8] sm:$0xf] }
 0x55b   :  { %v8528_v55 = vld [vmem:[#allocation3 + $0x1698] sm:$0xf]  ;;  %v13478_v56 = vcombine.low %v8496_v37, %v8497_v49  ;;  %15333 = vmatpush3.bf16.msra.mxu1 %v13485_v31  ;;  %v6721_v37 = vadd.f32 %v14739_v50, %v18493_v1  ;;  %v18560_v49 = vadd.f32 %v14776_v60, %v6718_v12  ;;  %v14740_v1 = vpop.f32.mrb[236].mxu0  ;;  %v16638_v50 = vld [vmem:[%s19463_s0 + $0xe0] ss:$52 sps:$4 sm:$0xff]  }
 0x55c   :  { %v8529_v4 = vld [vmem:[#allocation3 + $0x16b8] sm:$0xf] }
 0x55d   :  { %v8480_v35 = vld [vmem:[#allocation3 + $0x1098] sm:$0xf]  ;;  %v13494_v41 = vcombine.low %v8528_v55, %v8529_v4  ;;  %15294 = vmatprep.subr.bf16.mxu0 %v13478_v56 }
 0x55e   :  { %v8481_v34 = vld [vmem:[#allocation3 + $0x10b8] sm:$0xf] }
 0x55f   :  { %v8512_v11 = vld [vmem:[#allocation3 + $0x1498] sm:$0xf]  ;;  %v13470_v0 = vcombine.low %v8480_v35, %v8481_v34  ;;  %15334 = vmatprep.subr.bf16.mxu1 %v13494_v41  ;;  %v18565_v35 = vadd.f32 %v14779_v3, %v6721_v37 }
 0x560   :  { %v8513_v13 = vld [vmem:[#allocation3 + $0x14b8] sm:$0xf] }
 0x561   :  { %v16632_v43 = vld [vmem:[%s19463_s0 + $0x7c] ss:$52 sps:$4 sm:$0xff]   ;;  %v16633_v27 = vld [vmem:[%s19463_s0 + $0x84] ss:$52 sps:$4 sm:$0xff]   ;;  %v13486_v63 = vcombine.low %v8512_v11, %v8513_v13  ;;  %15295 = vmatpush3.bf16.msra.mxu0 %v13470_v0  ;;  %v14741_v13 = vpop.f32.mrb[237].mxu0 }
 0x562   :  { %9357 = vmatprep.mubr.bf16.mxu0 %v16632_v43  ;;  %v8498_v16 = vld [vmem:[#allocation3 + $0x12d8] sm:$0xf]  ;;  %9422 = vmatprep.mubr.bf16.mxu1 %v16633_v27  ;;  %v16637_v43 = vld [vmem:[%s19463_s0 + $0xec] ss:$52 sps:$4 sm:$0xff]   ;;  %v14743_v10 = vpop.f32.mrb[238].mxu0 }
 0x563   :  { %v8499_v30 = vld [vmem:[#allocation3 + $0x12f8] sm:$0xf]  ;;  %9423 = vmatmul.mubr.bf16.gmra.mrb[76].mxu1 %v16635_v51  ;;  %v14744_v54 = vpop.f32.mrb[239].mxu0 }
 0x564   :  { %v8530_v6 = vld [vmem:[#allocation3 + $0x16d8] sm:$0xf]  ;;  %v13479_v5 = vcombine.low %v8498_v16, %v8499_v30  ;;  %15335 = vmatpush3.bf16.msra.mxu1 %v13486_v63  ;;  %9430 = vmatprep.mubr.bf16.mxu1 %v16637_v43  ;;  %v14742_v30 = vadd.f32 %v14741_v13, %v14740_v1  ;;  %v14745_v20 = vadd.f32 %v14744_v54, %v14743_v10  ;;  %v14784_v63 = vpop.f32.mrb[239].mxu1 }
 0x565   :  { %v8531_v38 = vld [vmem:[#allocation3 + $0x16f8] sm:$0xf]  ;;  %v14785_v12 = vadd.f32 %v14784_v63, %v14783_v29  ;;  %v14842_v1 = vpop.f32.mrb[240].mxu1  ;;  %v9689_v63 = vld [vmem:[#allocation3 + $0x21c] sm:$0xf] }
 0x566   :  { %v8482_v33 = vld [vmem:[#allocation3 + $0x10d8] sm:$0xf]  ;;  %v13495_v22 = vcombine.low %v8530_v6, %v8531_v38  ;;  %15296 = vmatprep.subr.bf16.mxu0 %v13479_v5  ;;  %v6726_v60 = vadd.f32 %v14742_v30, %v18506_v18  ;;  %v14843_v44 = vpop.f32.mrb[241].mxu1 }
 0x567   :  { %v8483_v39 = vld [vmem:[#allocation3 + $0x10f8] sm:$0xf]  ;;  %v14844_v10 = vadd.f32 %v14843_v44, %v14842_v1  ;;  %v14845_v62 = vpop.f32.mrb[242].mxu1 }
 0x568   :  { %v8514_v61 = vld [vmem:[#allocation3 + $0x14d8] sm:$0xf]  ;;  %v13471_v25 = vcombine.low %v8482_v33, %v8483_v39  ;;  %15336 = vmatprep.subr.bf16.mxu1 %v13495_v22 }
 0x569   :  { %v8515_v53 = vld [vmem:[#allocation3 + $0x14f8] sm:$0xf] }
 0x56a   :  { %v8500_v57 = vld [vmem:[#allocation3 + $0x1318] sm:$0xf]  ;;  %v13487_v55 = vcombine.low %v8514_v61, %v8515_v53  ;;  %15297 = vmatpush3.bf16.msra.mxu0 %v13471_v25 }
 0x56b   :  { %v8501_v59 = vld [vmem:[#allocation3 + $0x1338] sm:$0xf] }
 0x56c   :  { %v16634_v19 = vld [vmem:[%s19463_s0 + $0x78] ss:$52 sps:$4 sm:$0xff]   ;;  %v13480_v4 = vcombine.low %v8500_v57, %v8501_v59  ;;  %15337 = vmatpush3.bf16.msra.mxu1 %v13487_v55  ;;  %v6729_v57 = vadd.f32 %v14745_v20, %v18511_v28  ;;  %v18578_v59 = vadd.f32 %v14782_v2, %v6726_v60  ;;  %v16639_v18 = vld [vmem:[%s19463_s0 + $0xe8] ss:$52 sps:$4 sm:$0xff]   ;;  %v14802_v28 = vpop.f32.mrb[240].mxu0 }
 0x56d   :  { %9358 = vmatmul.mubr.bf16.gmra.mrb[76].mxu0 %v16634_v19  ;;  %v8532_v8 = vld [vmem:[#allocation3 + $0x1718] sm:$0xf]  ;;  %9431 = vmatmul.mubr.bf16.gmra.mrb[80].mxu1 %v16639_v18  ;;  %v16640_v55 = vld [vmem:[%s19463_s0 + $0x14c] ss:$52 sps:$4 sm:$0xff]  }
 0x56e   :  { %v8533_v14 = vld [vmem:[#allocation3 + $0x1738] sm:$0xf]  ;;  %15298 = vmatprep.subr.bf16.mxu0 %v13480_v4 }
 0x56f   :  { %v8484_v17 = vld [vmem:[#allocation3 + $0x1118] sm:$0xf]  ;;  %v13496_v56 = vcombine.low %v8532_v8, %v8533_v14 }
 0x570   :  { %v8485_v32 = vld [vmem:[#allocation3 + $0x1138] sm:$0xf] }
 0x571   :  { %v8516_v40 = vld [vmem:[#allocation3 + $0x1518] sm:$0xf]  ;;  %v13472_v27 = vcombine.low %v8484_v17, %v8485_v32  ;;  %15338 = vmatprep.subr.bf16.mxu1 %v13496_v56  ;;  %v18583_v17 = vadd.f32 %v14785_v12, %v6729_v57  ;;  %v9674_v57 = vld [vmem:[#allocation3 + $0x3c] sm:$0xf] }
 0x572   :  { %v8517_v47 = vld [vmem:[#allocation3 + $0x1538] sm:$0xf] }
 0x573   :  { %v16636_v31 = vld [vmem:[%s19463_s0 + $0xe4] ss:$52 sps:$4 sm:$0xff]   ;;  %v13488_v0 = vcombine.low %v8516_v40, %v8517_v47  ;;  %15299 = vmatpush3.bf16.msra.mxu0 %v13472_v27  ;;  %v14803_v47 = vpop.f32.mrb[241].mxu0  ;;  %v16642_v20 = vld [vmem:[%s19463_s0 + $0x148] ss:$52 sps:$4 sm:$0xff]  }
 0x574   :  { %9365 = vmatprep.mubr.bf16.mxu0 %v16636_v31  ;;  %v8502_v34 = vld [vmem:[#allocation3 + $0x1358] sm:$0xf]  ;;  %v16641_v31 = vld [vmem:[%s19463_s0 + $0x154] ss:$52 sps:$4 sm:$0xff]   ;;  %v14805_v13 = vpop.f32.mrb[242].mxu0 }
 0x575   :  { %v8503_v11 = vld [vmem:[#allocation3 + $0x1378] sm:$0xf]  ;;  %9366 = vmatmul.mubr.bf16.gmra.mrb[80].mxu0 %v16638_v50  ;;  %15339 = vmatpush3.bf16.msra.mxu1 %v13488_v0  ;;  %v14806_v30 = vpop.f32.mrb[243].mxu0  ;;  %v14846_v0 = vpop.f32.mrb[243].mxu1 }
 0x576   :  { %v8534_v41 = vld [vmem:[#allocation3 + $0x1758] sm:$0xf]  ;;  %v13481_v33 = vcombine.low %v8502_v34, %v8503_v11  ;;  %9373 = vmatprep.mubr.bf16.mxu0 %v16640_v55  ;;  %9438 = vmatprep.mubr.bf16.mxu1 %v16641_v31  ;;  %v14804_v11 = vadd.f32 %v14803_v47, %v14802_v28  ;;  %v14807_v29 = vadd.f32 %v14806_v30, %v14805_v13  ;;  %v14808_v18 = vpop.f32.mrb[244].mxu0  ;;  %v9691_v28 = vld [vmem:[#allocation3 + $0x25c] sm:$0xf] }
 0x577   :  { %v8535_v16 = vld [vmem:[#allocation3 + $0x1778] sm:$0xf]  ;;  %v14847_v60 = vadd.f32 %v14846_v0, %v14845_v62  ;;  %v9692_v55 = vld [vmem:[#allocation3 + $0x27c] sm:$0xf] }
 0x578   :  { %v8486_v6 = vld [vmem:[#allocation3 + $0x1158] sm:$0xf]  ;;  %v13497_v5 = vcombine.low %v8534_v41, %v8535_v16  ;;  %15300 = vmatprep.subr.bf16.mxu0 %v13481_v33  ;;  %v6832_v2 = vadd.f32 %v14804_v11, %v18524_v58  ;;  %v16643_v58 = vld [vmem:[%s19463_s0 + $0x150] ss:$52 sps:$4 sm:$0xff]   ;;  %v9675_v11 = vld [vmem:[#allocation3 + $0x5c] sm:$0xf] }
 0x579   :  { %v8487_v38 = vld [vmem:[#allocation3 + $0x1178] sm:$0xf]  ;;  %9439 = vmatmul.mubr.bf16.gmra.mrb[84].mxu1 %v16643_v58  ;;  %v9676_v13 = vld [vmem:[#allocation3 + $0x7c] sm:$0xf] }
 0x57a   :  { %v8518_v39 = vld [vmem:[#allocation3 + $0x1558] sm:$0xf]  ;;  %v13473_v3 = vcombine.low %v8486_v6, %v8487_v38  ;;  %15340 = vmatprep.subr.bf16.mxu1 %v13497_v5  ;;  %v9690_v5 = vld [vmem:[#allocation3 + $0x23c] sm:$0xf]  ;;  %v18599_v12 = vadd.f32 %v14844_v10, %v6832_v2 }
 0x57b   :  { %v8519_v24 = vld [vmem:[#allocation3 + $0x1578] sm:$0xf] }
 0x57c   :  { %v8504_v61 = vld [vmem:[#allocation3 + $0x1398] sm:$0xf]  ;;  %v13489_v8 = vcombine.low %v8518_v39, %v8519_v24  ;;  %15301 = vmatpush3.bf16.msra.mxu0 %v13473_v3  ;;  %v13518_v3 = vcombine.low %v9689_v63, %v9690_v5 }
 0x57d   :  { %v8505_v53 = vld [vmem:[#allocation3 + $0x13b8] sm:$0xf]  ;;  %9374 = vmatmul.mubr.bf16.gmra.mrb[84].mxu0 %v16642_v20 }
 0x57e   :  { %v8536_v48 = vld [vmem:[#allocation3 + $0x1798] sm:$0xf]  ;;  %v13482_v14 = vcombine.low %v8504_v61, %v8505_v53  ;;  %15341 = vmatpush3.bf16.msra.mxu1 %v13489_v8  ;;  %v6835_v61 = vadd.f32 %v14807_v29, %v18529_v9  ;;  %v13511_v29 = vcombine.low %v9675_v11, %v9676_v13 }
 0x57f   :  { %v8537_v22 = vld [vmem:[#allocation3 + $0x17b8] sm:$0xf] }
 0x580   :  { %v8488_v19 = vld [vmem:[#allocation3 + $0x1198] sm:$0xf]  ;;  %v13498_v4 = vcombine.low %v8536_v48, %v8537_v22  ;;  %15302 = vmatprep.subr.bf16.mxu0 %v13482_v14  ;;  %v9673_v22 = vld [vmem:[#allocation3 + $0x1c] sm:$0xf]  ;;  %v18604_v14 = vadd.f32 %v14847_v60, %v6835_v61 }
 0x581   :  { %v8489_v37 = vld [vmem:[#allocation3 + $0x11b8] sm:$0xf] }
 0x582   :  { %v8520_v51 = vld [vmem:[#allocation3 + $0x1598] sm:$0xf]  ;;  %v13474_v43 = vcombine.low %v8488_v19, %v8489_v37  ;;  %15342 = vmatprep.subr.bf16.mxu1 %v13498_v4  ;;  %v14809_v37 = vpop.f32.mrb[245].mxu0 }
 0x583   :  { %v8521_v25 = vld [vmem:[#allocation3 + $0x15b8] sm:$0xf]  ;;  %v14810_v4 = vadd.f32 %v14809_v37, %v14808_v18 }
 0x584   :  { %v8506_v32 = vld [vmem:[#allocation3 + $0x13d8] sm:$0xf]  ;;  %v13490_v27 = vcombine.low %v8520_v51, %v8521_v25  ;;  %15303 = vmatpush3.bf16.msra.mxu0 %v13474_v43  ;;  %v14848_v51 = vpop.f32.mrb[244].mxu1  ;;  %v16645_v25 = vld [vmem:[%s19463_s0 + $0x2c] ss:$52 sps:$4 sm:$0xff]  }
 0x585   :  { %v8507_v40 = vld [vmem:[#allocation3 + $0x13f8] sm:$0xf]  ;;  %9544 = vmatprep.mubr.bf16.mxu1 %v16645_v25  ;;  %v6840_v44 = vadd.f32 %v14810_v4, %v18542_v26  ;;  %v9680_v25 = vld [vmem:[#allocation3 + $0xfc] sm:$0xf] }
 0x586   :  { %v8538_v56 = vld [vmem:[#allocation3 + $0x17d8] sm:$0xf]  ;;  %v13483_v6 = vcombine.low %v8506_v32, %v8507_v40  ;;  %15343 = vmatpush3.bf16.msra.mxu1 %v13490_v27  ;;  %v14811_v32 = vpop.f32.mrb[246].mxu0  ;;  %v14849_v40 = vpop.f32.mrb[245].mxu1  ;;  %v16646_v27 = vld [vmem:[%s19463_s0 + $0x20] ss:$52 sps:$4 sm:$0xff]  }
 0x587   :  { %v8539_v34 = vld [vmem:[#allocation3 + $0x17f8] sm:$0xf]  ;;  %v14812_v47 = vpop.f32.mrb[247].mxu0  ;;  %v14850_v1 = vadd.f32 %v14849_v40, %v14848_v51  ;;  %v14851_v31 = vpop.f32.mrb[246].mxu1  ;;  %v9679_v51 = vld [vmem:[#allocation3 + $0xdc] sm:$0xf] }
 0x588   :  { %v8490_v41 = vld [vmem:[#allocation3 + $0x11d8] sm:$0xf]  ;;  %v13499_v33 = vcombine.low %v8538_v56, %v8539_v34  ;;  %15304 = vmatprep.subr.bf16.mxu0 %v13483_v6  ;;  %v13510_v56 = vcombine.low %v9673_v22, %v9674_v57  ;;  %v14813_v43 = vadd.f32 %v14812_v47, %v14811_v32  ;;  %v9693_v6 = vld [vmem:[#allocation3 + $0x29c] sm:$0xf] }
 0x589   :  { %v8491_v16 = vld [vmem:[#allocation3 + $0x11f8] sm:$0xf]  ;;  %v18617_v2 = vadd.f32 %v14850_v1, %v6840_v44  ;;  %v13513_v44 = vcombine.low %v9679_v51, %v9680_v25 }
 0x58a   :  { %v8522_v38 = vld [vmem:[#allocation3 + $0x15d8] sm:$0xf]  ;;  %v13475_v53 = vcombine.low %v8490_v41, %v8491_v16  ;;  %15344 = vmatprep.subr.bf16.mxu1 %v13499_v33  ;;  %v14852_v41 = vpop.f32.mrb[247].mxu1  ;;  %v13519_v16 = vcombine.low %v9691_v28, %v9692_v55  ;;  %v9677_v33 = vld [vmem:[#allocation3 + $0x9c] sm:$0xf] }
 0x58b   :  { %v8523_v54 = vld [vmem:[#allocation3 + $0x15f8] sm:$0xf]  ;;  %v14853_v62 = vadd.f32 %v14852_v41, %v14851_v31  ;;  %v14854_v58 = vpop.f32.mrb[248].mxu1  ;;  %v9681_v41 = vld [vmem:[#allocation3 + $0x11c] sm:$0xf] }
 0x58c   :  { %v8540_v39 = vld [vmem:[#allocation3 + $0x1818] sm:$0xf]  ;;  %v13491_v50 = vcombine.low %v8522_v38, %v8523_v54  ;;  %15305 = vmatpush3.bf16.msra.mxu0 %v13475_v53  ;;  %v9694_v38 = vld [vmem:[#allocation3 + $0x2bc] sm:$0xf]  ;;  %v6843_v54 = vadd.f32 %v14813_v43, %v18547_v21  ;;  %v16649_v53 = vld [vmem:[%s19463_s0 + $0x94] ss:$52 sps:$4 sm:$0xff]  }
 0x58d   :  { %v8541_v24 = vld [vmem:[#allocation3 + $0x1838] sm:$0xf]  ;;  %v16648_v21 = vld [vmem:[%s19463_s0 + $0x8c] ss:$52 sps:$4 sm:$0xff]   ;;  %v13520_v60 = vcombine.low %v9693_v6, %v9694_v38  ;;  %v14855_v18 = vpop.f32.mrb[249].mxu1 }
 0x58e   :  { %v13500_v48 = vcombine.low %v8540_v39, %v8541_v24  ;;  %v16644_v9 = vld [vmem:[%s19463_s0 + $0x24] ss:$52 sps:$4 sm:$0xff]   ;;  %15345 = vmatpush3.bf16.msra.mxu1 %v13491_v50  ;;  %v16647_v26 = vld [vmem:[%s19463_s0 + $0x28] ss:$52 sps:$4 sm:$0xff]   ;;  %v14814_v24 = vpop.f32.mrb[248].mxu0  ;;  %v18622_v5 = vadd.f32 %v14853_v62, %v6843_v54 }
 0x58f   :  { %9479 = vmatprep.mubr.bf16.mxu0 %v16644_v9  ;;  %v8542_v19 = vld [vmem:[#allocation3 + $0x1858] sm:$0xf]  ;;  %15382 = vmatprep.subr.bf16.mxu1 %v13518_v3  ;;  %v9678_v39 = vld [vmem:[#allocation3 + $0xbc] sm:$0xf]  ;;  %v14815_v61 = vpop.f32.mrb[249].mxu0  ;;  %v14856_v3 = vadd.f32 %v14855_v18, %v14854_v58 }
 0x590   :  { %v8543_v8 = vld [vmem:[#allocation3 + $0x1878] sm:$0xf]  ;;  %15880 = vmatprep.subr.bf16.mxu0 %v13500_v48  ;;  %9480 = vmatmul.mubr.bf16.vlgmr.msra.gmra.mrb[88].mxu0 %v16646_v27  ;;  %v9695_v50 = vld [vmem:[#allocation3 + $0x2dc] sm:$0xf]  ;;  %v14816_v22 = vadd.f32 %v14815_v61, %v14814_v24  ;;  %v14817_v57 = vpop.f32.mrb[250].mxu0 }
 0x591   :  { %v13501_v34 = vcombine.low %v8542_v19, %v8543_v8  ;;  %v8544_v30 = vld [vmem:[#allocation3 + $0x1898] sm:$0xf]  ;;  %15881 = vmatpush3.bf16.msra.mxu0 %v13500_v48  ;;  %9545 = vmatmul.mubr.bf16.vlgmr.msra.gmra.mrb[88].mxu1 %v16647_v26  ;;  %v9696_v48 = vld [vmem:[#allocation3 + $0x2fc] sm:$0xf]  ;;  %v14818_v9 = vpop.f32.mrb[251].mxu0  ;;  %v14857_v19 = vpop.f32.mrb[250].mxu1  ;;  %v13512_v8 = vcombine.low %v9677_v33, %v9678_v39 }
 0x592   :  { %v8545_v10 = vld [vmem:[#allocation3 + $0x18b8] sm:$0xf]  ;;  %15383 = vmatpush3.bf16.msra.mxu1 %v13510_v56  ;;  %9487 = vmatprep.mubr.bf16.mxu0 %v16648_v21  ;;  %v6848_v28 = vadd.f32 %v14816_v22, %v18560_v49  ;;  %v14819_v55 = vadd.f32 %v14818_v9, %v14817_v57  ;;  %v14858_v4 = vpop.f32.mrb[251].mxu1  ;;  %v13521_v32 = vcombine.low %v9695_v50, %v9696_v48  ;;  %v9697_v56 = vld [vmem:[#allocation3 + $0x31c] sm:$0xf] }
 0x593   :  { %15882 = vmatprep.subr.bf16.mxu0 %v13501_v34  ;;  %v13502_v0 = vcombine.low %v8544_v30, %v8545_v10  ;;  %15384 = vmatprep.subr.bf16.mxu1 %v13519_v16  ;;  %v8546_v20 = vld [vmem:[#allocation3 + $0x18d8] sm:$0xf]  ;;  %v14859_v1 = vadd.f32 %v14858_v4, %v14857_v19  ;;  %v16651_v49 = vld [vmem:[%s19463_s0 + $0x90] ss:$52 sps:$4 sm:$0xff]   ;;  %v9682_v16 = vld [vmem:[#allocation3 + $0x13c] sm:$0xf] }
 0x594   :  { %v8547_v63 = vld [vmem:[#allocation3 + $0x18f8] sm:$0xf]  ;;  %9552 = vmatprep.mubr.bf16.mxu1 %v16649_v53  ;;  %v6851_v11 = vadd.f32 %v14819_v55, %v18565_v35  ;;  %v18635_v13 = vadd.f32 %v14856_v3, %v6848_v28  ;;  %v14820_v30 = vpop.f32.mrb[252].mxu0  ;;  %v16652_v35 = vld [vmem:[%s19463_s0 + $0xf4] ss:$52 sps:$4 sm:$0xff]   ;;  %v14860_v54 = vpop.f32.mrb[252].mxu1 }
 0x595   :  { %15883 = vmatpush3.bf16.msra.mxu0 %v13501_v34  ;;  %v13503_v37 = vcombine.low %v8546_v20, %v8547_v63  ;;  %v8548_v40 = vld [vmem:[#allocation3 + $0x1918] sm:$0xf]  ;;  %v9698_v34 = vld [vmem:[#allocation3 + $0x33c] sm:$0xf]  ;;  %v14821_v38 = vpop.f32.mrb[253].mxu0  ;;  %v14861_v24 = vpop.f32.mrb[253].mxu1  ;;  %v13514_v63 = vcombine.low %v9681_v41, %v9682_v16 }
 0x596   :  { %15385 = vmatpush3.bf16.msra.mxu1 %v13511_v29  ;;  %15884 = vmatprep.subr.bf16.mxu0 %v13502_v0  ;;  %v8549_v47 = vld [vmem:[#allocation3 + $0x1938] sm:$0xf]  ;;  %v13522_v10 = vcombine.low %v9697_v56, %v9698_v34  ;;  %v18640_v6 = vadd.f32 %v14859_v1, %v6851_v11  ;;  %v9699_v29 = vld [vmem:[#allocation3 + $0x35c] sm:$0xf]  ;;  %v14822_v33 = vadd.f32 %v14821_v38, %v14820_v30  ;;  %v14823_v39 = vpop.f32.mrb[254].mxu0  ;;  %v14863_v20 = vpop.f32.mrb[254].mxu1 }
 0x597   :  { %15386 = vmatprep.subr.bf16.mxu1 %v13520_v60  ;;  %v16650_v31 = vld [vmem:[%s19463_s0 + $0x88] ss:$52 sps:$4 sm:$0xff]   ;;  %v13504_v43 = vcombine.low %v8548_v40, %v8549_v47  ;;  %v14824_v21 = vpop.f32.mrb[255].mxu0  ;;  %v14862_v60 = vadd.f32 %v14861_v24, %v14860_v54  ;;  %v14864_v22 = vpop.f32.mrb[255].mxu1  ;;  %v16654_v19 = vld [vmem:[%s19463_s0 + $0xf0] ss:$52 sps:$4 sm:$0xff]  }
 0x598   :  { %9488 = vmatmul.mubr.bf16.gmra.mrb[92].mxu0 %v16650_v31  ;;  %v8550_v62 = vld [vmem:[#allocation3 + $0x1958] sm:$0xf]  ;;  %v9683_v58 = vld [vmem:[#allocation3 + $0x15c] sm:$0xf]  ;;  %v6856_v50 = vadd.f32 %v14822_v33, %v18578_v59  ;;  %v14825_v48 = vadd.f32 %v14824_v21, %v14823_v39  ;;  %v14865_v3 = vadd.f32 %v14864_v22, %v14863_v20  ;;  %v15850_v40 = vpop.f32.mrb[0].mxu0  ;;  %v14894_v41 = vpop.f32.mrb[0].mxu1 }
 0x599   :  { %15885 = vmatpush3.bf16.msra.mxu0 %v13502_v0  ;;  %9553 = vmatmul.mubr.bf16.gmra.mrb[92].mxu1 %v16651_v49  ;;  %v8551_v27 = vld [vmem:[#allocation3 + $0x1978] sm:$0xf]  ;;  %v9700_v0 = vld [vmem:[#allocation3 + $0x37c] sm:$0xf]  ;;  %v6970_v34 = vadd.f32 %v15850_v40, %v18617_v2  ;;  %v6961_v11 = vpop.f32.mrb[1].mxu0 }
 0x59a   :  { %15387 = vmatpush3.bf16.msra.mxu1 %v13512_v8  ;;  %15886 = vmatprep.subr.bf16.mxu0 %v13503_v37  ;;  %v16653_v26 = vld [vmem:[%s19463_s0 + $0xfc] ss:$52 sps:$4 sm:$0xff]   ;;  %v13505_v61 = vcombine.low %v8550_v62, %v8551_v27  ;;  %v13523_v57 = vcombine.low %v9699_v29, %v9700_v0  ;;  %v6859_v51 = vadd.f32 %v14825_v48, %v18583_v17  ;;  %v16655_v59 = vld [vmem:[%s19463_s0 + $0xf8] ss:$52 sps:$4 sm:$0xff]   ;;  %v18664_v16 = vld [vmem:[#allocation6 + $0x4] ss:$0 sm:$0xff] }
 0x59b   :  { %15388 = vmatprep.subr.bf16.mxu1 %v13521_v32  ;;  %9495 = vmatprep.mubr.bf16.mxu0 %v16652_v35  ;;  %v9684_v53 = vld [vmem:[#allocation3 + $0x17c] sm:$0xf]  ;;  %v8552_v18 = vld [vmem:[#allocation3 + $0x1998] sm:$0xf]  ;;  %v18653_v25 = vadd.f32 %v14862_v60, %v6856_v50  ;;  %v6962_v30 = vadd.f32 %v6961_v11, %v18599_v12  ;;  %v15851_v35 = vpop.f32.mrb[2].mxu0  ;;  %v14895_v27 = vpop.f32.mrb[1].mxu1 }
 0x59c   :  { %9560 = vmatprep.mubr.bf16.mxu1 %v16653_v26  ;;  %v8553_v9 = vld [vmem:[#allocation3 + $0x19b8] sm:$0xf]  ;;  %v9701_v8 = vld [vmem:[#allocation3 + $0x39c] sm:$0xf]  ;;  %v13515_v28 = vcombine.low %v9683_v58, %v9684_v53  ;;  %v18658_v56 = vadd.f32 %v14865_v3, %v6859_v51  ;;  %v6994_v2 = vmax.f32 %v6970_v34, 0.0  ;;  %v6973_v38 = vadd.f32 %v15851_v35, %v18622_v5  ;;  %v6964_v54 = vpop.f32.mrb[3].mxu0 }
 0x59d   :  { %15887 = vmatpush3.bf16.msra.mxu0 %v13503_v37  ;;  %v9702_v37 = vld [vmem:[#allocation3 + $0x3bc] sm:$0xf]  ;;  %v13506_v55 = vcombine.low %v8552_v18, %v8553_v9  ;;  %v8554_v1 = vld [vmem:[#allocation3 + $0x19d8] sm:$0xf]  ;;  %v18670_v0 = vadd.f32 %v14895_v27, %v14894_v41  ;;  %v14897_v33 = vpop.f32.mrb[2].mxu1  ;;  %v6992_v39 = vmax.f32 %v6962_v30, 0.0  ;;  %v6965_v12 = vadd.f32 %v6964_v54, %v18604_v14 }
 0x59e   :  { %15389 = vmatpush3.bf16.msra.mxu1 %v13513_v44  ;;  %15888 = vmatprep.subr.bf16.mxu0 %v13504_v43  ;;  %v9685_v4 = vld [vmem:[#allocation3 + $0x19c] sm:$0xf]  ;;  %v13524_v47 = vcombine.low %v9701_v8, %v9702_v37  ;;  %v8555_v31 = vld [vmem:[#allocation3 + $0x19f8] sm:$0xf]  ;;  %v14898_v20 = vpop.f32.mrb[3].mxu1 }
 0x59f   :  { %15390 = vmatprep.subr.bf16.mxu1 %v13522_v10  ;;  %v9686_v32 = vld [vmem:[#allocation3 + $0x1bc] sm:$0xf]  ;;  %v16657_v49 = vld [vmem:[%s19463_s0 + $0x164] ss:$52 sps:$4 sm:$0xff]   ;;  %v13507_v26 = vcombine.low %v8554_v1, %v8555_v31  ;;  %v18677_v50 = vadd.f32 %v14898_v20, %v14897_v33  ;;  %v7007_v48 = vmul.f32 %v18664_v16, %v6992_v39  ;;  %v6993_v14 = vmax.f32 %v6965_v12, 0.0 }
 0x5a0   :  { %9496 = vmatmul.mubr.bf16.gmra.mrb[96].mxu0 %v16654_v19  ;;  %v16656_v17 = vld [vmem:[%s19463_s0 + $0x15c] ss:$52 sps:$4 sm:$0xff]   ;;  %v13516_v10 = vcombine.low %v9685_v4, %v9686_v32  ;;  %v16658_v5 = vld [vmem:[%s19463_s0 + $0x158] ss:$52 sps:$4 sm:$0xff]   ;;  %v16659_v22 = vld [vmem:[%s19463_s0 + $0x160] ss:$52 sps:$4 sm:$0xff]  }
 0x5a1   :  { %15889 = vmatpush3.bf16.msra.mxu0 %v13504_v43  ;;  %9561 = vmatmul.mubr.bf16.gmra.mrb[96].mxu1 %v16655_v59  ;;  %v9703_v44 = vld [vmem:[#allocation3 + $0x3dc] sm:$0xf]  ;;  %v18689_v59 = vadd.f32 %v7007_v48, %v18370_v36  ;;  %v16661_v36 = vld [vmem:[%s19463_s0 + $0x4] ss:$52 sps:$4 sm:$0xff]  }
 0x5a2   :  { %15391 = vmatpush3.bf16.msra.mxu1 %v13514_v63  ;;  %15890 = vmatprep.subr.bf16.mxu0 %v13505_v61  ;;  %v9704_v43 = vld [vmem:[#allocation3 + $0x3fc] sm:$0xf]  ;;  %v7009_v63 = vmul.f32 %v18664_v16, %v6994_v2 }
 0x5a3   :  { %15392 = vmatprep.subr.bf16.mxu1 %v13523_v57  ;;  %9503 = vmatprep.mubr.bf16.mxu0 %v16656_v17  ;;  %v18667_v62 = vld [vmem:[#allocation3 + $0x1dc] sm:$0xf]  ;;  %v13525_v24 = vcombine.low %v9703_v44, %v9704_v43 }
 0x5a4   :  { %9568 = vmatprep.mubr.bf16.mxu1 %v16657_v49  ;;  %v9688_v29 = vld [vmem:[#allocation3 + $0x1fc] sm:$0xf]  ;;  %v18685_v9 = vadd.f32 %v7009_v63, %v18402_v15  ;;  %v16660_v15 = vld [vmem:[%s19463_s0 + $0x30] ss:$52 sps:$4 sm:$0xff]   ;;  %v14900_v49 = vpop.f32.mrb[4].mxu1 }
 0x5a5   :  { %15891 = vmatpush3.bf16.msra.mxu0 %v13505_v61  ;;  %v9721_v21 = vld [vmem:[#allocation3 + $0x61c] sm:$0xf]  ;;  %v6995_v61 = vmax.f32 %v6973_v38, 0.0  ;;  %v13517_v57 = vcombine.low %v18667_v62, %v9688_v29 }
 0x5a6   :  { %15393 = vmatpush3.bf16.msra.mxu1 %v13515_v28  ;;  %15892 = vmatprep.subr.bf16.mxu0 %v13506_v55  ;;  %v9722_v60 = vld [vmem:[#allocation3 + $0x63c] sm:$0xf]  ;;  %v7008_v28 = vmul.f32 %v18664_v16, %v6993_v14 }
 0x5a7   :  { %15394 = vmatprep.subr.bf16.mxu1 %v13524_v47  ;;  %v9753_v58 = vld [vmem:[#allocation3 + $0xa1c] sm:$0xf]  ;;  %v7010_v3 = vmul.f32 %v18664_v16, %v6995_v61  ;;  %v13534_v19 = vcombine.low %v9721_v21, %v9722_v60 }
 0x5a8   :  { %9504 = vmatmul.mubr.bf16.gmra.mrb[100].mxu0 %v16658_v5  ;;  %v9754_v53 = vld [vmem:[#allocation3 + $0xa3c] sm:$0xf]  ;;  %v18705_v44 = vadd.f32 %v7008_v28, %v18382_v23 }
 0x5a9   :  { %15893 = vmatpush3.bf16.msra.mxu0 %v13506_v55  ;;  %9569 = vmatmul.mubr.bf16.gmra.mrb[100].mxu1 %v16659_v22  ;;  %v9705_v18 = vld [vmem:[#allocation3 + $0x41c] sm:$0xf]  ;;  %v15854_v55 = vpop.f32.mrb[4].mxu0  ;;  %v13550_v4 = vcombine.low %v9753_v58, %v9754_v53  ;;  %v18696_v17 = vadd.f32 %v7010_v3, %v18413_v7 }
 0x5aa   :  { %15395 = vmatpush3.bf16.msra.mxu1 %v13516_v10  ;;  %15894 = vmatprep.subr.bf16.mxu0 %v13507_v26  ;;  %v9706_v8 = vld [vmem:[#allocation3 + $0x43c] sm:$0xf]  ;;  %v6986_v47 = vadd.f32 %v15854_v55, %v18653_v25  ;;  %v6977_v1 = vpop.f32.mrb[5].mxu0  ;;  %v14901_v10 = vpop.f32.mrb[5].mxu1 }
 0x5ab   :  { %v9737_v37 = vld [vmem:[#allocation3 + $0x81c] sm:$0xf]  ;;  %15396 = vmatprep.subr.bf16.mxu1 %v13525_v24  ;;  %15896 = vmatprep.mubr.bf16.mxu0 %v16660_v15  ;;  %v6978_v43 = vadd.f32 %v6977_v1, %v18635_v13  ;;  %v15855_v7 = vpop.f32.mrb[6].mxu0  ;;  %v13526_v41 = vcombine.low %v9705_v18, %v9706_v8  ;;  %v18709_v29 = vadd.f32 %v14901_v10, %v14900_v49  ;;  %v14903_v23 = vpop.f32.mrb[6].mxu1 }
 0x5ac   :  { %v9738_v51 = vld [vmem:[#allocation3 + $0x83c] sm:$0xf]  ;;  %10544 = vmatprep.mubr.bf16.mxu1 %v16661_v36  ;;  %v6998_v62 = vmax.f32 %v6986_v47, 0.0  ;;  %v6989_v27 = vadd.f32 %v15855_v7, %v18658_v56  ;;  %v6980_v2 = vpop.f32.mrb[7].mxu0  ;;  %v14904_v24 = vpop.f32.mrb[7].mxu1 }
 0x5ad   :  { %v9723_v32 = vld [vmem:[#allocation3 + $0x65c] sm:$0xf]  ;;  %15895 = vmatpush3.bf16.msra.mxu0 %v13507_v26  ;;  %v13542_v25 = vcombine.low %v9737_v37, %v9738_v51  ;;  %v6996_v33 = vmax.f32 %v6978_v43, 0.0  ;;  %v6981_v13 = vadd.f32 %v6980_v2, %v18640_v6  ;;  %v16662_v56 = vld [vmem:[%s19463_s0 + $0x98] ss:$52 sps:$4 sm:$0xff]   ;;  %v18716_v61 = vadd.f32 %v14904_v24, %v14903_v23 }
 0x5ae   :  { %v9724_v40 = vld [vmem:[#allocation3 + $0x67c] sm:$0xf]  ;;  %15397 = vmatpush3.bf16.msra.mxu1 %v13517_v57  ;;  %15422 = vmatprep.subr.bf16.mxu0 %v13534_v19  ;;  %v7013_v21 = vmul.f32 %v18664_v16, %v6998_v62  ;;  %v6999_v60 = vmax.f32 %v6989_v27, 0.0 }
 0x5af   :  { %v18702_v31 = vld [vmem:[#allocation3 + $0x45c] sm:$0xf]  ;;  %v13535_v38 = vcombine.low %v9723_v32, %v9724_v40  ;;  %15462 = vmatprep.subr.bf16.mxu1 %v13550_v4  ;;  %v7011_v5 = vmul.f32 %v18664_v16, %v6996_v33  ;;  %v6997_v6 = vmax.f32 %v6981_v13, 0.0  ;;  %v14906_v32 = vpop.f32.mrb[8].mxu1 }
 0x5b0   :  { %v9755_v34 = vld [vmem:[#allocation3 + $0xa5c] sm:$0xf]  ;;  %15897 = vmatmul.mubr.bf16.vlgmr.msra.gmra.mrb[104].mxu0 %v16662_v56  ;;  %v18724_v14 = vadd.f32 %v7013_v21, %v18449_v42  ;;  %v7014_v22 = vmul.f32 %v18664_v16, %v6999_v60 }
 0x5b1   :  { %v9756_v11 = vld [vmem:[#allocation3 + $0xa7c] sm:$0xf]  ;;  %15423 = vmatpush3.bf16.msra.mxu0 %v13526_v41  ;;  %v18728_v8 = vadd.f32 %v7011_v5, %v18424_v45  ;;  %v7012_v37 = vmul.f32 %v18664_v16, %v6997_v6 }
 0x5b2   :  { %v9708_v30 = vld [vmem:[#allocation3 + $0x47c] sm:$0xf]  ;;  %v13551_v26 = vcombine.low %v9755_v34, %v9756_v11  ;;  %15424 = vmatprep.subr.bf16.mxu0 %v13535_v38  ;;  %v18735_v4 = vadd.f32 %v7014_v22, %v18461_v46  ;;  %v14907_v34 = vpop.f32.mrb[9].mxu1 }
 0x5b3   :  { %v9739_v35 = vld [vmem:[#allocation3 + $0x85c] sm:$0xf]  ;;  %v13527_v53 = vcombine.low %v18702_v31, %v9708_v30  ;;  %v18741_v47 = vadd.f32 %v7012_v37, %v18432_v52  ;;  %v18743_v49 = vadd.f32 %v14907_v34, %v14906_v32  ;;  %v14909_v43 = vpop.f32.mrb[10].mxu1 }
 0x5b4   :  { %v9740_v54 = vld [vmem:[#allocation3 + $0x87c] sm:$0xf]  ;;  %v14910_v30 = vpop.f32.mrb[11].mxu1 }
 0x5b5   :  { %v9725_v39 = vld [vmem:[#allocation3 + $0x69c] sm:$0xf]  ;;  %v13543_v48 = vcombine.low %v9739_v35, %v9740_v54  ;;  %15425 = vmatpush3.bf16.msra.mxu0 %v13527_v53  ;;  %v18748_v62 = vadd.f32 %v14910_v30, %v14909_v43 }
 0x5b6   :  { %v9726_v12 = vld [vmem:[#allocation3 + $0x6bc] sm:$0xf] }
 0x5b7   :  { %v9757_v20 = vld [vmem:[#allocation3 + $0xa9c] sm:$0xf]  ;;  %v13536_v57 = vcombine.low %v9725_v39, %v9726_v12  ;;  %v16668_v12 = vld [vmem:[%s19463_s0 + $0xd4] ss:$52 sps:$4 sm:$0xff]  }
 0x5b8   :  { %v9758_v63 = vld [vmem:[#allocation3 + $0xabc] sm:$0xf] }
 0x5b9   :  { %v16663_v58 = vld [vmem:[%s19463_s0] ss:$52 sps:$4 sm:$0xff]   ;;  %v13552_v42 = vcombine.low %v9757_v20, %v9758_v63  ;;  %15426 = vmatprep.subr.bf16.mxu0 %v13536_v57  ;;  %v16666_v10 = vld [vmem:[%s19463_s0 + $0x168] ss:$52 sps:$4 sm:$0xff]   ;;  %v14912_v20 = vpop.f32.mrb[12].mxu1 }
 0x5ba   :  { %10545 = vmatmul.mubr.bf16.vlgmr.msra.gmra.mrb[104].mxu1 %v16663_v58  ;;  %v9709_v18 = vld [vmem:[#allocation3 + $0x49c] sm:$0xf]  ;;  %v14913_v53 = vpop.f32.mrb[13].mxu1 }
 0x5bb   :  { %15463 = vmatpush3.bf16.msra.mxu1 %v13542_v25  ;;  %v9710_v3 = vld [vmem:[#allocation3 + $0x4bc] sm:$0xf]  ;;  %v18759_v57 = vadd.f32 %v14913_v53, %v14912_v20 }
 0x5bc   :  { %v9741_v19 = vld [vmem:[#allocation3 + $0x89c] sm:$0xf]  ;;  %15464 = vmatprep.subr.bf16.mxu1 %v13551_v26  ;;  %v13528_v1 = vcombine.low %v9709_v18, %v9710_v3  ;;  %v14915_v18 = vpop.f32.mrb[14].mxu1 }
 0x5bd   :  { %v16664_v51 = vld [vmem:[%s19463_s0 + $0x100] ss:$52 sps:$4 sm:$0xff]   ;;  %v16667_v38 = vld [vmem:[%s19463_s0 + $0x68] ss:$52 sps:$4 sm:$0xff]  }
 0x5be   :  { %15900 = vmatprep.mubr.bf16.mxu0 %v16664_v51  ;;  %v9742_v28 = vld [vmem:[#allocation3 + $0x8bc] sm:$0xf]  ;;  %15427 = vmatpush3.bf16.msra.mxu0 %v13528_v1  ;;  %v16670_v1 = vld [vmem:[%s19463_s0 + $0xd0] ss:$52 sps:$4 sm:$0xff]  }
 0x5bf   :  { %v9727_v55 = vld [vmem:[#allocation3 + $0x6dc] sm:$0xf]  ;;  %15465 = vmatpush3.bf16.msra.mxu1 %v13543_v48  ;;  %v13544_v46 = vcombine.low %v9741_v19, %v9742_v28  ;;  %15901 = vmatmul.mubr.bf16.gmra.mrb[108].mxu0 %v16666_v10 }
 0x5c0   :  { %v9728_v15 = vld [vmem:[#allocation3 + $0x6fc] sm:$0xf]  ;;  %15466 = vmatprep.subr.bf16.mxu1 %v13552_v42  ;;  %v14916_v42 = vpop.f32.mrb[15].mxu1 }
 0x5c1   :  { %v16665_v45 = vld [vmem:[%s19463_s0 + $0x6c] ss:$52 sps:$4 sm:$0xff]   ;;  %v13537_v11 = vcombine.low %v9727_v55, %v9728_v15  ;;  %v18766_v32 = vadd.f32 %v14916_v42, %v14915_v18  ;;  %v16671_v30 = vld [vmem:[%s19463_s0 + $0x13c] ss:$52 sps:$4 sm:$0xff]  }
 0x5c2   :  { %10552 = vmatprep.mubr.bf16.mxu1 %v16665_v45  ;;  %v9759_v16 = vld [vmem:[#allocation3 + $0xadc] sm:$0xf]  ;;  %v18764_v45 = vld [vmem:[%s19465_s2 + $0x5] ss:$0 sm:$0xff]  ;;  %v16672_v42 = vld [vmem:[%s19463_s0 + $0x138] ss:$52 sps:$4 sm:$0xff]  }
 0x5c3   :  { %v9760_v40 = vld [vmem:[#allocation3 + $0xafc] sm:$0xf]  ;;  %10553 = vmatmul.mubr.bf16.gmra.mrb[108].mxu1 %v16667_v38  ;;  %15428 = vmatprep.subr.bf16.mxu0 %v13537_v11 }
 0x5c4   :  { %v9711_v36 = vld [vmem:[#allocation3 + $0x4dc] sm:$0xf]  ;;  %v13553_v25 = vcombine.low %v9759_v16, %v9760_v40  ;;  %15467 = vmatpush3.bf16.msra.mxu1 %v13544_v46  ;;  %10560 = vmatprep.mubr.bf16.mxu1 %v16668_v12 }
 0x5c5   :  { %v9712_v31 = vld [vmem:[#allocation3 + $0x4fc] sm:$0xf] }
 0x5c6   :  { %v9743_v7 = vld [vmem:[#allocation3 + $0x8dc] sm:$0xf]  ;;  %v13529_v54 = vcombine.low %v9711_v36, %v9712_v31  ;;  %15468 = vmatprep.subr.bf16.mxu1 %v13553_v25  ;;  %v14934_v25 = vpop.f32.mrb[8].mxu0 }
 0x5c7   :  { %v9744_v41 = vld [vmem:[#allocation3 + $0x8fc] sm:$0xf] }
 0x5c8   :  { %v9729_v35 = vld [vmem:[#allocation3 + $0x71c] sm:$0xf]  ;;  %v13545_v23 = vcombine.low %v9743_v7, %v9744_v41  ;;  %15429 = vmatpush3.bf16.msra.mxu0 %v13529_v54  ;;  %v7897_v41 = vadd.f32 %v18670_v0, %v18764_v45 }
 0x5c9   :  { %v9730_v52 = vld [vmem:[#allocation3 + $0x73c] sm:$0xf] }
 0x5ca   :  { %v9761_v27 = vld [vmem:[#allocation3 + $0xb1c] sm:$0xf]  ;;  %v13538_v33 = vcombine.low %v9729_v35, %v9730_v52  ;;  %15469 = vmatpush3.bf16.msra.mxu1 %v13545_v23  ;;  %v7900_v23 = vadd.f32 %v18677_v50, %v18764_v45 }
 0x5cb   :  { %v9762_v2 = vld [vmem:[#allocation3 + $0xb3c] sm:$0xf]  ;;  %10561 = vmatmul.mubr.bf16.gmra.mrb[112].mxu1 %v16670_v1 }
 0x5cc   :  { %v9713_v13 = vld [vmem:[#allocation3 + $0x51c] sm:$0xf]  ;;  %v13554_v24 = vcombine.low %v9761_v27, %v9762_v2  ;;  %15430 = vmatprep.subr.bf16.mxu0 %v13538_v33  ;;  %10568 = vmatprep.mubr.bf16.mxu1 %v16671_v30  ;;  %v14935_v27 = vpop.f32.mrb[9].mxu0  ;;  %v14974_v2 = vpop.f32.mrb[16].mxu1 }
 0x5cd   :  { %v9714_v26 = vld [vmem:[#allocation3 + $0x53c] sm:$0xf]  ;;  %v14936_v33 = vadd.f32 %v14935_v27, %v14934_v25  ;;  %v14975_v0 = vpop.f32.mrb[17].mxu1 }
 0x5ce   :  { %v9745_v39 = vld [vmem:[#allocation3 + $0x91c] sm:$0xf]  ;;  %v13530_v58 = vcombine.low %v9713_v13, %v9714_v26  ;;  %15470 = vmatprep.subr.bf16.mxu1 %v13554_v24  ;;  %v14937_v13 = vpop.f32.mrb[10].mxu0 }
 0x5cf   :  { %v9746_v21 = vld [vmem:[#allocation3 + $0x93c] sm:$0xf]  ;;  %v14938_v24 = vpop.f32.mrb[11].mxu0 }
 0x5d0   :  { %v9731_v60 = vld [vmem:[#allocation3 + $0x75c] sm:$0xf]  ;;  %v13546_v3 = vcombine.low %v9745_v39, %v9746_v21  ;;  %15431 = vmatpush3.bf16.msra.mxu0 %v13530_v58  ;;  %v14976_v21 = vadd.f32 %v14975_v0, %v14974_v2  ;;  %v14939_v58 = vadd.f32 %v14938_v24, %v14937_v13 }
 0x5d1   :  { %v9732_v56 = vld [vmem:[#allocation3 + $0x77c] sm:$0xf] }
 0x5d2   :  { %v9763_v63 = vld [vmem:[#allocation3 + $0xb5c] sm:$0xf]  ;;  %v13539_v19 = vcombine.low %v9731_v60, %v9732_v56  ;;  %15471 = vmatpush3.bf16.msra.mxu1 %v13546_v3  ;;  %v14977_v60 = vpop.f32.mrb[18].mxu1 }
 0x5d3   :  { %v9764_v5 = vld [vmem:[#allocation3 + $0xb7c] sm:$0xf]  ;;  %v14978_v53 = vpop.f32.mrb[19].mxu1  ;;  %10569 = vmatmul.mubr.bf16.gmra.mrb[116].mxu1 %v16672_v42 }
 0x5d4   :  { %v16669_v6 = vld [vmem:[%s19463_s0 + $0xc] ss:$52 sps:$4 sm:$0xff]   ;;  %v13555_v28 = vcombine.low %v9763_v63, %v9764_v5  ;;  %15432 = vmatprep.subr.bf16.mxu0 %v13539_v19  ;;  %v14979_v18 = vadd.f32 %v14978_v53, %v14977_v60  ;;  %v14980_v30 = vpop.f32.mrb[20].mxu1 }
 0x5d5   :  { %10609 = vmatprep.mubr.bf16.mxu0 %v16669_v6  ;;  %v9715_v48 = vld [vmem:[#allocation3 + $0x55c] sm:$0xf]  ;;  %v7962_v6 = vadd.f32 %v14936_v33, %v7897_v41  ;;  %v14981_v2 = vpop.f32.mrb[21].mxu1 }
 0x5d6   :  { %v9716_v22 = vld [vmem:[#allocation3 + $0x57c] sm:$0xf]  ;;  %15472 = vmatprep.subr.bf16.mxu1 %v13555_v28  ;;  %v14982_v13 = vadd.f32 %v14981_v2, %v14980_v30  ;;  %v14983_v0 = vpop.f32.mrb[22].mxu1 }
 0x5d7   :  { %v9747_v37 = vld [vmem:[#allocation3 + $0x95c] sm:$0xf]  ;;  %v13531_v36 = vcombine.low %v9715_v48, %v9716_v22 }
 0x5d8   :  { %v9748_v51 = vld [vmem:[#allocation3 + $0x97c] sm:$0xf] }
 0x5d9   :  { %v9733_v55 = vld [vmem:[#allocation3 + $0x79c] sm:$0xf]  ;;  %v13547_v34 = vcombine.low %v9747_v37, %v9748_v51  ;;  %15433 = vmatpush3.bf16.msra.mxu0 %v13531_v36  ;;  %v7965_v37 = vadd.f32 %v14939_v58, %v7900_v23  ;;  %v18778_v51 = vadd.f32 %v14976_v21, %v7962_v6 }
 0x5da   :  { %v9734_v15 = vld [vmem:[#allocation3 + $0x7bc] sm:$0xf] }
 0x5db   :  { %v9765_v16 = vld [vmem:[#allocation3 + $0xb9c] sm:$0xf]  ;;  %v13540_v46 = vcombine.low %v9733_v55, %v9734_v15  ;;  %15473 = vmatpush3.bf16.msra.mxu1 %v13547_v34  ;;  %v18785_v34 = vadd.f32 %v14979_v18, %v7965_v37 }
 0x5dc   :  { %v9766_v40 = vld [vmem:[#allocation3 + $0xbbc] sm:$0xf] }
 0x5dd   :  { %v9717_v31 = vld [vmem:[#allocation3 + $0x59c] sm:$0xf]  ;;  %v13556_v35 = vcombine.low %v9765_v16, %v9766_v40  ;;  %15434 = vmatprep.subr.bf16.mxu0 %v13540_v46  ;;  %v14940_v46 = vpop.f32.mrb[12].mxu0 }
 0x5de   :  { %v9718_v11 = vld [vmem:[#allocation3 + $0x5bc] sm:$0xf]  ;;  %v14941_v25 = vpop.f32.mrb[13].mxu0 }
 0x5df   :  { %v9749_v43 = vld [vmem:[#allocation3 + $0x99c] sm:$0xf]  ;;  %v13532_v26 = vcombine.low %v9717_v31, %v9718_v11  ;;  %15474 = vmatprep.subr.bf16.mxu1 %v13556_v35  ;;  %v7905_v31 = vadd.f32 %v18709_v29, %v18764_v45  ;;  %v16673_v11 = vld [vmem:[%s19463_s0 + $0x14] ss:$52 sps:$4 sm:$0xff]   ;;  %v14942_v29 = vadd.f32 %v14941_v25, %v14940_v46  ;;  %v14943_v27 = vpop.f32.mrb[14].mxu0  ;;  %v7916_v25 = vadd.f32 %v18748_v62, %v18764_v45 }
 0x5e0   :  { %v9750_v7 = vld [vmem:[#allocation3 + $0x9bc] sm:$0xf]  ;;  %10674 = vmatprep.mubr.bf16.mxu1 %v16673_v11  ;;  %v14944_v33 = vpop.f32.mrb[15].mxu0 }
 0x5e1   :  { %v9735_v52 = vld [vmem:[#allocation3 + $0x7dc] sm:$0xf]  ;;  %v13548_v56 = vcombine.low %v9749_v43, %v9750_v7  ;;  %15435 = vmatpush3.bf16.msra.mxu0 %v13532_v26  ;;  %v7970_v21 = vadd.f32 %v14942_v29, %v7905_v31  ;;  %v14945_v60 = vadd.f32 %v14944_v33, %v14943_v27 }
 0x5e2   :  { %v9736_v10 = vld [vmem:[#allocation3 + $0x7fc] sm:$0xf] }
 0x5e3   :  { %v9767_v38 = vld [vmem:[#allocation3 + $0xbdc] sm:$0xf]  ;;  %v13541_v20 = vcombine.low %v9735_v52, %v9736_v10  ;;  %15475 = vmatpush3.bf16.msra.mxu1 %v13548_v56  ;;  %v7908_v10 = vadd.f32 %v18716_v61, %v18764_v45  ;;  %v14984_v56 = vpop.f32.mrb[23].mxu1 }
 0x5e4   :  { %v9768_v54 = vld [vmem:[#allocation3 + $0xbfc] sm:$0xf] }
 0x5e5   :  { %v9719_v39 = vld [vmem:[#allocation3 + $0x5dc] sm:$0xf]  ;;  %v13557_v50 = vcombine.low %v9767_v38, %v9768_v54  ;;  %15436 = vmatprep.subr.bf16.mxu0 %v13541_v20 }
 0x5e6   :  { %v9720_v12 = vld [vmem:[#allocation3 + $0x5fc] sm:$0xf] }
 0x5e7   :  { %v9751_v63 = vld [vmem:[#allocation3 + $0x9dc] sm:$0xf]  ;;  %v13533_v28 = vcombine.low %v9719_v39, %v9720_v12  ;;  %15476 = vmatprep.subr.bf16.mxu1 %v13557_v50  ;;  %v7973_v50 = vadd.f32 %v14945_v60, %v7908_v10 }
 0x5e8   :  { %v9752_v5 = vld [vmem:[#allocation3 + $0x9fc] sm:$0xf] }
 0x5e9   :  { %v9785_v48 = vld [vmem:[#allocation3 + $0xe1c] sm:$0xf]  ;;  %v13549_v15 = vcombine.low %v9751_v63, %v9752_v5  ;;  %15437 = vmatpush3.bf16.msra.mxu0 %v13533_v28  ;;  %v14985_v5 = vadd.f32 %v14984_v56, %v14983_v0  ;;  %v16678_v56 = vld [vmem:[%s19463_s0 + $0x70] ss:$52 sps:$4 sm:$0xff]  }
 0x5ea   :  { %v9786_v22 = vld [vmem:[#allocation3 + $0xe3c] sm:$0xf] }
 0x5eb   :  { %v9817_v3 = vld [vmem:[#allocation3 + $0x121c] sm:$0xf]  ;;  %v13566_v16 = vcombine.low %v9785_v48, %v9786_v22  ;;  %15477 = vmatpush3.bf16.msra.mxu1 %v13549_v15  ;;  %v18795_v48 = vadd.f32 %v14982_v13, %v7970_v21  ;;  %v16675_v22 = vld [vmem:[%s19463_s0 + $0x10] ss:$52 sps:$4 sm:$0xff]   ;;  %v7913_v15 = vadd.f32 %v18743_v49, %v18764_v45 }
 0x5ec   :  { %v9818_v19 = vld [vmem:[#allocation3 + $0x123c] sm:$0xf] }
 0x5ed   :  { %v9769_v55 = vld [vmem:[#allocation3 + $0xc1c] sm:$0xf]  ;;  %v13582_v43 = vcombine.low %v9817_v3, %v9818_v19  ;;  %15502 = vmatprep.subr.bf16.mxu0 %v13566_v16  ;;  %v18802_v16 = vadd.f32 %v14985_v5, %v7973_v50 }
 0x5ee   :  { %v9770_v40 = vld [vmem:[#allocation3 + $0xc3c] sm:$0xf]  ;;  %10675 = vmatmul.mubr.bf16.vlgmr.msra.gmra.mrb[120].mxu1 %v16675_v22 }
 0x5ef   :  { %v9801_v1 = vld [vmem:[#allocation3 + $0x101c] sm:$0xf]  ;;  %v13558_v38 = vcombine.low %v9769_v55, %v9770_v40  ;;  %15542 = vmatprep.subr.bf16.mxu1 %v13582_v43  ;;  %v14946_v40 = vpop.f32.mrb[16].mxu0  ;;  %v14986_v43 = vpop.f32.mrb[24].mxu1 }
 0x5f0   :  { %v9802_v36 = vld [vmem:[#allocation3 + $0x103c] sm:$0xf]  ;;  %v14947_v11 = vpop.f32.mrb[17].mxu0 }
 0x5f1   :  { %v9787_v7 = vld [vmem:[#allocation3 + $0xe5c] sm:$0xf]  ;;  %v13574_v26 = vcombine.low %v9801_v1, %v9802_v36  ;;  %v16676_v1 = vld [vmem:[%s19463_s0 + $0x74] ss:$52 sps:$4 sm:$0xff]   ;;  %v14948_v30 = vadd.f32 %v14947_v11, %v14946_v40 }
 0x5f2   :  { %v9788_v41 = vld [vmem:[#allocation3 + $0xe7c] sm:$0xf] }
 0x5f3   :  { %v9819_v35 = vld [vmem:[#allocation3 + $0x125c] sm:$0xf]  ;;  %v13567_v39 = vcombine.low %v9787_v7, %v9788_v41  ;;  %15543 = vmatpush3.bf16.msra.mxu1 %v13574_v26  ;;  %v7978_v26 = vadd.f32 %v14948_v30, %v7913_v15 }
 0x5f4   :  { %v9820_v52 = vld [vmem:[#allocation3 + $0x127c] sm:$0xf] }
 0x5f5   :  { %v9771_v54 = vld [vmem:[#allocation3 + $0xc5c] sm:$0xf]  ;;  %v13583_v61 = vcombine.low %v9819_v35, %v9820_v52  ;;  %v14949_v35 = vpop.f32.mrb[18].mxu0  ;;  %v14987_v52 = vpop.f32.mrb[25].mxu1 }
 0x5f6   :  { %v9772_v23 = vld [vmem:[#allocation3 + $0xc7c] sm:$0xf]  ;;  %v14950_v2 = vpop.f32.mrb[19].mxu0 }
 0x5f7   :  { %v9803_v12 = vld [vmem:[#allocation3 + $0x105c] sm:$0xf]  ;;  %v13559_v18 = vcombine.low %v9771_v54, %v9772_v23  ;;  %15544 = vmatprep.subr.bf16.mxu1 %v13583_v61  ;;  %v14989_v54 = vpop.f32.mrb[26].mxu1 }
 0x5f8   :  { %v9804_v24 = vld [vmem:[#allocation3 + $0x107c] sm:$0xf] }
 0x5f9   :  { %v9789_v20 = vld [vmem:[#allocation3 + $0xe9c] sm:$0xf]  ;;  %v13575_v19 = vcombine.low %v9803_v12, %v9804_v24  ;;  %v14990_v12 = vpop.f32.mrb[27].mxu1 }
 0x5fa   :  { %v9790_v63 = vld [vmem:[#allocation3 + $0xebc] sm:$0xf]  ;;  %v14991_v60 = vadd.f32 %v14990_v12, %v14989_v54 }
 0x5fb   :  { %v16674_v6 = vld [vmem:[%s19463_s0 + $0x8] ss:$52 sps:$4 sm:$0xff]   ;;  %v13568_v37 = vcombine.low %v9789_v20, %v9790_v63  ;;  %15545 = vmatpush3.bf16.msra.mxu1 %v13575_v19 }
 0x5fc   :  { %10610 = vmatmul.mubr.bf16.vlgmr.msra.gmra.mrb[112].mxu0 %v16674_v6  ;;  %v9821_v58 = vld [vmem:[#allocation3 + $0x129c] sm:$0xf]  ;;  %v16679_v6 = vld [vmem:[%s19463_s0 + $0x78] ss:$52 sps:$4 sm:$0xff]  }
 0x5fd   :  { %v9822_v53 = vld [vmem:[#allocation3 + $0x12bc] sm:$0xf]  ;;  %15503 = vmatpush3.bf16.msra.mxu0 %v13558_v38  ;;  %10617 = vmatprep.mubr.bf16.mxu0 %v16676_v1  ;;  %v14988_v38 = vadd.f32 %v14987_v52, %v14986_v43  ;;  %v7924_v43 = vadd.f32 %v18766_v32, %v18764_v45 }
 0x5fe   :  { %v9773_v3 = vld [vmem:[#allocation3 + $0xc9c] sm:$0xf]  ;;  %15504 = vmatprep.subr.bf16.mxu0 %v13567_v39  ;;  %v13584_v36 = vcombine.low %v9821_v58, %v9822_v53  ;;  %v14951_v39 = vadd.f32 %v14950_v2, %v14949_v35 }
 0x5ff   :  { %v9774_v42 = vld [vmem:[#allocation3 + $0xcbc] sm:$0xf]  ;;  %v18815_v5 = vadd.f32 %v14988_v38, %v7978_v26 }
 0x600   :  { %v9805_v28 = vld [vmem:[#allocation3 + $0x109c] sm:$0xf]  ;;  %v13560_v10 = vcombine.low %v9773_v3, %v9774_v42  ;;  %15546 = vmatprep.subr.bf16.mxu1 %v13584_v36  ;;  %v7981_v63 = vadd.f32 %v14951_v39, %v7916_v25  ;;  %v16682_v39 = vld [vmem:[%s19463_s0 + $0xd8] ss:$52 sps:$4 sm:$0xff]  }
 0x601   :  { %v9806_v55 = vld [vmem:[#allocation3 + $0x10bc] sm:$0xf]  ;;  %15505 = vmatpush3.bf16.msra.mxu0 %v13559_v18 }
 0x602   :  { %v9791_v31 = vld [vmem:[#allocation3 + $0xedc] sm:$0xf]  ;;  %15506 = vmatprep.subr.bf16.mxu0 %v13568_v37  ;;  %v13576_v23 = vcombine.low %v9805_v28, %v9806_v55  ;;  %v7921_v37 = vadd.f32 %v18759_v57, %v18764_v45  ;;  %v18822_v42 = vadd.f32 %v14991_v60, %v7981_v63  ;;  %v14952_v28 = vpop.f32.mrb[20].mxu0 }
 0x603   :  { %v9792_v46 = vld [vmem:[#allocation3 + $0xefc] sm:$0xf]  ;;  %v14953_v36 = vpop.f32.mrb[21].mxu0 }
 0x604   :  { %v16677_v7 = vld [vmem:[%s19463_s0 + $0x7c] ss:$52 sps:$4 sm:$0xff]   ;;  %v13569_v33 = vcombine.low %v9791_v31, %v9792_v46  ;;  %10618 = vmatmul.mubr.bf16.gmra.mrb[116].mxu0 %v16678_v56  ;;  %15547 = vmatpush3.bf16.msra.mxu1 %v13576_v23  ;;  %v14992_v31 = vpop.f32.mrb[28].mxu1  ;;  %v16681_v46 = vld [vmem:[%s19463_s0 + $0xe4] ss:$52 sps:$4 sm:$0xff]  }
 0x605   :  { %10682 = vmatprep.mubr.bf16.mxu1 %v16677_v7  ;;  %v9823_v49 = vld [vmem:[#allocation3 + $0x12dc] sm:$0xf]  ;;  %15507 = vmatpush3.bf16.msra.mxu0 %v13560_v10  ;;  %v14954_v7 = vadd.f32 %v14953_v36, %v14952_v28 }
 0x606   :  { %v9824_v41 = vld [vmem:[#allocation3 + $0x12fc] sm:$0xf]  ;;  %10683 = vmatmul.mubr.bf16.gmra.mrb[124].mxu1 %v16679_v6  ;;  %15508 = vmatprep.subr.bf16.mxu0 %v13569_v33 }
 0x607   :  { %v9775_v29 = vld [vmem:[#allocation3 + $0xcdc] sm:$0xf]  ;;  %v13585_v62 = vcombine.low %v9823_v49, %v9824_v41  ;;  %10690 = vmatprep.mubr.bf16.mxu1 %v16681_v46  ;;  %v14955_v49 = vpop.f32.mrb[22].mxu0  ;;  %v14993_v41 = vpop.f32.mrb[29].mxu1  ;;  %v7986_v23 = vadd.f32 %v14954_v7, %v7921_v37 }
 0x608   :  { %v9776_v27 = vld [vmem:[#allocation3 + $0xcfc] sm:$0xf]  ;;  %v14956_v52 = vpop.f32.mrb[23].mxu0  ;;  %v14994_v10 = vadd.f32 %v14993_v41, %v14992_v31 }
 0x609   :  { %v9807_v13 = vld [vmem:[#allocation3 + $0x10dc] sm:$0xf]  ;;  %v13561_v58 = vcombine.low %v9775_v29, %v9776_v27  ;;  %15548 = vmatprep.subr.bf16.mxu1 %v13585_v62  ;;  %v14995_v29 = vpop.f32.mrb[30].mxu1  ;;  %v14957_v33 = vadd.f32 %v14956_v52, %v14955_v49 }
 0x60a   :  { %v9808_v0 = vld [vmem:[#allocation3 + $0x10fc] sm:$0xf] }
 0x60b   :  { %v9793_v24 = vld [vmem:[#allocation3 + $0xf1c] sm:$0xf]  ;;  %v13577_v50 = vcombine.low %v9807_v13, %v9808_v0  ;;  %15509 = vmatpush3.bf16.msra.mxu0 %v13561_v58  ;;  %v14996_v13 = vpop.f32.mrb[31].mxu1 }
 0x60c   :  { %v9794_v21 = vld [vmem:[#allocation3 + $0xf3c] sm:$0xf]  ;;  %v14997_v26 = vadd.f32 %v14996_v13, %v14995_v29 }
 0x60d   :  { %v9825_v61 = vld [vmem:[#allocation3 + $0x131c] sm:$0xf]  ;;  %v13570_v22 = vcombine.low %v9793_v24, %v9794_v21  ;;  %15549 = vmatpush3.bf16.msra.mxu1 %v13577_v50  ;;  %v7989_v24 = vadd.f32 %v14957_v33, %v7924_v43  ;;  %v18835_v21 = vadd.f32 %v14994_v10, %v7986_v23 }
 0x60e   :  { %v9826_v20 = vld [vmem:[#allocation3 + $0x133c] sm:$0xf] }
 0x60f   :  { %v9777_v53 = vld [vmem:[#allocation3 + $0xd1c] sm:$0xf]  ;;  %v13586_v15 = vcombine.low %v9825_v61, %v9826_v20  ;;  %15510 = vmatprep.subr.bf16.mxu0 %v13570_v22  ;;  %v18840_v50 = vadd.f32 %v14997_v26, %v7989_v24  ;;  %v15014_v22 = vpop.f32.mrb[24].mxu0 }
 0x610   :  { %v9778_v18 = vld [vmem:[#allocation3 + $0xd3c] sm:$0xf]  ;;  %v15015_v28 = vpop.f32.mrb[25].mxu0 }
 0x611   :  { %v9809_v3 = vld [vmem:[#allocation3 + $0x111c] sm:$0xf]  ;;  %v13562_v25 = vcombine.low %v9777_v53, %v9778_v18  ;;  %15550 = vmatprep.subr.bf16.mxu1 %v13586_v15  ;;  %v16684_v18 = vld [vmem:[%s19463_s0 + $0x144] ss:$52 sps:$4 sm:$0xff]   ;;  %v15016_v36 = vadd.f32 %v15015_v28, %v15014_v22  ;;  %v15017_v31 = vpop.f32.mrb[26].mxu0 }
 0x612   :  { %v9810_v19 = vld [vmem:[#allocation3 + $0x113c] sm:$0xf]  ;;  %v15018_v7 = vpop.f32.mrb[27].mxu0 }
 0x613   :  { %v16680_v55 = vld [vmem:[%s19463_s0 + $0xdc] ss:$52 sps:$4 sm:$0xff]   ;;  %v13578_v27 = vcombine.low %v9809_v3, %v9810_v19  ;;  %15511 = vmatpush3.bf16.msra.mxu0 %v13562_v25  ;;  %v16683_v60 = vld [vmem:[%s19463_s0 + $0xe0] ss:$52 sps:$4 sm:$0xff]   ;;  %v8092_v10 = vadd.f32 %v15016_v36, %v18778_v51  ;;  %v15019_v29 = vadd.f32 %v15018_v7, %v15017_v31  ;;  %v15020_v24 = vpop.f32.mrb[28].mxu0 }
 0x614   :  { %10625 = vmatprep.mubr.bf16.mxu0 %v16680_v55  ;;  %v9795_v40 = vld [vmem:[#allocation3 + $0xf5c] sm:$0xf]  ;;  %10691 = vmatmul.mubr.bf16.gmra.mrb[128].mxu1 %v16683_v60  ;;  %v15054_v55 = vpop.f32.mrb[32].mxu1 }
 0x615   :  { %v9796_v1 = vld [vmem:[#allocation3 + $0xf7c] sm:$0xf]  ;;  %10626 = vmatmul.mubr.bf16.gmra.mrb[120].mxu0 %v16682_v39  ;;  %15551 = vmatpush3.bf16.msra.mxu1 %v13578_v27  ;;  %v15055_v46 = vpop.f32.mrb[33].mxu1  ;;  %v8095_v13 = vadd.f32 %v15019_v29, %v18785_v34 }
 0x616   :  { %v9827_v57 = vld [vmem:[#allocation3 + $0x135c] sm:$0xf]  ;;  %v13571_v2 = vcombine.low %v9795_v40, %v9796_v1  ;;  %10633 = vmatprep.mubr.bf16.mxu0 %v16684_v18  ;;  %v15056_v49 = vadd.f32 %v15055_v46, %v15054_v55  ;;  %v15057_v41 = vpop.f32.mrb[34].mxu1 }
 0x617   :  { %v9828_v11 = vld [vmem:[#allocation3 + $0x137c] sm:$0xf]  ;;  %v15058_v27 = vpop.f32.mrb[35].mxu1 }
 0x618   :  { %v9779_v30 = vld [vmem:[#allocation3 + $0xd5c] sm:$0xf]  ;;  %v13587_v45 = vcombine.low %v9827_v57, %v9828_v11  ;;  %15512 = vmatprep.subr.bf16.mxu0 %v13571_v2  ;;  %v15059_v23 = vadd.f32 %v15058_v27, %v15057_v41 }
 0x619   :  { %v9780_v35 = vld [vmem:[#allocation3 + $0xd7c] sm:$0xf] }
 0x61a   :  { %v9811_v38 = vld [vmem:[#allocation3 + $0x115c] sm:$0xf]  ;;  %v13563_v56 = vcombine.low %v9779_v30, %v9780_v35  ;;  %15552 = vmatprep.subr.bf16.mxu1 %v13587_v45  ;;  %v18853_v45 = vadd.f32 %v15056_v49, %v8092_v10  ;;  %v16692_v49 = vld [vmem:[%s19463_s0 + $0x84] ss:$52 sps:$4 sm:$0xff]  }
 0x61b   :  { %v9812_v54 = vld [vmem:[#allocation3 + $0x117c] sm:$0xf] }
 0x61c   :  { %v9797_v32 = vld [vmem:[#allocation3 + $0xf9c] sm:$0xf]  ;;  %v13579_v20 = vcombine.low %v9811_v38, %v9812_v54  ;;  %15513 = vmatpush3.bf16.msra.mxu0 %v13563_v56 }
 0x61d   :  { %v9798_v0 = vld [vmem:[#allocation3 + $0xfbc] sm:$0xf] }
 0x61e   :  { %v9829_v12 = vld [vmem:[#allocation3 + $0x139c] sm:$0xf]  ;;  %v13572_v63 = vcombine.low %v9797_v32, %v9798_v0  ;;  %15553 = vmatpush3.bf16.msra.mxu1 %v13579_v20  ;;  %v15060_v20 = vpop.f32.mrb[36].mxu1 }
 0x61f   :  { %v9830_v62 = vld [vmem:[#allocation3 + $0x13bc] sm:$0xf] }
 0x620   :  { %v9781_v61 = vld [vmem:[#allocation3 + $0xd9c] sm:$0xf]  ;;  %v13588_v3 = vcombine.low %v9829_v12, %v9830_v62  ;;  %15514 = vmatprep.subr.bf16.mxu0 %v13572_v63  ;;  %v18858_v62 = vadd.f32 %v15059_v23, %v8095_v13  ;;  %v16689_v63 = vld [vmem:[%s19463_s0 + $0x24] ss:$52 sps:$4 sm:$0xff]  }
 0x621   :  { %v9782_v6 = vld [vmem:[#allocation3 + $0xdbc] sm:$0xf] }
 0x622   :  { %v9813_v58 = vld [vmem:[#allocation3 + $0x119c] sm:$0xf]  ;;  %v13564_v57 = vcombine.low %v9781_v61, %v9782_v6  ;;  %15554 = vmatprep.subr.bf16.mxu1 %v13588_v3  ;;  %v15021_v61 = vpop.f32.mrb[29].mxu0 }
 0x623   :  { %v9814_v53 = vld [vmem:[#allocation3 + $0x11bc] sm:$0xf]  ;;  %v15022_v6 = vadd.f32 %v15021_v61, %v15020_v24 }
 0x624   :  { %v9799_v19 = vld [vmem:[#allocation3 + $0xfdc] sm:$0xf]  ;;  %v13580_v25 = vcombine.low %v9813_v58, %v9814_v53  ;;  %15515 = vmatpush3.bf16.msra.mxu0 %v13564_v57  ;;  %v15023_v58 = vpop.f32.mrb[30].mxu0  ;;  %v15061_v53 = vpop.f32.mrb[37].mxu1  ;;  %v16690_v57 = vld [vmem:[%s19463_s0 + $0x18] ss:$52 sps:$4 sm:$0xff]  }
 0x625   :  { %v9800_v37 = vld [vmem:[#allocation3 + $0xffc] sm:$0xf]  ;;  %v15024_v18 = vpop.f32.mrb[31].mxu0  ;;  %v15062_v3 = vadd.f32 %v15061_v53, %v15060_v20 }
 0x626   :  { %v16685_v15 = vld [vmem:[%s19463_s0 + $0x14c] ss:$52 sps:$4 sm:$0xff]   ;;  %v13573_v30 = vcombine.low %v9799_v19, %v9800_v37  ;;  %v16687_v51 = vld [vmem:[%s19463_s0 + $0x148] ss:$52 sps:$4 sm:$0xff]   ;;  %15555 = vmatpush3.bf16.msra.mxu1 %v13580_v25  ;;  %v15063_v19 = vpop.f32.mrb[38].mxu1 }
 0x627   :  { %10698 = vmatprep.mubr.bf16.mxu1 %v16685_v15  ;;  %v9831_v40 = vld [vmem:[#allocation3 + $0x13dc] sm:$0xf]  ;;  %v8100_v15 = vadd.f32 %v15022_v6, %v18795_v48 }
 0x628   :  { %v9832_v1 = vld [vmem:[#allocation3 + $0x13fc] sm:$0xf]  ;;  %10699 = vmatmul.mubr.bf16.gmra.mrb[132].mxu1 %v16687_v51  ;;  %15516 = vmatprep.subr.bf16.mxu0 %v13573_v30 }
 0x629   :  { %v9783_v11 = vld [vmem:[#allocation3 + $0xddc] sm:$0xf]  ;;  %v13589_v2 = vcombine.low %v9831_v40, %v9832_v1  ;;  %10804 = vmatprep.mubr.bf16.mxu1 %v16689_v63  ;;  %v15025_v40 = vadd.f32 %v15024_v18, %v15023_v58  ;;  %v15064_v1 = vpop.f32.mrb[39].mxu1 }
 0x62a   :  { %v9784_v43 = vld [vmem:[#allocation3 + $0xdfc] sm:$0xf]  ;;  %v15065_v46 = vadd.f32 %v15064_v1, %v15063_v19 }
 0x62b   :  { %v9815_v35 = vld [vmem:[#allocation3 + $0x11dc] sm:$0xf]  ;;  %v13565_v32 = vcombine.low %v9783_v11, %v9784_v43  ;;  %15556 = vmatprep.subr.bf16.mxu1 %v13589_v2  ;;  %v8103_v11 = vadd.f32 %v15025_v40, %v18802_v16  ;;  %v18871_v43 = vadd.f32 %v15062_v3, %v8100_v15  ;;  %v15026_v16 = vpop.f32.mrb[32].mxu0  ;;  %v15066_v2 = vpop.f32.mrb[40].mxu1 }
 0x62c   :  { %v9816_v52 = vld [vmem:[#allocation3 + $0x11fc] sm:$0xf]  ;;  %v15027_v27 = vpop.f32.mrb[33].mxu0  ;;  %v15067_v23 = vpop.f32.mrb[41].mxu1 }
 0x62d   :  { %v9849_v38 = vld [vmem:[#allocation3 + $0x161c] sm:$0xf]  ;;  %v13581_v0 = vcombine.low %v9815_v35, %v9816_v52  ;;  %15517 = vmatpush3.bf16.msra.mxu0 %v13565_v32  ;;  %v18879_v35 = vadd.f32 %v15065_v46, %v8103_v11  ;;  %v15068_v51 = vadd.f32 %v15067_v23, %v15066_v2  ;;  %v15069_v32 = vpop.f32.mrb[42].mxu1  ;;  %v16700_v23 = vld [vmem:[%s19463_s0 + $0x154] ss:$52 sps:$4 sm:$0xff]  }
 0x62e   :  { %v9850_v54 = vld [vmem:[#allocation3 + $0x163c] sm:$0xf] }
 0x62f   :  { %v16686_v33 = vld [vmem:[%s19463_s0 + $0x140] ss:$52 sps:$4 sm:$0xff]   ;;  %v13598_v26 = vcombine.low %v9849_v38, %v9850_v54  ;;  %v16688_v34 = vld [vmem:[%s19463_s0 + $0x1c] ss:$52 sps:$4 sm:$0xff]   ;;  %15557 = vmatpush3.bf16.msra.mxu1 %v13581_v0  ;;  %v15028_v38 = vadd.f32 %v15027_v27, %v15026_v16  ;;  %v15029_v54 = vpop.f32.mrb[34].mxu0 }
 0x630   :  { %10634 = vmatmul.mubr.bf16.gmra.mrb[124].mxu0 %v16686_v33  ;;  %v9833_v39 = vld [vmem:[#allocation3 + $0x141c] sm:$0xf]  ;;  %v15030_v13 = vpop.f32.mrb[35].mxu0 }
 0x631   :  { %v9834_v12 = vld [vmem:[#allocation3 + $0x143c] sm:$0xf]  ;;  %10739 = vmatprep.mubr.bf16.mxu0 %v16688_v34  ;;  %15582 = vmatprep.subr.bf16.mxu0 %v13598_v26  ;;  %v15031_v24 = vadd.f32 %v15030_v13, %v15029_v54  ;;  %v15070_v34 = vpop.f32.mrb[43].mxu1  ;;  %v16699_v54 = vld [vmem:[%s19463_s0 + $0xf0] ss:$52 sps:$4 sm:$0xff]  }
 0x632   :  { %v9851_v60 = vld [vmem:[#allocation3 + $0x165c] sm:$0xf]  ;;  %v13590_v22 = vcombine.low %v9833_v39, %v9834_v12  ;;  %v8108_v12 = vadd.f32 %v15028_v38, %v18815_v5  ;;  %v15071_v61 = vadd.f32 %v15070_v34, %v15069_v32  ;;  %v15072_v40 = vpop.f32.mrb[44].mxu1 }
 0x633   :  { %v9852_v56 = vld [vmem:[#allocation3 + $0x167c] sm:$0xf]  ;;  %v8111_v63 = vadd.f32 %v15031_v24, %v18822_v42  ;;  %v15032_v42 = vpop.f32.mrb[36].mxu0 }
 0x634   :  { %v13599_v37 = vcombine.low %v9851_v60, %v9852_v56  ;;  %v9835_v28 = vld [vmem:[#allocation3 + $0x145c] sm:$0xf]  ;;  %v18889_v6 = vadd.f32 %v15068_v51, %v8108_v12  ;;  %v15033_v15 = vpop.f32.mrb[37].mxu0 }
 0x635   :  { %v9836_v55 = vld [vmem:[#allocation3 + $0x147c] sm:$0xf]  ;;  %v18897_v19 = vadd.f32 %v15071_v61, %v8111_v63  ;;  %v15034_v1 = vadd.f32 %v15033_v15, %v15032_v42 }
 0x636   :  { %v9853_v36 = vld [vmem:[#allocation3 + $0x169c] sm:$0xf]  ;;  %v13591_v48 = vcombine.low %v9835_v28, %v9836_v55 }
 0x637   :  { %v9854_v31 = vld [vmem:[#allocation3 + $0x16bc] sm:$0xf] }
 0x638   :  { %10740 = vmatmul.mubr.bf16.vlgmr.msra.gmra.mrb[128].mxu0 %v16690_v57  ;;  %v16691_v7 = vld [vmem:[%s19463_s0 + $0x20] ss:$52 sps:$4 sm:$0xff]   ;;  %v13600_v41 = vcombine.low %v9853_v36, %v9854_v31  ;;  %v16695_v58 = vld [vmem:[%s19463_s0 + $0x88] ss:$52 sps:$4 sm:$0xff]   ;;  %v15035_v36 = vpop.f32.mrb[38].mxu0  ;;  %v15073_v31 = vpop.f32.mrb[45].mxu1 }
 0x639   :  { %15583 = vmatpush3.bf16.msra.mxu0 %v13590_v22  ;;  %10805 = vmatmul.mubr.bf16.vlgmr.msra.gmra.mrb[136].mxu1 %v16691_v7  ;;  %v9837_v25 = vld [vmem:[#allocation3 + $0x149c] sm:$0xf]  ;;  %v15036_v57 = vpop.f32.mrb[39].mxu0  ;;  %v15074_v11 = vadd.f32 %v15073_v31, %v15072_v40  ;;  %v15075_v7 = vpop.f32.mrb[46].mxu1  ;;  %v16703_v40 = vld [vmem:[%s19463_s0 + $0x158] ss:$52 sps:$4 sm:$0xff]  }
 0x63a   :  { %15584 = vmatprep.subr.bf16.mxu0 %v13599_v37  ;;  %10747 = vmatprep.mubr.bf16.mxu0 %v16692_v49  ;;  %v9838_v30 = vld [vmem:[#allocation3 + $0x14bc] sm:$0xf]  ;;  %v16697_v37 = vld [vmem:[%s19463_s0 + $0xf4] ss:$52 sps:$4 sm:$0xff]   ;;  %v15076_v16 = vpop.f32.mrb[47].mxu1 }
 0x63b   :  { %v16693_v52 = vld [vmem:[%s19463_s0 + $0x8c] ss:$52 sps:$4 sm:$0xff]   ;;  %v13592_v33 = vcombine.low %v9837_v25, %v9838_v30  ;;  %v8116_v25 = vadd.f32 %v15034_v1, %v18835_v21  ;;  %v15037_v30 = vadd.f32 %v15036_v57, %v15035_v36  ;;  %v16698_v27 = vld [vmem:[%s19463_s0 + $0xe8] ss:$52 sps:$4 sm:$0xff]   ;;  %v15874_v24 = vpop.f32.mrb[48].mxu1 }
 0x63c   :  { %10812 = vmatprep.mubr.bf16.mxu1 %v16693_v52  ;;  %v9855_v10 = vld [vmem:[#allocation3 + $0x16dc] sm:$0xf]  ;;  %v18928_v36 = vld [vmem:[#allocation6 + $0x5] ss:$0 sm:$0xff] }
 0x63d   :  { %v9856_v29 = vld [vmem:[#allocation3 + $0x16fc] sm:$0xf]  ;;  %15585 = vmatpush3.bf16.msra.mxu0 %v13591_v48  ;;  %v8119_v2 = vadd.f32 %v15037_v30, %v18840_v50  ;;  %v18907_v38 = vadd.f32 %v15074_v11, %v8116_v25  ;;  %v15094_v50 = vpop.f32.mrb[40].mxu0 }
 0x63e   :  { %15586 = vmatprep.subr.bf16.mxu0 %v13600_v41  ;;  %v13601_v0 = vcombine.low %v9855_v10, %v9856_v29  ;;  %v9839_v26 = vld [vmem:[#allocation3 + $0x14dc] sm:$0xf]  ;;  %v15077_v29 = vadd.f32 %v15076_v16, %v15075_v7  ;;  %v15095_v12 = vpop.f32.mrb[41].mxu0 }
 0x63f   :  { %v9840_v39 = vld [vmem:[#allocation3 + $0x14fc] sm:$0xf]  ;;  %v15096_v34 = vadd.f32 %v15095_v12, %v15094_v50 }
 0x640   :  { %v9857_v60 = vld [vmem:[#allocation3 + $0x171c] sm:$0xf]  ;;  %v13593_v5 = vcombine.low %v9839_v26, %v9840_v39  ;;  %v18915_v32 = vadd.f32 %v15077_v29, %v8119_v2 }
 0x641   :  { %v9858_v56 = vld [vmem:[#allocation3 + $0x173c] sm:$0xf]  ;;  %15587 = vmatpush3.bf16.msra.mxu0 %v13592_v33  ;;  %10813 = vmatmul.mubr.bf16.gmra.mrb[140].mxu1 %v16695_v58 }
 0x642   :  { %v16694_v20 = vld [vmem:[%s19463_s0 + $0x80] ss:$52 sps:$4 sm:$0xff]   ;;  %15588 = vmatprep.subr.bf16.mxu0 %v13601_v0  ;;  %v13602_v22 = vcombine.low %v9857_v60, %v9858_v56  ;;  %10820 = vmatprep.mubr.bf16.mxu1 %v16697_v37  ;;  %v16701_v0 = vld [vmem:[%s19463_s0 + $0x15c] ss:$52 sps:$4 sm:$0xff]   ;;  %v15097_v60 = vpop.f32.mrb[42].mxu0  ;;  %v8286_v56 = vpop.f32.mrb[49].mxu1 }
 0x643   :  { %10748 = vmatmul.mubr.bf16.gmra.mrb[132].mxu0 %v16694_v20  ;;  %v16696_v53 = vld [vmem:[%s19463_s0 + $0xec] ss:$52 sps:$4 sm:$0xff]   ;;  %v15098_v20 = vpop.f32.mrb[43].mxu0  ;;  %v15875_v63 = vpop.f32.mrb[50].mxu1 }
 0x644   :  { %10755 = vmatprep.mubr.bf16.mxu0 %v16696_v53  ;;  %v9841_v18 = vld [vmem:[#allocation3 + $0x151c] sm:$0xf]  ;;  %v15100_v11 = vpop.f32.mrb[44].mxu0 }
 0x645   :  { %v9842_v3 = vld [vmem:[#allocation3 + $0x153c] sm:$0xf]  ;;  %15589 = vmatpush3.bf16.msra.mxu0 %v13593_v5 }
 0x646   :  { %v9859_v28 = vld [vmem:[#allocation3 + $0x175c] sm:$0xf]  ;;  %v13594_v46 = vcombine.low %v9841_v18, %v9842_v3  ;;  %15590 = vmatprep.subr.bf16.mxu0 %v13602_v22  ;;  %v15099_v22 = vadd.f32 %v15098_v20, %v15097_v60  ;;  %v8222_v18 = vadd.f32 %v15096_v34, %v18853_v45  ;;  %v8289_v3 = vpop.f32.mrb[51].mxu1 }
 0x647   :  { %v9860_v55 = vld [vmem:[#allocation3 + $0x177c] sm:$0xf] }
 0x648   :  { %v13603_v48 = vcombine.low %v9859_v28, %v9860_v55  ;;  %v9843_v49 = vld [vmem:[#allocation3 + $0x155c] sm:$0xf]  ;;  %v16702_v28 = vld [vmem:[%s19463_s0 + $0x150] ss:$52 sps:$4 sm:$0xff]   ;;  %v8287_v55 = vadd.f32 %v8286_v56, %v8222_v18  ;;  %v8225_v15 = vadd.f32 %v15099_v22, %v18858_v62 }
 0x649   :  { %v9844_v41 = vld [vmem:[#allocation3 + $0x157c] sm:$0xf]  ;;  %15591 = vmatpush3.bf16.msra.mxu0 %v13594_v46  ;;  %10821 = vmatmul.mubr.bf16.gmra.mrb[144].mxu1 %v16699_v54 }
 0x64a   :  { %v9861_v52 = vld [vmem:[#allocation3 + $0x179c] sm:$0xf]  ;;  %v13595_v21 = vcombine.low %v9843_v49, %v9844_v41  ;;  %15592 = vmatprep.subr.bf16.mxu0 %v13603_v48  ;;  %10828 = vmatprep.mubr.bf16.mxu1 %v16701_v0  ;;  %v8317_v46 = vmax.f32 %v8287_v55, 0.0  ;;  %v8290_v57 = vadd.f32 %v8289_v3, %v8225_v15  ;;  %v15101_v48 = vpop.f32.mrb[45].mxu0 }
 0x64b   :  { %v9862_v10 = vld [vmem:[#allocation3 + $0x17bc] sm:$0xf]  ;;  %10756 = vmatmul.mubr.bf16.gmra.mrb[136].mxu0 %v16698_v27  ;;  %v15102_v25 = vadd.f32 %v15101_v48, %v15100_v11  ;;  %v15103_v30 = vpop.f32.mrb[46].mxu0 }
 0x64c   :  { %10763 = vmatprep.mubr.bf16.mxu0 %v16700_v23  ;;  %v13604_v33 = vcombine.low %v9861_v52, %v9862_v10  ;;  %v9845_v13 = vld [vmem:[#allocation3 + $0x159c] sm:$0xf]  ;;  %v8332_v49 = vmul.f32 %v18928_v36, %v8317_v46  ;;  %v8318_v41 = vmax.f32 %v8290_v57, 0.0  ;;  %v15104_v16 = vpop.f32.mrb[47].mxu0  ;;  %v18934_v10 = vpop.f32.mrb[52].mxu1 }
 0x64d   :  { %v9846_v51 = vld [vmem:[#allocation3 + $0x15bc] sm:$0xf]  ;;  %15593 = vmatpush3.bf16.msra.mxu0 %v13595_v21  ;;  %v8230_v2 = vadd.f32 %v15102_v25, %v18871_v43  ;;  %v15105_v54 = vadd.f32 %v15104_v16, %v15103_v30  ;;  %v8302_v21 = vpop.f32.mrb[53].mxu1  ;;  %v16706_v43 = vld [vmem:[%s19463_s0 + $0x94] ss:$52 sps:$4 sm:$0xff]   ;;  %v15106_v60 = vpop.f32.mrb[48].mxu0 }
 0x64e   :  { %v9863_v26 = vld [vmem:[#allocation3 + $0x17dc] sm:$0xf]  ;;  %v13596_v61 = vcombine.low %v9845_v13, %v9846_v51  ;;  %15594 = vmatprep.subr.bf16.mxu0 %v13604_v33  ;;  %v18937_v29 = vadd.f32 %v8332_v49, %v18689_v59  ;;  %v8333_v27 = vmul.f32 %v18928_v36, %v8318_v41  ;;  %v18944_v51 = vpop.f32.mrb[54].mxu1  ;;  %v15107_v20 = vpop.f32.mrb[49].mxu0 }
 0x64f   :  { %v9864_v39 = vld [vmem:[#allocation3 + $0x17fc] sm:$0xf]  ;;  %v8295_v59 = vadd.f32 %v15874_v24, %v8230_v2  ;;  %v8233_v0 = vadd.f32 %v15105_v54, %v18879_v35  ;;  %v15109_v35 = vpop.f32.mrb[50].mxu0  ;;  %v16709_v2 = vld [vmem:[%s19463_s0 + $0xf8] ss:$52 sps:$4 sm:$0xff]  }
 0x650   :  { %v13605_v58 = vcombine.low %v9863_v26, %v9864_v39  ;;  %v9847_v5 = vld [vmem:[#allocation3 + $0x15dc] sm:$0xf]  ;;  %v18947_v50 = vadd.f32 %v8333_v27, %v18705_v44  ;;  %v8305_v26 = vpop.f32.mrb[55].mxu1 }
 0x651   :  { %v9848_v53 = vld [vmem:[#allocation3 + $0x15fc] sm:$0xf]  ;;  %15595 = vmatpush3.bf16.msra.mxu0 %v13596_v61  ;;  %10829 = vmatmul.mubr.bf16.gmra.mrb[148].mxu1 %v16703_v40  ;;  %v8319_v12 = vmax.f32 %v8295_v59, 0.0  ;;  %v8298_v34 = vadd.f32 %v15875_v63, %v8233_v0 }
 0x652   :  { %v9865_v42 = vld [vmem:[#allocation3 + $0x181c] sm:$0xf]  ;;  %v13597_v1 = vcombine.low %v9847_v5, %v9848_v53  ;;  %15596 = vmatprep.subr.bf16.mxu0 %v13605_v58  ;;  %v15108_v58 = vadd.f32 %v15107_v20, %v15106_v60  ;;  %v15110_v5 = vpop.f32.mrb[51].mxu0 }
 0x653   :  { %v9866_v37 = vld [vmem:[#allocation3 + $0x183c] sm:$0xf]  ;;  %10764 = vmatmul.mubr.bf16.gmra.mrb[140].mxu0 %v16702_v28  ;;  %v8334_v44 = vmul.f32 %v18928_v36, %v8319_v12  ;;  %v8320_v24 = vmax.f32 %v8298_v34, 0.0  ;;  %v15111_v18 = vadd.f32 %v15110_v5, %v15109_v35  ;;  %v16707_v28 = vld [vmem:[%s19463_s0 + $0x90] ss:$52 sps:$4 sm:$0xff]  }
 0x654   :  { %v16704_v45 = vld [vmem:[%s19463_s0 + $0x2c] ss:$52 sps:$4 sm:$0xff]   ;;  %v13606_v31 = vcombine.low %v9865_v42, %v9866_v37  ;;  %v16705_v13 = vld [vmem:[%s19463_s0 + $0x28] ss:$52 sps:$4 sm:$0xff]   ;;  %v8238_v3 = vadd.f32 %v15108_v58, %v18889_v6 }
 0x655   :  { %10869 = vmatprep.mubr.bf16.mxu0 %v16704_v45  ;;  %v9867_v7 = vld [vmem:[#allocation3 + $0x185c] sm:$0xf]  ;;  %15597 = vmatpush3.bf16.msra.mxu0 %v13597_v1  ;;  %v8335_v22 = vmul.f32 %v18928_v36, %v8320_v24  ;;  %v18957_v37 = vadd.f32 %v8334_v44, %v18685_v9  ;;  %v8241_v15 = vadd.f32 %v15111_v18, %v18897_v19 }
 0x656   :  { %v9868_v62 = vld [vmem:[#allocation3 + $0x187c] sm:$0xf]  ;;  %15904 = vmatprep.subr.bf16.mxu0 %v13606_v31  ;;  %v8303_v55 = vadd.f32 %v8302_v21, %v8238_v3 }
 0x657   :  { %v13607_v52 = vcombine.low %v9867_v7, %v9868_v62  ;;  %v9869_v23 = vld [vmem:[#allocation3 + $0x189c] sm:$0xf]  ;;  %v18967_v6 = vadd.f32 %v8335_v22, %v18696_v17  ;;  %v8306_v45 = vadd.f32 %v8305_v26, %v8241_v15 }
 0x658   :  { %v9870_v33 = vld [vmem:[#allocation3 + $0x18bc] sm:$0xf]  ;;  %v8321_v1 = vmax.f32 %v8303_v55, 0.0 }
 0x659   :  { %v13608_v39 = vcombine.low %v9869_v23, %v9870_v33  ;;  %v9871_v56 = vld [vmem:[#allocation3 + $0x18dc] sm:$0xf]  ;;  %v8322_v62 = vmax.f32 %v8306_v45, 0.0 }
 0x65a   :  { %v9872_v61 = vld [vmem:[#allocation3 + $0x18fc] sm:$0xf]  ;;  %v8336_v7 = vmul.f32 %v18928_v36, %v8321_v1 }
 0x65b   :  { %10870 = vmatmul.mubr.bf16.vlgmr.msra.gmra.mrb[144].mxu0 %v16705_v13  ;;  %v13609_v53 = vcombine.low %v9871_v56, %v9872_v61  ;;  %v9873_v42 = vld [vmem:[#allocation3 + $0x191c] sm:$0xf]  ;;  %v8337_v25 = vmul.f32 %v18928_v36, %v8322_v62 }
 0x65c   :  { %15905 = vmatpush3.bf16.msra.mxu0 %v13606_v31  ;;  %10877 = vmatprep.mubr.bf16.mxu0 %v16706_v43  ;;  %v9874_v63 = vld [vmem:[#allocation3 + $0x193c] sm:$0xf]  ;;  %v15112_v31 = vpop.f32.mrb[52].mxu0  ;;  %v18971_v17 = vadd.f32 %v8336_v7, %v18728_v8 }
 0x65d   :  { %15906 = vmatprep.subr.bf16.mxu0 %v13607_v52  ;;  %v16708_v40 = vld [vmem:[%s19463_s0 + $0xfc] ss:$52 sps:$4 sm:$0xff]   ;;  %v13610_v9 = vcombine.low %v9873_v42, %v9874_v63  ;;  %v15113_v11 = vpop.f32.mrb[53].mxu0  ;;  %v18979_v54 = vadd.f32 %v8337_v25, %v18741_v47  ;;  %v18990_v47 = vld [vmem:[%s19465_s2 + $0x6] ss:$0 sm:$0xff] }
 0x65e   :  { %v9875_v46 = vld [vmem:[#allocation3 + $0x195c] sm:$0xf]  ;;  %v15114_v19 = vadd.f32 %v15113_v11, %v15112_v31  ;;  %v15115_v48 = vpop.f32.mrb[54].mxu0 }
 0x65f   :  { %v9876_v57 = vld [vmem:[#allocation3 + $0x197c] sm:$0xf]  ;;  %v15116_v49 = vpop.f32.mrb[55].mxu0 }
 0x660   :  { %15907 = vmatpush3.bf16.msra.mxu0 %v13607_v52  ;;  %v13611_v41 = vcombine.low %v9875_v46, %v9876_v57  ;;  %v8246_v30 = vadd.f32 %v15114_v19, %v18907_v38  ;;  %v15117_v16 = vadd.f32 %v15116_v49, %v15115_v48  ;;  %v9877_v52 = vld [vmem:[#allocation3 + $0x199c] sm:$0xf]  ;;  %v16710_v38 = vld [vmem:[%s19463_s0 + $0x164] ss:$52 sps:$4 sm:$0xff]   ;;  %v15146_v59 = vpop.f32.mrb[56].mxu0 }
 0x661   :  { %15908 = vmatprep.subr.bf16.mxu0 %v13608_v39  ;;  %v9878_v27 = vld [vmem:[#allocation3 + $0x19bc] sm:$0xf] }
 0x662   :  { %v8311_v21 = vadd.f32 %v18934_v10, %v8246_v30  ;;  %v8249_v8 = vadd.f32 %v15117_v16, %v18915_v32  ;;  %v13612_v23 = vcombine.low %v9877_v52, %v9878_v27  ;;  %v9879_v0 = vld [vmem:[#allocation3 + $0x19dc] sm:$0xf]  ;;  %v15147_v32 = vpop.f32.mrb[57].mxu0  ;;  %v15186_v10 = vpop.f32.mrb[56].mxu1 }
 0x663   :  { %10878 = vmatmul.mubr.bf16.gmra.mrb[148].mxu0 %v16707_v28  ;;  %v9880_v43 = vld [vmem:[#allocation3 + $0x19fc] sm:$0xf]  ;;  %v15148_v12 = vadd.f32 %v15147_v32, %v15146_v59  ;;  %v15149_v34 = vpop.f32.mrb[58].mxu0  ;;  %v15187_v60 = vpop.f32.mrb[57].mxu1 }
 0x664   :  { %15909 = vmatpush3.bf16.msra.mxu0 %v13608_v39  ;;  %10885 = vmatprep.mubr.bf16.mxu0 %v16708_v40  ;;  %v8323_v33 = vmax.f32 %v8311_v21, 0.0  ;;  %v8314_v13 = vadd.f32 %v18944_v51, %v8249_v8  ;;  %v15150_v56 = vpop.f32.mrb[59].mxu0  ;;  %v15188_v61 = vadd.f32 %v15187_v60, %v15186_v10  ;;  %v15189_v51 = vpop.f32.mrb[58].mxu1  ;;  %v13613_v20 = vcombine.low %v9879_v0, %v9880_v43  ;;  %v16711_v22 = vld [vmem:[%s19463_s0 + $0x160] ss:$52 sps:$4 sm:$0xff]  }
 0x665   :  { %15910 = vmatprep.subr.bf16.mxu0 %v13609_v53  ;;  %v9222_v24 = vadd.f32 %v15148_v12, %v18990_v47  ;;  %v15151_v58 = vadd.f32 %v15150_v56, %v15149_v34  ;;  %v15190_v35 = vpop.f32.mrb[59].mxu1  ;;  %v15152_v63 = vpop.f32.mrb[60].mxu0  ;;  %v16714_v48 = vld [vmem:[%s19463_s0 + $0x100] ss:$52 sps:$4 sm:$0xff]   ;;  %v16715_v59 = vld [vmem:[%s19463_s0 + $0x168] ss:$52 sps:$4 sm:$0xff]  }
 0x666   :  { %v8338_v26 = vmul.f32 %v18928_v36, %v8323_v33  ;;  %v8324_v39 = vmax.f32 %v8314_v13, 0.0  ;;  %v15153_v28 = vpop.f32.mrb[61].mxu0  ;;  %v15192_v55 = vpop.f32.mrb[60].mxu1 }
 0x667   :  { %v9225_v18 = vadd.f32 %v15151_v58, %v18990_v47  ;;  %v19002_v3 = vadd.f32 %v15188_v61, %v9222_v24  ;;  %v15154_v15 = vadd.f32 %v15153_v28, %v15152_v63  ;;  %v15155_v40 = vpop.f32.mrb[62].mxu0 }
 0x668   :  { %15911 = vmatpush3.bf16.msra.mxu0 %v13609_v53  ;;  %v8339_v44 = vmul.f32 %v18928_v36, %v8324_v39  ;;  %v18996_v5 = vadd.f32 %v8338_v26, %v18724_v14  ;;  %v15191_v53 = vadd.f32 %v15190_v35, %v15189_v51  ;;  %v16712_v36 = vld [vmem:[%s19463_s0 + $0x30] ss:$52 sps:$4 sm:$0xff]   ;;  %v15156_v1 = vpop.f32.mrb[63].mxu0 }
 0x669   :  { %15912 = vmatprep.subr.bf16.mxu0 %v13610_v9  ;;  %v9230_v46 = vadd.f32 %v15154_v15, %v18990_v47  ;;  %v15157_v57 = vadd.f32 %v15156_v1, %v15155_v40 }
 0x66a   :  { %v19008_v42 = vadd.f32 %v8339_v44, %v18735_v4  ;;  %v19010_v14 = vadd.f32 %v15191_v53, %v9225_v18  ;;  %v16713_v4 = vld [vmem:[%s19463_s0 + $0x98] ss:$52 sps:$4 sm:$0xff]  }
 0x66b   :  { %10886 = vmatmul.mubr.bf16.gmra.mrb[152].mxu0 %v16709_v2  ;;  %v9233_v62 = vadd.f32 %v15157_v57, %v18990_v47 }
 0x66c   :  { %15913 = vmatpush3.bf16.msra.mxu0 %v13610_v9  ;;  %10893 = vmatprep.mubr.bf16.mxu0 %v16710_v38  ;;  %v15193_v9 = vpop.f32.mrb[61].mxu1 }
 0x66d   :  { %15914 = vmatprep.subr.bf16.mxu0 %v13611_v41  ;;  %v15194_v45 = vadd.f32 %v15193_v9, %v15192_v55  ;;  %v15195_v31 = vpop.f32.mrb[62].mxu1 }
 0x66e   :  { %v15196_v11 = vpop.f32.mrb[63].mxu1 }
 0x66f   :  { %v15197_v7 = vadd.f32 %v15196_v11, %v15195_v31  ;;  %v19017_v19 = vadd.f32 %v15194_v45, %v9230_v46  ;;  %v15198_v30 = vpop.f32.mrb[64].mxu1 }
 0x670   :  { %15915 = vmatpush3.bf16.msra.mxu0 %v13611_v41  ;;  %v15158_v41 = vpop.f32.mrb[64].mxu0  ;;  %v15199_v27 = vpop.f32.mrb[65].mxu1 }
 0x671   :  { %15916 = vmatprep.subr.bf16.mxu0 %v13612_v23  ;;  %v19022_v49 = vadd.f32 %v15197_v7, %v9233_v62  ;;  %v15159_v25 = vpop.f32.mrb[65].mxu0  ;;  %v15200_v21 = vadd.f32 %v15199_v27, %v15198_v30  ;;  %v15201_v8 = vpop.f32.mrb[66].mxu1 }
 0x672   :  { %v15160_v16 = vadd.f32 %v15159_v25, %v15158_v41  ;;  %v15161_v52 = vpop.f32.mrb[66].mxu0  ;;  %v15202_v33 = vpop.f32.mrb[67].mxu1 }
 0x673   :  { %10894 = vmatmul.mubr.bf16.gmra.mrb[156].mxu0 %v16711_v22  ;;  %v15162_v2 = vpop.f32.mrb[67].mxu0  ;;  %v15203_v13 = vadd.f32 %v15202_v33, %v15201_v8  ;;  %v15204_v39 = vpop.f32.mrb[68].mxu1 }
 0x674   :  { %15917 = vmatpush3.bf16.msra.mxu0 %v13612_v23  ;;  %15920 = vmatprep.mubr.bf16.mxu0 %v16712_v36  ;;  %v9238_v38 = vadd.f32 %v15160_v16, %v18990_v47  ;;  %v15163_v23 = vadd.f32 %v15162_v2, %v15161_v52  ;;  %v15164_v10 = vpop.f32.mrb[68].mxu0  ;;  %v15205_v60 = vpop.f32.mrb[69].mxu1 }
 0x675   :  { %15918 = vmatprep.subr.bf16.mxu0 %v13613_v20  ;;  %v15165_v26 = vpop.f32.mrb[69].mxu0  ;;  %v15206_v61 = vadd.f32 %v15205_v60, %v15204_v39  ;;  %v15207_v51 = vpop.f32.mrb[70].mxu1 }
 0x676   :  { %v9241_v0 = vadd.f32 %v15163_v23, %v18990_v47  ;;  %v9303_v43 = vadd.f32 %v15200_v21, %v9238_v38  ;;  %v15166_v12 = vadd.f32 %v15165_v26, %v15164_v10  ;;  %v15167_v34 = vpop.f32.mrb[70].mxu0  ;;  %v15208_v24 = vpop.f32.mrb[71].mxu1 }
 0x677   :  { %v15168_v56 = vpop.f32.mrb[71].mxu0  ;;  %v15209_v58 = vadd.f32 %v15208_v24, %v15207_v51  ;;  %v15266_v63 = vpop.f32.mrb[72].mxu1 }
 0x678   :  { %15919 = vmatpush3.bf16.msra.mxu0 %v13613_v20  ;;  %v9306_v32 = vadd.f32 %v15203_v13, %v9241_v0  ;;  %v9246_v20 = vadd.f32 %v15166_v12, %v18990_v47  ;;  %v15169_v44 = vadd.f32 %v15168_v56, %v15167_v34  ;;  %v15226_v18 = vpop.f32.mrb[72].mxu0  ;;  %v15267_v15 = vpop.f32.mrb[73].mxu1 }
 0x679   :  { %v15227_v36 = vpop.f32.mrb[73].mxu0  ;;  %v15268_v9 = vadd.f32 %v15267_v15, %v15266_v63  ;;  %v15269_v1 = vpop.f32.mrb[74].mxu1 }
 0x67a   :  { %v9249_v35 = vadd.f32 %v15169_v44, %v18990_v47  ;;  %v9311_v53 = vadd.f32 %v15206_v61, %v9246_v20  ;;  %v15228_v28 = vadd.f32 %v15227_v36, %v15226_v18  ;;  %v15229_v55 = vpop.f32.mrb[74].mxu0  ;;  %v15270_v46 = vpop.f32.mrb[75].mxu1 }
 0x67b   :  { %15921 = vmatmul.mubr.bf16.vlgmr.msra.gmra.mrb[160].mxu0 %v16713_v4  ;;  %v15230_v40 = vpop.f32.mrb[75].mxu0  ;;  %v15271_v57 = vadd.f32 %v15270_v46, %v15269_v1 }
 0x67c   :  { %15924 = vmatprep.mubr.bf16.mxu0 %v16714_v48  ;;  %v9314_v22 = vadd.f32 %v15209_v58, %v9249_v35  ;;  %v9352_v45 = vadd.f32 %v15228_v28, %v19002_v3  ;;  %v15231_v31 = vadd.f32 %v15230_v40, %v15229_v55  ;;  %v15232_v4 = vpop.f32.mrb[76].mxu0  ;;  %v15272_v48 = vpop.f32.mrb[76].mxu1 }
 0x67d   :  { %v15233_v62 = vpop.f32.mrb[77].mxu0  ;;  %v15273_v30 = vpop.f32.mrb[77].mxu1 }
 0x67e   :  { %v9355_v11 = vadd.f32 %v15231_v31, %v19010_v14  ;;  %v9417_v7 = vadd.f32 %v15268_v9, %v9352_v45  ;;  %v15234_v41 = vadd.f32 %v15233_v62, %v15232_v4  ;;  %v15235_v25 = vpop.f32.mrb[78].mxu0  ;;  %v15274_v52 = vadd.f32 %v15273_v30, %v15272_v48  ;;  %v15275_v27 = vpop.f32.mrb[78].mxu1 }
 0x67f   :  { %v15236_v16 = vpop.f32.mrb[79].mxu0  ;;  %v15276_v3 = vpop.f32.mrb[79].mxu1 }
 0x680   :  { %v9420_v47 = vadd.f32 %v15271_v57, %v9355_v11  ;;  %v9360_v2 = vadd.f32 %v15234_v41, %v19017_v19  ;;  %v15237_v21 = vadd.f32 %v15236_v16, %v15235_v25  ;;  %v15277_v8 = vadd.f32 %v15276_v3, %v15275_v27  ;;  %v15238_v33 = vpop.f32.mrb[80].mxu0 }
 0x681   :  { %v15239_v13 = vpop.f32.mrb[81].mxu0 }
 0x682   :  { %v9363_v38 = vadd.f32 %v15237_v21, %v19022_v49  ;;  %v9425_v23 = vadd.f32 %v15274_v52, %v9360_v2  ;;  %v15240_v0 = vadd.f32 %v15239_v13, %v15238_v33  ;;  %v15241_v10 = vpop.f32.mrb[82].mxu0 }
 0x683   :  { %15925 = vmatmul.mubr.bf16.gmra.mrb[164].mxu0 %v16715_v59  ;;  %v15278_v59 = vpop.f32.mrb[80].mxu1  ;;  %v15242_v39 = vpop.f32.mrb[83].mxu0 }
 0x684   :  { %v9428_v14 = vadd.f32 %v15277_v8, %v9363_v38  ;;  %v15279_v26 = vpop.f32.mrb[81].mxu1  ;;  %v9368_v60 = vadd.f32 %v15240_v0, %v9303_v43  ;;  %v15243_v56 = vadd.f32 %v15242_v39, %v15241_v10  ;;  %v15244_v24 = vpop.f32.mrb[84].mxu0 }
 0x685   :  { %v15280_v12 = vadd.f32 %v15279_v26, %v15278_v59  ;;  %v15281_v34 = vpop.f32.mrb[82].mxu1  ;;  %v15245_v49 = vpop.f32.mrb[85].mxu0 }
 0x686   :  { %v15282_v61 = vpop.f32.mrb[83].mxu1  ;;  %v9371_v51 = vadd.f32 %v15243_v56, %v9306_v32  ;;  %v15246_v35 = vadd.f32 %v15245_v49, %v15244_v24  ;;  %v15247_v18 = vpop.f32.mrb[86].mxu0 }
 0x687   :  { %v15283_v19 = vadd.f32 %v15282_v61, %v15281_v34  ;;  %v9433_v20 = vadd.f32 %v15280_v12, %v9368_v60  ;;  %v15284_v58 = vpop.f32.mrb[84].mxu1  ;;  %v15248_v63 = vpop.f32.mrb[87].mxu0 }
 0x688   :  { %v15285_v36 = vpop.f32.mrb[85].mxu1  ;;  %v9376_v15 = vadd.f32 %v15246_v35, %v9311_v53  ;;  %v15249_v40 = vadd.f32 %v15248_v63, %v15247_v18  ;;  %v15306_v46 = vpop.f32.mrb[88].mxu0 }
 0x689   :  { %v9436_v44 = vadd.f32 %v15283_v19, %v9371_v51  ;;  %v15286_v28 = vadd.f32 %v15285_v36, %v15284_v58  ;;  %v15287_v55 = vpop.f32.mrb[86].mxu1  ;;  %v15307_v32 = vpop.f32.mrb[89].mxu0 }
 0x68a   :  { %v15288_v9 = vpop.f32.mrb[87].mxu1  ;;  %v9379_v43 = vadd.f32 %v15249_v40, %v9314_v22  ;;  %v15308_v11 = vadd.f32 %v15307_v32, %v15306_v46  ;;  %v15309_v4 = vpop.f32.mrb[90].mxu0 }
 0x68b   :  { %v15289_v1 = vadd.f32 %v15288_v9, %v15287_v55  ;;  %v9441_v45 = vadd.f32 %v15286_v28, %v9376_v15  ;;  %v15346_v57 = vpop.f32.mrb[88].mxu1  ;;  %v15310_v48 = vpop.f32.mrb[91].mxu0 }
 0x68c   :  { %v15347_v62 = vpop.f32.mrb[89].mxu1  ;;  %v9482_v30 = vadd.f32 %v15308_v11, %v9417_v7  ;;  %v15311_v16 = vadd.f32 %v15310_v48, %v15309_v4  ;;  %v15312_v21 = vpop.f32.mrb[92].mxu0 }
 0x68d   :  { %v9444_v31 = vadd.f32 %v15289_v1, %v9379_v43  ;;  %v15348_v41 = vadd.f32 %v15347_v62, %v15346_v57  ;;  %v15349_v25 = vpop.f32.mrb[90].mxu1  ;;  %v15313_v22 = vpop.f32.mrb[93].mxu0 }
 0x68e   :  { %v15350_v52 = vpop.f32.mrb[91].mxu1  ;;  %v9485_v53 = vadd.f32 %v15311_v16, %v9420_v47  ;;  %v15314_v38 = vadd.f32 %v15313_v22, %v15312_v21  ;;  %v15315_v33 = vpop.f32.mrb[94].mxu0  ;;  %v13508_v21 = vld [vmem:[#allocation6 + $0x6] ss:$0 sm:$0xff] }
 0x68f   :  { %v15351_v27 = vadd.f32 %v15350_v52, %v15349_v25  ;;  %v9547_v2 = vadd.f32 %v15348_v41, %v9482_v30  ;;  %v15352_v8 = vpop.f32.mrb[92].mxu1  ;;  %v15316_v59 = vpop.f32.mrb[95].mxu0 }
 0x690   :  { %v15353_v13 = vpop.f32.mrb[93].mxu1  ;;  %v9490_v26 = vadd.f32 %v15314_v38, %v9425_v23  ;;  %v15317_v39 = vadd.f32 %v15316_v59, %v15315_v33  ;;  %v15318_v56 = vpop.f32.mrb[96].mxu0 }
 0x691   :  { %v9550_v3 = vadd.f32 %v15351_v27, %v9485_v53  ;;  %v15354_v0 = vadd.f32 %v15353_v13, %v15352_v8  ;;  %v15355_v10 = vpop.f32.mrb[94].mxu1  ;;  %v15319_v47 = vpop.f32.mrb[97].mxu0 }
 0x692   :  { %v15356_v12 = vpop.f32.mrb[95].mxu1  ;;  %v9493_v7 = vadd.f32 %v15317_v39, %v9428_v14  ;;  %v15320_v51 = vadd.f32 %v15319_v47, %v15318_v56  ;;  %v15321_v24 = vpop.f32.mrb[98].mxu0 }
 0x693   :  { %v15357_v34 = vadd.f32 %v15356_v12, %v15355_v10  ;;  %v9555_v60 = vadd.f32 %v15354_v0, %v9490_v26  ;;  %v15358_v19 = vpop.f32.mrb[96].mxu1  ;;  %v15322_v58 = vpop.f32.mrb[99].mxu0 }
 0x694   :  { %v15359_v49 = vpop.f32.mrb[97].mxu1  ;;  %v9498_v36 = vadd.f32 %v15320_v51, %v9433_v20  ;;  %v15323_v63 = vadd.f32 %v15322_v58, %v15321_v24  ;;  %v15324_v40 = vpop.f32.mrb[100].mxu0 }
 0x695   :  { %v9558_v61 = vadd.f32 %v15357_v34, %v9493_v7  ;;  %v15360_v35 = vadd.f32 %v15359_v49, %v15358_v19  ;;  %v15361_v18 = vpop.f32.mrb[98].mxu1  ;;  %v15325_v14 = vpop.f32.mrb[101].mxu0 }
 0x696   :  { %v15362_v28 = vpop.f32.mrb[99].mxu1  ;;  %v9501_v23 = vadd.f32 %v15323_v63, %v9436_v44  ;;  %v15326_v43 = vadd.f32 %v15325_v14, %v15324_v40  ;;  %v15327_v46 = vpop.f32.mrb[102].mxu0 }
 0x697   :  { %v15363_v55 = vadd.f32 %v15362_v28, %v15361_v18  ;;  %v9563_v15 = vadd.f32 %v15360_v35, %v9498_v36  ;;  %v15364_v1 = vpop.f32.mrb[100].mxu1  ;;  %v15328_v57 = vpop.f32.mrb[103].mxu0 }
 0x698   :  { %v15365_v32 = vpop.f32.mrb[101].mxu1  ;;  %v9506_v62 = vadd.f32 %v15326_v43, %v9441_v45  ;;  %v15329_v48 = vadd.f32 %v15328_v57, %v15327_v46  ;;  %v15898_v16 = vpop.f32.mrb[104].mxu0 }
 0x699   :  { %v9566_v9 = vadd.f32 %v15363_v55, %v9501_v23  ;;  %v15366_v11 = vadd.f32 %v15365_v32, %v15364_v1  ;;  %v15367_v4 = vpop.f32.mrb[102].mxu1  ;;  %v9620_v44 = vadd.f32 %v15898_v16, %v9555_v60  ;;  %v9611_v27 = vpop.f32.mrb[105].mxu0 }
 0x69a   :  { %v15368_v41 = vpop.f32.mrb[103].mxu1  ;;  %v9509_v20 = vadd.f32 %v15329_v48, %v9444_v31  ;;  %v9612_v22 = vadd.f32 %v9611_v27, %v9547_v2  ;;  %v15899_v8 = vpop.f32.mrb[106].mxu0 }
 0x69b   :  { %v15369_v25 = vadd.f32 %v15368_v41, %v15367_v4  ;;  %v9571_v30 = vadd.f32 %v15366_v11, %v9506_v62  ;;  %v15398_v53 = vpop.f32.mrb[104].mxu1  ;;  %v9644_v33 = vmax.f32 %v9620_v44, 0.0  ;;  %v9623_v13 = vadd.f32 %v15899_v8, %v9558_v61  ;;  %v9614_v59 = vpop.f32.mrb[107].mxu0 }
 0x69c   :  { %v15399_v38 = vpop.f32.mrb[105].mxu1  ;;  %v9642_v45 = vmax.f32 %v9612_v22, 0.0  ;;  %v9615_v26 = vadd.f32 %v9614_v59, %v9550_v3  ;;  %v15902_v19 = vpop.f32.mrb[108].mxu0 }
 0x69d   :  { %v9574_v52 = vadd.f32 %v15369_v25, %v9509_v20  ;;  %v15400_v0 = vadd.f32 %v15399_v38, %v15398_v53  ;;  %v15401_v10 = vpop.f32.mrb[106].mxu1  ;;  %v9659_v12 = vmul.f32 %v13508_v21, %v9644_v33  ;;  %v9645_v31 = vmax.f32 %v9623_v13, 0.0  ;;  %v9627_v3 = vpop.f32.mrb[109].mxu0 }
 0x69e   :  { %v15402_v39 = vpop.f32.mrb[107].mxu1  ;;  %v9657_v7 = vmul.f32 %v13508_v21, %v9642_v45  ;;  %v9643_v56 = vmax.f32 %v9615_v26, 0.0  ;;  %v9636_v24 = vadd.f32 %v15902_v19, %v9571_v30  ;;  %v9628_v35 = vadd.f32 %v9627_v3, %v9563_v15  ;;  %v15903_v18 = vpop.f32.mrb[110].mxu0 }
 0x69f   :  { %v15403_v34 = vadd.f32 %v15402_v39, %v15401_v10  ;;  %v9660_v60 = vmul.f32 %v13508_v21, %v9645_v31  ;;  %v19036_v47 = vadd.f32 %v9659_v12, %v18957_v37  ;;  %v15404_v49 = vpop.f32.mrb[108].mxu1  ;;  %v9639_v37 = vadd.f32 %v15903_v18, %v9574_v52  ;;  %v9630_v28 = vpop.f32.mrb[111].mxu0 }
 0x6a0   :  { %v9658_v2 = vmul.f32 %v13508_v21, %v9643_v56  ;;  %v19039_v51 = vadd.f32 %v9657_v7, %v18937_v29  ;;  %v15405_v36 = vpop.f32.mrb[109].mxu1  ;;  %v9648_v63 = vmax.f32 %v9636_v24, 0.0  ;;  %v9646_v40 = vmax.f32 %v9628_v35, 0.0 }
 0x6a1   :  { %v19042_v61 = vadd.f32 %v9660_v60, %v18967_v6  ;;  %v15406_v55 = vadd.f32 %v15405_v36, %v15404_v49  ;;  %v15407_v23 = vpop.f32.mrb[110].mxu1  ;;  %v9631_v29 = vadd.f32 %v9630_v28, %v9566_v9  ;;  %v9649_v6 = vmax.f32 %v9639_v37, 0.0 }
 0x6a2   :  { %v19045_v58 = vadd.f32 %v9658_v2, %v18947_v50  ;;  %v15408_v14 = vpop.f32.mrb[111].mxu1  ;;  %v9663_v1 = vmul.f32 %v13508_v21, %v9648_v63  ;;  %v9661_v46 = vmul.f32 %v13508_v21, %v9646_v40 }
 0x6a3   :  { %v15409_v43 = vadd.f32 %v15408_v14, %v15407_v23  ;;  %v9647_v32 = vmax.f32 %v9631_v29, 0.0  ;;  %v9664_v50 = vmul.f32 %v13508_v21, %v9649_v6  ;;  %v15410_v62 = vpop.f32.mrb[112].mxu1 }
 0x6a4   :  { %v19048_v57 = vadd.f32 %v9663_v1, %v18996_v5  ;;  %v19051_v15 = vadd.f32 %v9661_v46, %v18971_v17  ;;  %v15411_v48 = vpop.f32.mrb[113].mxu1  ;;  %v16815_v5 = vmov 0  }
 0x6a5   :  { %v9662_v11 = vmul.f32 %v13508_v21, %v9647_v32  ;;  %v19054_v4 = vadd.f32 %v9664_v50, %v19008_v42  ;;  %v15412_v41 = vadd.f32 %v15411_v48, %v15410_v62  ;;  %v15413_v25 = vpop.f32.mrb[114].mxu1  ;;  %16273 = vset.pattern.permute.xlu0 %v16815_v5  ;;  %v13509_v42 = vld [vmem:[%s19465_s2 + $0x7] ss:$0 sm:$0xff]  ;;  %s16816_s2 = smov 64  }
 0x6a6   :  { %v15414_v20 = vpop.f32.mrb[115].mxu1  ;;  %v10547_v21 = vadd.f32 %v15400_v0, %v13509_v42  ;;  %v10550_v38 = vadd.f32 %v15403_v34, %v13509_v42  ;;  %v10555_v2 = vadd.f32 %v15406_v55, %v13509_v42  ;;  %v10558_v34 = vadd.f32 %v15409_v43, %v13509_v42 }
 0x6a7   :  { %v19057_v9 = vadd.f32 %v9662_v11, %v18979_v54  ;;  %v15415_v30 = vadd.f32 %v15414_v20, %v15413_v25  ;;  %v15416_v16 = vpop.f32.mrb[116].mxu1  ;;  %v10563_v55 = vadd.f32 %v15412_v41, %v13509_v42 }
 0x6a8   :  { %v15417_v52 = vpop.f32.mrb[117].mxu1 }
 0x6a9   :  { %v15418_v44 = vadd.f32 %v15417_v52, %v15416_v16  ;;  %v15419_v17 = vpop.f32.mrb[118].mxu1  ;;  %v10566_v43 = vadd.f32 %v15415_v30, %v13509_v42 }
 0x6aa   :  { %v15420_v27 = vpop.f32.mrb[119].mxu1 }
 0x6ab   :  { %v15421_v53 = vadd.f32 %v15420_v27, %v15419_v17 }
 0x6c1   :  { %v15478_v8 = vpop.f32.mrb[120].mxu1 }
 0x6c2   :  { %v15479_v59 = vpop.f32.mrb[121].mxu1 }
 0x6c3   :  { %v15480_v45 = vadd.f32 %v15479_v59, %v15478_v8  ;;  %v15481_v26 = vpop.f32.mrb[122].mxu1 }
 0x6c4   :  { %v15482_v31 = vpop.f32.mrb[123].mxu1 }
 0x6c5   :  { %v15483_v7 = vadd.f32 %v15482_v31, %v15481_v26 }
 0x6cf   :  { %v15438_v54 = vpop.f32.mrb[112].mxu0 }
 0x6d0   :  { %v15439_v22 = vpop.f32.mrb[113].mxu0 }
 0x6d1   :  { %v15440_v33 = vadd.f32 %v15439_v22, %v15438_v54  ;;  %v15441_v13 = vpop.f32.mrb[114].mxu0  ;;  %v10571_v22 = vadd.f32 %v15418_v44, %v13509_v42 }
 0x6d2   :  { %v15442_v10 = vpop.f32.mrb[115].mxu0 }
 0x6d3   :  { %v10612_v39 = vadd.f32 %v15440_v33, %v10547_v21  ;;  %v15443_v12 = vadd.f32 %v15442_v10, %v15441_v13  ;;  %v10574_v13 = vadd.f32 %v15421_v53, %v13509_v42 }
 0x6d5   :  { %v10615_v56 = vadd.f32 %v15443_v12, %v10550_v38  ;;  %v19062_v60 = vadd.f32 %v15480_v45, %v10612_v39 }
 0x6d7   :  { %v19064_v19 = vadd.f32 %v15483_v7, %v10615_v56  ;;  %v15444_v0 = vpop.f32.mrb[116].mxu0 }
 0x6d8   :  { %v15445_v24 = vpop.f32.mrb[117].mxu0 }
 0x6d9   :  { %v15484_v3 = vpop.f32.mrb[124].mxu1  ;;  %v15446_v49 = vadd.f32 %v15445_v24, %v15444_v0  ;;  %v15447_v35 = vpop.f32.mrb[118].mxu0 }
 0x6da   :  { %v15485_v18 = vpop.f32.mrb[125].mxu1  ;;  %v15448_v36 = vpop.f32.mrb[119].mxu0 }
 0x6db   :  { %v15486_v63 = vadd.f32 %v15485_v18, %v15484_v3  ;;  %v15487_v37 = vpop.f32.mrb[126].mxu1  ;;  %v10620_v28 = vadd.f32 %v15446_v49, %v10555_v2  ;;  %v15449_v23 = vadd.f32 %v15448_v36, %v15447_v35 }
 0x6dc   :  { %v15488_v40 = vpop.f32.mrb[127].mxu1 }
 0x6dd   :  { %v15489_v29 = vadd.f32 %v15488_v40, %v15487_v37  ;;  %v10623_v14 = vadd.f32 %v15449_v23, %v10558_v34  ;;  %v19066_v1 = vadd.f32 %v15486_v63, %v10620_v28 }
 0x6df   :  { %v19068_v6 = vadd.f32 %v15489_v29, %v10623_v14 }
 0x6e7   :  { %v15490_v50 = vpop.f32.mrb[128].mxu1 }
 0x6e8   :  { %v15450_v46 = vpop.f32.mrb[120].mxu0  ;;  %v15491_v48 = vpop.f32.mrb[129].mxu1 }
 0x6e9   :  { %v15451_v32 = vpop.f32.mrb[121].mxu0  ;;  %v15492_v20 = vadd.f32 %v15491_v48, %v15490_v50  ;;  %v15493_v16 = vpop.f32.mrb[130].mxu1 }
 0x6ea   :  { %v15452_v11 = vadd.f32 %v15451_v32, %v15450_v46  ;;  %v15453_v62 = vpop.f32.mrb[122].mxu0  ;;  %v15494_v17 = vpop.f32.mrb[131].mxu1 }
 0x6eb   :  { %v15454_v25 = vpop.f32.mrb[123].mxu0  ;;  %v15495_v27 = vadd.f32 %v15494_v17, %v15493_v16 }
 0x6ec   :  { %v10628_v5 = vadd.f32 %v15452_v11, %v10563_v55  ;;  %v15455_v52 = vadd.f32 %v15454_v25, %v15453_v62 }
 0x6ee   :  { %v10631_v21 = vadd.f32 %v15455_v52, %v10566_v43  ;;  %v10693_v54 = vadd.f32 %v15492_v20, %v10628_v5 }
 0x6f0   :  { %v19070_v41 = vadd.f32 %v15495_v27, %v10631_v21 }
 0x6fb   :  { %v15496_v33 = vpop.f32.mrb[132].mxu1 }
 0x6fc   :  { %v15497_v10 = vpop.f32.mrb[133].mxu1 }
 0x6fd   :  { %v15498_v26 = vadd.f32 %v15497_v10, %v15496_v33  ;;  %v15499_v39 = vpop.f32.mrb[134].mxu1 }
 0x6fe   :  { %v15500_v7 = vpop.f32.mrb[135].mxu1 }
 0x6ff   :  { %v15501_v56 = vadd.f32 %v15500_v7, %v15499_v39 }
 0x703   :  { %v15456_v8 = vpop.f32.mrb[124].mxu0 }
 0x704   :  { %v15457_v38 = vpop.f32.mrb[125].mxu0 }
 0x705   :  { %v15458_v30 = vadd.f32 %v15457_v38, %v15456_v8  ;;  %v15459_v59 = vpop.f32.mrb[126].mxu0 }
 0x706   :  { %v15460_v45 = vpop.f32.mrb[127].mxu0 }
 0x707   :  { %v10636_v12 = vadd.f32 %v15458_v30, %v10571_v22  ;;  %v15461_v31 = vadd.f32 %v15460_v45, %v15459_v59 }
 0x709   :  { %v10639_v2 = vadd.f32 %v15461_v31, %v10574_v13  ;;  %v10701_v0 = vadd.f32 %v15498_v26, %v10636_v12 }
 0x70b   :  { %v10704_v24 = vadd.f32 %v15501_v56, %v10639_v2  ;;  %v15518_v44 = vpop.f32.mrb[128].mxu0 }
 0x70c   :  { %v15519_v3 = vpop.f32.mrb[129].mxu0  ;;  %v15558_v34 = vpop.f32.mrb[136].mxu1 }
 0x70d   :  { %v15520_v49 = vadd.f32 %v15519_v3, %v15518_v44  ;;  %v15521_v35 = vpop.f32.mrb[130].mxu0  ;;  %v15559_v18 = vpop.f32.mrb[137].mxu1 }
 0x70e   :  { %v15522_v42 = vpop.f32.mrb[131].mxu0  ;;  %v15560_v53 = vadd.f32 %v15559_v18, %v15558_v34  ;;  %v15561_v36 = vpop.f32.mrb[138].mxu1 }
 0x70f   :  { %v10742_v63 = vadd.f32 %v15520_v49, %v19062_v60  ;;  %v15523_v37 = vadd.f32 %v15522_v42, %v15521_v35  ;;  %v15562_v28 = vpop.f32.mrb[139].mxu1 }
 0x710   :  { %v15563_v23 = vadd.f32 %v15562_v28, %v15561_v36 }
 0x711   :  { %v10745_v40 = vadd.f32 %v15523_v37, %v19064_v19  ;;  %v10807_v29 = vadd.f32 %v15560_v53, %v10742_v63 }
 0x713   :  { %v10810_v14 = vadd.f32 %v15563_v23, %v10745_v40 }
 0x714   :  { %v15564_v32 = vpop.f32.mrb[140].mxu1 }
 0x715   :  { %v15565_v11 = vpop.f32.mrb[141].mxu1 }
 0x716   :  { %v15524_v55 = vpop.f32.mrb[132].mxu0  ;;  %v15566_v48 = vadd.f32 %v15565_v11, %v15564_v32  ;;  %v15567_v25 = vpop.f32.mrb[142].mxu1 }
 0x717   :  { %v15525_v46 = vpop.f32.mrb[133].mxu0  ;;  %v15568_v60 = vpop.f32.mrb[143].mxu1 }
 0x718   :  { %v15526_v50 = vadd.f32 %v15525_v46, %v15524_v55  ;;  %v15527_v43 = vpop.f32.mrb[134].mxu0  ;;  %v15569_v5 = vadd.f32 %v15568_v60, %v15567_v25 }
 0x719   :  { %v15528_v62 = vpop.f32.mrb[135].mxu0 }
 0x71a   :  { %v10750_v20 = vadd.f32 %v15526_v50, %v19066_v1  ;;  %v15529_v16 = vadd.f32 %v15528_v62, %v15527_v43 }
 0x71c   :  { %v10753_v52 = vadd.f32 %v15529_v16, %v19068_v6  ;;  %v10815_v17 = vadd.f32 %v15566_v48, %v10750_v20  ;;  %v15570_v22 = vpop.f32.mrb[144].mxu1 }
 0x71d   :  { %v15571_v33 = vpop.f32.mrb[145].mxu1 }
 0x71e   :  { %v10818_v19 = vadd.f32 %v15569_v5, %v10753_v52  ;;  %v15530_v27 = vpop.f32.mrb[136].mxu0  ;;  %v15572_v30 = vadd.f32 %v15571_v33, %v15570_v22  ;;  %v15573_v59 = vpop.f32.mrb[146].mxu1 }
 0x71f   :  { %v15531_v21 = vpop.f32.mrb[137].mxu0  ;;  %v15574_v26 = vpop.f32.mrb[147].mxu1 }
 0x720   :  { %v15532_v8 = vadd.f32 %v15531_v21, %v15530_v27  ;;  %v15533_v38 = vpop.f32.mrb[138].mxu0  ;;  %v15575_v1 = vadd.f32 %v15574_v26, %v15573_v59 }
 0x721   :  { %v15534_v13 = vpop.f32.mrb[139].mxu0 }
 0x722   :  { %v10758_v10 = vadd.f32 %v15532_v8, %v10693_v54  ;;  %v15535_v45 = vadd.f32 %v15534_v13, %v15533_v38 }
 0x724   :  { %v10761_v39 = vadd.f32 %v15535_v45, %v19070_v41  ;;  %v10823_v12 = vadd.f32 %v15572_v30, %v10758_v10  ;;  %v15576_v56 = vpop.f32.mrb[148].mxu1 }
 0x725   :  { %v15577_v3 = vpop.f32.mrb[149].mxu1 }
 0x726   :  { %v10826_v31 = vadd.f32 %v15575_v1, %v10761_v39  ;;  %v15536_v6 = vpop.f32.mrb[140].mxu0  ;;  %v15578_v49 = vadd.f32 %v15577_v3, %v15576_v56  ;;  %v15579_v35 = vpop.f32.mrb[150].mxu1 }
 0x727   :  { %v15537_v7 = vpop.f32.mrb[141].mxu0  ;;  %v15580_v53 = vpop.f32.mrb[151].mxu1 }
 0x728   :  { %v15538_v2 = vadd.f32 %v15537_v7, %v15536_v6  ;;  %v15539_v44 = vpop.f32.mrb[142].mxu0  ;;  %v15581_v54 = vadd.f32 %v15580_v53, %v15579_v35 }
 0x729   :  { %v15540_v34 = vpop.f32.mrb[143].mxu0 }
 0x72a   :  { %v10766_v18 = vadd.f32 %v15538_v2, %v10701_v0  ;;  %v15541_v42 = vadd.f32 %v15540_v34, %v15539_v44 }
 0x72c   :  { %v10769_v36 = vadd.f32 %v15541_v42, %v10704_v24  ;;  %v10831_v63 = vadd.f32 %v15578_v49, %v10766_v18 }
 0x72e   :  { %v10834_v37 = vadd.f32 %v15581_v54, %v10769_v36  ;;  %v15598_v28 = vpop.f32.mrb[144].mxu0 }
 0x72f   :  { %v15599_v41 = vpop.f32.mrb[145].mxu0 }
 0x730   :  { %v15600_v23 = vadd.f32 %v15599_v41, %v15598_v28  ;;  %v15601_v40 = vpop.f32.mrb[146].mxu0 }
 0x731   :  { %v15602_v55 = vpop.f32.mrb[147].mxu0 }
 0x732   :  { %v15603_v46 = vadd.f32 %v15602_v55, %v15601_v40  ;;  %v10872_v32 = vadd.f32 %v15600_v23, %v10807_v29 }
 0x734   :  { %v10875_v50 = vadd.f32 %v15603_v46, %v10810_v14 }
 0x736   :  { %v15604_v43 = vpop.f32.mrb[148].mxu0 }
 0x737   :  { %v15605_v11 = vpop.f32.mrb[149].mxu0 }
 0x738   :  { %v15606_v62 = vadd.f32 %v15605_v11, %v15604_v43  ;;  %v15607_v48 = vpop.f32.mrb[150].mxu0 }
 0x739   :  { %v15608_v25 = vpop.f32.mrb[151].mxu0 }
 0x73a   :  { %v15609_v0 = vadd.f32 %v15608_v25, %v15607_v48  ;;  %v10880_v20 = vadd.f32 %v15606_v62, %v10815_v17 }
 0x73c   :  { %v10883_v16 = vadd.f32 %v15609_v0, %v10818_v19  ;;  %v13614_v19 = vld [vmem:[#allocation6 + $0x7] ss:$0 sm:$0xff]  ;;  %v13615_v0 = vld [vmem:[#allocation2] ss:$0 sm:$0xff] }
 0x73e   :  { %v15610_v60 = vpop.f32.mrb[152].mxu0 }
 0x73f   :  { %v15611_v24 = vpop.f32.mrb[153].mxu0 }
 0x740   :  { %v15612_v5 = vadd.f32 %v15611_v24, %v15610_v60  ;;  %v15613_v52 = vpop.f32.mrb[154].mxu0 }
 0x741   :  { %v15614_v27 = vpop.f32.mrb[155].mxu0 }
 0x742   :  { %v15615_v21 = vadd.f32 %v15614_v27, %v15613_v52  ;;  %v10888_v22 = vadd.f32 %v15612_v5, %v10823_v12 }
 0x744   :  { %v10891_v8 = vadd.f32 %v15615_v21, %v10826_v31 }
 0x746   :  { %v15616_v38 = vpop.f32.mrb[156].mxu0 }
 0x747   :  { %v15617_v33 = vpop.f32.mrb[157].mxu0 }
 0x748   :  { %v15618_v29 = vadd.f32 %v15617_v33, %v15616_v38  ;;  %v15619_v14 = vpop.f32.mrb[158].mxu0 }
 0x749   :  { %v15620_v13 = vpop.f32.mrb[159].mxu0 }
 0x74a   :  { %v15621_v30 = vadd.f32 %v15620_v13, %v15619_v14  ;;  %v10896_v59 = vadd.f32 %v15618_v29, %v10831_v63 }
 0x74c   :  { %v10899_v10 = vadd.f32 %v15621_v30, %v10834_v37 }
 0x74e   :  { %v15922_v45 = vpop.f32.mrb[160].mxu0 }
 0x74f   :  { %v10945_v26 = vadd.f32 %v15922_v45, %v10880_v20  ;;  %v10936_v17 = vpop.f32.mrb[161].mxu0 }
 0x750   :  { %v10937_v1 = vadd.f32 %v10936_v17, %v10872_v32  ;;  %v15923_v39 = vpop.f32.mrb[162].mxu0 }
 0x751   :  { %v10969_v6 = vmax.f32 %v10945_v26, 0.0  ;;  %v10948_v7 = vadd.f32 %v15923_v39, %v10883_v16  ;;  %v10939_v56 = vpop.f32.mrb[163].mxu0 }
 0x752   :  { %v10967_v2 = vmax.f32 %v10937_v1, 0.0  ;;  %v10940_v12 = vadd.f32 %v10939_v56, %v10875_v50 }
 0x753   :  { %v10984_v31 = vmul.f32 %v13614_v19, %v10969_v6  ;;  %v10970_v44 = vmax.f32 %v10948_v7, 0.0  ;;  %v11106_v6 = vld [vmem:[%s19468_s5 + $0x10] sm:$0xff] }
 0x754   :  { %v10982_v3 = vmul.f32 %v13614_v19, %v10967_v2  ;;  %v10968_v34 = vmax.f32 %v10940_v12, 0.0 }
 0x755   :  { %v10985_v49 = vmul.f32 %v13614_v19, %v10970_v44  ;;  %v10992_v35 = vadd.f32 %v10984_v31, %v19036_v47  ;;  %v11105_v31 = vld [vmem:[%s19468_s5 + $0x8] sm:$0xff] }
 0x756   :  { %v10983_v18 = vmul.f32 %v13614_v19, %v10968_v34  ;;  %v15926_v42 = vpop.f32.mrb[164].mxu0  ;;  %v10990_v53 = vadd.f32 %v10982_v3, %v19039_v51 }
 0x757   :  { %v10961_v54 = vadd.f32 %v15926_v42, %v10896_v59  ;;  %v10952_v36 = vpop.f32.mrb[165].mxu0  ;;  %11010 = vrot.lane.b32.xlu1 %v10992_v35, %s16816_s2  ;;  %v10993_v63 = vadd.f32 %v10985_v49, %v19042_v61 }
 0x758   :  { %v10953_v37 = vadd.f32 %v10952_v36, %v10888_v22  ;;  %v15927_v28 = vpop.f32.mrb[166].mxu0  ;;  %11006 = vrot.lane.b32.xlu0 %v10990_v53, %s16816_s2  ;;  %v10991_v41 = vadd.f32 %v10983_v18, %v19045_v58 }
 0x759   :  { %v10973_v23 = vmax.f32 %v10961_v54, 0.0  ;;  %v10964_v40 = vadd.f32 %v15927_v28, %v10899_v10  ;;  %v10955_v55 = vpop.f32.mrb[167].mxu0  ;;  %v11108_v28 = vld [vmem:[%s19468_s5 + $0x20] sm:$0xff] }
 0x75a   :  { %v10971_v46 = vmax.f32 %v10953_v37, 0.0  ;;  %v10956_v47 = vadd.f32 %v10955_v55, %v10891_v8  ;;  %v11107_v37 = vld [vmem:[%s19468_s5 + $0x18] sm:$0xff] }
 0x75b   :  { %v10988_v32 = vmul.f32 %v13614_v19, %v10973_v23  ;;  %v10974_v50 = vmax.f32 %v10964_v40, 0.0  ;;  %11012 = vrot.lane.b32.xlu1 %v10993_v63, %s16816_s2 }
 0x75c   :  { %v10986_v51 = vmul.f32 %v13614_v19, %v10971_v46  ;;  %v10972_v43 = vmax.f32 %v10956_v47, 0.0  ;;  %11008 = vrot.lane.b32.xlu0 %v10991_v41, %s16816_s2 }
 0x75d   :  { %v10989_v11 = vmul.f32 %v13614_v19, %v10974_v50  ;;  %v10996_v62 = vadd.f32 %v10988_v32, %v19048_v57 }
 0x75e   :  { %v10987_v61 = vmul.f32 %v13614_v19, %v10972_v43  ;;  %v10994_v48 = vadd.f32 %v10986_v51, %v19051_v15  ;;  %v11104_v19 = vld [vmem:[%s19468_s5] sm:$0xff] }
 0x75f   :  { %v10997_v25 = vadd.f32 %v10989_v11, %v19054_v4  ;;  %v11109_v11 = vld [vmem:[%s19468_s5 + $0x28] sm:$0xff] }
 0x760   :  { %11014 = vrot.lane.b32.xlu0 %v10994_v48, %s16816_s2  ;;  %v10995_v58 = vadd.f32 %v10987_v61, %v19057_v9 }
 0x762   :  { %11016 = vrot.lane.b32.xlu1 %v10995_v58, %s16816_s2 }
 0x764   :  { %11018 = vrot.lane.b32.xlu0 %v10996_v62, %s16816_s2 }
 0x766   :  { %11020 = vrot.lane.b32.xlu1 %v10997_v25, %s16816_s2 }
 0x768   :  { %11085 = vperm.xlu0 %16273, %v13615_v0  }
 0x7c9   :  { %v11011_v20 = vpop.permute.xlu1 %11010 }
 0x7ca   :  { %v11032_v16 = vadd.f32 %v11011_v20, %v10992_v35  ;;  %v11007_v60 = vpop.permute.xlu0 %11006 }
 0x7cb   :  { %v11030_v24 = vadd.f32 %v11007_v60, %v10990_v53 }
 0x7cc   :  { %11050 = vrot.lane.b32.xlu0 %v11032_v16, %s16817_s16 }
 0x7cd   :  { %11046 = vrot.lane.b32.xlu1 %v11030_v24, %s16817_s16  ;;  %v11013_v15 = vpop.permute.xlu1 %11012 }
 0x7ce   :  { %v11009_v57 = vpop.permute.xlu0 %11008  ;;  %v11033_v52 = vadd.f32 %v11013_v15, %v10993_v63 }
 0x7cf   :  { %v11031_v5 = vadd.f32 %v11009_v57, %v10991_v41 }
 0x7d1   :  { %11048 = vrot.lane.b32.xlu1 %v11031_v5, %s16817_s16 }
 0x7d2   :  { %v11015_v4 = vpop.permute.xlu0 %11014 }
 0x7d3   :  { %v11034_v27 = vadd.f32 %v11015_v4, %v10994_v48 }
 0x7d4   :  { %v11017_v9 = vpop.permute.xlu1 %11016 }
 0x7d5   :  { %11052 = vrot.lane.b32.xlu1 %v11033_v52, %s16817_s16  ;;  %11054 = vrot.lane.b32.xlu0 %v11034_v27, %s16817_s16  ;;  %v11035_v22 = vadd.f32 %v11017_v9, %v10995_v58 }
 0x7d6   :  { %v11019_v21 = vpop.permute.xlu0 %11018 }
 0x7d7   :  { %v11036_v8 = vadd.f32 %v11019_v21, %v10996_v62  ;;  %v11110_v62 = vld [vmem:[%s19468_s5 + $0x30] sm:$0xff] }
 0x7d8   :  { %v11021_v38 = vpop.permute.xlu1 %11020 }
 0x7d9   :  { %11056 = vrot.lane.b32.xlu1 %v11035_v22, %s16817_s16  ;;  %11058 = vrot.lane.b32.xlu0 %v11036_v8, %s16817_s16  ;;  %v11037_v33 = vadd.f32 %v11021_v38, %v10997_v25 }
 0x7dd   :  { %11060 = vrot.lane.b32.xlu1 %v11037_v33, %s16817_s16 }
 0x7e7   :  { %v11086_v29 = vpop.permute.xlu0 %11085 }
 0x83e   :  { %v11051_v14 = vpop.permute.xlu0 %11050 }
 0x83f   :  { %v11072_v13 = vadd.f32 %v11051_v14, %v11032_v16  ;;  %v11047_v30 = vpop.permute.xlu1 %11046 }
 0x840   :  { %v11070_v59 = vadd.f32 %v11047_v30, %v11030_v24  ;;  %v11111_v24 = vld [vmem:[%s19468_s5 + $0x38] sm:$0xff] }
 0x841   :  { %v11090_v10 = vadd.f32 %v11086_v29, %v11072_v13 }
 0x842   :  { %v11088_v45 = vadd.f32 %v11086_v29, %v11070_v59 }
 0x843   :  { %v11098_v26 = vmax.f32 %v11090_v10, 0.0  ;;  %v11049_v17 = vpop.permute.xlu1 %11048 }
 0x844   :  { %v11096_v1 = vmax.f32 %v11088_v45, 0.0  ;;  %v11071_v39 = vadd.f32 %v11049_v17, %v11031_v5 }
 0x845   :  { %v11114_v44 = vadd.f32 %v11106_v6, %v11098_v26 }
 0x846   :  { %v11089_v7 = vadd.f32 %v11086_v29, %v11071_v39  ;;  %v11112_v56 = vadd.f32 %v11104_v19, %v11096_v1 }
 0x847   :  { %v11053_v2 = vpop.permute.xlu1 %11052  ;;  %v11055_v12 = vpop.permute.xlu0 %11054  ;;  %v11127_v63 = vsel %vm11120_vm0, %v11114_v44, 0.0 }
 0x848   :  { %v11097_v3 = vmax.f32 %v11089_v7, 0.0  ;;  %v11073_v34 = vadd.f32 %v11053_v2, %v11033_v52  ;;  %v11074_v49 = vadd.f32 %v11055_v12, %v11034_v27  ;;  %v11121_v35 = vsel %vm11120_vm0, %v11112_v56, 0.0 }
 0x849   :  { %11122 = vadd.xlane.f32.xlu0 %v11121_v35 }
 0x84a   :  { %v11091_v18 = vadd.f32 %v11086_v29, %v11073_v34  ;;  %v11092_v42 = vadd.f32 %v11086_v29, %v11074_v49  ;;  %v11113_v53 = vadd.f32 %v11105_v31, %v11097_v3 }
 0x84b   :  { %v11057_v54 = vpop.permute.xlu1 %11056  ;;  %v11059_v36 = vpop.permute.xlu0 %11058 }
 0x84c   :  { %v11099_v41 = vmax.f32 %v11091_v18, 0.0  ;;  %v11100_v23 = vmax.f32 %v11092_v42, 0.0  ;;  %v11075_v40 = vadd.f32 %v11057_v54, %v11035_v22  ;;  %v11076_v55 = vadd.f32 %v11059_v36, %v11036_v8 }
 0x84d   :  { %v11124_v46 = vsel %vm11120_vm0, %v11113_v53, 0.0  ;;  %11128 = vadd.xlane.f32.xlu0 %v11127_v63 }
 0x84e   :  { %v11093_v47 = vadd.f32 %v11086_v29, %v11075_v40  ;;  %v11094_v32 = vadd.f32 %v11086_v29, %v11076_v55  ;;  %11125 = vadd.xlane.f32.xlu1 %v11124_v46  ;;  %v11115_v50 = vadd.f32 %v11107_v37, %v11099_v41  ;;  %v11116_v51 = vadd.f32 %v11108_v28, %v11100_v23  ;;  %v11256_v40 = vld [vmem:[%s19471_s8] sm:$0xff]  ;;  %v11257_v55 = vld [vmem:[%s19471_s8 + $0x8] sm:$0xff] }
 0x84f   :  { %v11061_v43 = vpop.permute.xlu1 %11060  ;;  %v11292_v46 = vand.u32 4294901760, %v11256_v40 }
 0x850   :  { %v11101_v61 = vmax.f32 %v11093_v47, 0.0  ;;  %v11102_v48 = vmax.f32 %v11094_v32, 0.0  ;;  %v11077_v25 = vadd.f32 %v11061_v43, %v11037_v33  ;;  %v11130_v58 = vsel %vm11120_vm0, %v11115_v50, 0.0 }
 0x851   :  { %11131 = vadd.xlane.f32.xlu0 %v11130_v58  ;;  %v11133_v0 = vsel %vm11120_vm0, %v11116_v51, 0.0  ;;  %v11295_v47 = vand.u32 4294901760, %v11257_v55 }
 0x852   :  { %v11095_v20 = vadd.f32 %v11086_v29, %v11077_v25  ;;  %11134 = vadd.xlane.f32.xlu1 %v11133_v0  ;;  %v11117_v16 = vadd.f32 %v11109_v11, %v11101_v61  ;;  %v11118_v60 = vadd.f32 %v11110_v62, %v11102_v48  ;;  %v11442_v61 = vsub.f32 %v11256_v40, %v11292_v46  ;;  %v19194_v40 = vld [vmem:[%s19470_s7] ss:$0 sm:$0xff] }
 0x853   :  { %v19163_v32 = vpack.c.bf16 %v11295_v47, %v11292_v46  ;;  %v11449_v48 = vsub.f32 %v11257_v55, %v11295_v47 }
 0x854   :  { %v11103_v57 = vmax.f32 %v11095_v20, 0.0  ;;  %v11136_v5 = vsel %vm11120_vm0, %v11117_v16, 0.0  ;;  %v11139_v15 = vsel %vm11120_vm0, %v11118_v60, 0.0  ;;  %v11443_v25 = vand.u32 4294901760, %v11442_v61 }
 0x855   :  { %11137 = vadd.xlane.f32.xlu0 %v11136_v5  ;;  %16115 = vmatprep.subr.bf16.mxu1 %v19163_v32  ;;  %v11450_v58 = vand.u32 4294901760, %v11449_v48 }
 0x856   :  { %11140 = vadd.xlane.f32.xlu1 %v11139_v15  ;;  %v11119_v4 = vadd.f32 %v11111_v24, %v11103_v57  ;;  %16117 = vmatpush3.bf16.msra.mxu1 %v19163_v32  ;;  %v11444_v0 = vsub.f32 %v11442_v61, %v11443_v25 }
 0x857   :  { %v11451_v20 = vsub.f32 %v11449_v48, %v11450_v58 }
 0x858   :  { %v11142_v52 = vsel %vm11120_vm0, %v11119_v4, 0.0  ;;  %v11445_v24 = vand.u32 4294901760, %v11444_v0 }
 0x859   :  { %11143 = vadd.xlane.f32.xlu0 %v11142_v52  ;;  %v11452_v57 = vand.u32 4294901760, %v11451_v20 }
 0x8d6   :  { %v11123_v27 = vpop.xlane.xlu0 %11122 }
 0x8d7   :  { %v11146_v9 = vmul.f32 0.03125, %v11123_v27 }
 0x8d9   :  { %v19117_v21 = vsub.f32 %v11112_v56, %v11146_v9 }
 0x8da   :  { %v11129_v22 = vpop.xlane.xlu0 %11128 }
 0x8db   :  { %v11126_v8 = vpop.xlane.xlu1 %11125  ;;  %v11148_v38 = vmul.f32 0.03125, %v11129_v22  ;;  %v11162_v33 = vmul.f32 %v19117_v21, %v19117_v21 }
 0x8dc   :  { %v11147_v29 = vmul.f32 0.03125, %v11126_v8 }
 0x8dd   :  { %v19121_v14 = vsub.f32 %v11114_v44, %v11148_v38  ;;  %v11170_v13 = vsel %vm11120_vm0, %v11162_v33, 0.0  ;;  %v19182_v38 = vpack.c.bf16 %v11449_v48, %v11442_v61 }
 0x8de   :  { %v19124_v30 = vsub.f32 %v11113_v53, %v11147_v29  ;;  %11171 = vadd.xlane.f32.xlu1 %v11170_v13  ;;  %v11132_v59 = vpop.xlane.xlu0 %11131  ;;  %v19186_v29 = vpack.c.bf16 %v11450_v58, %v11443_v25 }
 0x8df   :  { %v11135_v10 = vpop.xlane.xlu1 %11134  ;;  %v11149_v45 = vmul.f32 0.03125, %v11132_v59  ;;  %v11164_v26 = vmul.f32 %v19121_v14, %v19121_v14 }
 0x8e0   :  { %v11150_v17 = vmul.f32 0.03125, %v11135_v10  ;;  %v11163_v19 = vmul.f32 %v19124_v30, %v19124_v30 }
 0x8e1   :  { %v19130_v1 = vsub.f32 %v11115_v50, %v11149_v45  ;;  %v11176_v39 = vsel %vm11120_vm0, %v11164_v26, 0.0  ;;  %v11258_v50 = vld [vmem:[%s19471_s8 + $0x10] sm:$0xff] }
 0x8e2   :  { %v19133_v6 = vsub.f32 %v11116_v51, %v11150_v17  ;;  %v11173_v7 = vsel %vm11120_vm0, %v11163_v19, 0.0  ;;  %11177 = vadd.xlane.f32.xlu1 %v11176_v39  ;;  %v11138_v56 = vpop.xlane.xlu0 %11137  ;;  %v11259_v51 = vld [vmem:[%s19471_s8 + $0x18] sm:$0xff]  ;;  %v11298_v43 = vand.u32 4294901760, %v11258_v50 }
 0x8e3   :  { %11174 = vadd.xlane.f32.xlu0 %v11173_v7  ;;  %v11141_v2 = vpop.xlane.xlu1 %11140  ;;  %v11151_v12 = vmul.f32 0.03125, %v11138_v56  ;;  %v11165_v31 = vmul.f32 %v19130_v1, %v19130_v1  ;;  %v11301_v11 = vand.u32 4294901760, %v11259_v51 }
 0x8e4   :  { %v11152_v44 = vmul.f32 0.03125, %v11141_v2  ;;  %v11166_v3 = vmul.f32 %v19133_v6, %v19133_v6 }
 0x8e5   :  { %v19140_v34 = vsub.f32 %v11117_v16, %v11151_v12  ;;  %v11179_v49 = vsel %vm11120_vm0, %v11165_v31, 0.0  ;;  %v19173_v62 = vpack.c.bf16 %v11301_v11, %v11298_v43  ;;  %v11456_v16 = vsub.f32 %v11258_v50, %v11298_v43 }
 0x8e6   :  { %v19143_v35 = vsub.f32 %v11118_v60, %v11152_v44  ;;  %v11182_v18 = vsel %vm11120_vm0, %v11166_v3, 0.0  ;;  %v11144_v42 = vpop.xlane.xlu0 %11143  ;;  %v11463_v60 = vsub.f32 %v11259_v51, %v11301_v11 }
 0x8e7   :  { %11183 = vadd.xlane.f32.xlu1 %v11182_v18  ;;  %11180 = vadd.xlane.f32.xlu0 %v11179_v49  ;;  %v11153_v53 = vmul.f32 0.03125, %v11144_v42  ;;  %v11167_v54 = vmul.f32 %v19140_v34, %v19140_v34  ;;  %v11457_v5 = vand.u32 4294901760, %v11456_v16 }
 0x8e8   :  { %v11168_v36 = vmul.f32 %v19143_v35, %v19143_v35  ;;  %16119 = vmatprep.subr.bf16.mxu1 %v19173_v62  ;;  %v11464_v15 = vand.u32 4294901760, %v11463_v60  ;;  %v19184_v33 = vpack.c.bf16 %v11463_v60, %v11456_v16 }
 0x8e9   :  { %v19150_v63 = vsub.f32 %v11119_v4, %v11153_v53  ;;  %v11185_v37 = vsel %vm11120_vm0, %v11167_v54, 0.0  ;;  %16121 = vmatpush3.bf16.msra.mxu1 %v19173_v62  ;;  %v19177_v4 = vpack.c.bf16 %v11452_v57, %v11445_v24  ;;  %v11458_v52 = vsub.f32 %v11456_v16, %v11457_v5 }
 0x8ea   :  { %v11188_v28 = vsel %vm11120_vm0, %v11168_v36, 0.0  ;;  %v11465_v27 = vsub.f32 %v11463_v60, %v11464_v15  ;;  %v19188_v13 = vpack.c.bf16 %v11464_v15, %v11457_v5 }
 0x8eb   :  { %11189 = vadd.xlane.f32.xlu1 %v11188_v28  ;;  %11186 = vadd.xlane.f32.xlu0 %v11185_v37  ;;  %v11169_v41 = vmul.f32 %v19150_v63, %v19150_v63  ;;  %v11459_v9 = vand.u32 4294901760, %v11458_v52  ;;  %v13616_v37 = vld [vmem:[#allocation8] ss:$0 sm:$0xff] }
 0x8ec   :  { %16123 = vmatprep.subr.bf16.mxu1 %v19177_v4  ;;  %v11466_v22 = vand.u32 4294901760, %v11465_v27 }
 0x8ed   :  { %v11191_v23 = vsel %vm11120_vm0, %v11169_v41, 0.0 }
 0x8ee   :  { %v19180_v8 = vpack.c.bf16 %v11466_v22, %v11459_v9 }
 0x8ef   :  { %11192 = vadd.xlane.f32.xlu0 %v11191_v23 }
 0x96b   :  { %v11172_v59 = vpop.xlane.xlu1 %11171 }
 0x96c   :  { %v11194_v10 = vmul.f32 0.03125, %v11172_v59 }
 0x96e   :  { %v11202_v45 = vadd.f32 1e-06, %v11194_v10 }
 0x96f   :  { %v11178_v26 = vpop.xlane.xlu1 %11177 }
 0x970   :  { %16350 = vrsqrt.f32 %v11202_v45  ;;  %v11196_v17 = vmul.f32 0.03125, %v11178_v26  ;;  %v11175_v19 = vpop.xlane.xlu0 %11174 }
 0x971   :  { %v11195_v39 = vmul.f32 0.03125, %v11175_v19 }
 0x972   :  { %v11204_v7 = vadd.f32 1e-06, %v11196_v17 }
 0x973   :  { %v11203_v56 = vadd.f32 1e-06, %v11195_v39 }
 0x974   :  { %16352 = vrsqrt.f32 %v11204_v7  ;;  %v11184_v2 = vpop.xlane.xlu1 %11183  ;;  %v11181_v12 = vpop.xlane.xlu0 %11180 }
 0x975   :  { %16354 = vrsqrt.f32 %v11203_v56  ;;  %v11198_v31 = vmul.f32 0.03125, %v11184_v2  ;;  %v11197_v44 = vmul.f32 0.03125, %v11181_v12 }
 0x977   :  { %v11206_v3 = vadd.f32 1e-06, %v11198_v31  ;;  %v11205_v49 = vadd.f32 1e-06, %v11197_v44 }
 0x978   :  { %v11190_v18 = vpop.xlane.xlu1 %11189  ;;  %v11187_v42 = vpop.xlane.xlu0 %11186 }
 0x979   :  { %16356 = vrsqrt.f32 %v11206_v3  ;;  %v11200_v53 = vmul.f32 0.03125, %v11190_v18  ;;  %v11199_v54 = vmul.f32 0.03125, %v11187_v42 }
 0x97a   :  { %v16351_v36 = vpop.eup %16350  ;;  %16358 = vrsqrt.f32 %v11205_v49 }
 0x97b   :  { %v11218_v28 = vmul.f32 %v16351_v36, %v19117_v21  ;;  %v11208_v41 = vadd.f32 1e-06, %v11200_v53  ;;  %v11207_v23 = vadd.f32 1e-06, %v11199_v54 }
 0x97c   :  { %v11193_v55 = vpop.xlane.xlu0 %11192 }
 0x97d   :  { %16360 = vrsqrt.f32 %v11208_v41  ;;  %v11201_v46 = vmul.f32 0.03125, %v11193_v55  ;;  %v11233_v47 = vmul.f32 %v13616_v37, %v11218_v28 }
 0x97e   :  { %v16353_v50 = vpop.eup %16352  ;;  %16362 = vrsqrt.f32 %v11207_v23 }
 0x97f   :  { %v16355_v51 = vpop.eup %16354  ;;  %v11220_v43 = vmul.f32 %v16353_v50, %v19121_v14  ;;  %v11209_v11 = vadd.f32 1e-06, %v11201_v46  ;;  %v19198_v61 = vadd.f32 %v19194_v40, %v11233_v47 }
 0x980   :  { %v11219_v21 = vmul.f32 %v16355_v51, %v19124_v30 }
 0x981   :  { %16364 = vrsqrt.f32 %v11209_v11  ;;  %v11268_v48 = vsel %vm11120_vm0, %v19198_v61, 0  ;;  %v11235_v25 = vmul.f32 %v13616_v37, %v11220_v43 }
 0x982   :  { %v11234_v58 = vmul.f32 %v13616_v37, %v11219_v21  ;;  %v19203_v0 = vand.u32 4294901760, %v11268_v48 }
 0x983   :  { %v16357_v20 = vpop.eup %16356  ;;  %v19206_v16 = vadd.f32 %v19194_v40, %v11235_v25 }
 0x984   :  { %v16359_v60 = vpop.eup %16358  ;;  %v19209_v14 = vadd.f32 %v19194_v40, %v11234_v58  ;;  %v11222_v24 = vmul.f32 %v16357_v20, %v19133_v6  ;;  %v19213_v30 = vsub.f32 %v11268_v48, %v19203_v0 }
 0x985   :  { %v11221_v57 = vmul.f32 %v16359_v60, %v19130_v1  ;;  %v11274_v5 = vsel %vm11120_vm0, %v19206_v16, 0 }
 0x986   :  { %v11271_v15 = vsel %vm11120_vm0, %v19209_v14, 0  ;;  %v11362_v52 = vand.u32 4294901760, %v19213_v30  ;;  %v19221_v27 = vand.u32 4294901760, %v11274_v5  ;;  %v11237_v9 = vmul.f32 %v13616_v37, %v11222_v24 }
 0x987   :  { %v16361_v22 = vpop.eup %16360  ;;  %v19223_v59 = vand.u32 4294901760, %v11271_v15  ;;  %v11236_v6 = vmul.f32 %v13616_v37, %v11221_v57 }
 0x988   :  { %v16363_v10 = vpop.eup %16362  ;;  %v11224_v45 = vmul.f32 %v16361_v22, %v19143_v35  ;;  %v11363_v1 = vsub.f32 %v19213_v30, %v11362_v52  ;;  %v19230_v26 = vsub.f32 %v11274_v5, %v19221_v27  ;;  %v19233_v17 = vadd.f32 %v19194_v40, %v11237_v9 }
 0x989   :  { %v19236_v19 = vsub.f32 %v11271_v15, %v19223_v59  ;;  %v19239_v39 = vadd.f32 %v19194_v40, %v11236_v6  ;;  %v11223_v7 = vmul.f32 %v16363_v10, %v19140_v34 }
 0x98a   :  { %v11364_v56 = vand.u32 4294901760, %v11363_v1  ;;  %v11382_v35 = vand.u32 4294901760, %v19230_v26  ;;  %v11280_v2 = vsel %vm11120_vm0, %v19233_v17, 0  ;;  %v11239_v12 = vmul.f32 %v13616_v37, %v11224_v45 }
 0x98b   :  { %v16365_v31 = vpop.eup %16364  ;;  %v11372_v44 = vand.u32 4294901760, %v19236_v19  ;;  %v11238_v3 = vmul.f32 %v13616_v37, %v11223_v7  ;;  %v11277_v49 = vsel %vm11120_vm0, %v19239_v39, 0  ;;  %v19248_v18 = vand.u32 4294901760, %v11280_v2 }
 0x98c   :  { %v11225_v42 = vmul.f32 %v16365_v31, %v19150_v63  ;;  %15936 = vmatprep.mubr.f32.mxu1 %v11364_v56  ;;  %v11383_v34 = vsub.f32 %v19230_v26, %v11382_v35  ;;  %v19254_v53 = vand.u32 4294901760, %v11277_v49  ;;  %v19257_v54 = vadd.f32 %v19194_v40, %v11239_v12 }
 0x98d   :  { %v11373_v36 = vsub.f32 %v19236_v19, %v11372_v44  ;;  %v19263_v28 = vadd.f32 %v19194_v40, %v11238_v3  ;;  %v19266_v41 = vsub.f32 %v11280_v2, %v19248_v18 }
 0x98e   :  { %v11240_v63 = vmul.f32 %v13616_v37, %v11225_v42  ;;  %v11384_v23 = vand.u32 4294901760, %v11383_v34  ;;  %v19269_v55 = vsub.f32 %v11277_v49, %v19254_v53  ;;  %v11286_v46 = vsel %vm11120_vm0, %v19257_v54, 0 }
 0x98f   :  { %v11374_v47 = vand.u32 4294901760, %v11373_v36  ;;  %v11402_v50 = vand.u32 4294901760, %v19266_v41  ;;  %v11283_v51 = vsel %vm11120_vm0, %v19263_v28, 0  ;;  %v19276_v43 = vand.u32 4294901760, %v11286_v46 }
 0x990   :  { %v19279_v11 = vadd.f32 %v19194_v40, %v11240_v63  ;;  %v11392_v37 = vand.u32 4294901760, %v19269_v55  ;;  %v19282_v21 = vand.u32 4294901760, %v11283_v51 }
 0x991   :  { %15937 = vmatmul.mubr.f32.vlgmr.msra.gmra.mrb[152].mxu1 %v11374_v47  ;;  %v11403_v48 = vsub.f32 %v19266_v41, %v11402_v50  ;;  %v11421_v25 = vsub.f32 %v11286_v46, %v19276_v43 }
 0x992   :  { %15939 = vmatprep.mubr.f32.mxu1 %v11384_v23  ;;  %16125 = vmatpush3.bf16.msra.mxu1 %v19177_v4  ;;  %v11393_v58 = vsub.f32 %v19269_v55, %v11392_v37  ;;  %v11411_v20 = vsub.f32 %v11283_v51, %v19282_v21  ;;  %v11289_v40 = vsel %vm11120_vm0, %v19279_v11, 0 }
 0x993   :  { %v11404_v60 = vand.u32 4294901760, %v11403_v48  ;;  %16127 = vmatprep.subr.bf16.mxu1 %v19180_v8  ;;  %v11422_v24 = vand.u32 4294901760, %v11421_v25  ;;  %v19294_v57 = vand.u32 4294901760, %v11289_v40 }
 0x994   :  { %v11394_v5 = vand.u32 4294901760, %v11393_v58  ;;  %v11412_v15 = vand.u32 4294901760, %v11411_v20 }
 0x995   :  { %v11423_v9 = vsub.f32 %v11421_v25, %v11422_v24  ;;  %v11431_v22 = vsub.f32 %v11289_v40, %v19294_v57 }
 0x996   :  { %15940 = vmatmul.mubr.f32.gmra.mrb[154].mxu1 %v11394_v5  ;;  %v11413_v6 = vsub.f32 %v11411_v20, %v11412_v15 }
 0x997   :  { %15942 = vmatprep.mubr.f32.mxu1 %v11404_v60  ;;  %v11424_v10 = vand.u32 4294901760, %v11423_v9  ;;  %16129 = vmatpush3.bf16.msra.mxu1 %v19180_v8  ;;  %v11432_v45 = vand.u32 4294901760, %v11431_v22 }
 0x998   :  { %v11414_v1 = vand.u32 4294901760, %v11413_v6  ;;  %16131 = vmatprep.subr.bf16.mxu1 %v19182_v38 }
 0x999   :  { %v11433_v7 = vsub.f32 %v11431_v22, %v11432_v45 }
 0x99a   :  { %15943 = vmatmul.mubr.f32.gmra.mrb[156].mxu1 %v11414_v1 }
 0x99b   :  { %15945 = vmatprep.mubr.f32.mxu1 %v11424_v10  ;;  %v11434_v56 = vand.u32 4294901760, %v11433_v7 }
 0x99e   :  { %15946 = vmatmul.mubr.f32.gmra.mrb[158].mxu1 %v11434_v56 }
 0x99f   :  { %15956 = vmatprep.mubr.f32.mxu1 %v19203_v0 }
 0x9a2   :  { %15957 = vmatmul.mubr.f32.vlgmr.msra.gmra.mrb[152].mxu1 %v19223_v59 }
 0x9a3   :  { %15959 = vmatprep.mubr.f32.mxu1 %v19221_v27  ;;  %16133 = vmatpush3.bf16.msra.mxu1 %v19182_v38 }
 0x9a4   :  { %16135 = vmatprep.subr.bf16.mxu1 %v19184_v33 }
 0x9a6   :  { %15960 = vmatmul.mubr.f32.gmra.mrb[154].mxu1 %v19254_v53 }
 0x9a7   :  { %15962 = vmatprep.mubr.f32.mxu1 %v19248_v18  ;;  %16137 = vmatpush3.bf16.msra.mxu1 %v19184_v33 }
 0x9a8   :  { %16139 = vmatprep.subr.bf16.mxu1 %v19163_v32 }
 0x9aa   :  { %15963 = vmatmul.mubr.f32.gmra.mrb[156].mxu1 %v19282_v21 }
 0x9ab   :  { %15965 = vmatprep.mubr.f32.mxu1 %v19276_v43 }
 0x9ae   :  { %15966 = vmatmul.mubr.f32.gmra.mrb[158].mxu1 %v19294_v57 }
 0x9af   :  { %15976 = vmatprep.mubr.f32.mxu1 %v19213_v30  ;;  %v11262_v30 = vlaneseq }
 0x9b2   :  { %15977 = vmatmul.mubr.f32.vlgmr.msra.gmra.mrb[152].mxu1 %v19236_v19 }
 0x9b3   :  { %15979 = vmatprep.mubr.f32.mxu1 %v19230_v26  ;;  %16141 = vmatpush3.bf16.msra.mxu1 %v19163_v32 }
 0x9b4   :  { %16143 = vmatprep.subr.bf16.mxu1 %v19173_v62 }
 0x9b6   :  { %15980 = vmatmul.mubr.f32.gmra.mrb[154].mxu1 %v19269_v55 }
 0x9b7   :  { %15982 = vmatprep.mubr.f32.mxu1 %v19266_v41  ;;  %16145 = vmatpush3.bf16.msra.mxu1 %v19173_v62 }
 0x9b8   :  { %16147 = vmatprep.subr.bf16.mxu1 %v19186_v29 }
 0x9ba   :  { %15983 = vmatmul.mubr.f32.gmra.mrb[156].mxu1 %v11411_v20 }
 0x9bb   :  { %15985 = vmatprep.mubr.f32.mxu1 %v11421_v25 }
 0x9be   :  { %15986 = vmatmul.mubr.f32.gmra.mrb[158].mxu1 %v11431_v22 }
 0x9bf   :  { %15996 = vmatprep.mubr.f32.mxu1 %v11362_v52  ;;  %v11263_v52 = vshrl.u32 %v11262_v30, 7 }
 0x9c2   :  { %15997 = vmatmul.mubr.f32.vlgmr.msra.gmra.mrb[152].mxu1 %v11372_v44 }
 0x9c3   :  { %15999 = vmatprep.mubr.f32.mxu1 %v11382_v35  ;;  %16149 = vmatpush3.bf16.msra.mxu1 %v19186_v29  ;;  %v11264_v35 = vsub.s32 0, %v11263_v52 }
 0x9c4   :  { %16151 = vmatprep.subr.bf16.mxu1 %v19188_v13 }
 0x9c6   :  { %16000 = vmatmul.mubr.f32.gmra.mrb[154].mxu1 %v11392_v37 }
 0x9c7   :  { %16002 = vmatprep.mubr.f32.mxu1 %v11402_v50  ;;  %16153 = vmatpush3.bf16.msra.mxu1 %v19188_v13 }
 0x9c8   :  { %16155 = vmatprep.subr.bf16.mxu1 %v19163_v32 }
 0x9ca   :  { %16003 = vmatmul.mubr.f32.gmra.mrb[156].mxu1 %v11412_v15 }
 0x9cb   :  { %16005 = vmatprep.mubr.f32.mxu1 %v11422_v24 }
 0x9ce   :  { %16006 = vmatmul.mubr.f32.gmra.mrb[158].mxu1 %v11432_v45 }
 0x9cf   :  { %16016 = vmatprep.mubr.f32.mxu1 %v19203_v0 }
 0x9d2   :  { %16017 = vmatmul.mubr.f32.vlgmr.msra.gmra.mrb[152].mxu1 %v19223_v59 }
 0x9d3   :  { %16019 = vmatprep.mubr.f32.mxu1 %v19221_v27  ;;  %16157 = vmatpush3.bf16.msra.mxu1 %v19163_v32 }
 0x9d4   :  { %16159 = vmatprep.subr.bf16.mxu1 %v19173_v62 }
 0x9d6   :  { %16020 = vmatmul.mubr.f32.gmra.mrb[154].mxu1 %v19254_v53 }
 0x9d7   :  { %16022 = vmatprep.mubr.f32.mxu1 %v19248_v18  ;;  %16161 = vmatpush3.bf16.msra.mxu1 %v19173_v62 }
 0x9da   :  { %16023 = vmatmul.mubr.f32.gmra.mrb[156].mxu1 %v19282_v21 }
 0x9db   :  { %16025 = vmatprep.mubr.f32.mxu1 %v19276_v43 }
 0x9de   :  { %16026 = vmatmul.mubr.f32.gmra.mrb[158].mxu1 %v19294_v57 }
 0x9df   :  { %16036 = vmatprep.mubr.f32.mxu1 %v19203_v0 }
 0x9e2   :  { %16037 = vmatmul.mubr.f32.vlgmr.msra.gmra.mrb[152].mxu1 %v19223_v59 }
 0x9e3   :  { %16039 = vmatprep.mubr.f32.mxu1 %v19221_v27  ;;  %v19354_v27 = vld [vmem:[%s19472_s9] sm:$0x1] }
 0x9e4   :  { %v11265_v2 = vrot.slane %v19354_v27, %v11264_v35 }
 0x9e6   :  { %16040 = vmatmul.mubr.f32.gmra.mrb[154].mxu1 %v19254_v53 }
 0x9e7   :  { %16042 = vmatprep.mubr.f32.mxu1 %v19248_v18 }
 0x9ea   :  { %16043 = vmatmul.mubr.f32.gmra.mrb[156].mxu1 %v19282_v21 }
 0x9eb   :  { %16045 = vmatprep.mubr.f32.mxu1 %v19276_v43 }
 0x9ee   :  { %16046 = vmatmul.mubr.f32.gmra.mrb[158].mxu1 %v19294_v57 }
 0xab5   :  { %v16038_v26 = vpop.f32.mrb[152].mxu1 }
 0xab6   :  { %v12031_v19 = vpop.f32.mrb[153].mxu1  ;;  %v16198_v49 = vadd.f32 %v16038_v26, %v11265_v2 }
 0xab7   :  { %v16199_v18 = vadd.f32 %v12031_v19, %v11265_v2 }
 0xab9   :  { %v16041_v0 = vpop.f32.mrb[154].mxu1 }
 0xaba   :  { %v12043_v59 = vpop.f32.mrb[155].mxu1  ;;  %v16200_v34 = vadd.f32 %v16041_v0, %v11265_v2 }
 0xabb   :  { %v16201_v41 = vadd.f32 %v12043_v59, %v11265_v2 }
 0xabd   :  { %v16044_v12 = vpop.f32.mrb[156].mxu1 }
 0xabe   :  { %v12055_v31 = vpop.f32.mrb[157].mxu1  ;;  %v16202_v44 = vadd.f32 %v16044_v12, %v11265_v2 }
 0xabf   :  { %v16203_v3 = vadd.f32 %v12055_v31, %v11265_v2 }
 0xac0   :  { %v12078_v63 = vmax.f32 %v16198_v49, %v16202_v44 }
 0xac1   :  { %v16047_v42 = vpop.f32.mrb[158].mxu1  ;;  %v12077_v23 = vmax.f32 %v16199_v18, %v16203_v3 }
 0xac2   :  { %v16204_v53 = vadd.f32 %v16047_v42, %v11265_v2  ;;  %v12067_v36 = vpop.f32.mrb[159].mxu1 }
 0xac3   :  { %v16205_v55 = vadd.f32 %v12067_v36, %v11265_v2  ;;  %v12081_v50 = vmax.f32 %v12077_v23, %v12078_v63 }
 0xac4   :  { %v12080_v46 = vmax.f32 %v16200_v34, %v16204_v53 }
 0xac5   :  { %v12079_v47 = vmax.f32 %v16201_v41, %v16205_v55 }
 0xac7   :  { %v12082_v51 = vmax.f32 %v12079_v47, %v12080_v46 }
 0xac9   :  { %v12083_v43 = vmax.f32 %v12081_v50, %v12082_v51 }
 0xacb   :  { %12084 = vmax.xlane.f32.xlu1 %v12083_v43 }
 0xb58   :  { %v12085_v37 = vpop.xlane.xlu1 %12084 }
 0xb59   :  { %v12086_v21 = vrot.slane %v12085_v37, 4 }
 0xb5b   :  { %v12087_v48 = vmax.f32 %v12085_v37, %v12086_v21 }
 0xb5d   :  { %v12088_v25 = vrot.slane %v12087_v48, 2 }
 0xb5f   :  { %v12089_v58 = vmax.f32 %v12087_v48, %v12088_v25 }
 0xb61   :  { %v12090_v20 = vrot.slane %v12089_v58, 1 }
 0xb63   :  { %v12091_v40 = vmax.f32 %v12089_v58, %v12090_v20 }
 0xb65   :  { %16257 = vpush %v12091_v40 }
 0xb96   :  { %s16258_s9 = spop %16257 }
 0xb97   :  { %v12093_v60 = vstv %s16258_s9 }
 0xb98   :  { %v12095_v24 = vsub.f32 %v16198_v49, %v12093_v60  ;;  %v12094_v57 = vsub.f32 %v16199_v18, %v12093_v60  ;;  %v12097_v5 = vsub.f32 %v16200_v34, %v12093_v60  ;;  %v12096_v15 = vsub.f32 %v16201_v41, %v12093_v60 }
 0xb99   :  { %v12099_v10 = vsub.f32 %v16202_v44, %v12093_v60  ;;  %v12098_v1 = vsub.f32 %v16203_v3, %v12093_v60  ;;  %v12101_v56 = vsub.f32 %v16204_v53, %v12093_v60  ;;  %v12100_v52 = vsub.f32 %v16205_v55, %v12093_v60 }
 0xb9a   :  { %v12104_v9 = vmul.f32 1.442695, %v12095_v24  ;;  %v12102_v22 = vmul.f32 1.442695, %v12094_v57  ;;  %v12108_v6 = vmul.f32 1.442695, %v12097_v5 }
 0xb9b   :  { %v12106_v45 = vmul.f32 1.442695, %v12096_v15  ;;  %v12112_v7 = vmul.f32 1.442695, %v12099_v10  ;;  %v12110_v30 = vmul.f32 1.442695, %v12098_v1 }
 0xb9c   :  { %16366 = vpow2.f32 %v12104_v9  ;;  %v12116_v26 = vmul.f32 1.442695, %v12101_v56  ;;  %v12114_v19 = vmul.f32 1.442695, %v12100_v52  ;;  %v16818_v24 = vmov 0.0|0.0  }
 0xb9d   :  { %16368 = vpow2.f32 %v12102_v22  ;;  %16162 = vmatprep.subr.bf16.mxu0 %v16818_v24  ;;  %v16820_v57 = vmov 0.0  }
 0xb9e   :  { %16370 = vpow2.f32 %v12108_v6  ;;  %16056 = vmatprep.mubr.msk.f32.mxu0 %vm16819_vm2, %v16820_v57  ;;  %16164 = vmatpush3.bf16.msra.mxu0 %v19163_v32 }
 0xb9f   :  { %16372 = vpow2.f32 %v12106_v45  ;;  %16165 = vmatprep.subr.bf16.mxu0 %v16818_v24 }
 0xba0   :  { %16374 = vpow2.f32 %v12112_v7 }
 0xba1   :  { %16376 = vpow2.f32 %v12110_v30 }
 0xba2   :  { %16378 = vpow2.f32 %v12116_v26  ;;  %16167 = vmatpush3.bf16.msra.mxu0 %v19173_v62 }
 0xba3   :  { %16380 = vpow2.f32 %v12114_v19  ;;  %16168 = vmatprep.subr.bf16.mxu0 %v16818_v24 }
 0xba6   :  { %v16367_v35 = vpop.eup %16366 }
 0xba7   :  { %v16369_v0 = vpop.eup %16368  ;;  %12120 = vadd.xlane.f32.xlu1 %v16367_v35 }
 0xba8   :  { %12118 = vadd.xlane.f32.xlu0 %v16369_v0  ;;  %v16371_v59 = vpop.eup %16370 }
 0xba9   :  { %v16373_v2 = vpop.eup %16372 }
 0xbaa   :  { %v16375_v12 = vpop.eup %16374 }
 0xbab   :  { %12124 = vadd.xlane.f32.xlu1 %v16371_v59  ;;  %v16377_v31 = vpop.eup %16376 }
 0xbac   :  { %12122 = vadd.xlane.f32.xlu0 %v16373_v2  ;;  %v16379_v44 = vpop.eup %16378 }
 0xbad   :  { %v16381_v3 = vpop.eup %16380 }
 0xbaf   :  { %12128 = vadd.xlane.f32.xlu1 %v16375_v12 }
 0xbb0   :  { %12126 = vadd.xlane.f32.xlu0 %v16377_v31 }
 0xbb3   :  { %12132 = vadd.xlane.f32.xlu1 %v16379_v44 }
 0xbb4   :  { %12130 = vadd.xlane.f32.xlu0 %v16381_v3 }
 0xc34   :  { %v12121_v49 = vpop.xlane.xlu1 %12120 }
 0xc35   :  { %v12119_v18 = vpop.xlane.xlu0 %12118  ;;  %v12136_v42 = vsel %vm12134_vm1, %v12121_v49, 0.0 }
 0xc36   :  { %v12135_v34 = vsel %vm12134_vm1, %v12119_v18, 0.0 }
 0xc37   :  { %v12137_v36 = vadd.f32 %v12136_v42, %v12135_v34 }
 0xc38   :  { %v12125_v53 = vpop.xlane.xlu1 %12124 }
 0xc39   :  { %v12123_v41 = vpop.xlane.xlu0 %12122  ;;  %v12140_v55 = vsel %vm12134_vm1, %v12125_v53, 0.0 }
 0xc3a   :  { %v12138_v63 = vsel %vm12134_vm1, %v12123_v41, 0.0 }
 0xc3b   :  { %v12139_v23 = vadd.f32 %v12138_v63, %v12137_v36 }
 0xc3c   :  { %v12129_v46 = vpop.xlane.xlu1 %12128 }
 0xc3d   :  { %v12141_v47 = vadd.f32 %v12140_v55, %v12139_v23  ;;  %v12127_v50 = vpop.xlane.xlu0 %12126  ;;  %v12144_v37 = vsel %vm12134_vm1, %v12129_v46, 0.0 }
 0xc3e   :  { %v12142_v51 = vsel %vm12134_vm1, %v12127_v50, 0.0 }
 0xc3f   :  { %v12143_v43 = vadd.f32 %v12142_v51, %v12141_v47 }
 0xc40   :  { %v12133_v21 = vpop.xlane.xlu1 %12132 }
 0xc41   :  { %v12145_v48 = vadd.f32 %v12144_v37, %v12143_v43  ;;  %v12131_v25 = vpop.xlane.xlu0 %12130  ;;  %v12148_v40 = vsel %vm12134_vm1, %v12133_v21, 0.0 }
 0xc42   :  { %v12146_v58 = vsel %vm12134_vm1, %v12131_v25, 0.0 }
 0xc43   :  { %v12147_v20 = vadd.f32 %v12146_v58, %v12145_v48 }
 0xc45   :  { %v12149_v60 = vadd.f32 %v12148_v40, %v12147_v20 }
 0xc47   :  { %12150 = vadd.xlane.f32.xlu0 %v12149_v60 }
 0xcd4   :  { %v12151_v5 = vpop.xlane.xlu0 %12150 }
 0xcd5   :  { %v12152_v15 = vrot.slane %v12151_v5, 4 }
 0xcd7   :  { %v12153_v9 = vadd.f32 %v12152_v15, %v12151_v5 }
 0xcd9   :  { %v12154_v22 = vrot.slane %v12153_v9, 2 }
 0xcdb   :  { %v12155_v6 = vadd.f32 %v12154_v22, %v12153_v9 }
 0xcdd   :  { %v12156_v10 = vrot.slane %v12155_v6, 1 }
 0xcdf   :  { %v12157_v45 = vadd.f32 %v12156_v10, %v12155_v6 }
 0xce1   :  { %16259 = vpush %v12157_v45 }
 0xd12   :  { %s16260_s17 = spop %16259 }
 0xd13   :  { %v12159_v1 = vstv %s16260_s17 }
 0xd14   :  { %16382 = vrcp.f32 %v12159_v1 }
 0xd1e   :  { %v16383_v7 = vpop.eup %16382 }
 0xd1f   :  { %v12161_v56 = vmul.f32 %v16383_v7, %v12119_v18  ;;  %v12162_v30 = vmul.f32 %v16383_v7, %v12121_v49  ;;  %v12163_v52 = vmul.f32 %v16383_v7, %v12123_v41  ;;  %v12164_v26 = vmul.f32 %v16383_v7, %v12125_v53 }
 0xd20   :  { %v12165_v19 = vmul.f32 %v16383_v7, %v12127_v50  ;;  %v12166_v35 = vmul.f32 %v16383_v7, %v12129_v46  ;;  %v12167_v0 = vmul.f32 %v16383_v7, %v12131_v25  ;;  %v12168_v59 = vmul.f32 %v16383_v7, %v12133_v21 }
 0xd21   :  { %v12169_v2 = vmul.f32 %v12161_v56, %v19198_v61  ;;  %v12170_v12 = vmul.f32 %v12162_v30, %v19209_v14  ;;  %v12171_v31 = vmul.f32 %v12163_v52, %v19206_v16  ;;  %12687 = vst.msk [vmem:[%s19474_s11] sm:$0xff] %vm12134_vm1, %v12161_v56  ;;  %12688 = vst.msk [vmem:[%s19474_s11 + $0x8] sm:$0xff] %vm12134_vm1, %v12162_v30 }
 0xd22   :  { %12689 = vst.msk [vmem:[%s19474_s11 + $0x10] sm:$0xff] %vm12134_vm1, %v12163_v52  ;;  %12690 = vst.msk [vmem:[%s19474_s11 + $0x18] sm:$0xff] %vm12134_vm1, %v12164_v26  ;;  %v12172_v61 = vmul.f32 %v12164_v26, %v19239_v39  ;;  %v12173_v3 = vmul.f32 %v12165_v19, %v19233_v17  ;;  %v12174_v42 = vmul.f32 %v12166_v35, %v19263_v28 }
 0xd23   :  { %12691 = vst.msk [vmem:[%s19474_s11 + $0x20] sm:$0xff] %vm12134_vm1, %v12165_v19  ;;  %12692 = vst.msk [vmem:[%s19474_s11 + $0x28] sm:$0xff] %vm12134_vm1, %v12166_v35  ;;  %v12177_v16 = vsel %vm11120_vm0, %v12169_v2, 0.0  ;;  %v12178_v14 = vsel %vm11120_vm0, %v12170_v12, 0.0  ;;  %v12180_v49 = vsel %vm11120_vm0, %v12171_v31, 0.0  ;;  %v12175_v36 = vmul.f32 %v12167_v0, %v19257_v54 }
 0xd24   :  { %12693 = vst.msk [vmem:[%s19474_s11 + $0x30] sm:$0xff] %vm12134_vm1, %v12167_v0  ;;  %12694 = vst.msk [vmem:[%s19474_s11 + $0x38] sm:$0xff] %vm12134_vm1, %v12168_v59  ;;  %v12179_v44 = vadd.f32 %v12178_v14, %v12177_v16  ;;  %v12182_v34 = vsel %vm11120_vm0, %v12172_v61, 0.0  ;;  %v12184_v41 = vsel %vm11120_vm0, %v12173_v3, 0.0  ;;  %v12176_v63 = vmul.f32 %v12168_v59, %v19279_v11  ;;  %s16821_s11 = smov [#allocation9]  }
 0xd25   :  { %v12186_v23 = vsel %vm11120_vm0, %v12174_v42, 0.0  ;;  %v12188_v17 = vsel %vm11120_vm0, %v12175_v36, 0.0  ;;  %s12701_s13 = sshll.u32 %s16821_s11, 4  ;;  %s12702_s13 = int_to_ptr.vmem [resolvable:$true] %s12701_s13 }
 0xd26   :  { %v12181_v18 = vadd.f32 %v12180_v49, %v12179_v44  ;;  %v12190_v47 = vsel %vm11120_vm0, %v12176_v63, 0.0  ;;  %s16782_s14 = scalar_lea.vmem %s12702_s13, 16  ;;  %s16786_s1 = scalar_lea.vmem %s12702_s13, 32 }
 0xd27   :  { %p16783_p10 = scmp.ne.s32.totalorder %s12702_s13, %s16782_s14  ;;  %p16787_p11 = scmp.lt.s32.totalorder %s12702_s13, %s12702_s13 }
 0xd28   :  { %v12183_v53 = vadd.f32 %v12182_v34, %v12181_v18  ;;  %p16788_p12 = scmp.lt.s32.totalorder %s16786_s1, %s16782_s14 }
 0xd2a   :  { %v12185_v39 = vadd.f32 %v12184_v41, %v12183_v53  ;;  %p16789_p13 = por %p16788_p12, %p16787_p11 }
 0xd2c   :  { %v12187_v55 = vadd.f32 %v12186_v23, %v12185_v39  ;;  %p16790_p0 = pnand %p16789_p13, %p16783_p10 }
 0xd2e   :  { %v12189_v46 = vadd.f32 %v12188_v17, %v12187_v55 }
 0xd30   :  { %v12191_v50 = vadd.f32 %v12190_v47, %v12189_v46 }
 0xd32   :  { %v12192_v28 = vrot.slane %v12191_v50, 4 }
 0xd34   :  { %v12193_v51 = vadd.f32 %v12192_v28, %v12191_v50 }
 0xd36   :  { %v12194_v43 = vrot.slane %v12193_v51, 2 }
 0xd38   :  { %v12195_v37 = vadd.f32 %v12194_v43, %v12193_v51 }
 0xd3a   :  { %v12196_v21 = vrot.slane %v12195_v37, 1 }
 0xd3c   :  { %v12197_v54 = vadd.f32 %v12196_v21, %v12195_v37 }
 0xd3e   :  { %v12199_v48 = vsel %vm11120_vm0, %v12197_v54, 0 }
 0xd3f   :  { %v12270_v25 = vand.u32 4294901760, %v12199_v48 }
 0xd41   :  { %v12271_v58 = vsub.f32 %v12199_v48, %v12270_v25 }
 0xd43   :  { %v12272_v11 = vand.u32 4294901760, %v12271_v58 }
 0xd45   :  { %v12273_v20 = vsub.f32 %v12271_v58, %v12272_v11 }
 0xd47   :  { %v12274_v40 = vand.u32 4294901760, %v12273_v20 }
 0xd49   :  { %16057 = vmatmul.mubr.f32.vlgmr.msra.gmra.mrb[168].mxu0 %v12274_v40 }
 0xd4a   :  { %16170 = vmatpush3.bf16.msra.mxu0 %v19177_v4  ;;  %16067 = vmatprep.mubr.msk.f32.mxu0 %vm16819_vm2, %v16820_v57 }
 0xd4b   :  { %16171 = vmatprep.subr.bf16.mxu0 %v16818_v24 }
 0xd4e   :  { %16173 = vmatpush3.bf16.msra.mxu0 %v19180_v8 }
 0xd4f   :  { %16174 = vmatprep.subr.bf16.mxu0 %v16818_v24 }
 0xd51   :  { %16068 = vmatmul.mubr.f32.vlgmr.msra.gmra.mrb[168].mxu0 %v12270_v25 }
 0xd52   :  { %16176 = vmatpush3.bf16.msra.mxu0 %v19182_v38  ;;  %16078 = vmatprep.mubr.msk.f32.mxu0 %vm16819_vm2, %v16820_v57 }
 0xd53   :  { %16177 = vmatprep.subr.bf16.mxu0 %v16818_v24 }
 0xd56   :  { %16179 = vmatpush3.bf16.msra.mxu0 %v19184_v33 }
 0xd57   :  { %16180 = vmatprep.subr.bf16.mxu0 %v16818_v24 }
 0xd59   :  { %16079 = vmatmul.mubr.f32.vlgmr.msra.gmra.mrb[168].mxu0 %v12271_v58 }
 0xd5a   :  { %16182 = vmatpush3.bf16.msra.mxu0 %v19163_v32  ;;  %16089 = vmatprep.mubr.msk.f32.mxu0 %vm16819_vm2, %v16820_v57 }
 0xd5b   :  { %16183 = vmatprep.subr.bf16.mxu0 %v16818_v24 }
 0xd5e   :  { %16185 = vmatpush3.bf16.msra.mxu0 %v19173_v62 }
 0xd5f   :  { %16186 = vmatprep.subr.bf16.mxu0 %v16818_v24 }
 0xd61   :  { %16090 = vmatmul.mubr.f32.vlgmr.msra.gmra.mrb[168].mxu0 %v12272_v11 }
 0xd62   :  { %16188 = vmatpush3.bf16.msra.mxu0 %v19186_v29  ;;  %16100 = vmatprep.mubr.msk.f32.mxu0 %vm16819_vm2, %v16820_v57 }
 0xd63   :  { %16189 = vmatprep.subr.bf16.mxu0 %v16818_v24 }
 0xd66   :  { %16191 = vmatpush3.bf16.msra.mxu0 %v19188_v13 }
 0xd67   :  { %16192 = vmatprep.subr.bf16.mxu0 %v16818_v24 }
 0xd69   :  { %16101 = vmatmul.mubr.f32.vlgmr.msra.gmra.mrb[168].mxu0 %v12270_v25 }
 0xd6a   :  { %16194 = vmatpush3.bf16.msra.mxu0 %v19163_v32  ;;  %16111 = vmatprep.mubr.msk.f32.mxu0 %vm16819_vm2, %v16820_v57 }
 0xd6b   :  { %16195 = vmatprep.subr.bf16.mxu0 %v16818_v24 }
 0xd6e   :  { %16197 = vmatpush3.bf16.msra.mxu0 %v19173_v62 }
 0xd71   :  { %16112 = vmatmul.mubr.f32.vlgmr.msra.gmra.mrb[168].mxu0 %v12270_v25 }
 0xe44   :  { %v12682_v4 = vpop.f32.mrb[168].mxu0 }
 0xe45   :  { %v16206_v8 = vadd.f32 %v12682_v4, %v19354_v27  ;;  %v16113_v38 = vpop.f32.mrb[169].mxu0 }
 0xe47   :  { %12686 = vst [vmem:[#allocation9] sm:$0x1] %v16206_v8 }
 0xe48   :  { %16793 = shalt.err (!%p16790_p0)
}
 0xe49   :  { %s16794_s0 = scalar_lea.hbm %s19473_s10, 16 }
 0xe4a   :  { %p16795_p1 = scmp.ne.s32.totalorder %s19473_s10, %s16794_s0  ;;  %p16798_p2 = scmp.lt.u32.totalorder %s16794_s0, %s19473_s10 }
 0xe4c   :  { %p16800_p3 = pnand %p16798_p2, %p16795_p1 }
 0xe4e   :  { %16803 = shalt.err (!%p16800_p3)
}
 0xe4f   :  { %12704 = dma.vmem_to_hbm [thread:$0]  %s12702_s13, 16, %s19473_s10, [#allocation5]  }
 0xe50   :  { %16808 = dma.done.wait [#allocation5], 16  }
 0xe51   :  { %16809 = vsyncadd [#allocation5], 4294967280 }
 0xe52   :  { %12712 = vsyncpa [#allocation4], 1 }
 0xe53   :  { %12713 = vsyncpa [#allocation7], 1 }
 0xe54   :  { %12714 = vsyncpa [#allocation5], 1 }

</bundles_post_ra>
